<compile_context>
chip_gen: v6e
topology: v6e:2x2x1
jax: 0.10.0
libtpu: 0.0.40
codegen_flags: <defaults>
</compile_context>

<pallas_src>
import jax
import jax.numpy as jnp
from jax.experimental import pallas as pl
from jax.experimental.pallas import tpu as pltpu


# MXU input dtype. bf16 = ~2x MXU rate on v6e/v7x + half the patch/selector
# bytes; set to jnp.float32 for exact f32 parity with a reference.
MXU_DTYPE = jnp.bfloat16

_PAD = 128       # lane padding on each side of the flattened image in the slab
_CIN1 = 8        # conv1 input channels padded 3 -> 8 (sublane-aligned stores)
_HIDDEN = 100    # fc hidden size (PyTorch)
_HIDDEN_PAD = 128


def _conv3x3_relu(a, w_ref, b_ref, mask_ref, slab_ref, patches_ref, H, W):
    """Channel-major 3x3 "same" conv + bias + ReLU via one im2col matmul.

    a:           (Cin, H*W) f32 activation.
    w_ref:       (Cout, 9*Cin) weight ref (MXU dtype), columns (kh, kw, cin).
    b_ref:       (Cout, 1) f32 bias ref.
    mask_ref:    (2, H*W) 0/1 w-boundary masks: row 0 -> dw=-1, row 1 -> dw=+1.
    slab_ref:    f32 VMEM scratch >= (Cin, H*W + 2*_PAD) for lane-shifted reads.
    patches_ref: MXU-dtype VMEM scratch >= (9*Cin, H*W) im2col matrix.
    """
    cin = a.shape[0]
    hw = H * W
    # Zero both pad strips: dh=+-1 taps that fall off the top/bottom of the
    # image read exact zeros from here (this replaces 3 of the 9 masks).
    z = jnp.zeros((cin, _PAD), jnp.float32)
    slab_ref[:cin, :_PAD] = z
    slab_ref[:cin, _PAD + hw:2 * _PAD + hw] = z
    slab_ref[:cin, _PAD:_PAD + hw] = a
    # Build the (9*Cin, H*W) patch matrix: tap (kh, kw) is a lane-shifted read;
    # only dw != 0 taps need a w-boundary mask (padding=1 semantics).
    for kh in range(3):
        for kw in range(3):
            t = kh * 3 + kw
            s = (kh - 1) * W + (kw - 1)
            shifted = slab_ref[:cin, _PAD + s:_PAD + s + hw]
            if kw != 1:
                shifted = shifted * mask_ref[kw // 2:kw // 2 + 1, :]
            patches_ref[t * cin:(t + 1) * cin, :hw] = shifted.astype(
                patches_ref.dtype)
    # Single fat MXU contraction: (Cout, 9*Cin) @ (9*Cin, H*W), f32 accumulate.
    acc = jnp.dot(w_ref[...], patches_ref[:9 * cin, :hw],
                  preferred_element_type=jnp.float32)
    return jnp.maximum(acc + b_ref[...], 0.0)


def _maxpool2x2(a, sel_ref, slab_ref, W):
    """Channel-major 2x2/stride-2 max-pool of a (C, H*W) map.

    Elementwise max of the maps shifted by {0, 1, W, W+1}, then subsample the
    even-(h, w) positions with the (H*W, H*W/4) 0/1 selection matrix (MXU).
    """
    c, hw = a.shape
    slab_ref[:c, _PAD + hw:2 * _PAD + hw] = jnp.zeros((c, _PAD), jnp.float32)
    slab_ref[:c, _PAD:_PAD + hw] = a
    m = a
    for s in (1, W, W + 1):
        m = jnp.maximum(m, slab_ref[:c, _PAD + s:_PAD + s + hw])
    return jnp.dot(m.astype(MXU_DTYPE), sel_ref[...],
                   preferred_element_type=jnp.float32)


def _conv_stack_kernel(x_ref, w1_ref, b1_ref, w2_ref, b2_ref, w3_ref, b3_ref,
                       m32_ref, m16_ref, s2_ref, s3_ref,
                       o_ref, slab_ref, patches_ref):
    # Bt images per grid step; static Python loop reuses the slab/patch scratch
    # and the resident constants, amortizing per-step overhead and DMAs.
    for i in range(x_ref.shape[0]):
        h = _conv3x3_relu(x_ref[i], w1_ref, b1_ref, m32_ref,
                          slab_ref, patches_ref, 32, 32)        # (16, 1024)
        h = _conv3x3_relu(h, w2_ref, b2_ref, m32_ref,
                          slab_ref, patches_ref, 32, 32)        # (32, 1024)
        h = _maxpool2x2(h, s2_ref, slab_ref, 32)                # (32, 256)
        h = _conv3x3_relu(h, w3_ref, b3_ref, m16_ref,
                          slab_ref, patches_ref, 16, 16)        # (64, 256)
        h = _maxpool2x2(h, s3_ref, slab_ref, 16)                # (64, 64)
        o_ref[i] = h.astype(o_ref.dtype)


def _conv_batch_tile(B):
    """Images per conv grid step: amortize step overhead, but keep >= 2 grid
    steps when possible so ("parallel",) can feed both v7x TensorCores."""
    for t in (8, 4, 2):
        if B % t == 0 and B // t >= 2:
            return t
    return 1


def _mlp_batch_tile(B):
    """Batch tile for the MLP: multiples of 8 keep the (Bt, 4096) block
    sublane-aligned; small/odd batches run as one resident step."""
    for t in (128, 64, 32, 16, 8):
        if B % t == 0:
            return t
    return B


def conv_stack(x_flat, params, consts, bt):
    """(B, 8, 1024) channel-major input -> (B, 64, 64) pooled conv3 features."""
    B = x_flat.shape[0]

    def const_spec(shape):
        return pl.BlockSpec(shape, lambda b: (0,) * len(shape))

    flops_img = 2 * (16 * 72 * 1024 + 32 * 144 * 1024 + 32 * 1024 * 256
                     + 64 * 288 * 256 + 64 * 256 * 64)          # ~40 MFLOP
    const_bytes = (16 * 72 + 32 * 144 + 64 * 288 + 1024 * 256 + 256 * 64) * 2 \
        + (2 * 1024 + 2 * 256 + 16 + 32 + 64) * 4

    return pl.pallas_call(
        _conv_stack_kernel,
        out_shape=jax.ShapeDtypeStruct((B, 64, 64), jnp.float32),
        grid=(B // bt,),
        in_specs=[
            pl.BlockSpec((bt, _CIN1, 1024), lambda b: (b, 0, 0)),   # images
            const_spec((16, 9 * _CIN1)), const_spec((16, 1)),       # conv1
            const_spec((32, 144)), const_spec((32, 1)),             # conv2
            const_spec((64, 288)), const_spec((64, 1)),             # conv3
            const_spec((2, 1024)), const_spec((2, 256)),            # w-masks
            const_spec((1024, 256)), const_spec((256, 64)),         # pool sel
        ],
        out_specs=pl.BlockSpec((bt, 64, 64), lambda b: (b, 0, 0)),
        scratch_shapes=[
            pltpu.VMEM((64, 2 * _PAD + 1024), jnp.float32),   # shift slab
            pltpu.VMEM((288, 1024), MXU_DTYPE),               # im2col patches
        ],
        compiler_params=pltpu.CompilerParams(
            dimension_semantics=("parallel",)),
        cost_estimate=pl.CostEstimate(
            flops=B * flops_img, transcendentals=0,
            bytes_accessed=B * (_CIN1 * 1024 + 64 * 64) * 4 + const_bytes),
    )(x_flat, params["w1"], params["b1"], params["w2"], params["b2"],
      params["w3"], params["b3"], consts["mask32"], consts["mask16"],
      consts["sel32"], consts["sel16"])


def _mlp_kernel(x_ref, wf_ref, bf_ref, wo_ref, bo_ref, o_ref):
    h = jnp.dot(x_ref[...].astype(MXU_DTYPE), wf_ref[...],
                preferred_element_type=jnp.float32) + bf_ref[...]
    h = jnp.maximum(h, 0.0)                                     # fc + ReLU
    y = jnp.dot(h.astype(MXU_DTYPE), wo_ref[...],
                preferred_element_type=jnp.float32) + bo_ref[...]
    o_ref[...] = y.astype(o_ref.dtype)                          # out layer


def mlp(x, wf, bf, wo, bo, bt):
    """Fused fc(4096->128 padded)+ReLU and out(->10), batch-tiled over B."""
    B, F = x.shape
    Hp = wf.shape[1]
    O = wo.shape[1]
    return pl.pallas_call(
        _mlp_kernel,
        out_shape=jax.ShapeDtypeStruct((B, O), jnp.float32),
        grid=(B // bt,),
        in_specs=[
            pl.BlockSpec((bt, F), lambda i: (i, 0)),
            pl.BlockSpec((F, Hp), lambda i: (0, 0)),
            pl.BlockSpec((1, Hp), lambda i: (0, 0)),
            pl.BlockSpec((Hp, O), lambda i: (0, 0)),
            pl.BlockSpec((1, O), lambda i: (0, 0)),
        ],
        out_specs=pl.BlockSpec((bt, O), lambda i: (i, 0)),
        compiler_params=pltpu.CompilerParams(
            dimension_semantics=("parallel",)),
        cost_estimate=pl.CostEstimate(
            flops=2 * B * (F * Hp + Hp * O), transcendentals=0,
            bytes_accessed=B * (F + O) * 4 + (F * Hp + Hp * O) * 2),
    )(x, wf, bf, wo, bo)


def _tap_masks(H, W):
    """(2, H*W) 0/1 masks: row 0 -> dw=-1 needs w>0, row 1 -> dw=+1 needs w<W-1.
    (dh overflow is handled by the zeroed slab pad strips.)"""
    w = jnp.arange(H * W) % W
    return jnp.stack([(w > 0), (w < W - 1)]).astype(jnp.float32)


def _pool_selector(H, W):
    """(H*W, H*W/4) 0/1 matrix selecting the even-(h, w) positions."""
    Ho, Wo = H // 2, W // 2
    q = jnp.arange(Ho * Wo)
    src = 2 * (q // Wo) * W + 2 * (q % Wo)
    return jnp.zeros((H * W, Ho * Wo), jnp.float32).at[src, q].set(
        1.0).astype(MXU_DTYPE)


def make_consts():
    return {
        "mask32": _tap_masks(32, 32),
        "mask16": _tap_masks(16, 16),
        "sel32": _pool_selector(32, 32),
        "sel16": _pool_selector(16, 16),
    }


def init_params(key):
    ks = jax.random.split(key, 10)

    def conv_w(k, cin, cout, cin_pad=None):
        cin_pad = cin if cin_pad is None else cin_pad
        scale = 1.0 / jnp.sqrt(cin * 9.0)
        # (Cout, 3, 3, Cin) -> (Cout, 9*Cin); column order (kh, kw, cin) matches
        # the in-kernel patch layout.  (Torch weights: permute(0,2,3,1) first.)
        w = jax.random.normal(k, (cout, 3, 3, cin), jnp.float32) * scale
        if cin_pad != cin:
            w = jnp.concatenate(
                [w, jnp.zeros((cout, 3, 3, cin_pad - cin), jnp.float32)], -1)
        return w.reshape(cout, 9 * cin_pad).astype(MXU_DTYPE)

    def fc_w(k, fin, fout, fout_pad):
        scale = 1.0 / jnp.sqrt(float(fin))
        w = jax.random.normal(k, (fin, fout), jnp.float32) * scale
        return jnp.pad(w, ((0, 0), (0, fout_pad - fout))).astype(MXU_DTYPE)

    def out_w(k, fin, fout, fin_pad):
        scale = 1.0 / jnp.sqrt(float(fin))
        w = jax.random.normal(k, (fin, fout), jnp.float32) * scale
        return jnp.pad(w, ((0, fin_pad - fin), (0, 0))).astype(MXU_DTYPE)

    bf = jax.random.normal(ks[7], (1, _HIDDEN), jnp.float32) * 0.01
    return {
        "w1": conv_w(ks[0], 3, 16, cin_pad=_CIN1),
        "b1": jax.random.normal(ks[1], (16, 1), jnp.float32) * 0.01,
        "w2": conv_w(ks[2], 16, 32),
        "b2": jax.random.normal(ks[3], (32, 1), jnp.float32) * 0.01,
        "w3": conv_w(ks[4], 32, 64),
        "b3": jax.random.normal(ks[5], (64, 1), jnp.float32) * 0.01,
        "wf": fc_w(ks[6], 64 * 8 * 8, _HIDDEN, _HIDDEN_PAD),
        "bf": jnp.pad(bf, ((0, 0), (0, _HIDDEN_PAD - _HIDDEN))),
        "wo": out_w(ks[8], _HIDDEN, 10, _HIDDEN_PAD),
        "bo": jax.random.normal(ks[9], (1, 10), jnp.float32) * 0.01,
    }


@jax.jit
def deep_cnn_forward(x_nchw, params, consts):
    B, C, H, W = x_nchw.shape
    # NCHW is already channel-major; flattening spatial dims is metadata-only.
    x_flat = x_nchw.reshape(B, C, H * W)
    if C < _CIN1:
        # Pad channels 3 -> 8 (zero weights on the pad channels in w1) so the
        # per-tap patch stores are sublane-aligned.  Cheap one-off XLA op.
        x_flat = jnp.concatenate(
            [x_flat, jnp.zeros((B, _CIN1 - C, H * W), x_flat.dtype)], axis=1)
    feat = conv_stack(x_flat, params, consts, _conv_batch_tile(B))  # (B,64,64)
    # TODO(synk): the reference forward's `print(x.shape)` debug statement is
    # omitted (the shape is statically (B, 64, 8, 8)).
    feat = feat.reshape(B, 64 * 8 * 8)        # channel-major == torch view(B,-1)
    return mlp(feat, params["wf"], params["bf"], params["wo"], params["bo"],
               _mlp_batch_tile(B))


if __name__ == "__main__":
    key = jax.random.PRNGKey(0)
    kx, kp = jax.random.split(key)
    # nn.Linear(64*8*8, ...) after two 2x2 pools implies 32x32 spatial input.
    x = jax.random.normal(kx, (2, 3, 32, 32), jnp.float32)   # NCHW like torch
    params = init_params(kp)
    consts = make_consts()
    out = deep_cnn_forward(x, params, consts)
    jax.block_until_ready(out)
    assert out.shape == (2, 10)
    print("KERNEL_OK")
</pallas_src>

<mosaic_0001>
module attributes {stable_mosaic.version = 11 : i64} {
  func.func @_mlp_kernel(%arg0: i32, %arg1: memref<2x4096xf32, #tpu.memory_space<vmem>>, %arg2: memref<4096x128xbf16, #tpu.memory_space<vmem>>, %arg3: memref<1x128xf32, #tpu.memory_space<vmem>>, %arg4: memref<128x10xbf16, #tpu.memory_space<vmem>>, %arg5: memref<1x10xf32, #tpu.memory_space<vmem>>, %arg6: memref<2x10xf32, #tpu.memory_space<vmem>>) attributes {dimension_semantics = [#tpu.dimension_semantics<parallel>], iteration_bounds = array<i64: 1>, scalar_prefetch = 0 : i64, scratch_operands = 0 : i64, tpu.core_type = #tpu.core_type<tc>, window_params = [{transform_indices = @transform_0, window_bounds = array<i64: 2, 4096>}, {pipeline_mode = #tpu.pipeline_mode<synchronous>, transform_indices = @transform_1, window_bounds = array<i64: 4096, 128>}, {pipeline_mode = #tpu.pipeline_mode<synchronous>, transform_indices = @transform_2, window_bounds = array<i64: 1, 128>}, {pipeline_mode = #tpu.pipeline_mode<synchronous>, transform_indices = @transform_3, window_bounds = array<i64: 128, 10>}, {pipeline_mode = #tpu.pipeline_mode<synchronous>, transform_indices = @transform_4, window_bounds = array<i64: 1, 10>}, {transform_indices = @transform_5, window_bounds = array<i64: 2, 10>}]} {
    %c0 = arith.constant 0 : index
    %c0_0 = arith.constant 0 : index
    %0 = vector.load %arg1[%c0, %c0_0] : memref<2x4096xf32, #tpu.memory_space<vmem>>, vector<2x4096xf32>
    %1 = arith.truncf %0 : vector<2x4096xf32> to vector<2x4096xbf16>
    %c0_1 = arith.constant 0 : index
    %c0_2 = arith.constant 0 : index
    %2 = vector.load %arg2[%c0_1, %c0_2] : memref<4096x128xbf16, #tpu.memory_space<vmem>>, vector<4096x128xbf16>
    %cst = arith.constant dense<0.000000e+00> : vector<2x128xf32>
    %3 = tpu.matmul %1, %2, %cst {dimension_numbers = #tpu.dot_dimension_numbers<[1], [0], [0], [1], [0, 0, 1, 1], [], []>} : vector<2x4096xbf16>, vector<4096x128xbf16>, vector<2x128xf32> -> vector<2x128xf32>
    %c0_3 = arith.constant 0 : index
    %c0_4 = arith.constant 0 : index
    %4 = vector.load %arg3[%c0_3, %c0_4] : memref<1x128xf32, #tpu.memory_space<vmem>>, vector<1x128xf32>
    %5 = vector.broadcast %4 : vector<1x128xf32> to vector<2x128xf32>
    %6 = arith.addf %3, %5 : vector<2x128xf32>
    %cst_5 = arith.constant 0.000000e+00 : f32
    %7 = vector.broadcast %cst_5 : f32 to vector<2x128xf32>
    %8 = arith.maximumf %6, %7 : vector<2x128xf32>
    %9 = arith.truncf %8 : vector<2x128xf32> to vector<2x128xbf16>
    %c0_6 = arith.constant 0 : index
    %c0_7 = arith.constant 0 : index
    %10 = vector.load %arg4[%c0_6, %c0_7] : memref<128x10xbf16, #tpu.memory_space<vmem>>, vector<128x10xbf16>
    %cst_8 = arith.constant dense<0.000000e+00> : vector<2x10xf32>
    %11 = tpu.matmul %9, %10, %cst_8 {dimension_numbers = #tpu.dot_dimension_numbers<[1], [0], [0], [1], [0, 0, 1, 1], [], []>} : vector<2x128xbf16>, vector<128x10xbf16>, vector<2x10xf32> -> vector<2x10xf32>
    %c0_9 = arith.constant 0 : index
    %c0_10 = arith.constant 0 : index
    %12 = vector.load %arg5[%c0_9, %c0_10] : memref<1x10xf32, #tpu.memory_space<vmem>>, vector<1x10xf32>
    %13 = vector.broadcast %12 : vector<1x10xf32> to vector<2x10xf32>
    %14 = arith.addf %11, %13 : vector<2x10xf32>
    %c0_11 = arith.constant 0 : index
    %c0_12 = arith.constant 0 : index
    %15 = vector.load %arg6[%c0_11, %c0_12] : memref<2x10xf32, #tpu.memory_space<vmem>>, vector<2x10xf32>
    tpu.vector_store %arg6[%c0_11, %c0_12], %14 {strides = array<i32>} : memref<2x10xf32, #tpu.memory_space<vmem>>, vector<2x10xf32>,
    return
  }
  func.func @transform_0(%arg0: i32) -> (i32, i32) {
    %c0_i32 = arith.constant 0 : i32
    %c0_i32_0 = arith.constant 0 : i32
    return %arg0, %c0_i32 : i32, i32
  }
  func.func @transform_1(%arg0: i32) -> (i32, i32) {
    %c0_i32 = arith.constant 0 : i32
    %c0_i32_0 = arith.constant 0 : i32
    %c0_i32_1 = arith.constant 0 : i32
    return %c0_i32, %c0_i32_0 : i32, i32
  }
  func.func @transform_2(%arg0: i32) -> (i32, i32) {
    %c0_i32 = arith.constant 0 : i32
    %c0_i32_0 = arith.constant 0 : i32
    %c0_i32_1 = arith.constant 0 : i32
    return %c0_i32, %c0_i32_0 : i32, i32
  }
  func.func @transform_3(%arg0: i32) -> (i32, i32) {
    %c0_i32 = arith.constant 0 : i32
    %c0_i32_0 = arith.constant 0 : i32
    %c0_i32_1 = arith.constant 0 : i32
    return %c0_i32, %c0_i32_0 : i32, i32
  }
  func.func @transform_4(%arg0: i32) -> (i32, i32) {
    %c0_i32 = arith.constant 0 : i32
    %c0_i32_0 = arith.constant 0 : i32
    %c0_i32_1 = arith.constant 0 : i32
    return %c0_i32, %c0_i32_0 : i32, i32
  }
  func.func @transform_5(%arg0: i32) -> (i32, i32) {
    %c0_i32 = arith.constant 0 : i32
    %c0_i32_0 = arith.constant 0 : i32
    return %arg0, %c0_i32 : i32, i32
  }
}

module attributes {stable_mosaic.version = 11 : i64} {
  func.func @_conv_stack_kernel(%arg0: i32, %arg1: memref<1x8x1024xf32, #tpu.memory_space<vmem>>, %arg2: memref<16x72xbf16, #tpu.memory_space<vmem>>, %arg3: memref<16x1xf32, #tpu.memory_space<vmem>>, %arg4: memref<32x144xbf16, #tpu.memory_space<vmem>>, %arg5: memref<32x1xf32, #tpu.memory_space<vmem>>, %arg6: memref<64x288xbf16, #tpu.memory_space<vmem>>, %arg7: memref<64x1xf32, #tpu.memory_space<vmem>>, %arg8: memref<2x1024xf32, #tpu.memory_space<vmem>>, %arg9: memref<2x256xf32, #tpu.memory_space<vmem>>, %arg10: memref<1024x256xbf16, #tpu.memory_space<vmem>>, %arg11: memref<256x64xbf16, #tpu.memory_space<vmem>>, %arg12: memref<1x64x64xf32, #tpu.memory_space<vmem>>, %arg13: memref<64x1280xf32, #tpu.memory_space<vmem>>, %arg14: memref<288x1024xbf16, #tpu.memory_space<vmem>>) attributes {dimension_semantics = [#tpu.dimension_semantics<parallel>], iteration_bounds = array<i64: 2>, scalar_prefetch = 0 : i64, scratch_operands = 2 : i64, tpu.core_type = #tpu.core_type<tc>, window_params = [{transform_indices = @transform_0, window_bounds = array<i64: 1, 8, 1024>}, {pipeline_mode = #tpu.pipeline_mode<synchronous>, transform_indices = @transform_1, window_bounds = array<i64: 16, 72>}, {pipeline_mode = #tpu.pipeline_mode<synchronous>, transform_indices = @transform_2, window_bounds = array<i64: 16, 1>}, {pipeline_mode = #tpu.pipeline_mode<synchronous>, transform_indices = @transform_3, window_bounds = array<i64: 32, 144>}, {pipeline_mode = #tpu.pipeline_mode<synchronous>, transform_indices = @transform_4, window_bounds = array<i64: 32, 1>}, {pipeline_mode = #tpu.pipeline_mode<synchronous>, transform_indices = @transform_5, window_bounds = array<i64: 64, 288>}, {pipeline_mode = #tpu.pipeline_mode<synchronous>, transform_indices = @transform_6, window_bounds = array<i64: 64, 1>}, {pipeline_mode = #tpu.pipeline_mode<synchronous>, transform_indices = @transform_7, window_bounds = array<i64: 2, 1024>}, {pipeline_mode = #tpu.pipeline_mode<synchronous>, transform_indices = @transform_8, window_bounds = array<i64: 2, 256>}, {pipeline_mode = #tpu.pipeline_mode<synchronous>, transform_indices = @transform_9, window_bounds = array<i64: 1024, 256>}, {pipeline_mode = #tpu.pipeline_mode<synchronous>, transform_indices = @transform_10, window_bounds = array<i64: 256, 64>}, {transform_indices = @transform_11, window_bounds = array<i64: 1, 64, 64>}]} {
    %c0 = arith.constant 0 : index
    %c0_0 = arith.constant 0 : index
    %c0_1 = arith.constant 0 : index
    %0 = vector.load %arg1[%c0, %c0_0, %c0_1] : memref<1x8x1024xf32, #tpu.memory_space<vmem>>, vector<1x8x1024xf32>
    %1 = vector.shape_cast %0 : vector<1x8x1024xf32> to vector<8x1024xf32>
    %cst = arith.constant 0.000000e+00 : f32
    %2 = vector.broadcast %cst : f32 to vector<8x128xf32>
    %c0_2 = arith.constant 0 : index
    %c0_3 = arith.constant 0 : index
    %3 = vector.load %arg13[%c0_2, %c0_3] : memref<64x1280xf32, #tpu.memory_space<vmem>>, vector<8x128xf32>
    tpu.vector_store %arg13[%c0_2, %c0_3], %2 {strides = array<i32>} : memref<64x1280xf32, #tpu.memory_space<vmem>>, vector<8x128xf32>,
    %c0_4 = arith.constant 0 : index
    %c1152 = arith.constant 1152 : index
    %4 = vector.load %arg13[%c0_4, %c1152] : memref<64x1280xf32, #tpu.memory_space<vmem>>, vector<8x128xf32>
    tpu.vector_store %arg13[%c0_4, %c1152], %2 {strides = array<i32>} : memref<64x1280xf32, #tpu.memory_space<vmem>>, vector<8x128xf32>,
    %c0_5 = arith.constant 0 : index
    %c128 = arith.constant 128 : index
    %5 = vector.load %arg13[%c0_5, %c128] : memref<64x1280xf32, #tpu.memory_space<vmem>>, vector<8x1024xf32>
    tpu.vector_store %arg13[%c0_5, %c128], %1 {strides = array<i32>} : memref<64x1280xf32, #tpu.memory_space<vmem>>, vector<8x1024xf32>,
    %c0_6 = arith.constant 0 : index
    %c95 = arith.constant 95 : index
    %6 = vector.load %arg13[%c0_6, %c95] : memref<64x1280xf32, #tpu.memory_space<vmem>>, vector<8x1024xf32>
    %c0_7 = arith.constant 0 : index
    %c0_8 = arith.constant 0 : index
    %7 = vector.load %arg8[%c0_7, %c0_8] : memref<2x1024xf32, #tpu.memory_space<vmem>>, vector<1x1024xf32>
    %8 = vector.broadcast %7 : vector<1x1024xf32> to vector<8x1024xf32>
    %9 = arith.mulf %6, %8 : vector<8x1024xf32>
    %10 = arith.truncf %9 : vector<8x1024xf32> to vector<8x1024xbf16>
    %c0_9 = arith.constant 0 : index
    %c0_10 = arith.constant 0 : index
    %11 = vector.load %arg14[%c0_9, %c0_10] : memref<288x1024xbf16, #tpu.memory_space<vmem>>, vector<8x1024xbf16>
    tpu.vector_store %arg14[%c0_9, %c0_10], %10 {strides = array<i32>} : memref<288x1024xbf16, #tpu.memory_space<vmem>>, vector<8x1024xbf16>,
    %c0_11 = arith.constant 0 : index
    %c96 = arith.constant 96 : index
    %12 = vector.load %arg13[%c0_11, %c96] : memref<64x1280xf32, #tpu.memory_space<vmem>>, vector<8x1024xf32>
    %13 = arith.truncf %12 : vector<8x1024xf32> to vector<8x1024xbf16>
    %c8 = arith.constant 8 : index
    %c0_12 = arith.constant 0 : index
    %14 = vector.load %arg14[%c8, %c0_12] : memref<288x1024xbf16, #tpu.memory_space<vmem>>, vector<8x1024xbf16>
    tpu.vector_store %arg14[%c8, %c0_12], %13 {strides = array<i32>} : memref<288x1024xbf16, #tpu.memory_space<vmem>>, vector<8x1024xbf16>,
    %c0_13 = arith.constant 0 : index
    %c97 = arith.constant 97 : index
    %15 = vector.load %arg13[%c0_13, %c97] : memref<64x1280xf32, #tpu.memory_space<vmem>>, vector<8x1024xf32>
    %c1 = arith.constant 1 : index
    %c0_14 = arith.constant 0 : index
    %16 = vector.load %arg8[%c1, %c0_14] : memref<2x1024xf32, #tpu.memory_space<vmem>>, vector<1x1024xf32>
    %17 = vector.broadcast %16 : vector<1x1024xf32> to vector<8x1024xf32>
    %18 = arith.mulf %15, %17 : vector<8x1024xf32>
    %19 = arith.truncf %18 : vector<8x1024xf32> to vector<8x1024xbf16>
    %c16 = arith.constant 16 : index
    %c0_15 = arith.constant 0 : index
    %20 = vector.load %arg14[%c16, %c0_15] : memref<288x1024xbf16, #tpu.memory_space<vmem>>, vector<8x1024xbf16>
    tpu.vector_store %arg14[%c16, %c0_15], %19 {strides = array<i32>} : memref<288x1024xbf16, #tpu.memory_space<vmem>>, vector<8x1024xbf16>,
    %c0_16 = arith.constant 0 : index
    %c127 = arith.constant 127 : index
    %21 = vector.load %arg13[%c0_16, %c127] : memref<64x1280xf32, #tpu.memory_space<vmem>>, vector<8x1024xf32>
    %c0_17 = arith.constant 0 : index
    %c0_18 = arith.constant 0 : index
    %22 = vector.load %arg8[%c0_17, %c0_18] : memref<2x1024xf32, #tpu.memory_space<vmem>>, vector<1x1024xf32>
    %23 = vector.broadcast %22 : vector<1x1024xf32> to vector<8x1024xf32>
    %24 = arith.mulf %21, %23 : vector<8x1024xf32>
    %25 = arith.truncf %24 : vector<8x1024xf32> to vector<8x1024xbf16>
    %c24 = arith.constant 24 : index
    %c0_19 = arith.constant 0 : index
    %26 = vector.load %arg14[%c24, %c0_19] : memref<288x1024xbf16, #tpu.memory_space<vmem>>, vector<8x1024xbf16>
    tpu.vector_store %arg14[%c24, %c0_19], %25 {strides = array<i32>} : memref<288x1024xbf16, #tpu.memory_space<vmem>>, vector<8x1024xbf16>,
    %c0_20 = arith.constant 0 : index
    %c128_21 = arith.constant 128 : index
    %27 = vector.load %arg13[%c0_20, %c128_21] : memref<64x1280xf32, #tpu.memory_space<vmem>>, vector<8x1024xf32>
    %28 = arith.truncf %27 : vector<8x1024xf32> to vector<8x1024xbf16>
    %c32 = arith.constant 32 : index
    %c0_22 = arith.constant 0 : index
    %29 = vector.load %arg14[%c32, %c0_22] : memref<288x1024xbf16, #tpu.memory_space<vmem>>, vector<8x1024xbf16>
    tpu.vector_store %arg14[%c32, %c0_22], %28 {strides = array<i32>} : memref<288x1024xbf16, #tpu.memory_space<vmem>>, vector<8x1024xbf16>,
    %c0_23 = arith.constant 0 : index
    %c129 = arith.constant 129 : index
    %30 = vector.load %arg13[%c0_23, %c129] : memref<64x1280xf32, #tpu.memory_space<vmem>>, vector<8x1024xf32>
    %c1_24 = arith.constant 1 : index
    %c0_25 = arith.constant 0 : index
    %31 = vector.load %arg8[%c1_24, %c0_25] : memref<2x1024xf32, #tpu.memory_space<vmem>>, vector<1x1024xf32>
    %32 = vector.broadcast %31 : vector<1x1024xf32> to vector<8x1024xf32>
    %33 = arith.mulf %30, %32 : vector<8x1024xf32>
    %34 = arith.truncf %33 : vector<8x1024xf32> to vector<8x1024xbf16>
    %c40 = arith.constant 40 : index
    %c0_26 = arith.constant 0 : index
    %35 = vector.load %arg14[%c40, %c0_26] : memref<288x1024xbf16, #tpu.memory_space<vmem>>, vector<8x1024xbf16>
    tpu.vector_store %arg14[%c40, %c0_26], %34 {strides = array<i32>} : memref<288x1024xbf16, #tpu.memory_space<vmem>>, vector<8x1024xbf16>,
    %c0_27 = arith.constant 0 : index
    %c159 = arith.constant 159 : index
    %36 = vector.load %arg13[%c0_27, %c159] : memref<64x1280xf32, #tpu.memory_space<vmem>>, vector<8x1024xf32>
    %c0_28 = arith.constant 0 : index
    %c0_29 = arith.constant 0 : index
    %37 = vector.load %arg8[%c0_28, %c0_29] : memref<2x1024xf32, #tpu.memory_space<vmem>>, vector<1x1024xf32>
    %38 = vector.broadcast %37 : vector<1x1024xf32> to vector<8x1024xf32>
    %39 = arith.mulf %36, %38 : vector<8x1024xf32>
    %40 = arith.truncf %39 : vector<8x1024xf32> to vector<8x1024xbf16>
    %c48 = arith.constant 48 : index
    %c0_30 = arith.constant 0 : index
    %41 = vector.load %arg14[%c48, %c0_30] : memref<288x1024xbf16, #tpu.memory_space<vmem>>, vector<8x1024xbf16>
    tpu.vector_store %arg14[%c48, %c0_30], %40 {strides = array<i32>} : memref<288x1024xbf16, #tpu.memory_space<vmem>>, vector<8x1024xbf16>,
    %c0_31 = arith.constant 0 : index
    %c160 = arith.constant 160 : index
    %42 = vector.load %arg13[%c0_31, %c160] : memref<64x1280xf32, #tpu.memory_space<vmem>>, vector<8x1024xf32>
    %43 = arith.truncf %42 : vector<8x1024xf32> to vector<8x1024xbf16>
    %c56 = arith.constant 56 : index
    %c0_32 = arith.constant 0 : index
    %44 = vector.load %arg14[%c56, %c0_32] : memref<288x1024xbf16, #tpu.memory_space<vmem>>, vector<8x1024xbf16>
    tpu.vector_store %arg14[%c56, %c0_32], %43 {strides = array<i32>} : memref<288x1024xbf16, #tpu.memory_space<vmem>>, vector<8x1024xbf16>,
    %c0_33 = arith.constant 0 : index
    %c161 = arith.constant 161 : index
    %45 = vector.load %arg13[%c0_33, %c161] : memref<64x1280xf32, #tpu.memory_space<vmem>>, vector<8x1024xf32>
    %c1_34 = arith.constant 1 : index
    %c0_35 = arith.constant 0 : index
    %46 = vector.load %arg8[%c1_34, %c0_35] : memref<2x1024xf32, #tpu.memory_space<vmem>>, vector<1x1024xf32>
    %47 = vector.broadcast %46 : vector<1x1024xf32> to vector<8x1024xf32>
    %48 = arith.mulf %45, %47 : vector<8x1024xf32>
    %49 = arith.truncf %48 : vector<8x1024xf32> to vector<8x1024xbf16>
    %c64 = arith.constant 64 : index
    %c0_36 = arith.constant 0 : index
    %50 = vector.load %arg14[%c64, %c0_36] : memref<288x1024xbf16, #tpu.memory_space<vmem>>, vector<8x1024xbf16>
    tpu.vector_store %arg14[%c64, %c0_36], %49 {strides = array<i32>} : memref<288x1024xbf16, #tpu.memory_space<vmem>>, vector<8x1024xbf16>,
    %c0_37 = arith.constant 0 : index
    %c0_38 = arith.constant 0 : index
    %51 = vector.load %arg2[%c0_37, %c0_38] : memref<16x72xbf16, #tpu.memory_space<vmem>>, vector<16x72xbf16>
    %c0_39 = arith.constant 0 : index
    %c0_40 = arith.constant 0 : index
    %52 = vector.load %arg14[%c0_39, %c0_40] : memref<288x1024xbf16, #tpu.memory_space<vmem>>, vector<72x1024xbf16>
    %cst_41 = arith.constant dense<0.000000e+00> : vector<16x1024xf32>
    %53 = tpu.matmul %51, %52, %cst_41 {dimension_numbers = #tpu.dot_dimension_numbers<[1], [0], [0], [1], [0, 0, 1, 1], [], []>} : vector<16x72xbf16>, vector<72x1024xbf16>, vector<16x1024xf32> -> vector<16x1024xf32>
    %c0_42 = arith.constant 0 : index
    %c0_43 = arith.constant 0 : index
    %54 = vector.load %arg3[%c0_42, %c0_43] : memref<16x1xf32, #tpu.memory_space<vmem>>, vector<16x1xf32>
    %55 = vector.broadcast %54 : vector<16x1xf32> to vector<16x1024xf32>
    %56 = arith.addf %53, %55 : vector<16x1024xf32>
    %cst_44 = arith.constant 0.000000e+00 : f32
    %57 = vector.broadcast %cst_44 : f32 to vector<16x1024xf32>
    %58 = arith.maximumf %56, %57 : vector<16x1024xf32>
    %cst_45 = arith.constant 0.000000e+00 : f32
    %59 = vector.broadcast %cst_45 : f32 to vector<16x128xf32>
    %c0_46 = arith.constant 0 : index
    %c0_47 = arith.constant 0 : index
    %60 = vector.load %arg13[%c0_46, %c0_47] : memref<64x1280xf32, #tpu.memory_space<vmem>>, vector<16x128xf32>
    tpu.vector_store %arg13[%c0_46, %c0_47], %59 {strides = array<i32>} : memref<64x1280xf32, #tpu.memory_space<vmem>>, vector<16x128xf32>,
    %c0_48 = arith.constant 0 : index
    %c1152_49 = arith.constant 1152 : index
    %61 = vector.load %arg13[%c0_48, %c1152_49] : memref<64x1280xf32, #tpu.memory_space<vmem>>, vector<16x128xf32>
    tpu.vector_store %arg13[%c0_48, %c1152_49], %59 {strides = array<i32>} : memref<64x1280xf32, #tpu.memory_space<vmem>>, vector<16x128xf32>,
    %c0_50 = arith.constant 0 : index
    %c128_51 = arith.constant 128 : index
    %62 = vector.load %arg13[%c0_50, %c128_51] : memref<64x1280xf32, #tpu.memory_space<vmem>>, vector<16x1024xf32>
    tpu.vector_store %arg13[%c0_50, %c128_51], %58 {strides = array<i32>} : memref<64x1280xf32, #tpu.memory_space<vmem>>, vector<16x1024xf32>,
    %c0_52 = arith.constant 0 : index
    %c95_53 = arith.constant 95 : index
    %63 = vector.load %arg13[%c0_52, %c95_53] : memref<64x1280xf32, #tpu.memory_space<vmem>>, vector<16x1024xf32>
    %c0_54 = arith.constant 0 : index
    %c0_55 = arith.constant 0 : index
    %64 = vector.load %arg8[%c0_54, %c0_55] : memref<2x1024xf32, #tpu.memory_space<vmem>>, vector<1x1024xf32>
    %65 = vector.broadcast %64 : vector<1x1024xf32> to vector<16x1024xf32>
    %66 = arith.mulf %63, %65 : vector<16x1024xf32>
    %67 = arith.truncf %66 : vector<16x1024xf32> to vector<16x1024xbf16>
    %c0_56 = arith.constant 0 : index
    %c0_57 = arith.constant 0 : index
    %68 = vector.load %arg14[%c0_56, %c0_57] : memref<288x1024xbf16, #tpu.memory_space<vmem>>, vector<16x1024xbf16>
    tpu.vector_store %arg14[%c0_56, %c0_57], %67 {strides = array<i32>} : memref<288x1024xbf16, #tpu.memory_space<vmem>>, vector<16x1024xbf16>,
    %c0_58 = arith.constant 0 : index
    %c96_59 = arith.constant 96 : index
    %69 = vector.load %arg13[%c0_58, %c96_59] : memref<64x1280xf32, #tpu.memory_space<vmem>>, vector<16x1024xf32>
    %70 = arith.truncf %69 : vector<16x1024xf32> to vector<16x1024xbf16>
    %c16_60 = arith.constant 16 : index
    %c0_61 = arith.constant 0 : index
    %71 = vector.load %arg14[%c16_60, %c0_61] : memref<288x1024xbf16, #tpu.memory_space<vmem>>, vector<16x1024xbf16>
    tpu.vector_store %arg14[%c16_60, %c0_61], %70 {strides = array<i32>} : memref<288x1024xbf16, #tpu.memory_space<vmem>>, vector<16x1024xbf16>,
    %c0_62 = arith.constant 0 : index
    %c97_63 = arith.constant 97 : index
    %72 = vector.load %arg13[%c0_62, %c97_63] : memref<64x1280xf32, #tpu.memory_space<vmem>>, vector<16x1024xf32>
    %c1_64 = arith.constant 1 : index
    %c0_65 = arith.constant 0 : index
    %73 = vector.load %arg8[%c1_64, %c0_65] : memref<2x1024xf32, #tpu.memory_space<vmem>>, vector<1x1024xf32>
    %74 = vector.broadcast %73 : vector<1x1024xf32> to vector<16x1024xf32>
    %75 = arith.mulf %72, %74 : vector<16x1024xf32>
    %76 = arith.truncf %75 : vector<16x1024xf32> to vector<16x1024xbf16>
    %c32_66 = arith.constant 32 : index
    %c0_67 = arith.constant 0 : index
    %77 = vector.load %arg14[%c32_66, %c0_67] : memref<288x1024xbf16, #tpu.memory_space<vmem>>, vector<16x1024xbf16>
    tpu.vector_store %arg14[%c32_66, %c0_67], %76 {strides = array<i32>} : memref<288x1024xbf16, #tpu.memory_space<vmem>>, vector<16x1024xbf16>,
    %c0_68 = arith.constant 0 : index
    %c127_69 = arith.constant 127 : index
    %78 = vector.load %arg13[%c0_68, %c127_69] : memref<64x1280xf32, #tpu.memory_space<vmem>>, vector<16x1024xf32>
    %c0_70 = arith.constant 0 : index
    %c0_71 = arith.constant 0 : index
    %79 = vector.load %arg8[%c0_70, %c0_71] : memref<2x1024xf32, #tpu.memory_space<vmem>>, vector<1x1024xf32>
    %80 = vector.broadcast %79 : vector<1x1024xf32> to vector<16x1024xf32>
    %81 = arith.mulf %78, %80 : vector<16x1024xf32>
    %82 = arith.truncf %81 : vector<16x1024xf32> to vector<16x1024xbf16>
    %c48_72 = arith.constant 48 : index
    %c0_73 = arith.constant 0 : index
    %83 = vector.load %arg14[%c48_72, %c0_73] : memref<288x1024xbf16, #tpu.memory_space<vmem>>, vector<16x1024xbf16>
    tpu.vector_store %arg14[%c48_72, %c0_73], %82 {strides = array<i32>} : memref<288x1024xbf16, #tpu.memory_space<vmem>>, vector<16x1024xbf16>,
    %c0_74 = arith.constant 0 : index
    %c128_75 = arith.constant 128 : index
    %84 = vector.load %arg13[%c0_74, %c128_75] : memref<64x1280xf32, #tpu.memory_space<vmem>>, vector<16x1024xf32>
    %85 = arith.truncf %84 : vector<16x1024xf32> to vector<16x1024xbf16>
    %c64_76 = arith.constant 64 : index
    %c0_77 = arith.constant 0 : index
    %86 = vector.load %arg14[%c64_76, %c0_77] : memref<288x1024xbf16, #tpu.memory_space<vmem>>, vector<16x1024xbf16>
    tpu.vector_store %arg14[%c64_76, %c0_77], %85 {strides = array<i32>} : memref<288x1024xbf16, #tpu.memory_space<vmem>>, vector<16x1024xbf16>,
    %c0_78 = arith.constant 0 : index
    %c129_79 = arith.constant 129 : index
    %87 = vector.load %arg13[%c0_78, %c129_79] : memref<64x1280xf32, #tpu.memory_space<vmem>>, vector<16x1024xf32>
    %c1_80 = arith.constant 1 : index
    %c0_81 = arith.constant 0 : index
    %88 = vector.load %arg8[%c1_80, %c0_81] : memref<2x1024xf32, #tpu.memory_space<vmem>>, vector<1x1024xf32>
    %89 = vector.broadcast %88 : vector<1x1024xf32> to vector<16x1024xf32>
    %90 = arith.mulf %87, %89 : vector<16x1024xf32>
    %91 = arith.truncf %90 : vector<16x1024xf32> to vector<16x1024xbf16>
    %c80 = arith.constant 80 : index
    %c0_82 = arith.constant 0 : index
    %92 = vector.load %arg14[%c80, %c0_82] : memref<288x1024xbf16, #tpu.memory_space<vmem>>, vector<16x1024xbf16>
    tpu.vector_store %arg14[%c80, %c0_82], %91 {strides = array<i32>} : memref<288x1024xbf16, #tpu.memory_space<vmem>>, vector<16x1024xbf16>,
    %c0_83 = arith.constant 0 : index
    %c159_84 = arith.constant 159 : index
    %93 = vector.load %arg13[%c0_83, %c159_84] : memref<64x1280xf32, #tpu.memory_space<vmem>>, vector<16x1024xf32>
    %c0_85 = arith.constant 0 : index
    %c0_86 = arith.constant 0 : index
    %94 = vector.load %arg8[%c0_85, %c0_86] : memref<2x1024xf32, #tpu.memory_space<vmem>>, vector<1x1024xf32>
    %95 = vector.broadcast %94 : vector<1x1024xf32> to vector<16x1024xf32>
    %96 = arith.mulf %93, %95 : vector<16x1024xf32>
    %97 = arith.truncf %96 : vector<16x1024xf32> to vector<16x1024xbf16>
    %c96_87 = arith.constant 96 : index
    %c0_88 = arith.constant 0 : index
    %98 = vector.load %arg14[%c96_87, %c0_88] : memref<288x1024xbf16, #tpu.memory_space<vmem>>, vector<16x1024xbf16>
    tpu.vector_store %arg14[%c96_87, %c0_88], %97 {strides = array<i32>} : memref<288x1024xbf16, #tpu.memory_space<vmem>>, vector<16x1024xbf16>,
    %c0_89 = arith.constant 0 : index
    %c160_90 = arith.constant 160 : index
    %99 = vector.load %arg13[%c0_89, %c160_90] : memref<64x1280xf32, #tpu.memory_space<vmem>>, vector<16x1024xf32>
    %100 = arith.truncf %99 : vector<16x1024xf32> to vector<16x1024xbf16>
    %c112 = arith.constant 112 : index
    %c0_91 = arith.constant 0 : index
    %101 = vector.load %arg14[%c112, %c0_91] : memref<288x1024xbf16, #tpu.memory_space<vmem>>, vector<16x1024xbf16>
    tpu.vector_store %arg14[%c112, %c0_91], %100 {strides = array<i32>} : memref<288x1024xbf16, #tpu.memory_space<vmem>>, vector<16x1024xbf16>,
    %c0_92 = arith.constant 0 : index
    %c161_93 = arith.constant 161 : index
    %102 = vector.load %arg13[%c0_92, %c161_93] : memref<64x1280xf32, #tpu.memory_space<vmem>>, vector<16x1024xf32>
    %c1_94 = arith.constant 1 : index
    %c0_95 = arith.constant 0 : index
    %103 = vector.load %arg8[%c1_94, %c0_95] : memref<2x1024xf32, #tpu.memory_space<vmem>>, vector<1x1024xf32>
    %104 = vector.broadcast %103 : vector<1x1024xf32> to vector<16x1024xf32>
    %105 = arith.mulf %102, %104 : vector<16x1024xf32>
    %106 = arith.truncf %105 : vector<16x1024xf32> to vector<16x1024xbf16>
    %c128_96 = arith.constant 128 : index
    %c0_97 = arith.constant 0 : index
    %107 = vector.load %arg14[%c128_96, %c0_97] : memref<288x1024xbf16, #tpu.memory_space<vmem>>, vector<16x1024xbf16>
    tpu.vector_store %arg14[%c128_96, %c0_97], %106 {strides = array<i32>} : memref<288x1024xbf16, #tpu.memory_space<vmem>>, vector<16x1024xbf16>,
    %c0_98 = arith.constant 0 : index
    %c0_99 = arith.constant 0 : index
    %108 = vector.load %arg4[%c0_98, %c0_99] : memref<32x144xbf16, #tpu.memory_space<vmem>>, vector<32x144xbf16>
    %c0_100 = arith.constant 0 : index
    %c0_101 = arith.constant 0 : index
    %109 = vector.load %arg14[%c0_100, %c0_101] : memref<288x1024xbf16, #tpu.memory_space<vmem>>, vector<144x1024xbf16>
    %cst_102 = arith.constant dense<0.000000e+00> : vector<32x1024xf32>
    %110 = tpu.matmul %108, %109, %cst_102 {dimension_numbers = #tpu.dot_dimension_numbers<[1], [0], [0], [1], [0, 0, 1, 1], [], []>} : vector<32x144xbf16>, vector<144x1024xbf16>, vector<32x1024xf32> -> vector<32x1024xf32>
    %c0_103 = arith.constant 0 : index
    %c0_104 = arith.constant 0 : index
    %111 = vector.load %arg5[%c0_103, %c0_104] : memref<32x1xf32, #tpu.memory_space<vmem>>, vector<32x1xf32>
    %112 = vector.broadcast %111 : vector<32x1xf32> to vector<32x1024xf32>
    %113 = arith.addf %110, %112 : vector<32x1024xf32>
    %cst_105 = arith.constant 0.000000e+00 : f32
    %114 = vector.broadcast %cst_105 : f32 to vector<32x1024xf32>
    %115 = arith.maximumf %113, %114 : vector<32x1024xf32>
    %cst_106 = arith.constant 0.000000e+00 : f32
    %116 = vector.broadcast %cst_106 : f32 to vector<32x128xf32>
    %c0_107 = arith.constant 0 : index
    %c1152_108 = arith.constant 1152 : index
    %117 = vector.load %arg13[%c0_107, %c1152_108] : memref<64x1280xf32, #tpu.memory_space<vmem>>, vector<32x128xf32>
    tpu.vector_store %arg13[%c0_107, %c1152_108], %116 {strides = array<i32>} : memref<64x1280xf32, #tpu.memory_space<vmem>>, vector<32x128xf32>,
    %c0_109 = arith.constant 0 : index
    %c128_110 = arith.constant 128 : index
    %118 = vector.load %arg13[%c0_109, %c128_110] : memref<64x1280xf32, #tpu.memory_space<vmem>>, vector<32x1024xf32>
    tpu.vector_store %arg13[%c0_109, %c128_110], %115 {strides = array<i32>} : memref<64x1280xf32, #tpu.memory_space<vmem>>, vector<32x1024xf32>,
    %c0_111 = arith.constant 0 : index
    %c129_112 = arith.constant 129 : index
    %119 = vector.load %arg13[%c0_111, %c129_112] : memref<64x1280xf32, #tpu.memory_space<vmem>>, vector<32x1024xf32>
    %120 = arith.maximumf %115, %119 : vector<32x1024xf32>
    %c0_113 = arith.constant 0 : index
    %c160_114 = arith.constant 160 : index
    %121 = vector.load %arg13[%c0_113, %c160_114] : memref<64x1280xf32, #tpu.memory_space<vmem>>, vector<32x1024xf32>
    %122 = arith.maximumf %120, %121 : vector<32x1024xf32>
    %c0_115 = arith.constant 0 : index
    %c161_116 = arith.constant 161 : index
    %123 = vector.load %arg13[%c0_115, %c161_116] : memref<64x1280xf32, #tpu.memory_space<vmem>>, vector<32x1024xf32>
    %124 = arith.maximumf %122, %123 : vector<32x1024xf32>
    %125 = arith.truncf %124 : vector<32x1024xf32> to vector<32x1024xbf16>
    %c0_117 = arith.constant 0 : index
    %c0_118 = arith.constant 0 : index
    %126 = vector.load %arg10[%c0_117, %c0_118] : memref<1024x256xbf16, #tpu.memory_space<vmem>>, vector<1024x256xbf16>
    %cst_119 = arith.constant dense<0.000000e+00> : vector<32x256xf32>
    %127 = tpu.matmul %125, %126, %cst_119 {dimension_numbers = #tpu.dot_dimension_numbers<[1], [0], [0], [1], [0, 0, 1, 1], [], []>} : vector<32x1024xbf16>, vector<1024x256xbf16>, vector<32x256xf32> -> vector<32x256xf32>
    %cst_120 = arith.constant 0.000000e+00 : f32
    %128 = vector.broadcast %cst_120 : f32 to vector<32x128xf32>
    %c0_121 = arith.constant 0 : index
    %c0_122 = arith.constant 0 : index
    %129 = vector.load %arg13[%c0_121, %c0_122] : memref<64x1280xf32, #tpu.memory_space<vmem>>, vector<32x128xf32>
    tpu.vector_store %arg13[%c0_121, %c0_122], %128 {strides = array<i32>} : memref<64x1280xf32, #tpu.memory_space<vmem>>, vector<32x128xf32>,
    %c0_123 = arith.constant 0 : index
    %c384 = arith.constant 384 : index
    %130 = vector.load %arg13[%c0_123, %c384] : memref<64x1280xf32, #tpu.memory_space<vmem>>, vector<32x128xf32>
    tpu.vector_store %arg13[%c0_123, %c384], %128 {strides = array<i32>} : memref<64x1280xf32, #tpu.memory_space<vmem>>, vector<32x128xf32>,
    %c0_124 = arith.constant 0 : index
    %c128_125 = arith.constant 128 : index
    %131 = vector.load %arg13[%c0_124, %c128_125] : memref<64x1280xf32, #tpu.memory_space<vmem>>, vector<32x256xf32>
    tpu.vector_store %arg13[%c0_124, %c128_125], %127 {strides = array<i32>} : memref<64x1280xf32, #tpu.memory_space<vmem>>, vector<32x256xf32>,
    %c0_126 = arith.constant 0 : index
    %c111 = arith.constant 111 : index
    %132 = vector.load %arg13[%c0_126, %c111] : memref<64x1280xf32, #tpu.memory_space<vmem>>, vector<32x256xf32>
    %c0_127 = arith.constant 0 : index
    %c0_128 = arith.constant 0 : index
    %133 = vector.load %arg9[%c0_127, %c0_128] : memref<2x256xf32, #tpu.memory_space<vmem>>, vector<1x256xf32>
    %134 = vector.broadcast %133 : vector<1x256xf32> to vector<32x256xf32>
    %135 = arith.mulf %132, %134 : vector<32x256xf32>
    %136 = arith.truncf %135 : vector<32x256xf32> to vector<32x256xbf16>
    %c0_129 = arith.constant 0 : index
    %c0_130 = arith.constant 0 : index
    %137 = vector.load %arg14[%c0_129, %c0_130] : memref<288x1024xbf16, #tpu.memory_space<vmem>>, vector<32x256xbf16>
    tpu.vector_store %arg14[%c0_129, %c0_130], %136 {strides = array<i32>} : memref<288x1024xbf16, #tpu.memory_space<vmem>>, vector<32x256xbf16>,
    %c0_131 = arith.constant 0 : index
    %c112_132 = arith.constant 112 : index
    %138 = vector.load %arg13[%c0_131, %c112_132] : memref<64x1280xf32, #tpu.memory_space<vmem>>, vector<32x256xf32>
    %139 = arith.truncf %138 : vector<32x256xf32> to vector<32x256xbf16>
    %c32_133 = arith.constant 32 : index
    %c0_134 = arith.constant 0 : index
    %140 = vector.load %arg14[%c32_133, %c0_134] : memref<288x1024xbf16, #tpu.memory_space<vmem>>, vector<32x256xbf16>
    tpu.vector_store %arg14[%c32_133, %c0_134], %139 {strides = array<i32>} : memref<288x1024xbf16, #tpu.memory_space<vmem>>, vector<32x256xbf16>,
    %c0_135 = arith.constant 0 : index
    %c113 = arith.constant 113 : index
    %141 = vector.load %arg13[%c0_135, %c113] : memref<64x1280xf32, #tpu.memory_space<vmem>>, vector<32x256xf32>
    %c1_136 = arith.constant 1 : index
    %c0_137 = arith.constant 0 : index
    %142 = vector.load %arg9[%c1_136, %c0_137] : memref<2x256xf32, #tpu.memory_space<vmem>>, vector<1x256xf32>
    %143 = vector.broadcast %142 : vector<1x256xf32> to vector<32x256xf32>
    %144 = arith.mulf %141, %143 : vector<32x256xf32>
    %145 = arith.truncf %144 : vector<32x256xf32> to vector<32x256xbf16>
    %c64_138 = arith.constant 64 : index
    %c0_139 = arith.constant 0 : index
    %146 = vector.load %arg14[%c64_138, %c0_139] : memref<288x1024xbf16, #tpu.memory_space<vmem>>, vector<32x256xbf16>
    tpu.vector_store %arg14[%c64_138, %c0_139], %145 {strides = array<i32>} : memref<288x1024xbf16, #tpu.memory_space<vmem>>, vector<32x256xbf16>,
    %c0_140 = arith.constant 0 : index
    %c127_141 = arith.constant 127 : index
    %147 = vector.load %arg13[%c0_140, %c127_141] : memref<64x1280xf32, #tpu.memory_space<vmem>>, vector<32x256xf32>
    %c0_142 = arith.constant 0 : index
    %c0_143 = arith.constant 0 : index
    %148 = vector.load %arg9[%c0_142, %c0_143] : memref<2x256xf32, #tpu.memory_space<vmem>>, vector<1x256xf32>
    %149 = vector.broadcast %148 : vector<1x256xf32> to vector<32x256xf32>
    %150 = arith.mulf %147, %149 : vector<32x256xf32>
    %151 = arith.truncf %150 : vector<32x256xf32> to vector<32x256xbf16>
    %c96_144 = arith.constant 96 : index
    %c0_145 = arith.constant 0 : index
    %152 = vector.load %arg14[%c96_144, %c0_145] : memref<288x1024xbf16, #tpu.memory_space<vmem>>, vector<32x256xbf16>
    tpu.vector_store %arg14[%c96_144, %c0_145], %151 {strides = array<i32>} : memref<288x1024xbf16, #tpu.memory_space<vmem>>, vector<32x256xbf16>,
    %c0_146 = arith.constant 0 : index
    %c128_147 = arith.constant 128 : index
    %153 = vector.load %arg13[%c0_146, %c128_147] : memref<64x1280xf32, #tpu.memory_space<vmem>>, vector<32x256xf32>
    %154 = arith.truncf %153 : vector<32x256xf32> to vector<32x256xbf16>
    %c128_148 = arith.constant 128 : index
    %c0_149 = arith.constant 0 : index
    %155 = vector.load %arg14[%c128_148, %c0_149] : memref<288x1024xbf16, #tpu.memory_space<vmem>>, vector<32x256xbf16>
    tpu.vector_store %arg14[%c128_148, %c0_149], %154 {strides = array<i32>} : memref<288x1024xbf16, #tpu.memory_space<vmem>>, vector<32x256xbf16>,
    %c0_150 = arith.constant 0 : index
    %c129_151 = arith.constant 129 : index
    %156 = vector.load %arg13[%c0_150, %c129_151] : memref<64x1280xf32, #tpu.memory_space<vmem>>, vector<32x256xf32>
    %c1_152 = arith.constant 1 : index
    %c0_153 = arith.constant 0 : index
    %157 = vector.load %arg9[%c1_152, %c0_153] : memref<2x256xf32, #tpu.memory_space<vmem>>, vector<1x256xf32>
    %158 = vector.broadcast %157 : vector<1x256xf32> to vector<32x256xf32>
    %159 = arith.mulf %156, %158 : vector<32x256xf32>
    %160 = arith.truncf %159 : vector<32x256xf32> to vector<32x256xbf16>
    %c160_154 = arith.constant 160 : index
    %c0_155 = arith.constant 0 : index
    %161 = vector.load %arg14[%c160_154, %c0_155] : memref<288x1024xbf16, #tpu.memory_space<vmem>>, vector<32x256xbf16>
    tpu.vector_store %arg14[%c160_154, %c0_155], %160 {strides = array<i32>} : memref<288x1024xbf16, #tpu.memory_space<vmem>>, vector<32x256xbf16>,
    %c0_156 = arith.constant 0 : index
    %c143 = arith.constant 143 : index
    %162 = vector.load %arg13[%c0_156, %c143] : memref<64x1280xf32, #tpu.memory_space<vmem>>, vector<32x256xf32>
    %c0_157 = arith.constant 0 : index
    %c0_158 = arith.constant 0 : index
    %163 = vector.load %arg9[%c0_157, %c0_158] : memref<2x256xf32, #tpu.memory_space<vmem>>, vector<1x256xf32>
    %164 = vector.broadcast %163 : vector<1x256xf32> to vector<32x256xf32>
    %165 = arith.mulf %162, %164 : vector<32x256xf32>
    %166 = arith.truncf %165 : vector<32x256xf32> to vector<32x256xbf16>
    %c192 = arith.constant 192 : index
    %c0_159 = arith.constant 0 : index
    %167 = vector.load %arg14[%c192, %c0_159] : memref<288x1024xbf16, #tpu.memory_space<vmem>>, vector<32x256xbf16>
    tpu.vector_store %arg14[%c192, %c0_159], %166 {strides = array<i32>} : memref<288x1024xbf16, #tpu.memory_space<vmem>>, vector<32x256xbf16>,
    %c0_160 = arith.constant 0 : index
    %c144 = arith.constant 144 : index
    %168 = vector.load %arg13[%c0_160, %c144] : memref<64x1280xf32, #tpu.memory_space<vmem>>, vector<32x256xf32>
    %169 = arith.truncf %168 : vector<32x256xf32> to vector<32x256xbf16>
    %c224 = arith.constant 224 : index
    %c0_161 = arith.constant 0 : index
    %170 = vector.load %arg14[%c224, %c0_161] : memref<288x1024xbf16, #tpu.memory_space<vmem>>, vector<32x256xbf16>
    tpu.vector_store %arg14[%c224, %c0_161], %169 {strides = array<i32>} : memref<288x1024xbf16, #tpu.memory_space<vmem>>, vector<32x256xbf16>,
    %c0_162 = arith.constant 0 : index
    %c145 = arith.constant 145 : index
    %171 = vector.load %arg13[%c0_162, %c145] : memref<64x1280xf32, #tpu.memory_space<vmem>>, vector<32x256xf32>
    %c1_163 = arith.constant 1 : index
    %c0_164 = arith.constant 0 : index
    %172 = vector.load %arg9[%c1_163, %c0_164] : memref<2x256xf32, #tpu.memory_space<vmem>>, vector<1x256xf32>
    %173 = vector.broadcast %172 : vector<1x256xf32> to vector<32x256xf32>
    %174 = arith.mulf %171, %173 : vector<32x256xf32>
    %175 = arith.truncf %174 : vector<32x256xf32> to vector<32x256xbf16>
    %c256 = arith.constant 256 : index
    %c0_165 = arith.constant 0 : index
    %176 = vector.load %arg14[%c256, %c0_165] : memref<288x1024xbf16, #tpu.memory_space<vmem>>, vector<32x256xbf16>
    tpu.vector_store %arg14[%c256, %c0_165], %175 {strides = array<i32>} : memref<288x1024xbf16, #tpu.memory_space<vmem>>, vector<32x256xbf16>,
    %c0_166 = arith.constant 0 : index
    %c0_167 = arith.constant 0 : index
    %177 = vector.load %arg6[%c0_166, %c0_167] : memref<64x288xbf16, #tpu.memory_space<vmem>>, vector<64x288xbf16>
    %c0_168 = arith.constant 0 : index
    %c0_169 = arith.constant 0 : index
    %178 = vector.load %arg14[%c0_168, %c0_169] : memref<288x1024xbf16, #tpu.memory_space<vmem>>, vector<288x256xbf16>
    %cst_170 = arith.constant dense<0.000000e+00> : vector<64x256xf32>
    %179 = tpu.matmul %177, %178, %cst_170 {dimension_numbers = #tpu.dot_dimension_numbers<[1], [0], [0], [1], [0, 0, 1, 1], [], []>} : vector<64x288xbf16>, vector<288x256xbf16>, vector<64x256xf32> -> vector<64x256xf32>
    %c0_171 = arith.constant 0 : index
    %c0_172 = arith.constant 0 : index
    %180 = vector.load %arg7[%c0_171, %c0_172] : memref<64x1xf32, #tpu.memory_space<vmem>>, vector<64x1xf32>
    %181 = vector.broadcast %180 : vector<64x1xf32> to vector<64x256xf32>
    %182 = arith.addf %179, %181 : vector<64x256xf32>
    %cst_173 = arith.constant 0.000000e+00 : f32
    %183 = vector.broadcast %cst_173 : f32 to vector<64x256xf32>
    %184 = arith.maximumf %182, %183 : vector<64x256xf32>
    %cst_174 = arith.constant 0.000000e+00 : f32
    %185 = vector.broadcast %cst_174 : f32 to vector<64x128xf32>
    %c0_175 = arith.constant 0 : index
    %c384_176 = arith.constant 384 : index
    %186 = vector.load %arg13[%c0_175, %c384_176] : memref<64x1280xf32, #tpu.memory_space<vmem>>, vector<64x128xf32>
    tpu.vector_store %arg13[%c0_175, %c384_176], %185 {strides = array<i32>} : memref<64x1280xf32, #tpu.memory_space<vmem>>, vector<64x128xf32>,
    %c0_177 = arith.constant 0 : index
    %c128_178 = arith.constant 128 : index
    %187 = vector.load %arg13[%c0_177, %c128_178] : memref<64x1280xf32, #tpu.memory_space<vmem>>, vector<64x256xf32>
    tpu.vector_store %arg13[%c0_177, %c128_178], %184 {strides = array<i32>} : memref<64x1280xf32, #tpu.memory_space<vmem>>, vector<64x256xf32>,
    %c0_179 = arith.constant 0 : index
    %c129_180 = arith.constant 129 : index
    %188 = vector.load %arg13[%c0_179, %c129_180] : memref<64x1280xf32, #tpu.memory_space<vmem>>, vector<64x256xf32>
    %189 = arith.maximumf %184, %188 : vector<64x256xf32>
    %c0_181 = arith.constant 0 : index
    %c144_182 = arith.constant 144 : index
    %190 = vector.load %arg13[%c0_181, %c144_182] : memref<64x1280xf32, #tpu.memory_space<vmem>>, vector<64x256xf32>
    %191 = arith.maximumf %189, %190 : vector<64x256xf32>
    %c0_183 = arith.constant 0 : index
    %c145_184 = arith.constant 145 : index
    %192 = vector.load %arg13[%c0_183, %c145_184] : memref<64x1280xf32, #tpu.memory_space<vmem>>, vector<64x256xf32>
    %193 = arith.maximumf %191, %192 : vector<64x256xf32>
    %194 = arith.truncf %193 : vector<64x256xf32> to vector<64x256xbf16>
    %c0_185 = arith.constant 0 : index
    %c0_186 = arith.constant 0 : index
    %195 = vector.load %arg11[%c0_185, %c0_186] : memref<256x64xbf16, #tpu.memory_space<vmem>>, vector<256x64xbf16>
    %cst_187 = arith.constant dense<0.000000e+00> : vector<64x64xf32>
    %196 = tpu.matmul %194, %195, %cst_187 {dimension_numbers = #tpu.dot_dimension_numbers<[1], [0], [0], [1], [0, 0, 1, 1], [], []>} : vector<64x256xbf16>, vector<256x64xbf16>, vector<64x64xf32> -> vector<64x64xf32>
    %c0_188 = arith.constant 0 : index
    %c0_189 = arith.constant 0 : index
    %c0_190 = arith.constant 0 : index
    %197 = vector.load %arg12[%c0_188, %c0_189, %c0_190] : memref<1x64x64xf32, #tpu.memory_space<vmem>>, vector<1x64x64xf32>
    %198 = vector.shape_cast %197 : vector<1x64x64xf32> to vector<64x64xf32>
    %199 = vector.shape_cast %196 : vector<64x64xf32> to vector<1x64x64xf32>
    tpu.vector_store %arg12[%c0_188, %c0_189, %c0_190], %199 {strides = array<i32>} : memref<1x64x64xf32, #tpu.memory_space<vmem>>, vector<1x64x64xf32>,
    return
  }
  func.func @transform_0(%arg0: i32) -> (i32, i32, i32) {
    %c0_i32 = arith.constant 0 : i32
    %c0_i32_0 = arith.constant 0 : i32
    %c0_i32_1 = arith.constant 0 : i32
    return %arg0, %c0_i32, %c0_i32_0 : i32, i32, i32
  }
  func.func @transform_1(%arg0: i32) -> (i32, i32) {
    %c0_i32 = arith.constant 0 : i32
    %c0_i32_0 = arith.constant 0 : i32
    %c0_i32_1 = arith.constant 0 : i32
    return %c0_i32, %c0_i32_0 : i32, i32
  }
  func.func @transform_2(%arg0: i32) -> (i32, i32) {
    %c0_i32 = arith.constant 0 : i32
    %c0_i32_0 = arith.constant 0 : i32
    %c0_i32_1 = arith.constant 0 : i32
    return %c0_i32, %c0_i32_0 : i32, i32
  }
  func.func @transform_3(%arg0: i32) -> (i32, i32) {
    %c0_i32 = arith.constant 0 : i32
    %c0_i32_0 = arith.constant 0 : i32
    %c0_i32_1 = arith.constant 0 : i32
    return %c0_i32, %c0_i32_0 : i32, i32
  }
  func.func @transform_4(%arg0: i32) -> (i32, i32) {
    %c0_i32 = arith.constant 0 : i32
    %c0_i32_0 = arith.constant 0 : i32
    %c0_i32_1 = arith.constant 0 : i32
    return %c0_i32, %c0_i32_0 : i32, i32
  }
  func.func @transform_5(%arg0: i32) -> (i32, i32) {
    %c0_i32 = arith.constant 0 : i32
    %c0_i32_0 = arith.constant 0 : i32
    %c0_i32_1 = arith.constant 0 : i32
    return %c0_i32, %c0_i32_0 : i32, i32
  }
  func.func @transform_6(%arg0: i32) -> (i32, i32) {
    %c0_i32 = arith.constant 0 : i32
    %c0_i32_0 = arith.constant 0 : i32
    %c0_i32_1 = arith.constant 0 : i32
    return %c0_i32, %c0_i32_0 : i32, i32
  }
  func.func @transform_7(%arg0: i32) -> (i32, i32) {
    %c0_i32 = arith.constant 0 : i32
    %c0_i32_0 = arith.constant 0 : i32
    %c0_i32_1 = arith.constant 0 : i32
    return %c0_i32, %c0_i32_0 : i32, i32
  }
  func.func @transform_8(%arg0: i32) -> (i32, i32) {
    %c0_i32 = arith.constant 0 : i32
    %c0_i32_0 = arith.constant 0 : i32
    %c0_i32_1 = arith.constant 0 : i32
    return %c0_i32, %c0_i32_0 : i32, i32
  }
  func.func @transform_9(%arg0: i32) -> (i32, i32) {
    %c0_i32 = arith.constant 0 : i32
    %c0_i32_0 = arith.constant 0 : i32
    %c0_i32_1 = arith.constant 0 : i32
    return %c0_i32, %c0_i32_0 : i32, i32
  }
  func.func @transform_10(%arg0: i32) -> (i32, i32) {
    %c0_i32 = arith.constant 0 : i32
    %c0_i32_0 = arith.constant 0 : i32
    %c0_i32_1 = arith.constant 0 : i32
    return %c0_i32, %c0_i32_0 : i32, i32
  }
  func.func @transform_11(%arg0: i32) -> (i32, i32, i32) {
    %c0_i32 = arith.constant 0 : i32
    %c0_i32_0 = arith.constant 0 : i32
    %c0_i32_1 = arith.constant 0 : i32
    return %arg0, %c0_i32, %c0_i32_0 : i32, i32, i32
  }
}

</mosaic_0001>

<bundles_post_ra>
// kernel: deep_cnn_forward.3
= control target key start
LH: loop header
LB: loop body
LE: loop exit
PB: predicated region body
PF: predicated region fallthrough
CT: control target
= control target key end

     0   :  { %v42_v28 = vlaneseq  ;;  %v4007_v36 = vmov 1983009808   ;;  %s4887_s0 = inlined_call_operand.vmem [shape: f32[2,4096], index: 0, kind: input, shape index: {}]   ;;  %s4888_s1 = inlined_call_operand.vmem [shape: bf16[4096,128], index: 1, kind: input, shape index: {}]   ;;  %s4889_s2 = inlined_call_operand.vmem [shape: f32[1,128], index: 2, kind: input, shape index: {}]   ;;  %s4890_s3 = inlined_call_operand.vmem [shape: bf16[128,10], index: 3, kind: input, shape index: {}]   ;;  %s4891_s4 = inlined_call_operand.vmem [shape: f32[1,10], index: 4, kind: input, shape index: {}]   ;;  %s4892_s5 = inlined_call_operand.hbm [shape: f32[2,10], index: 5, kind: output, shape index: {}]  }
   0x1   :  { %v3713_v0 = vld [vmem:[%s4888_s1 + $0x78] sm:$0xff]   ;;  %v3717_v4 = vld [vmem:[%s4888_s1 + $0x70] sm:$0xff]   ;;  %v3721_v8 = vld [vmem:[%s4888_s1 + $0x68] sm:$0xff]   ;;  %v40_v37 = vunpack.c.l.s4 %v4007_v36 }
   0x2   :  { %v3714_v1 = vld [vmem:[%s4888_s1 + $0xf8] sm:$0xff]   ;;  %3328 = vmatprep.subr.bf16.mxu0 %v3713_v0  ;;  %v3718_v5 = vld [vmem:[%s4888_s1 + $0xf0] sm:$0xff]   ;;  %v3722_v9 = vld [vmem:[%s4888_s1 + $0xe8] sm:$0xff]   ;;  %v43_v33 = vshrl.u32 %v42_v28, 7 }
   0x3   :  { %v3715_v2 = vld [vmem:[%s4888_s1 + $0x38] sm:$0xff]   ;;  %3350 = vmatprep.subr.bf16.mxu1 %v3714_v1  ;;  %v3719_v6 = vld [vmem:[%s4888_s1 + $0x30] sm:$0xff]   ;;  %v3723_v10 = vld [vmem:[%s4888_s1 + $0x28] sm:$0xff]   ;;  %v41_v39 = vunpack.c.0.s8 %v40_v37 }
   0x4   :  { %v3716_v3 = vld [vmem:[%s4888_s1 + $0xb8] sm:$0xff]   ;;  %3329 = vmatpush3.bf16.msra.mxu0 %v3715_v2  ;;  %v3720_v7 = vld [vmem:[%s4888_s1 + $0xb0] sm:$0xff]   ;;  %v3724_v11 = vld [vmem:[%s4888_s1 + $0xa8] sm:$0xff]  }
   0x5   :  { %3351 = vmatpush3.bf16.msra.mxu1 %v3716_v3  ;;  %3330 = vmatprep.subr.bf16.mxu0 %v3717_v4  ;;  %v3725_v12 = vld [vmem:[%s4888_s1 + $0x60] sm:$0xff]   ;;  %v3729_v16 = vld [vmem:[%s4888_s1 + $0x58] sm:$0xff]   ;;  %v3733_v20 = vld [vmem:[%s4888_s1 + $0x50] sm:$0xff]   ;;  %v4146_v41 = vsub.s32 %v41_v39, %v43_v33 }
   0x6   :  { %3352 = vmatprep.subr.bf16.mxu1 %v3718_v5  ;;  %v3726_v13 = vld [vmem:[%s4888_s1 + $0xe0] sm:$0xff]   ;;  %v3730_v17 = vld [vmem:[%s4888_s1 + $0xd8] sm:$0xff]   ;;  %v3734_v21 = vld [vmem:[%s4888_s1 + $0xd0] sm:$0xff]  }
   0x7   :  { %v3727_v14 = vld [vmem:[%s4888_s1 + $0x20] sm:$0xff]   ;;  %v3731_v18 = vld [vmem:[%s4888_s1 + $0x18] sm:$0xff]   ;;  %v3735_v22 = vld [vmem:[%s4888_s1 + $0x10] sm:$0xff]  }
   0x8   :  { %3331 = vmatpush3.bf16.msra.mxu0 %v3719_v6  ;;  %v3728_v15 = vld [vmem:[%s4888_s1 + $0xa0] sm:$0xff]   ;;  %v3732_v19 = vld [vmem:[%s4888_s1 + $0x98] sm:$0xff]   ;;  %v3736_v23 = vld [vmem:[%s4888_s1 + $0x90] sm:$0xff]  }
   0x9   :  { %3353 = vmatpush3.bf16.msra.mxu1 %v3720_v7  ;;  %3332 = vmatprep.subr.bf16.mxu0 %v3721_v8  ;;  %v3737_v24 = vld [vmem:[%s4888_s1 + $0x48] sm:$0xff]   ;;  %v3741_v29 = vld [vmem:[%s4888_s1 + $0x40] sm:$0xff]   ;;  %v3746_v35 = vld [vmem:[%s4888_s1 + $0x178] sm:$0xff]  }
   0xa   :  { %3354 = vmatprep.subr.bf16.mxu1 %v3722_v9  ;;  %v3738_v25 = vld [vmem:[%s4888_s1 + $0xc8] sm:$0xff]   ;;  %v3742_v30 = vld [vmem:[%s4888_s1 + $0xc0] sm:$0xff]   ;;  %v3747_v38 = vld [vmem:[%s4888_s1 + $0x1f8] sm:$0xff]  }
   0xb   :  { %v3739_v26 = vld [vmem:[%s4888_s1 + $0x8] sm:$0xff]   ;;  %v3743_v31 = vld [vmem:[%s4888_s1] sm:$0xff]   ;;  %v3748_v46 = vld [vmem:[%s4888_s1 + $0x138] sm:$0xff]  }
   0xc   :  { %3333 = vmatpush3.bf16.msra.mxu0 %v3723_v10  ;;  %v3740_v27 = vld [vmem:[%s4888_s1 + $0x88] sm:$0xff]   ;;  %v3744_v32 = vld [vmem:[%s4888_s1 + $0x80] sm:$0xff]   ;;  %v3749_v49 = vld [vmem:[%s4888_s1 + $0x1b8] sm:$0xff]  }
   0xd   :  { %3355 = vmatpush3.bf16.msra.mxu1 %v3724_v11  ;;  %3334 = vmatprep.subr.bf16.mxu0 %v3725_v12  ;;  %v22_v34 = vld [vmem:[%s4887_s0] sm:$0xff]  ;;  %v3750_v52 = vld [vmem:[%s4888_s1 + $0x170] sm:$0xff]   ;;  %v3754_v56 = vld [vmem:[%s4888_s1 + $0x168] sm:$0xff]  }
   0xe   :  { %3356 = vmatprep.subr.bf16.mxu1 %v3726_v13  ;;  %v38_v40 = vcombine.high %v22_v34, %v22_v34  ;;  %v45_v42 = vrot.slane %v22_v34, %v4146_v41  ;;  %v3751_v53 = vld [vmem:[%s4888_s1 + $0x1f0] sm:$0xff]   ;;  %v3755_v57 = vld [vmem:[%s4888_s1 + $0x1e8] sm:$0xff]   ;;  %v3758_v60 = vld [vmem:[%s4888_s1 + $0x160] sm:$0xff]  }
   0xf   :  { %v3752_v54 = vld [vmem:[%s4888_s1 + $0x130] sm:$0xff]   ;;  %v3756_v58 = vld [vmem:[%s4888_s1 + $0x128] sm:$0xff]   ;;  %v3759_v61 = vld [vmem:[%s4888_s1 + $0x1e0] sm:$0xff]  }
  0x10   :  { %3335 = vmatpush3.bf16.msra.mxu0 %v3727_v14  ;;  %v52_v43 = vrot.slane %v38_v40, %v4146_v41  ;;  %v53_v44 = vcombine.high %v45_v42, %v45_v42  ;;  %v206_v47 = vpack.c.bf16 %v45_v42, %v45_v42  ;;  %v3753_v55 = vld [vmem:[%s4888_s1 + $0x1b0] sm:$0xff]   ;;  %v3757_v59 = vld [vmem:[%s4888_s1 + $0x1a8] sm:$0xff]   ;;  %v3760_v62 = vld [vmem:[%s4888_s1 + $0x120] sm:$0xff]  }
  0x11   :  { %3357 = vmatpush3.bf16.msra.mxu1 %v3728_v15  ;;  %3336 = vmatprep.subr.bf16.mxu0 %v3729_v16  ;;  %v3761_v63 = vld [vmem:[%s4888_s1 + $0x1a0] sm:$0xff]   ;;  %v3762_v0 = vld [vmem:[%s4888_s1 + $0x158] sm:$0xff]   ;;  %v3766_v4 = vld [vmem:[%s4888_s1 + $0x150] sm:$0xff]  }
  0x12   :  { %3358 = vmatprep.subr.bf16.mxu1 %v3730_v17  ;;  %v54_v45 = vcombine.high %v52_v43, %v52_v43  ;;  %v208_v48 = vpack.c.bf16 %v52_v43, %v52_v43  ;;  %v207_v50 = vpack.c.bf16 %v53_v44, %v53_v44  ;;  %v3763_v1 = vld [vmem:[%s4888_s1 + $0x1d8] sm:$0xff]   ;;  %v3767_v5 = vld [vmem:[%s4888_s1 + $0x1d0] sm:$0xff]   ;;  %v3770_v8 = vld [vmem:[%s4888_s1 + $0x148] sm:$0xff]  }
  0x13   :  { %v3764_v2 = vld [vmem:[%s4888_s1 + $0x118] sm:$0xff]   ;;  %v3768_v6 = vld [vmem:[%s4888_s1 + $0x110] sm:$0xff]   ;;  %v3771_v9 = vld [vmem:[%s4888_s1 + $0x1c8] sm:$0xff]  }
  0x14   :  { %3337 = vmatpush3.bf16.msra.mxu0 %v3731_v18  ;;  %v209_v51 = vpack.c.bf16 %v54_v45, %v54_v45  ;;  %2325 = vmatprep.mubr.bf16.mxu0 %v207_v50  ;;  %v3765_v3 = vld [vmem:[%s4888_s1 + $0x198] sm:$0xff]   ;;  %v3769_v7 = vld [vmem:[%s4888_s1 + $0x190] sm:$0xff]   ;;  %v23_v10 = vld [vmem:[%s4887_s0 + $0x8] sm:$0xff] }
  0x15   :  { %3359 = vmatpush3.bf16.msra.mxu1 %v3732_v19  ;;  %3338 = vmatprep.subr.bf16.mxu0 %v3733_v20  ;;  %v3772_v11 = vld [vmem:[%s4888_s1 + $0x108] sm:$0xff]   ;;  %v62_v12 = vrot.slane %v23_v10, %v4146_v41  ;;  %v55_v13 = vcombine.high %v23_v10, %v23_v10  ;;  %v3774_v15 = vld [vmem:[%s4888_s1 + $0x140] sm:$0xff]   ;;  %v3786_v33 = vld [vmem:[%s4888_s1 + $0x2b0] sm:$0xff]  }
  0x16   :  { %3360 = vmatprep.subr.bf16.mxu1 %v3734_v21  ;;  %2365 = vmatprep.mubr.bf16.mxu1 %v209_v51  ;;  %v3773_v14 = vld [vmem:[%s4888_s1 + $0x188] sm:$0xff]   ;;  %v3775_v18 = vld [vmem:[%s4888_s1 + $0x1c0] sm:$0xff]   ;;  %v3795_v43 = vld [vmem:[%s4888_s1 + $0x258] sm:$0xff]  }
  0x17   :  { %v70_v16 = vcombine.high %v62_v12, %v62_v12  ;;  %v69_v17 = vrot.slane %v55_v13, %v4146_v41  ;;  %v3776_v19 = vld [vmem:[%s4888_s1 + $0x100] sm:$0xff]   ;;  %v3787_v34 = vld [vmem:[%s4888_s1 + $0x268] sm:$0xff]   ;;  %v3796_v44 = vld [vmem:[%s4888_s1 + $0x2d8] sm:$0xff]  }
  0x18   :  { %3339 = vmatpush3.bf16.msra.mxu0 %v3735_v22  ;;  %v3777_v22 = vld [vmem:[%s4888_s1 + $0x180] sm:$0xff]   ;;  %v3789_v36 = vld [vmem:[%s4888_s1 + $0x228] sm:$0xff]   ;;  %v3797_v45 = vld [vmem:[%s4888_s1 + $0x218] sm:$0xff]  }
  0x19   :  { %3361 = vmatpush3.bf16.msra.mxu1 %v3736_v23  ;;  %3340 = vmatprep.subr.bf16.mxu0 %v3737_v24  ;;  %v211_v20 = vpack.c.bf16 %v70_v16, %v70_v16  ;;  %v71_v21 = vcombine.high %v69_v17, %v69_v17  ;;  %v3779_v24 = vld [vmem:[%s4888_s1 + $0x278] sm:$0xff]   ;;  %v212_v28 = vpack.c.bf16 %v69_v17, %v69_v17  ;;  %v3790_v37 = vld [vmem:[%s4888_s1 + $0x2a8] sm:$0xff]   ;;  %v3792_v39 = vld [vmem:[%s4888_s1 + $0x2e0] sm:$0xff]  }
  0x1a   :  { %3362 = vmatprep.subr.bf16.mxu1 %v3738_v25  ;;  %v3780_v25 = vld [vmem:[%s4888_s1 + $0x2f8] sm:$0xff]   ;;  %v3793_v40 = vld [vmem:[%s4888_s1 + $0x220] sm:$0xff]   ;;  %v3802_v50 = vld [vmem:[%s4888_s1 + $0x290] sm:$0xff]  }
  0x1b   :  { %v213_v23 = vpack.c.bf16 %v71_v21, %v71_v21  ;;  %v3794_v42 = vld [vmem:[%s4888_s1 + $0x2a0] sm:$0xff]   ;;  %v3803_v51 = vld [vmem:[%s4888_s1 + $0x248] sm:$0xff]   ;;  %v3817_v10 = vld [vmem:[%s4888_s1 + $0x3f0] sm:$0xff]  }
  0x1c   :  { %3341 = vmatpush3.bf16.msra.mxu0 %v3739_v26  ;;  %v3781_v26 = vld [vmem:[%s4888_s1 + $0x238] sm:$0xff]   ;;  %v3820_v13 = vld [vmem:[%s4888_s1 + $0x368] sm:$0xff]   ;;  %v3824_v17 = vld [vmem:[%s4888_s1 + $0x360] sm:$0xff]  }
  0x1d   :  { %3363 = vmatpush3.bf16.msra.mxu1 %v3740_v27  ;;  %3342 = vmatprep.subr.bf16.mxu0 %v3741_v29  ;;  %v210_v27 = vpack.c.bf16 %v62_v12, %v62_v12  ;;  %v3782_v29 = vld [vmem:[%s4888_s1 + $0x2b8] sm:$0xff]   ;;  %v3819_v12 = vld [vmem:[%s4888_s1 + $0x3b0] sm:$0xff]   ;;  %v3823_v16 = vld [vmem:[%s4888_s1 + $0x3a8] sm:$0xff]  }
  0x1e   :  { %3364 = vmatprep.subr.bf16.mxu1 %v3742_v30  ;;  %v3783_v30 = vld [vmem:[%s4888_s1 + $0x270] sm:$0xff]   ;;  %v3828_v21 = vld [vmem:[%s4888_s1 + $0x358] sm:$0xff]  }
  0x20   :  { %3343 = vmatpush3.bf16.msra.mxu0 %v3743_v31  ;;  %v3784_v31 = vld [vmem:[%s4888_s1 + $0x2f0] sm:$0xff]  }
  0x21   :  { %3365 = vmatpush3.bf16.msra.mxu1 %v3744_v32  ;;  %3372 = vmatprep.subr.bf16.mxu0 %v3746_v35  ;;  %v3785_v32 = vld [vmem:[%s4888_s1 + $0x230] sm:$0xff]   ;;  %v3788_v35 = vld [vmem:[%s4888_s1 + $0x2e8] sm:$0xff]  }
  0x22   :  { %3394 = vmatprep.subr.bf16.mxu1 %v3747_v38  ;;  %v3791_v38 = vld [vmem:[%s4888_s1 + $0x260] sm:$0xff]  }
  0x23   :  { %2326 = vmatmul.mubr.bf16.vlgmr.msra.gmra.mxu0 %v206_v47  ;;  %v3799_v47 = vld [vmem:[%s4888_s1 + $0x250] sm:$0xff]  }
  0x24   :  { %2366 = vmatmul.mubr.bf16.vlgmr.msra.gmra.mxu1 %v208_v48  ;;  %3373 = vmatpush3.bf16.msra.mxu0 %v3748_v46  ;;  %v3798_v46 = vld [vmem:[%s4888_s1 + $0x298] sm:$0xff]   ;;  %v3800_v48 = vld [vmem:[%s4888_s1 + $0x2d0] sm:$0xff]  }
  0x25   :  { %3395 = vmatpush3.bf16.msra.mxu1 %v3749_v49  ;;  %3374 = vmatprep.subr.bf16.mxu0 %v3750_v52  ;;  %v3801_v49 = vld [vmem:[%s4888_s1 + $0x210] sm:$0xff]   ;;  %v3804_v52 = vld [vmem:[%s4888_s1 + $0x2c8] sm:$0xff]  }
  0x26   :  { %3396 = vmatprep.subr.bf16.mxu1 %v3751_v53  ;;  %2405 = vmatprep.mubr.bf16.mxu0 %v211_v20  ;;  %v24_v53 = vld [vmem:[%s4887_s0 + $0x10] sm:$0xff]  ;;  %v3827_v20 = vld [vmem:[%s4888_s1 + $0x3a0] sm:$0xff]  }
  0x27   :  { %2445 = vmatprep.mubr.bf16.mxu1 %v213_v23  ;;  %v3830_v23 = vld [vmem:[%s4888_s1 + $0x318] sm:$0xff]  }
  0x28   :  { %3375 = vmatpush3.bf16.msra.mxu0 %v3752_v54  ;;  %v3805_v54 = vld [vmem:[%s4888_s1 + $0x208] sm:$0xff]  }
  0x29   :  { %3397 = vmatpush3.bf16.msra.mxu1 %v3753_v55  ;;  %3376 = vmatprep.subr.bf16.mxu0 %v3754_v56  ;;  %v79_v55 = vrot.slane %v24_v53, %v4146_v41  ;;  %v72_v56 = vcombine.high %v24_v53, %v24_v53  ;;  %v3850_v53 = vld [vmem:[%s4888_s1 + $0x4f0] sm:$0xff]  }
  0x2a   :  { %3398 = vmatprep.subr.bf16.mxu1 %v3755_v57  ;;  %v3806_v57 = vld [vmem:[%s4888_s1 + $0x288] sm:$0xff]  }
  0x2c   :  { %3377 = vmatpush3.bf16.msra.mxu0 %v3756_v58  ;;  %v3807_v58 = vld [vmem:[%s4888_s1 + $0x240] sm:$0xff]  }
  0x2d   :  { %3399 = vmatpush3.bf16.msra.mxu1 %v3757_v59  ;;  %3378 = vmatprep.subr.bf16.mxu0 %v3758_v60  ;;  %v87_v59 = vcombine.high %v79_v55, %v79_v55  ;;  %v86_v60 = vrot.slane %v72_v56, %v4146_v41  ;;  %v3853_v56 = vld [vmem:[%s4888_s1 + $0x468] sm:$0xff]  }
  0x2e   :  { %3400 = vmatprep.subr.bf16.mxu1 %v3759_v61  ;;  %v3808_v61 = vld [vmem:[%s4888_s1 + $0x2c0] sm:$0xff]  }
  0x30   :  { %3379 = vmatpush3.bf16.msra.mxu0 %v3760_v62  ;;  %v3809_v62 = vld [vmem:[%s4888_s1 + $0x200] sm:$0xff]  }
  0x31   :  { %3401 = vmatpush3.bf16.msra.mxu1 %v3761_v63  ;;  %3380 = vmatprep.subr.bf16.mxu0 %v3762_v0  ;;  %v215_v63 = vpack.c.bf16 %v87_v59, %v87_v59  ;;  %v88_v0 = vcombine.high %v86_v60, %v86_v60  ;;  %v3856_v59 = vld [vmem:[%s4888_s1 + $0x4a8] sm:$0xff]  }
  0x32   :  { %3402 = vmatprep.subr.bf16.mxu1 %v3763_v1  ;;  %v3810_v1 = vld [vmem:[%s4888_s1 + $0x280] sm:$0xff]  }
  0x34   :  { %3381 = vmatpush3.bf16.msra.mxu0 %v3764_v2  ;;  %v217_v2 = vpack.c.bf16 %v88_v0, %v88_v0  ;;  %v3861_v0 = vld [vmem:[%s4888_s1 + $0x458] sm:$0xff]  }
  0x35   :  { %3403 = vmatpush3.bf16.msra.mxu1 %v3765_v3  ;;  %3382 = vmatprep.subr.bf16.mxu0 %v3766_v4  ;;  %v3812_v3 = vld [vmem:[%s4888_s1 + $0x378] sm:$0xff]  }
  0x36   :  { %3404 = vmatprep.subr.bf16.mxu1 %v3767_v5  ;;  %v3813_v4 = vld [vmem:[%s4888_s1 + $0x3f8] sm:$0xff]  }
  0x37   :  { %v3814_v5 = vld [vmem:[%s4888_s1 + $0x338] sm:$0xff]  }
  0x38   :  { %3383 = vmatpush3.bf16.msra.mxu0 %v3768_v6  ;;  %v214_v6 = vpack.c.bf16 %v79_v55, %v79_v55  ;;  %v3852_v55 = vld [vmem:[%s4888_s1 + $0x4b0] sm:$0xff]  }
  0x39   :  { %3405 = vmatpush3.bf16.msra.mxu1 %v3769_v7  ;;  %3384 = vmatprep.subr.bf16.mxu0 %v3770_v8  ;;  %v216_v7 = vpack.c.bf16 %v86_v60, %v86_v60  ;;  %v3815_v8 = vld [vmem:[%s4888_s1 + $0x3b8] sm:$0xff]   ;;  %v3857_v60 = vld [vmem:[%s4888_s1 + $0x460] sm:$0xff]  }
  0x3a   :  { %3406 = vmatprep.subr.bf16.mxu1 %v3771_v9  ;;  %v3816_v9 = vld [vmem:[%s4888_s1 + $0x370] sm:$0xff]  }
  0x3c   :  { %3385 = vmatpush3.bf16.msra.mxu0 %v3772_v11  ;;  %v3818_v11 = vld [vmem:[%s4888_s1 + $0x330] sm:$0xff]  }
  0x3d   :  { %3407 = vmatpush3.bf16.msra.mxu1 %v3773_v14  ;;  %3386 = vmatprep.subr.bf16.mxu0 %v3774_v15  ;;  %v3821_v14 = vld [vmem:[%s4888_s1 + $0x3e8] sm:$0xff]  }
  0x3e   :  { %3408 = vmatprep.subr.bf16.mxu1 %v3775_v18  ;;  %v3822_v15 = vld [vmem:[%s4888_s1 + $0x328] sm:$0xff]   ;;  %v3825_v18 = vld [vmem:[%s4888_s1 + $0x3e0] sm:$0xff]  }
  0x40   :  { %3387 = vmatpush3.bf16.msra.mxu0 %v3776_v19  ;;  %v3826_v19 = vld [vmem:[%s4888_s1 + $0x320] sm:$0xff]  }
  0x41   :  { %3409 = vmatpush3.bf16.msra.mxu1 %v3777_v22  ;;  %3416 = vmatprep.subr.bf16.mxu0 %v3779_v24  ;;  %v3829_v22 = vld [vmem:[%s4888_s1 + $0x3d8] sm:$0xff]  }
  0x42   :  { %3438 = vmatprep.subr.bf16.mxu1 %v3780_v25  ;;  %v3831_v24 = vld [vmem:[%s4888_s1 + $0x398] sm:$0xff]   ;;  %v3832_v25 = vld [vmem:[%s4888_s1 + $0x350] sm:$0xff]  }
  0x43   :  { %2406 = vmatmul.mubr.bf16.vlgmr.msra.gmra.mxu0 %v210_v27  ;;  %v3834_v27 = vld [vmem:[%s4888_s1 + $0x310] sm:$0xff]  }
  0x44   :  { %2446 = vmatmul.mubr.bf16.vlgmr.msra.gmra.mxu1 %v212_v28  ;;  %3417 = vmatpush3.bf16.msra.mxu0 %v3781_v26  ;;  %v3833_v26 = vld [vmem:[%s4888_s1 + $0x3d0] sm:$0xff]  }
  0x45   :  { %3439 = vmatpush3.bf16.msra.mxu1 %v3782_v29  ;;  %3418 = vmatprep.subr.bf16.mxu0 %v3783_v30  ;;  %v3835_v28 = vld [vmem:[%s4888_s1 + $0x390] sm:$0xff]   ;;  %v3836_v29 = vld [vmem:[%s4888_s1 + $0x348] sm:$0xff]  }
  0x46   :  { %3440 = vmatprep.subr.bf16.mxu1 %v3784_v31  ;;  %2485 = vmatprep.mubr.bf16.mxu0 %v215_v63  ;;  %v3837_v30 = vld [vmem:[%s4888_s1 + $0x3c8] sm:$0xff]   ;;  %v3860_v63 = vld [vmem:[%s4888_s1 + $0x4a0] sm:$0xff]  }
  0x47   :  { %2525 = vmatprep.mubr.bf16.mxu1 %v217_v2  ;;  %v3838_v31 = vld [vmem:[%s4888_s1 + $0x308] sm:$0xff]   ;;  %v3863_v2 = vld [vmem:[%s4888_s1 + $0x418] sm:$0xff]  }
  0x48   :  { %3419 = vmatpush3.bf16.msra.mxu0 %v3785_v32  ;;  %v25_v32 = vld [vmem:[%s4887_s0 + $0x18] sm:$0xff] }
  0x49   :  { %3441 = vmatpush3.bf16.msra.mxu1 %v3786_v33  ;;  %3420 = vmatprep.subr.bf16.mxu0 %v3787_v34  ;;  %v3839_v33 = vld [vmem:[%s4888_s1 + $0x388] sm:$0xff]   ;;  %v96_v34 = vrot.slane %v25_v32, %v4146_v41 }
  0x4a   :  { %3442 = vmatprep.subr.bf16.mxu1 %v3788_v35  ;;  %v89_v35 = vcombine.high %v25_v32, %v25_v32  ;;  %v3884_v32 = vld [vmem:[%s4888_s1 + $0x530] sm:$0xff]  }
  0x4c   :  { %3421 = vmatpush3.bf16.msra.mxu0 %v3789_v36  ;;  %v3840_v36 = vld [vmem:[%s4888_s1 + $0x340] sm:$0xff]  }
  0x4d   :  { %3443 = vmatpush3.bf16.msra.mxu1 %v3790_v37  ;;  %3422 = vmatprep.subr.bf16.mxu0 %v3791_v38  ;;  %v3841_v37 = vld [vmem:[%s4888_s1 + $0x3c0] sm:$0xff]   ;;  %v104_v38 = vcombine.high %v96_v34, %v96_v34 }
  0x4e   :  { %3444 = vmatprep.subr.bf16.mxu1 %v3792_v39  ;;  %v103_v39 = vrot.slane %v89_v35, %v4146_v41  ;;  %v3887_v35 = vld [vmem:[%s4888_s1 + $0x5e8] sm:$0xff]  }
  0x50   :  { %3423 = vmatpush3.bf16.msra.mxu0 %v3793_v40  ;;  %v3842_v40 = vld [vmem:[%s4888_s1 + $0x300] sm:$0xff]  }
  0x51   :  { %3445 = vmatpush3.bf16.msra.mxu1 %v3794_v42  ;;  %3424 = vmatprep.subr.bf16.mxu0 %v3795_v43  ;;  %v3843_v42 = vld [vmem:[%s4888_s1 + $0x380] sm:$0xff]   ;;  %v219_v43 = vpack.c.bf16 %v104_v38, %v104_v38 }
  0x52   :  { %3446 = vmatprep.subr.bf16.mxu1 %v3796_v44  ;;  %v105_v44 = vcombine.high %v103_v39, %v103_v39  ;;  %v3890_v38 = vld [vmem:[%s4888_s1 + $0x560] sm:$0xff]  }
  0x54   :  { %3425 = vmatpush3.bf16.msra.mxu0 %v3797_v45  ;;  %v3845_v45 = vld [vmem:[%s4888_s1 + $0x478] sm:$0xff]  }
  0x55   :  { %3447 = vmatpush3.bf16.msra.mxu1 %v3798_v46  ;;  %3426 = vmatprep.subr.bf16.mxu0 %v3799_v47  ;;  %v221_v46 = vpack.c.bf16 %v105_v44, %v105_v44  ;;  %v3846_v47 = vld [vmem:[%s4888_s1 + $0x4f8] sm:$0xff]  }
  0x56   :  { %3448 = vmatprep.subr.bf16.mxu1 %v3800_v48  ;;  %v3847_v48 = vld [vmem:[%s4888_s1 + $0x438] sm:$0xff]  }
  0x57   :  { %v3895_v44 = vld [vmem:[%s4888_s1 + $0x5d8] sm:$0xff]  }
  0x58   :  { %3427 = vmatpush3.bf16.msra.mxu0 %v3801_v49  ;;  %v218_v49 = vpack.c.bf16 %v96_v34, %v96_v34  ;;  %v3886_v34 = vld [vmem:[%s4888_s1 + $0x568] sm:$0xff]  }
  0x59   :  { %3449 = vmatpush3.bf16.msra.mxu1 %v3802_v50  ;;  %3428 = vmatprep.subr.bf16.mxu0 %v3803_v51  ;;  %v220_v50 = vpack.c.bf16 %v103_v39, %v103_v39  ;;  %v3848_v51 = vld [vmem:[%s4888_s1 + $0x4b8] sm:$0xff]   ;;  %v3891_v39 = vld [vmem:[%s4888_s1 + $0x5e0] sm:$0xff]  }
  0x5a   :  { %3450 = vmatprep.subr.bf16.mxu1 %v3804_v52  ;;  %v3849_v52 = vld [vmem:[%s4888_s1 + $0x470] sm:$0xff]  }
  0x5c   :  { %3429 = vmatpush3.bf16.msra.mxu0 %v3805_v54  ;;  %v3851_v54 = vld [vmem:[%s4888_s1 + $0x430] sm:$0xff]  }
  0x5d   :  { %3451 = vmatpush3.bf16.msra.mxu1 %v3806_v57  ;;  %3430 = vmatprep.subr.bf16.mxu0 %v3807_v58  ;;  %v3854_v57 = vld [vmem:[%s4888_s1 + $0x4e8] sm:$0xff]  }
  0x5e   :  { %3452 = vmatprep.subr.bf16.mxu1 %v3808_v61  ;;  %v3855_v58 = vld [vmem:[%s4888_s1 + $0x428] sm:$0xff]   ;;  %v3858_v61 = vld [vmem:[%s4888_s1 + $0x4e0] sm:$0xff]  }
  0x60   :  { %3431 = vmatpush3.bf16.msra.mxu0 %v3809_v62  ;;  %v3859_v62 = vld [vmem:[%s4888_s1 + $0x420] sm:$0xff]  }
  0x61   :  { %3453 = vmatpush3.bf16.msra.mxu1 %v3810_v1  ;;  %3460 = vmatprep.subr.bf16.mxu0 %v3812_v3  ;;  %v3862_v1 = vld [vmem:[%s4888_s1 + $0x4d8] sm:$0xff]  }
  0x62   :  { %3482 = vmatprep.subr.bf16.mxu1 %v3813_v4  ;;  %v3864_v3 = vld [vmem:[%s4888_s1 + $0x498] sm:$0xff]   ;;  %v3865_v4 = vld [vmem:[%s4888_s1 + $0x450] sm:$0xff]  }
  0x63   :  { %2486 = vmatmul.mubr.bf16.vlgmr.msra.gmra.mxu0 %v214_v6  ;;  %v3867_v6 = vld [vmem:[%s4888_s1 + $0x410] sm:$0xff]  }
  0x64   :  { %2526 = vmatmul.mubr.bf16.vlgmr.msra.gmra.mxu1 %v216_v7  ;;  %3461 = vmatpush3.bf16.msra.mxu0 %v3814_v5  ;;  %v3866_v5 = vld [vmem:[%s4888_s1 + $0x4d0] sm:$0xff]  }
  0x65   :  { %3483 = vmatpush3.bf16.msra.mxu1 %v3815_v8  ;;  %3462 = vmatprep.subr.bf16.mxu0 %v3816_v9  ;;  %v3868_v7 = vld [vmem:[%s4888_s1 + $0x490] sm:$0xff]   ;;  %v3869_v8 = vld [vmem:[%s4888_s1 + $0x448] sm:$0xff]  }
  0x66   :  { %3484 = vmatprep.subr.bf16.mxu1 %v3817_v10  ;;  %2565 = vmatprep.mubr.bf16.mxu0 %v219_v43  ;;  %v3870_v9 = vld [vmem:[%s4888_s1 + $0x4c8] sm:$0xff]   ;;  %v3894_v43 = vld [vmem:[%s4888_s1 + $0x558] sm:$0xff]  }
  0x67   :  { %2605 = vmatprep.mubr.bf16.mxu1 %v221_v46  ;;  %v3871_v10 = vld [vmem:[%s4888_s1 + $0x408] sm:$0xff]   ;;  %v3897_v46 = vld [vmem:[%s4888_s1 + $0x598] sm:$0xff]  }
  0x68   :  { %3463 = vmatpush3.bf16.msra.mxu0 %v3818_v11  ;;  %v26_v11 = vld [vmem:[%s4887_s0 + $0x20] sm:$0xff] }
  0x69   :  { %3485 = vmatpush3.bf16.msra.mxu1 %v3819_v12  ;;  %3464 = vmatprep.subr.bf16.mxu0 %v3820_v13  ;;  %v3872_v12 = vld [vmem:[%s4888_s1 + $0x488] sm:$0xff]   ;;  %v113_v13 = vrot.slane %v26_v11, %v4146_v41 }
  0x6a   :  { %3486 = vmatprep.subr.bf16.mxu1 %v3821_v14  ;;  %v106_v14 = vcombine.high %v26_v11, %v26_v11  ;;  %v3917_v11 = vld [vmem:[%s4888_s1 + $0x630] sm:$0xff]  }
  0x6c   :  { %3465 = vmatpush3.bf16.msra.mxu0 %v3822_v15  ;;  %v3873_v15 = vld [vmem:[%s4888_s1 + $0x440] sm:$0xff]  }
  0x6d   :  { %3487 = vmatpush3.bf16.msra.mxu1 %v3823_v16  ;;  %3466 = vmatprep.subr.bf16.mxu0 %v3824_v17  ;;  %v3874_v16 = vld [vmem:[%s4888_s1 + $0x4c0] sm:$0xff]   ;;  %v121_v17 = vcombine.high %v113_v13, %v113_v13 }
  0x6e   :  { %3488 = vmatprep.subr.bf16.mxu1 %v3825_v18  ;;  %v120_v18 = vrot.slane %v106_v14, %v4146_v41  ;;  %v3920_v14 = vld [vmem:[%s4888_s1 + $0x6e8] sm:$0xff]  }
  0x70   :  { %3467 = vmatpush3.bf16.msra.mxu0 %v3826_v19  ;;  %v3875_v19 = vld [vmem:[%s4888_s1 + $0x400] sm:$0xff]  }
  0x71   :  { %3489 = vmatpush3.bf16.msra.mxu1 %v3827_v20  ;;  %3468 = vmatprep.subr.bf16.mxu0 %v3828_v21  ;;  %v3876_v20 = vld [vmem:[%s4888_s1 + $0x480] sm:$0xff]   ;;  %v223_v21 = vpack.c.bf16 %v121_v17, %v121_v17 }
  0x72   :  { %3490 = vmatprep.subr.bf16.mxu1 %v3829_v22  ;;  %v122_v22 = vcombine.high %v120_v18, %v120_v18  ;;  %v3923_v17 = vld [vmem:[%s4888_s1 + $0x660] sm:$0xff]  }
  0x74   :  { %3469 = vmatpush3.bf16.msra.mxu0 %v3830_v23  ;;  %v3878_v23 = vld [vmem:[%s4888_s1 + $0x578] sm:$0xff]  }
  0x75   :  { %3491 = vmatpush3.bf16.msra.mxu1 %v3831_v24  ;;  %3470 = vmatprep.subr.bf16.mxu0 %v3832_v25  ;;  %v225_v24 = vpack.c.bf16 %v122_v22, %v122_v22  ;;  %v3879_v25 = vld [vmem:[%s4888_s1 + $0x5f8] sm:$0xff]  }
  0x76   :  { %3492 = vmatprep.subr.bf16.mxu1 %v3833_v26  ;;  %v3880_v26 = vld [vmem:[%s4888_s1 + $0x538] sm:$0xff]  }
  0x77   :  { %v3928_v22 = vld [vmem:[%s4888_s1 + $0x6d8] sm:$0xff]  }
  0x78   :  { %3471 = vmatpush3.bf16.msra.mxu0 %v3834_v27  ;;  %v222_v27 = vpack.c.bf16 %v113_v13, %v113_v13  ;;  %v3919_v13 = vld [vmem:[%s4888_s1 + $0x668] sm:$0xff]  }
  0x79   :  { %3493 = vmatpush3.bf16.msra.mxu1 %v3835_v28  ;;  %3472 = vmatprep.subr.bf16.mxu0 %v3836_v29  ;;  %v224_v28 = vpack.c.bf16 %v120_v18, %v120_v18  ;;  %v3881_v29 = vld [vmem:[%s4888_s1 + $0x5b8] sm:$0xff]   ;;  %v3924_v18 = vld [vmem:[%s4888_s1 + $0x6e0] sm:$0xff]  }
  0x7a   :  { %3494 = vmatprep.subr.bf16.mxu1 %v3837_v30  ;;  %v3882_v30 = vld [vmem:[%s4888_s1 + $0x570] sm:$0xff]  }
  0x7c   :  { %3473 = vmatpush3.bf16.msra.mxu0 %v3838_v31  ;;  %v3883_v31 = vld [vmem:[%s4888_s1 + $0x5f0] sm:$0xff]  }
  0x7d   :  { %3495 = vmatpush3.bf16.msra.mxu1 %v3839_v33  ;;  %3474 = vmatprep.subr.bf16.mxu0 %v3840_v36  ;;  %v3885_v33 = vld [vmem:[%s4888_s1 + $0x5b0] sm:$0xff]   ;;  %v3888_v36 = vld [vmem:[%s4888_s1 + $0x528] sm:$0xff]  }
  0x7e   :  { %3496 = vmatprep.subr.bf16.mxu1 %v3841_v37  ;;  %v3889_v37 = vld [vmem:[%s4888_s1 + $0x5a8] sm:$0xff]  }
  0x80   :  { %3475 = vmatpush3.bf16.msra.mxu0 %v3842_v40  ;;  %v3892_v40 = vld [vmem:[%s4888_s1 + $0x520] sm:$0xff]  }
  0x81   :  { %3497 = vmatpush3.bf16.msra.mxu1 %v3843_v42  ;;  %3504 = vmatprep.subr.bf16.mxu0 %v3845_v45  ;;  %v3893_v42 = vld [vmem:[%s4888_s1 + $0x5a0] sm:$0xff]   ;;  %v3896_v45 = vld [vmem:[%s4888_s1 + $0x518] sm:$0xff]  }
  0x82   :  { %3526 = vmatprep.subr.bf16.mxu1 %v3846_v47  ;;  %v3898_v47 = vld [vmem:[%s4888_s1 + $0x550] sm:$0xff]  }
  0x83   :  { %2566 = vmatmul.mubr.bf16.vlgmr.msra.gmra.mxu0 %v218_v49  ;;  %v3900_v49 = vld [vmem:[%s4888_s1 + $0x510] sm:$0xff]  }
  0x84   :  { %2606 = vmatmul.mubr.bf16.vlgmr.msra.gmra.mxu1 %v220_v50  ;;  %3505 = vmatpush3.bf16.msra.mxu0 %v3847_v48  ;;  %v3899_v48 = vld [vmem:[%s4888_s1 + $0x5d0] sm:$0xff]  }
  0x85   :  { %3527 = vmatpush3.bf16.msra.mxu1 %v3848_v51  ;;  %3506 = vmatprep.subr.bf16.mxu0 %v3849_v52  ;;  %v3901_v50 = vld [vmem:[%s4888_s1 + $0x590] sm:$0xff]   ;;  %v3902_v51 = vld [vmem:[%s4888_s1 + $0x548] sm:$0xff]  }
  0x86   :  { %3528 = vmatprep.subr.bf16.mxu1 %v3850_v53  ;;  %2645 = vmatprep.mubr.bf16.mxu0 %v223_v21  ;;  %v3903_v52 = vld [vmem:[%s4888_s1 + $0x5c8] sm:$0xff]   ;;  %v3927_v21 = vld [vmem:[%s4888_s1 + $0x658] sm:$0xff]  }
  0x87   :  { %2685 = vmatprep.mubr.bf16.mxu1 %v225_v24  ;;  %v3904_v53 = vld [vmem:[%s4888_s1 + $0x508] sm:$0xff]   ;;  %v3930_v24 = vld [vmem:[%s4888_s1 + $0x698] sm:$0xff]  }
  0x88   :  { %3507 = vmatpush3.bf16.msra.mxu0 %v3851_v54  ;;  %v27_v54 = vld [vmem:[%s4887_s0 + $0x28] sm:$0xff] }
  0x89   :  { %3529 = vmatpush3.bf16.msra.mxu1 %v3852_v55  ;;  %3508 = vmatprep.subr.bf16.mxu0 %v3853_v56  ;;  %v3905_v55 = vld [vmem:[%s4888_s1 + $0x588] sm:$0xff]   ;;  %v130_v56 = vrot.slane %v27_v54, %v4146_v41 }
  0x8a   :  { %3530 = vmatprep.subr.bf16.mxu1 %v3854_v57  ;;  %v123_v57 = vcombine.high %v27_v54, %v27_v54  ;;  %v3950_v54 = vld [vmem:[%s4888_s1 + $0x730] sm:$0xff]  }
  0x8c   :  { %3509 = vmatpush3.bf16.msra.mxu0 %v3855_v58  ;;  %v3906_v58 = vld [vmem:[%s4888_s1 + $0x540] sm:$0xff]  }
  0x8d   :  { %3531 = vmatpush3.bf16.msra.mxu1 %v3856_v59  ;;  %3510 = vmatprep.subr.bf16.mxu0 %v3857_v60  ;;  %v3907_v59 = vld [vmem:[%s4888_s1 + $0x5c0] sm:$0xff]   ;;  %v138_v60 = vcombine.high %v130_v56, %v130_v56 }
  0x8e   :  { %3532 = vmatprep.subr.bf16.mxu1 %v3858_v61  ;;  %v137_v61 = vrot.slane %v123_v57, %v4146_v41  ;;  %v3062_v57 = vld [vmem:[%s4889_s2] ss:$0 sm:$0xff] }
  0x90   :  { %3511 = vmatpush3.bf16.msra.mxu0 %v3859_v62  ;;  %v3908_v62 = vld [vmem:[%s4888_s1 + $0x500] sm:$0xff]  }
  0x91   :  { %3533 = vmatpush3.bf16.msra.mxu1 %v3860_v63  ;;  %3512 = vmatprep.subr.bf16.mxu0 %v3861_v0  ;;  %v3909_v63 = vld [vmem:[%s4888_s1 + $0x580] sm:$0xff]   ;;  %v227_v0 = vpack.c.bf16 %v138_v60, %v138_v60 }
  0x92   :  { %3534 = vmatprep.subr.bf16.mxu1 %v3862_v1  ;;  %v139_v1 = vcombine.high %v137_v61, %v137_v61 }
  0x94   :  { %3513 = vmatpush3.bf16.msra.mxu0 %v3863_v2  ;;  %v3911_v2 = vld [vmem:[%s4888_s1 + $0x678] sm:$0xff]  }
  0x95   :  { %3535 = vmatpush3.bf16.msra.mxu1 %v3864_v3  ;;  %3514 = vmatprep.subr.bf16.mxu0 %v3865_v4  ;;  %v229_v3 = vpack.c.bf16 %v139_v1, %v139_v1  ;;  %v3912_v4 = vld [vmem:[%s4888_s1 + $0x6f8] sm:$0xff]   ;;  %v3954_v1 = vld [vmem:[%s4888_s1 + $0x728] sm:$0xff]  }
  0x96   :  { %3536 = vmatprep.subr.bf16.mxu1 %v3866_v5  ;;  %v3913_v5 = vld [vmem:[%s4888_s1 + $0x638] sm:$0xff]  }
  0x98   :  { %3515 = vmatpush3.bf16.msra.mxu0 %v3867_v6  ;;  %v226_v6 = vpack.c.bf16 %v130_v56, %v130_v56 }
  0x99   :  { %3537 = vmatpush3.bf16.msra.mxu1 %v3868_v7  ;;  %3516 = vmatprep.subr.bf16.mxu0 %v3869_v8  ;;  %v228_v7 = vpack.c.bf16 %v137_v61, %v137_v61  ;;  %v3914_v8 = vld [vmem:[%s4888_s1 + $0x6b8] sm:$0xff]  }
  0x9a   :  { %3538 = vmatprep.subr.bf16.mxu1 %v3870_v9  ;;  %v3915_v9 = vld [vmem:[%s4888_s1 + $0x670] sm:$0xff]  }
  0x9c   :  { %3517 = vmatpush3.bf16.msra.mxu0 %v3871_v10  ;;  %v3916_v10 = vld [vmem:[%s4888_s1 + $0x6f0] sm:$0xff]  }
  0x9d   :  { %3539 = vmatpush3.bf16.msra.mxu1 %v3872_v12  ;;  %3518 = vmatprep.subr.bf16.mxu0 %v3873_v15  ;;  %v3918_v12 = vld [vmem:[%s4888_s1 + $0x6b0] sm:$0xff]   ;;  %v3921_v15 = vld [vmem:[%s4888_s1 + $0x628] sm:$0xff]  }
  0x9e   :  { %3540 = vmatprep.subr.bf16.mxu1 %v3874_v16  ;;  %v3922_v16 = vld [vmem:[%s4888_s1 + $0x6a8] sm:$0xff]  }
  0xa0   :  { %3519 = vmatpush3.bf16.msra.mxu0 %v3875_v19  ;;  %v3925_v19 = vld [vmem:[%s4888_s1 + $0x620] sm:$0xff]  }
  0xa1   :  { %3541 = vmatpush3.bf16.msra.mxu1 %v3876_v20  ;;  %3548 = vmatprep.subr.bf16.mxu0 %v3878_v23  ;;  %v3926_v20 = vld [vmem:[%s4888_s1 + $0x6a0] sm:$0xff]   ;;  %v3929_v23 = vld [vmem:[%s4888_s1 + $0x618] sm:$0xff]  }
  0xa2   :  { %3570 = vmatprep.subr.bf16.mxu1 %v3879_v25  ;;  %v3931_v25 = vld [vmem:[%s4888_s1 + $0x650] sm:$0xff]  }
  0xa3   :  { %2646 = vmatmul.mubr.bf16.vlgmr.msra.gmra.mxu0 %v222_v27  ;;  %v3933_v27 = vld [vmem:[%s4888_s1 + $0x610] sm:$0xff]  }
  0xa4   :  { %2686 = vmatmul.mubr.bf16.vlgmr.msra.gmra.mxu1 %v224_v28  ;;  %3549 = vmatpush3.bf16.msra.mxu0 %v3880_v26  ;;  %v3932_v26 = vld [vmem:[%s4888_s1 + $0x6d0] sm:$0xff]  }
  0xa5   :  { %3571 = vmatpush3.bf16.msra.mxu1 %v3881_v29  ;;  %3550 = vmatprep.subr.bf16.mxu0 %v3882_v30  ;;  %v3934_v28 = vld [vmem:[%s4888_s1 + $0x690] sm:$0xff]   ;;  %v3935_v29 = vld [vmem:[%s4888_s1 + $0x648] sm:$0xff]  }
  0xa6   :  { %3572 = vmatprep.subr.bf16.mxu1 %v3883_v31  ;;  %2725 = vmatprep.mubr.bf16.mxu0 %v227_v0  ;;  %v3936_v30 = vld [vmem:[%s4888_s1 + $0x6c8] sm:$0xff]  }
  0xa7   :  { %2765 = vmatprep.mubr.bf16.mxu1 %v229_v3  ;;  %v3937_v31 = vld [vmem:[%s4888_s1 + $0x608] sm:$0xff]  }
  0xa8   :  { %3551 = vmatpush3.bf16.msra.mxu0 %v3884_v32  ;;  %v3938_v32 = vld [vmem:[%s4888_s1 + $0x688] sm:$0xff]  }
  0xa9   :  { %3573 = vmatpush3.bf16.msra.mxu1 %v3885_v33  ;;  %3552 = vmatprep.subr.bf16.mxu0 %v3886_v34  ;;  %v28_v33 = vld [vmem:[%s4887_s0 + $0x30] sm:$0xff]  ;;  %v3939_v34 = vld [vmem:[%s4888_s1 + $0x640] sm:$0xff]  }
  0xaa   :  { %3574 = vmatprep.subr.bf16.mxu1 %v3887_v35  ;;  %v147_v35 = vrot.slane %v28_v33, %v4146_v41 }
  0xac   :  { %3553 = vmatpush3.bf16.msra.mxu0 %v3888_v36  ;;  %v140_v36 = vcombine.high %v28_v33, %v28_v33 }
  0xad   :  { %3575 = vmatpush3.bf16.msra.mxu1 %v3889_v37  ;;  %3554 = vmatprep.subr.bf16.mxu0 %v3890_v38  ;;  %v3940_v37 = vld [vmem:[%s4888_s1 + $0x6c0] sm:$0xff]   ;;  %v155_v38 = vcombine.high %v147_v35, %v147_v35 }
  0xae   :  { %3576 = vmatprep.subr.bf16.mxu1 %v3891_v39  ;;  %v154_v39 = vrot.slane %v140_v36, %v4146_v41 }
  0xb0   :  { %3555 = vmatpush3.bf16.msra.mxu0 %v3892_v40  ;;  %v3941_v40 = vld [vmem:[%s4888_s1 + $0x600] sm:$0xff]  }
  0xb1   :  { %3577 = vmatpush3.bf16.msra.mxu1 %v3893_v42  ;;  %3556 = vmatprep.subr.bf16.mxu0 %v3894_v43  ;;  %v3942_v42 = vld [vmem:[%s4888_s1 + $0x680] sm:$0xff]   ;;  %v231_v43 = vpack.c.bf16 %v155_v38, %v155_v38 }
  0xb2   :  { %3578 = vmatprep.subr.bf16.mxu1 %v3895_v44  ;;  %v156_v44 = vcombine.high %v154_v39, %v154_v39 }
  0xb4   :  { %3557 = vmatpush3.bf16.msra.mxu0 %v3896_v45  ;;  %v3944_v45 = vld [vmem:[%s4888_s1 + $0x778] sm:$0xff]  }
  0xb5   :  { %3579 = vmatpush3.bf16.msra.mxu1 %v3897_v46  ;;  %3558 = vmatprep.subr.bf16.mxu0 %v3898_v47  ;;  %v3945_v46 = vld [vmem:[%s4888_s1 + $0x7f8] sm:$0xff]   ;;  %v233_v47 = vpack.c.bf16 %v156_v44, %v156_v44 }
  0xb6   :  { %3580 = vmatprep.subr.bf16.mxu1 %v3899_v48  ;;  %v3946_v48 = vld [vmem:[%s4888_s1 + $0x738] sm:$0xff]  }
  0xb8   :  { %3559 = vmatpush3.bf16.msra.mxu0 %v3900_v49  ;;  %v230_v49 = vpack.c.bf16 %v147_v35, %v147_v35 }
  0xb9   :  { %3581 = vmatpush3.bf16.msra.mxu1 %v3901_v50  ;;  %3560 = vmatprep.subr.bf16.mxu0 %v3902_v51  ;;  %v232_v50 = vpack.c.bf16 %v154_v39, %v154_v39  ;;  %v3947_v51 = vld [vmem:[%s4888_s1 + $0x7b8] sm:$0xff]  }
  0xba   :  { %3582 = vmatprep.subr.bf16.mxu1 %v3903_v52  ;;  %v3948_v52 = vld [vmem:[%s4888_s1 + $0x770] sm:$0xff]  }
  0xbc   :  { %3561 = vmatpush3.bf16.msra.mxu0 %v3904_v53  ;;  %v3949_v53 = vld [vmem:[%s4888_s1 + $0x7f0] sm:$0xff]  }
  0xbd   :  { %3583 = vmatpush3.bf16.msra.mxu1 %v3905_v55  ;;  %3562 = vmatprep.subr.bf16.mxu0 %v3906_v58  ;;  %v3951_v58 = vld [vmem:[%s4888_s1 + $0x7b0] sm:$0xff]  }
  0xbe   :  { %3584 = vmatprep.subr.bf16.mxu1 %v3907_v59  ;;  %v3952_v59 = vld [vmem:[%s4888_s1 + $0x768] sm:$0xff]  }
  0xc0   :  { %3563 = vmatpush3.bf16.msra.mxu0 %v3908_v62  ;;  %v3953_v62 = vld [vmem:[%s4888_s1 + $0x7e8] sm:$0xff]  }
  0xc1   :  { %3585 = vmatpush3.bf16.msra.mxu1 %v3909_v63  ;;  %3592 = vmatprep.subr.bf16.mxu0 %v3911_v2 }
  0xc2   :  { %3614 = vmatprep.subr.bf16.mxu1 %v3912_v4  ;;  %v3955_v4 = vld [vmem:[%s4888_s1 + $0x7a8] sm:$0xff]  }
  0xc3   :  { %2726 = vmatmul.mubr.bf16.vlgmr.msra.gmra.mxu0 %v226_v6  ;;  %v3956_v6 = vld [vmem:[%s4888_s1 + $0x760] sm:$0xff]  }
  0xc4   :  { %2766 = vmatmul.mubr.bf16.vlgmr.msra.gmra.mxu1 %v228_v7  ;;  %3593 = vmatpush3.bf16.msra.mxu0 %v3913_v5 }
  0xc5   :  { %3615 = vmatpush3.bf16.msra.mxu1 %v3914_v8  ;;  %3594 = vmatprep.subr.bf16.mxu0 %v3915_v9  ;;  %v3957_v9 = vld [vmem:[%s4888_s1 + $0x7e0] sm:$0xff]  }
  0xc6   :  { %3616 = vmatprep.subr.bf16.mxu1 %v3916_v10  ;;  %2805 = vmatprep.mubr.bf16.mxu0 %v231_v43 }
  0xc7   :  { %2845 = vmatprep.mubr.bf16.mxu1 %v233_v47 }
  0xc8   :  { %3595 = vmatpush3.bf16.msra.mxu0 %v3917_v11  ;;  %v3958_v11 = vld [vmem:[%s4888_s1 + $0x720] sm:$0xff]  }
  0xc9   :  { %3617 = vmatpush3.bf16.msra.mxu1 %v3918_v12  ;;  %3596 = vmatprep.subr.bf16.mxu0 %v3919_v13  ;;  %v3959_v12 = vld [vmem:[%s4888_s1 + $0x7a0] sm:$0xff]   ;;  %v3960_v13 = vld [vmem:[%s4888_s1 + $0x758] sm:$0xff]  }
  0xca   :  { %3618 = vmatprep.subr.bf16.mxu1 %v3920_v14  ;;  %v3961_v14 = vld [vmem:[%s4888_s1 + $0x7d8] sm:$0xff]  }
  0xcc   :  { %3597 = vmatpush3.bf16.msra.mxu0 %v3921_v15  ;;  %v3962_v15 = vld [vmem:[%s4888_s1 + $0x718] sm:$0xff]  }
  0xcd   :  { %3619 = vmatpush3.bf16.msra.mxu1 %v3922_v16  ;;  %3598 = vmatprep.subr.bf16.mxu0 %v3923_v17  ;;  %v3963_v16 = vld [vmem:[%s4888_s1 + $0x798] sm:$0xff]   ;;  %v3964_v17 = vld [vmem:[%s4888_s1 + $0x750] sm:$0xff]  }
  0xce   :  { %3620 = vmatprep.subr.bf16.mxu1 %v3924_v18  ;;  %v3965_v18 = vld [vmem:[%s4888_s1 + $0x7d0] sm:$0xff]  }
  0xd0   :  { %3599 = vmatpush3.bf16.msra.mxu0 %v3925_v19  ;;  %v3966_v19 = vld [vmem:[%s4888_s1 + $0x710] sm:$0xff]  }
  0xd1   :  { %3621 = vmatpush3.bf16.msra.mxu1 %v3926_v20  ;;  %3600 = vmatprep.subr.bf16.mxu0 %v3927_v21  ;;  %v3967_v20 = vld [vmem:[%s4888_s1 + $0x790] sm:$0xff]   ;;  %v3968_v21 = vld [vmem:[%s4888_s1 + $0x748] sm:$0xff]  }
  0xd2   :  { %3622 = vmatprep.subr.bf16.mxu1 %v3928_v22  ;;  %v3969_v22 = vld [vmem:[%s4888_s1 + $0x7c8] sm:$0xff]  }
  0xd4   :  { %3601 = vmatpush3.bf16.msra.mxu0 %v3929_v23  ;;  %v3970_v23 = vld [vmem:[%s4888_s1 + $0x708] sm:$0xff]  }
  0xd5   :  { %3623 = vmatpush3.bf16.msra.mxu1 %v3930_v24  ;;  %3602 = vmatprep.subr.bf16.mxu0 %v3931_v25  ;;  %v3971_v24 = vld [vmem:[%s4888_s1 + $0x788] sm:$0xff]   ;;  %v3972_v25 = vld [vmem:[%s4888_s1 + $0x740] sm:$0xff]  }
  0xd6   :  { %3624 = vmatprep.subr.bf16.mxu1 %v3932_v26  ;;  %v3973_v26 = vld [vmem:[%s4888_s1 + $0x7c0] sm:$0xff]  }
  0xd8   :  { %3603 = vmatpush3.bf16.msra.mxu0 %v3933_v27  ;;  %v29_v27 = vld [vmem:[%s4887_s0 + $0x38] sm:$0xff] }
  0xd9   :  { %3625 = vmatpush3.bf16.msra.mxu1 %v3934_v28  ;;  %3604 = vmatprep.subr.bf16.mxu0 %v3935_v29  ;;  %v164_v28 = vrot.slane %v29_v27, %v4146_v41  ;;  %v157_v29 = vcombine.high %v29_v27, %v29_v27 }
  0xda   :  { %3626 = vmatprep.subr.bf16.mxu1 %v3936_v30  ;;  %v3974_v30 = vld [vmem:[%s4888_s1 + $0x700] sm:$0xff]  }
  0xdb   :  { %v171_v33 = vrot.slane %v157_v29, %v4146_v41 }
  0xdc   :  { %3605 = vmatpush3.bf16.msra.mxu0 %v3937_v31  ;;  %v3975_v31 = vld [vmem:[%s4888_s1 + $0x780] sm:$0xff]  }
  0xdd   :  { %3627 = vmatpush3.bf16.msra.mxu1 %v3938_v32  ;;  %3606 = vmatprep.subr.bf16.mxu0 %v3939_v34  ;;  %v172_v32 = vcombine.high %v164_v28, %v164_v28  ;;  %v173_v35 = vcombine.high %v171_v33, %v171_v33 }
  0xde   :  { %3628 = vmatprep.subr.bf16.mxu1 %v3940_v37 }
  0xdf   :  { %v235_v34 = vpack.c.bf16 %v172_v32, %v172_v32 }
  0xe0   :  { %3607 = vmatpush3.bf16.msra.mxu0 %v3941_v40 }
  0xe1   :  { %3629 = vmatpush3.bf16.msra.mxu1 %v3942_v42  ;;  %3636 = vmatprep.subr.bf16.mxu0 %v3944_v45 }
  0xe2   :  { %3658 = vmatprep.subr.bf16.mxu1 %v3945_v46 }
  0xe3   :  { %v3344_v55 = vpop.f32.mrf.mxu0  ;;  %2806 = vmatmul.mubr.bf16.vlgmr.msra.gmra.mxu0 %v230_v49 }
  0xe4   :  { %v3366_v56 = vpop.f32.mrf.mxu1  ;;  %2846 = vmatmul.mubr.bf16.vlgmr.msra.gmra.mxu1 %v232_v50  ;;  %3637 = vmatpush3.bf16.msra.mxu0 %v3946_v48 }
  0xe5   :  { %3659 = vmatpush3.bf16.msra.mxu1 %v3947_v51  ;;  %v3345_v60 = vpop.f32.mrf.mxu0  ;;  %3638 = vmatprep.subr.bf16.mxu0 %v3948_v52 }
  0xe6   :  { %v3367_v61 = vpop.f32.mrf.mxu1  ;;  %3660 = vmatprep.subr.bf16.mxu1 %v3949_v53  ;;  %v3346_v63 = vadd.f32 %v3345_v60, %v3344_v55 }
  0xe7   :  { %v3368_v0 = vadd.f32 %v3367_v61, %v3366_v56  ;;  %v3347_v2 = vpop.f32.mrf.mxu0 }
  0xe8   :  { %v3369_v3 = vpop.f32.mrf.mxu1  ;;  %v2328_v5 = vadd.f32 %v3346_v63, %v3062_v57  ;;  %3639 = vmatpush3.bf16.msra.mxu0 %v3950_v54 }
  0xe9   :  { %3661 = vmatpush3.bf16.msra.mxu1 %v3951_v58  ;;  %v3348_v7 = vpop.f32.mrf.mxu0  ;;  %3640 = vmatprep.subr.bf16.mxu0 %v3952_v59 }
  0xea   :  { %v3370_v8 = vpop.f32.mrf.mxu1  ;;  %3662 = vmatprep.subr.bf16.mxu1 %v3953_v62  ;;  %v4795_v10 = vadd.f32 %v3368_v0, %v2328_v5 }
  0xec   :  { %3641 = vmatpush3.bf16.msra.mxu0 %v3954_v1 }
  0xed   :  { %3663 = vmatpush3.bf16.msra.mxu1 %v3955_v4  ;;  %3642 = vmatprep.subr.bf16.mxu0 %v3956_v6 }
  0xee   :  { %3664 = vmatprep.subr.bf16.mxu1 %v3957_v9 }
  0xf0   :  { %3643 = vmatpush3.bf16.msra.mxu0 %v3958_v11 }
  0xf1   :  { %3665 = vmatpush3.bf16.msra.mxu1 %v3959_v12  ;;  %3644 = vmatprep.subr.bf16.mxu0 %v3960_v13 }
  0xf2   :  { %3666 = vmatprep.subr.bf16.mxu1 %v3961_v14 }
  0xf4   :  { %3645 = vmatpush3.bf16.msra.mxu0 %v3962_v15 }
  0xf5   :  { %3667 = vmatpush3.bf16.msra.mxu1 %v3963_v16  ;;  %3646 = vmatprep.subr.bf16.mxu0 %v3964_v17 }
  0xf6   :  { %3668 = vmatprep.subr.bf16.mxu1 %v3965_v18 }
  0xf8   :  { %3647 = vmatpush3.bf16.msra.mxu0 %v3966_v19 }
  0xf9   :  { %3669 = vmatpush3.bf16.msra.mxu1 %v3967_v20  ;;  %3648 = vmatprep.subr.bf16.mxu0 %v3968_v21 }
  0xfa   :  { %3670 = vmatprep.subr.bf16.mxu1 %v3969_v22 }
  0xfc   :  { %3649 = vmatpush3.bf16.msra.mxu0 %v3970_v23 }
  0xfd   :  { %3671 = vmatpush3.bf16.msra.mxu1 %v3971_v24  ;;  %3650 = vmatprep.subr.bf16.mxu0 %v3972_v25 }
  0xfe   :  { %3672 = vmatprep.subr.bf16.mxu1 %v3973_v26 }
  0xff   :  { %10 = vsyncpa [#allocation3], 0  ;;  %2885 = vmatprep.mubr.bf16.mxu0 %v235_v34  ;;  %v237_v36 = vpack.c.bf16 %v173_v35, %v173_v35  ;;  %v234_v37 = vpack.c.bf16 %v164_v28, %v164_v28  ;;  %v236_v38 = vpack.c.bf16 %v171_v33, %v171_v33  ;;  %v3977_v63 = vld [vmem:[%s4890_s3 + $0x38] sm:$0xff]   ;;  %v4008_v0 = vmov 0.0   ;;  %v3978_v1 = vld [vmem:[%s4890_s3 + $0x30] sm:$0xff]   ;;  %s4010_s10 = smov [#allocation2]  }
 0x100   :  { %3651 = vmatpush3.bf16.msra.mxu0 %v3974_v30  ;;  %v3979_v2 = vld [vmem:[%s4890_s3 + $0x28] sm:$0xff]   ;;  %v3980_v3 = vld [vmem:[%s4890_s3 + $0x20] sm:$0xff]   ;;  %v3981_v4 = vld [vmem:[%s4890_s3 + $0x18] sm:$0xff]   ;;  %vm4009_vm0 = vmmov 0   ;;  %s3054_s11 = sshll.u32 %s4010_s10, 4  ;;  %vm3046_vm1 = vcmask 74752   ;;  %s3055_s11 = int_to_ptr.vmem [resolvable:$true] %s3054_s11 }
 0x101   :  { %3673 = vmatpush3.bf16.msra.mxu1 %v3975_v31  ;;  %2925 = vmatprep.mubr.bf16.mxu1 %v237_v36  ;;  %v3982_v7 = vld [vmem:[%s4890_s3 + $0x10] sm:$0xff]   ;;  %v3983_v14 = vld [vmem:[%s4890_s3 + $0x8] sm:$0xff]   ;;  %v3984_v19 = vld [vmem:[%s4890_s3] sm:$0xff]   ;;  %s3985_s12 = scalar_lea.vmem %s3055_s11, 32  ;;  %p3990_p1 = scmp.lt.s32.totalorder %s3055_s11, %s3055_s11 }
 0x102   :  { %3689 = vmatprep.subr.bf16.mxu0 %v4008_v0  ;;  %p3986_p0 = scmp.ne.s32.totalorder %s3055_s11, %s3985_s12  ;;  %p3991_p2 = scmp.lt.s32.totalorder %s3985_s12, %s3985_s12 }
 0x103   :  { %v3388_v39 = vpop.f32.mrf.mxu0  ;;  %2886 = vmatmul.mubr.bf16.vlgmr.msra.gmra.mxu0 %v234_v37 }
 0x104   :  { %v3410_v40 = vpop.f32.mrf.mxu1  ;;  %2926 = vmatmul.mubr.bf16.vlgmr.msra.gmra.mxu1 %v236_v38  ;;  %3690 = vmatpush3.bf16.msra.mxu0 %v3977_v63  ;;  %p3992_p3 = por %p3991_p2, %p3990_p1 }
 0x105   :  { %v3389_v42 = vpop.f32.mrf.mxu0  ;;  %3691 = vmatprep.subr.bf16.mxu0 %v4008_v0  ;;  %3705 = vmatprep.mubr.msk.bf16.mxu0 %vm4009_vm0, %v4008_v0 }
 0x106   :  { %v3411_v41 = vpop.f32.mrf.mxu1  ;;  %v3390_v43 = vadd.f32 %v3389_v42, %v3388_v39  ;;  %p3993_p4 = pnand %p3992_p3, %p3986_p0 }
 0x107   :  { %v3412_v44 = vadd.f32 %v3411_v41, %v3410_v40  ;;  %v3391_v45 = vpop.f32.mrf.mxu0 }
 0x108   :  { %v3413_v46 = vpop.f32.mrf.mxu1  ;;  %v2408_v47 = vadd.f32 %v3390_v43, %v4795_v10  ;;  %3692 = vmatpush3.bf16.msra.mxu0 %v3978_v1 }
 0x109   :  { %v3392_v48 = vpop.f32.mrf.mxu0  ;;  %3693 = vmatprep.subr.bf16.mxu0 %v4008_v0 }
 0x10a   :  { %v3414_v49 = vpop.f32.mrf.mxu1  ;;  %v2448_v50 = vadd.f32 %v3412_v44, %v2408_v47 }
 0x10c   :  { %3694 = vmatpush3.bf16.msra.mxu0 %v3979_v2 }
 0x10d   :  { %3695 = vmatprep.subr.bf16.mxu0 %v4008_v0 }
 0x110   :  { %3696 = vmatpush3.bf16.msra.mxu0 %v3980_v3 }
 0x111   :  { %3697 = vmatprep.subr.bf16.mxu0 %v4008_v0 }
 0x114   :  { %3698 = vmatpush3.bf16.msra.mxu0 %v3981_v4 }
 0x115   :  { %3699 = vmatprep.subr.bf16.mxu0 %v4008_v0 }
 0x118   :  { %3700 = vmatpush3.bf16.msra.mxu0 %v3982_v7 }
 0x119   :  { %3701 = vmatprep.subr.bf16.mxu0 %v4008_v0 }
 0x11c   :  { %3702 = vmatpush3.bf16.msra.mxu0 %v3983_v14 }
 0x11d   :  { %3703 = vmatprep.subr.bf16.mxu0 %v4008_v0 }
 0x120   :  { %3704 = vmatpush3.bf16.msra.mxu0 %v3984_v19 }
 0x123   :  { %v3432_v51 = vpop.f32.mrf.mxu0 }
 0x124   :  { %v3454_v52 = vpop.f32.mrf.mxu1 }
 0x125   :  { %v3433_v53 = vpop.f32.mrf.mxu0 }
 0x126   :  { %v3455_v54 = vpop.f32.mrf.mxu1  ;;  %v3434_v55 = vadd.f32 %v3433_v53, %v3432_v51 }
 0x127   :  { %v3456_v56 = vadd.f32 %v3455_v54, %v3454_v52  ;;  %v3435_v57 = vpop.f32.mrf.mxu0 }
 0x128   :  { %v3457_v58 = vpop.f32.mrf.mxu1  ;;  %v2488_v59 = vadd.f32 %v3434_v55, %v2448_v50 }
 0x129   :  { %v3436_v60 = vpop.f32.mrf.mxu0 }
 0x12a   :  { %v3458_v61 = vpop.f32.mrf.mxu1  ;;  %v2528_v62 = vadd.f32 %v3456_v56, %v2488_v59 }
 0x143   :  { %v3476_v5 = vpop.f32.mrf.mxu0 }
 0x144   :  { %v3498_v6 = vpop.f32.mrf.mxu1 }
 0x145   :  { %v3477_v8 = vpop.f32.mrf.mxu0 }
 0x146   :  { %v3499_v9 = vpop.f32.mrf.mxu1  ;;  %v3478_v10 = vadd.f32 %v3477_v8, %v3476_v5 }
 0x147   :  { %v3500_v11 = vadd.f32 %v3499_v9, %v3498_v6  ;;  %v3479_v12 = vpop.f32.mrf.mxu0  ;;  %v3319_v6 = vld [vmem:[%s4891_s4] ss:$0 sm:$0xff] }
 0x148   :  { %v3501_v13 = vpop.f32.mrf.mxu1  ;;  %v2568_v15 = vadd.f32 %v3478_v10, %v2528_v62 }
 0x149   :  { %v3480_v16 = vpop.f32.mrf.mxu0 }
 0x14a   :  { %v3502_v17 = vpop.f32.mrf.mxu1  ;;  %v2608_v18 = vadd.f32 %v3500_v11, %v2568_v15 }
 0x163   :  { %v3520_v20 = vpop.f32.mrf.mxu0 }
 0x164   :  { %v3542_v21 = vpop.f32.mrf.mxu1 }
 0x165   :  { %v3521_v22 = vpop.f32.mrf.mxu0 }
 0x166   :  { %v3543_v23 = vpop.f32.mrf.mxu1  ;;  %v3522_v24 = vadd.f32 %v3521_v22, %v3520_v20 }
 0x167   :  { %v3544_v25 = vadd.f32 %v3543_v23, %v3542_v21  ;;  %v3523_v26 = vpop.f32.mrf.mxu0 }
 0x168   :  { %v3545_v27 = vpop.f32.mrf.mxu1  ;;  %v2648_v28 = vadd.f32 %v3522_v24, %v2608_v18 }
 0x169   :  { %v3524_v29 = vpop.f32.mrf.mxu0 }
 0x16a   :  { %v3546_v30 = vpop.f32.mrf.mxu1  ;;  %v2688_v31 = vadd.f32 %v3544_v25, %v2648_v28 }
 0x183   :  { %v3564_v32 = vpop.f32.mrf.mxu0 }
 0x184   :  { %v3586_v33 = vpop.f32.mrf.mxu1 }
 0x185   :  { %v3565_v34 = vpop.f32.mrf.mxu0 }
 0x186   :  { %v3587_v35 = vpop.f32.mrf.mxu1  ;;  %v3566_v48 = vadd.f32 %v3565_v34, %v3564_v32 }
 0x187   :  { %v3567_v36 = vpop.f32.mrf.mxu0  ;;  %v3588_v50 = vadd.f32 %v3587_v35, %v3586_v33 }
 0x188   :  { %v3589_v37 = vpop.f32.mrf.mxu1  ;;  %v2728_v49 = vadd.f32 %v3566_v48, %v2688_v31 }
 0x189   :  { %v3568_v38 = vpop.f32.mrf.mxu0 }
 0x18a   :  { %v3590_v39 = vpop.f32.mrf.mxu1  ;;  %v2768_v52 = vadd.f32 %v3588_v50, %v2728_v49 }
 0x1a3   :  { %v3608_v40 = vpop.f32.mrf.mxu0 }
 0x1a4   :  { %v3630_v42 = vpop.f32.mrf.mxu1 }
 0x1a5   :  { %v3609_v41 = vpop.f32.mrf.mxu0 }
 0x1a6   :  { %v3631_v43 = vpop.f32.mrf.mxu1  ;;  %v3610_v51 = vadd.f32 %v3609_v41, %v3608_v40 }
 0x1a7   :  { %v3611_v44 = vpop.f32.mrf.mxu0  ;;  %v3632_v54 = vadd.f32 %v3631_v43, %v3630_v42 }
 0x1a8   :  { %v3633_v45 = vpop.f32.mrf.mxu1  ;;  %v2808_v53 = vadd.f32 %v3610_v51, %v2768_v52 }
 0x1a9   :  { %v3612_v46 = vpop.f32.mrf.mxu0 }
 0x1aa   :  { %v3634_v47 = vpop.f32.mrf.mxu1  ;;  %v2848_v59 = vadd.f32 %v3632_v54, %v2808_v53 }
 0x1c3   :  { %v3652_v55 = vpop.f32.mrf.mxu0 }
 0x1c4   :  { %v3674_v56 = vpop.f32.mrf.mxu1 }
 0x1c5   :  { %v3653_v57 = vpop.f32.mrf.mxu0 }
 0x1c6   :  { %v3675_v58 = vpop.f32.mrf.mxu1  ;;  %v3654_v60 = vadd.f32 %v3653_v57, %v3652_v55 }
 0x1c7   :  { %v3655_v61 = vpop.f32.mrf.mxu0  ;;  %v3676_v0 = vadd.f32 %v3675_v58, %v3674_v56 }
 0x1c8   :  { %v3677_v62 = vpop.f32.mrf.mxu1  ;;  %v2888_v63 = vadd.f32 %v3654_v60, %v2848_v59 }
 0x1c9   :  { %v3656_v1 = vpop.f32.mrf.mxu0 }
 0x1ca   :  { %v3678_v2 = vpop.f32.mrf.mxu1  ;;  %v2928_v3 = vadd.f32 %v3676_v0, %v2888_v63 }
 0x1cc   :  { %v2933_v4 = vmax.f32 %v2928_v3, 0.0 }
 0x1ce   :  { %v2934_v5 = vpack.c.bf16 %v2933_v4, %v2933_v4 }
 0x1d0   :  { %3706 = vmatmul.mubr.bf16.vlgmr.msra.gmra.mxu0 %v2934_v5 }
 0x290   :  { %v3040_v7 = vpop.f32.mrf.mxu0 }
 0x291   :  { %v3041_v8 = vadd.f32 %v3319_v6, %v3040_v7 }
 0x292   :  { %v3707_v9 = vpop.f32.mrf.mxu0 }
 0x293   :  { %3047 = vst.msk [vmem:[#allocation2] sm:$0x3] %vm3046_vm1, %v3041_v8 }
 0x294   :  { %v3043_v10 = vpop.f32.mrf.mxu0 }
 0x295   :  { %3996 = shalt.err (!%p3993_p4)
}
 0x296   :  { %3057 = dma.vmem_to_hbm [thread:$0]  %s3055_s11, 32, %s4892_s5, [#allocation3]   ;;  %v3708_v11 = vpop.f32.mrf.mxu0 }
 0x297   :  { %4005 = dma.done.wait [#allocation3], 32  }
 0x298   :  { %4006 = vsyncadd [#allocation3], 4294967264 }
 0x299   :  { %3061 = vsyncpa [#allocation3], 1 }

// kernel: deep_cnn_forward.2
= control target key start
LH: loop header
LB: loop body
LE: loop exit
PB: predicated region body
PF: predicated region fallthrough
CT: control target
= control target key end

     0   :  { %16 = vsyncpa [#allocation5], 0  ;;  %s13258_s0 = inlined_call_operand.vmem [shape: f32[2,8,1024], index: 0, kind: input, shape index: {}]   ;;  %s13259_s1 = inlined_call_operand.vmem [shape: bf16[16,72], index: 1, kind: input, shape index: {}]   ;;  %s13260_s2 = inlined_call_operand.vmem [shape: f32[16,1], index: 2, kind: input, shape index: {}]   ;;  %s13261_s3 = inlined_call_operand.vmem [shape: bf16[32,144], index: 3, kind: input, shape index: {}]   ;;  %s13262_s4 = inlined_call_operand.vmem [shape: f32[32,1], index: 4, kind: input, shape index: {}]   ;;  %s13263_s5 = inlined_call_operand.hbm [shape: bf16[64,288], index: 5, kind: input, shape index: {}]   ;;  %s13264_s6 = inlined_call_operand.vmem [shape: f32[64,1], index: 6, kind: input, shape index: {}]   ;;  %s13265_s7 = inlined_call_operand.vmem [shape: f32[2,1024], index: 7, kind: input, shape index: {}]   ;;  %s13266_s8 = inlined_call_operand.vmem [shape: f32[2,256], index: 8, kind: input, shape index: {}]   ;;  %s13267_s9 = inlined_call_operand.hbm [shape: bf16[1024,256], index: 9, kind: input, shape index: {}]   ;;  %s13268_s10 = inlined_call_operand.vmem [shape: bf16[256,64], index: 10, kind: input, shape index: {}]   ;;  %s13269_s11 = inlined_call_operand.vmem [shape: f32[2,64,64], index: 11, kind: output, shape index: {}]  }
   0x1   :  { %17 = vsyncpa [#allocation7], 0  ;;  %s9686_s17 = smov 0  }
   0x2 LB: > { %s9603_s18 = smov [#allocation4]   ;;  %s9692_s20 = sadd.s32 4294967295, %s9601_s17   ;;  %s9601_s17 = sphi %s9686_s17, %s23_s17  }
   0x3   : > { %s314_s19 = sshll.u32 %s9603_s18, 4  ;;  %p7996_p0 = scmp.ge.s32.totalorder %s9601_s17, 1  ;;  %s315_s19 = int_to_ptr.vmem [resolvable:$true] %s314_s19 }
   0x4   : > { %p290_p1 = scmp.lt.s32.totalorder %s9601_s17, 3  ;;  %p8816_p3 = scmp.eq.s32.totalorder %s9692_s20, 0 }
   0x5   : > { %s9604_s22 = smov [#allocation6]   ;;  %s9546_s25 = scalar_lea.vmem %s315_s19, 1536 }
   0x6   : > { %p9696_p2 = pnand %p7996_p0, %p290_p1  ;;  %s336_s23 = sshll.u32 %s9604_s22, 4  ;;  %s337_s23 = int_to_ptr.vmem [resolvable:$true] %s336_s23 }
   0x7   : > { %p9547_p7 = scmp.ne.s32.totalorder %s315_s19, %s9546_s25  ;;  %p9554_p10 = scmp.lt.s32.totalorder %s315_s19, %s315_s19 }
   0x8   : > { %p8809_p4 = pneg %p9696_p2  ;;  %p9555_p11 = scmp.lt.s32.totalorder %s9546_s25, %s9546_s25 }
   0xa   : > { %p9705_p5 = pnand %p8816_p3, %p8809_p4  ;;  %p9556_p12 = por %p9555_p11, %p9554_p10 }
   0xc   : > { %p9537_p6 = pneg %p9705_p5 }
   0xe   : > { %p9549_p8 = pnand %p9547_p7, %p9537_p6 }
  0x10   : > { %p9550_p9 = pneg %p9549_p8 }
  0x12   : > { %p9557_p13 = pnand %p9556_p12, %p9550_p9 }
  0x14   : > { %9560 = shalt.err (!%p9557_p13)
}
  0x15   : > { %s9605_s26 = smov 192   ;;  %s9606_s27 = smov 12  }
  0x16   : > { %8812 = dma.hbm_to_vmem [thread:$0]  (!%p9705_p5), %s13263_s5, 1536, %s315_s19, [#allocation5], %s9605_s26, %s9605_s26, %s9606_s27  }
  0x17   : > { %s9572_s30 = scalar_lea.vmem %s337_s23, 16384  ;;  %p9580_p7 = scmp.lt.s32.totalorder %s337_s23, %s337_s23 }
  0x18   : > { %p9573_p0 = scmp.ne.s32.totalorder %s337_s23, %s9572_s30  ;;  %p9581_p8 = scmp.lt.s32.totalorder %s9572_s30, %s9572_s30 }
  0x1a   : > { %p9575_p1 = pnand %p9573_p0, %p9537_p6  ;;  %p9582_p10 = por %p9581_p8, %p9580_p7 }
  0x1c   : > { %p9576_p4 = pneg %p9575_p1 }
  0x1e   : > { %p9583_p9 = pnand %p9582_p10, %p9576_p4 }
  0x20   : > { %9586 = shalt.err (!%p9583_p9)
}
  0x21   : > { %s9607_s12 = smov 128   ;;  %s9608_s13 = smov 8  }
  0x22   : > { %8815 = dma.hbm_to_vmem [thread:$0]  (!%p9705_p5), %s13267_s9, 16384, %s337_s23, [#allocation7], %s9607_s12, %s9607_s12, %s9608_s13  }
  0x23   : > { %363 = sbr.rel (%p9696_p2) target bundleno = 2269 (0x8dd), region = 64 }
  0x28   : > { %9592 = dma.done.wait (%p8816_p3), [#allocation5], 1536  }
  0x29   : > { %9594 = vsyncadd (%p8816_p3), [#allocation5], 4294965760 }
  0x2a   : > { %9596 = dma.done.wait (%p8816_p3), [#allocation7], 16384  }
  0x2b   : > { %9598 = vsyncadd (%p8816_p3), [#allocation7], 4294950912  ;;  %v447_v0 = vlaneseq  ;;  %v9754_v6 = vld [vmem:[%s13265_s7 + $0x1] ss:$2 sm:$0xff]  ;;  %s9609_s19 = smov 33   ;;  %s9610_s23 = smov 31  }
  0x2c   : > { %v9775_v13 = vld [vmem:[%s13265_s7] ss:$2 sm:$0xff]  ;;  %v9798_v20 = vld [vmem:[%s13265_s7 + $0x1] ss:$2 sm:$0xff]  ;;  %s9611_s26 = smov 1   ;;  %s9612_s29 = smov 97  }
  0x2d   : > { %v9737_v1 = vshrl.u32 %v447_v0, 7  ;;  %v9821_v27 = vld [vmem:[%s13265_s7 + $0x1] ss:$2 sm:$0xff]  ;;  %v818_v34 = vld [vmem:[%s13265_s7] ss:$2 sm:$0xff]  ;;  %s9613_s13 = smov 127  }
  0x2e   : > { %v445_v41 = vld [vmem:[%s13265_s7] ss:$2 sm:$0xff]  ;;  %s9614_s16 = smov 95   ;;  %p407_p2 = scmp.lt.s32.totalorder %s9692_s20, 1  ;;  %vm570_vm0 = vcmask 269312   ;;  %vm793_vm1 = vcmask 252928  }
  0x2f   : > { %v9740_v2 = vsub.s32 0, %v9737_v1  ;;  %v9743_v3 = vsub.s32 2, %v9737_v1  ;;  %v9746_v4 = vsub.s32 1, %v9737_v1  ;;  %v9749_v5 = vsub.s32 3, %v9737_v1  ;;  %s9615_s25 = smov 96   ;;  %s9618_s27 = smov 32  }
  0x30   : > { %v9767_v11 = vsub.s32 5, %v9737_v1  ;;  %v9770_v12 = vsub.s32 4, %v9737_v1  ;;  %v9878_v50 = vsub.s32 7, %v9737_v1  ;;  %v9881_v51 = vsub.s32 6, %v9737_v1  ;;  %s13430_s20 = smov (!%p407_p2, %s9692_s20), 1  ;;  %s9621_s14 = smov 111  }
  0x31   : > { %v1395_v7 = vrot.slane %v9754_v6, %v9743_v3  ;;  %v1387_v8 = vrot.slane %v9754_v6, %v9740_v2  ;;  %v1399_v9 = vrot.slane %v9754_v6, %v9749_v5  ;;  %v1391_v10 = vrot.slane %v9754_v6, %v9746_v4  ;;  %s8547_s18 = sshll.u32 %s13430_s20, 6  ;;  %s9623_s21 = smov 17  }
  0x32   : > { %v1407_v14 = vrot.slane %v9754_v6, %v9767_v11  ;;  %v1403_v15 = vrot.slane %v9754_v6, %v9770_v12  ;;  %v1169_v16 = vrot.slane %v9775_v13, %v9746_v4  ;;  %v1165_v17 = vrot.slane %v9775_v13, %v9740_v2  ;;  %s9921_s24 = scalar_lea.vmem %s13258_s0, %s8547_s18  ;;  %s9624_s22 = smov 112  }
  0x33   : > { %1420 = vrot.lane.b32.xlu1 %v1395_v7, %s9609_s19  ;;  %1416 = vrot.lane.b32.xlu0 %v1387_v8, %s9609_s19  ;;  %v1177_v18 = vrot.slane %v9775_v13, %v9749_v5  ;;  %v1173_v19 = vrot.slane %v9775_v13, %v9743_v3  ;;  %v1185_v21 = vrot.slane %v9775_v13, %v9767_v11  ;;  %v9928_v0 = vld [vmem:[%s9921_s24] sm:$0xff]  ;;  %v9931_v1 = vld [vmem:[%s9921_s24 + $0x8] sm:$0xff]  ;;  %vm942_vm2 = vcmask 7168  }
  0x34   : > { %v1181_v22 = vrot.slane %v9775_v13, %v9770_v12  ;;  %v1020_v23 = vrot.slane %v9798_v20, %v9746_v4  ;;  %v1016_v24 = vrot.slane %v9798_v20, %v9740_v2  ;;  %v1028_v25 = vrot.slane %v9798_v20, %v9749_v5  ;;  %v9937_v7 = vld [vmem:[%s9921_s24 + $0x10] sm:$0xff] }
  0x35   : > { %v1024_v26 = vrot.slane %v9798_v20, %v9743_v3  ;;  %v1036_v28 = vrot.slane %v9798_v20, %v9767_v11  ;;  %v1032_v29 = vrot.slane %v9798_v20, %v9770_v12  ;;  %v678_v30 = vrot.slane %v9821_v27, %v9746_v4 }
  0x36   : > { %v674_v31 = vrot.slane %v9821_v27, %v9740_v2  ;;  %v686_v32 = vrot.slane %v9821_v27, %v9749_v5  ;;  %v682_v33 = vrot.slane %v9821_v27, %v9743_v3  ;;  %v694_v35 = vrot.slane %v9821_v27, %v9767_v11 }
  0x37   : > { %1422 = vrot.lane.b32.xlu1 %v1399_v9, %s9609_s19  ;;  %1418 = vrot.lane.b32.xlu0 %v1391_v10, %s9609_s19  ;;  %v690_v36 = vrot.slane %v9821_v27, %v9770_v12  ;;  %v827_v37 = vrot.slane %v818_v34, %v9746_v4  ;;  %v823_v38 = vrot.slane %v818_v34, %v9740_v2  ;;  %v9950_v10 = vld [vmem:[%s9921_s24 + $0x20] sm:$0xff]  ;;  %vm719_vm3 = vcmask 793600  }
  0x38   : > { %v835_v39 = vrot.slane %v818_v34, %v9749_v5  ;;  %v831_v40 = vrot.slane %v818_v34, %v9743_v3  ;;  %v843_v42 = vrot.slane %v818_v34, %v9767_v11  ;;  %v839_v43 = vrot.slane %v818_v34, %v9770_v12 }
  0x39   : > { %v454_v44 = vrot.slane %v445_v41, %v9746_v4  ;;  %v450_v45 = vrot.slane %v445_v41, %v9740_v2  ;;  %v462_v46 = vrot.slane %v445_v41, %v9749_v5  ;;  %v458_v47 = vrot.slane %v445_v41, %v9743_v3 }
  0x3a   : > { %v470_v48 = vrot.slane %v445_v41, %v9767_v11  ;;  %v466_v49 = vrot.slane %v445_v41, %v9770_v12  ;;  %v1415_v52 = vrot.slane %v9754_v6, %v9878_v50  ;;  %v1411_v53 = vrot.slane %v9754_v6, %v9881_v51  ;;  %v9934_v6 = vld [vmem:[%s9921_s24 + $0x18] sm:$0xff] }
  0x3b   : > { %1426 = vrot.lane.b32.xlu1 %v1407_v14, %s9609_s19  ;;  %1424 = vrot.lane.b32.xlu0 %v1403_v15, %s9609_s19  ;;  %v1193_v54 = vrot.slane %v9775_v13, %v9878_v50  ;;  %v1189_v55 = vrot.slane %v9775_v13, %v9881_v51  ;;  %v1044_v56 = vrot.slane %v9798_v20, %v9878_v50  ;;  %v9953_v13 = vld [vmem:[%s9921_s24 + $0x28] sm:$0xff]  ;;  %vm868_vm4 = vcmask 1039360  }
  0x3c   : > { %v1040_v57 = vrot.slane %v9798_v20, %v9881_v51  ;;  %v702_v58 = vrot.slane %v9821_v27, %v9878_v50  ;;  %v698_v59 = vrot.slane %v9821_v27, %v9881_v51  ;;  %v851_v60 = vrot.slane %v818_v34, %v9878_v50 }
  0x3d   : > { %v847_v61 = vrot.slane %v818_v34, %v9881_v51  ;;  %v478_v62 = vrot.slane %v445_v41, %v9878_v50  ;;  %v474_v63 = vrot.slane %v445_v41, %v9881_v51  ;;  %v9943_v8 = vpack.c.bf16 %v9931_v1, %v9928_v0 }
  0x3e   : > { %v9947_v9 = vpack.c.bf16 %v9934_v6, %v9937_v7  ;;  %v9961_v14 = vpack.c.bf16 %v9953_v13, %v9950_v10  ;;  %vm495_vm5 = vcmask 777216   ;;  %vm568_vm6 = vcmask 1043456  }
  0x3f   : > { %1196 = vrot.lane.b32.xlu1 %v1169_v16, %s9610_s23  ;;  %1194 = vrot.lane.b32.xlu0 %v1165_v17, %s9610_s23  ;;  %vm1357_vm7 = vcmask 785408   ;;  %vm643_vm8 = vcmask 261120   ;;  %vm1757_vm9 = vcmask 588800   ;;  %vm4056_vm10 = vcmask 130048  }
  0x40   : > { %vm6160_vm11 = vcmask 924672   ;;  %vm5958_vm12 = vcmask 908288   ;;  %vm6032_vm13 = vcmask 138240   ;;  %vm6234_vm14 = vcmask 121856  }
  0x41   : > { %vm6699_vm15 = vcmask 916480  }
  0x43   : > { %1200 = vrot.lane.b32.xlu1 %v1177_v18, %s9610_s23  ;;  %1198 = vrot.lane.b32.xlu0 %v1173_v19, %s9610_s23 }
  0x47   : > { %1204 = vrot.lane.b32.xlu1 %v1185_v21, %s9610_s23  ;;  %1202 = vrot.lane.b32.xlu0 %v1181_v22, %s9610_s23 }
  0x4b   : > { %1047 = vrot.lane.b32.xlu1 %v1020_v23, %s9611_s26  ;;  %1045 = vrot.lane.b32.xlu0 %v1016_v24, %s9611_s26 }
  0x4f   : > { %1051 = vrot.lane.b32.xlu1 %v1028_v25, %s9611_s26  ;;  %1049 = vrot.lane.b32.xlu0 %v1024_v26, %s9611_s26 }
  0x53   : > { %1055 = vrot.lane.b32.xlu1 %v1036_v28, %s9611_s26  ;;  %1053 = vrot.lane.b32.xlu0 %v1032_v29, %s9611_s26 }
  0x57   : > { %705 = vrot.lane.b32.xlu1 %v678_v30, %s9612_s29  ;;  %703 = vrot.lane.b32.xlu0 %v674_v31, %s9612_s29 }
  0x5b   : > { %709 = vrot.lane.b32.xlu1 %v686_v32, %s9612_s29  ;;  %707 = vrot.lane.b32.xlu0 %v682_v33, %s9612_s29 }
  0x5f   : > { %713 = vrot.lane.b32.xlu1 %v694_v35, %s9612_s29  ;;  %711 = vrot.lane.b32.xlu0 %v690_v36, %s9612_s29 }
  0x63   : > { %854 = vrot.lane.b32.xlu1 %v827_v37, %s9613_s13  ;;  %852 = vrot.lane.b32.xlu0 %v823_v38, %s9613_s13 }
  0x67   : > { %858 = vrot.lane.b32.xlu1 %v835_v39, %s9613_s13  ;;  %856 = vrot.lane.b32.xlu0 %v831_v40, %s9613_s13 }
  0x6b   : > { %862 = vrot.lane.b32.xlu1 %v843_v42, %s9613_s13  ;;  %860 = vrot.lane.b32.xlu0 %v839_v43, %s9613_s13 }
  0x6f   : > { %481 = vrot.lane.b32.xlu1 %v454_v44, %s9614_s16  ;;  %479 = vrot.lane.b32.xlu0 %v450_v45, %s9614_s16 }
  0x73   : > { %485 = vrot.lane.b32.xlu1 %v462_v46, %s9614_s16  ;;  %483 = vrot.lane.b32.xlu0 %v458_v47, %s9614_s16 }
  0x77   : > { %489 = vrot.lane.b32.xlu1 %v470_v48, %s9614_s16  ;;  %487 = vrot.lane.b32.xlu0 %v466_v49, %s9614_s16 }
  0x7b   : > { %1430 = vrot.lane.b32.xlu1 %v1415_v52, %s9609_s19  ;;  %1428 = vrot.lane.b32.xlu0 %v1411_v53, %s9609_s19 }
  0x7f   : > { %1208 = vrot.lane.b32.xlu1 %v1193_v54, %s9610_s23  ;;  %1206 = vrot.lane.b32.xlu0 %v1189_v55, %s9610_s23 }
  0x83   : > { %1059 = vrot.lane.b32.xlu1 %v1044_v56, %s9611_s26  ;;  %1057 = vrot.lane.b32.xlu0 %v1040_v57, %s9611_s26 }
  0x87   : > { %717 = vrot.lane.b32.xlu1 %v702_v58, %s9612_s29  ;;  %715 = vrot.lane.b32.xlu0 %v698_v59, %s9612_s29 }
  0x8b   : > { %866 = vrot.lane.b32.xlu1 %v851_v60, %s9613_s13  ;;  %864 = vrot.lane.b32.xlu0 %v847_v61, %s9613_s13 }
  0x8f   : > { %493 = vrot.lane.b32.xlu1 %v478_v62, %s9614_s16  ;;  %491 = vrot.lane.b32.xlu0 %v474_v63, %s9614_s16 }
  0x93   : > { %1341 = vrot.lane.b32.xlu0 %v9943_v8, %s9615_s25  ;;  %1343 = vrot.lane.b32.xlu1 %v9947_v9, %s9615_s25 }
  0x97   : > { %1345 = vrot.lane.b32.xlu0 %v9961_v14, %s9615_s25 }
  0xa5   : > { %v1421_v15 = vpop.permute.xlu1 %1420  ;;  %v1417_v16 = vpop.permute.xlu0 %1416 }
  0xa6   : > { %v1449_v22 = vmul.f32 %v1417_v16, %v9928_v0 }
  0xa9   : > { %v1423_v17 = vpop.permute.xlu1 %1422  ;;  %v1419_v18 = vpop.permute.xlu0 %1418 }
  0xaa   : > { %v1435_v19 = vsel %vm570_vm0, %v1421_v15, %v1423_v17  ;;  %v1433_v20 = vsel %vm570_vm0, %v1417_v16, %v1419_v18  ;;  %v1434_v21 = vsel %vm570_vm0, %v1419_v18, %v1421_v15 }
  0xab   : > { %v1452_v23 = vmul.f32 %v1435_v19, %v9934_v6  ;;  %v1450_v24 = vmul.f32 %v1433_v20, %v9931_v1  ;;  %v1451_v25 = vmul.f32 %v1434_v21, %v9937_v7 }
  0xad   : > { %v9972_v26 = vpop.permute.xlu1 %1426  ;;  %v1425_v27 = vpop.permute.xlu0 %1424  ;;  %v8589_v28 = vpack.c.bf16 %v1452_v23, %v1451_v25  ;;  %v8588_v29 = vpack.c.bf16 %v1450_v24, %v1449_v22 }
  0xae   : > { %v1436_v30 = vsel %vm570_vm0, %v1423_v17, %v1425_v27  ;;  %v1437_v31 = vsel %vm570_vm0, %v1425_v27, %v9972_v26 }
  0xaf   : > { %v1453_v32 = vmul.f32 %v1436_v30, %v9950_v10  ;;  %v1454_v33 = vmul.f32 %v1437_v31, %v9953_v13  ;;  %1492 = vrot.lane.b32.xlu1 %v8589_v28, %s9614_s16  ;;  %1490 = vrot.lane.b32.xlu0 %v8588_v29, %s9614_s16 }
  0xb1   : > { %v1197_v34 = vpop.permute.xlu1 %1196  ;;  %v1195_v35 = vpop.permute.xlu0 %1194  ;;  %v8590_v36 = vpack.c.bf16 %v1454_v33, %v1453_v32 }
  0xb2   : > { %v1211_v37 = vsel %vm793_vm1, %v1195_v35, %v1197_v34  ;;  %v1227_v38 = vmul.f32 %v1195_v35, %v9928_v0 }
  0xb3   : > { %v1228_v39 = vmul.f32 %v1211_v37, %v9931_v1  ;;  %1494 = vrot.lane.b32.xlu0 %v8590_v36, %s9614_s16 }
  0xb5   : > { %v1201_v40 = vpop.permute.xlu1 %1200  ;;  %v1199_v41 = vpop.permute.xlu0 %1198  ;;  %v8578_v42 = vpack.c.bf16 %v1228_v39, %v1227_v38 }
  0xb6   : > { %v1212_v43 = vsel %vm793_vm1, %v1197_v34, %v1199_v41  ;;  %v1213_v44 = vsel %vm793_vm1, %v1199_v41, %v1201_v40 }
  0xb7   : > { %v1229_v45 = vmul.f32 %v1212_v43, %v9937_v7  ;;  %v1230_v46 = vmul.f32 %v1213_v44, %v9934_v6  ;;  %1268 = vrot.lane.b32.xlu1 %v8578_v42, %s9612_s29 }
  0xb9   : > { %v9990_v47 = vpop.permute.xlu1 %1204  ;;  %v1203_v48 = vpop.permute.xlu0 %1202  ;;  %v8579_v49 = vpack.c.bf16 %v1230_v46, %v1229_v45 }
  0xba   : > { %v1214_v52 = vsel %vm793_vm1, %v1201_v40, %v1203_v48  ;;  %v1215_v53 = vsel %vm793_vm1, %v1203_v48, %v9990_v47 }
  0xbb   : > { %v1231_v54 = vmul.f32 %v1214_v52, %v9950_v10  ;;  %v1232_v55 = vmul.f32 %v1215_v53, %v9953_v13  ;;  %1270 = vrot.lane.b32.xlu0 %v8579_v49, %s9612_s29 }
  0xbd   : > { %v1048_v56 = vpop.permute.xlu1 %1047  ;;  %v1046_v57 = vpop.permute.xlu0 %1045  ;;  %v8580_v58 = vpack.c.bf16 %v1232_v55, %v1231_v54 }
  0xbe   : > { %v1062_v59 = vsel %vm942_vm2, %v1046_v57, %v1048_v56  ;;  %v1078_v60 = vmul.f32 %v1046_v57, %v9928_v0 }
  0xbf   : > { %v1079_v61 = vmul.f32 %v1062_v59, %v9931_v1  ;;  %1272 = vrot.lane.b32.xlu1 %v8580_v58, %s9612_s29 }
  0xc1   : > { %v1052_v62 = vpop.permute.xlu1 %1051  ;;  %v1050_v63 = vpop.permute.xlu0 %1049  ;;  %v8573_v15 = vpack.c.bf16 %v1079_v61, %v1078_v60 }
  0xc2   : > { %v1063_v16 = vsel %vm942_vm2, %v1048_v56, %v1050_v63  ;;  %v1064_v17 = vsel %vm942_vm2, %v1050_v63, %v1052_v62 }
  0xc3   : > { %v1080_v18 = vmul.f32 %v1063_v16, %v9937_v7  ;;  %v1081_v19 = vmul.f32 %v1064_v17, %v9934_v6  ;;  %1119 = vrot.lane.b32.xlu1 %v8573_v15, %s9613_s13 }
  0xc5   : > { %v10007_v20 = vpop.permute.xlu1 %1055  ;;  %v1054_v21 = vpop.permute.xlu0 %1053  ;;  %v8574_v22 = vpack.c.bf16 %v1081_v19, %v1080_v18 }
  0xc6   : > { %v1065_v23 = vsel %vm942_vm2, %v1052_v62, %v1054_v21  ;;  %v1066_v24 = vsel %vm942_vm2, %v1054_v21, %v10007_v20 }
  0xc7   : > { %v1082_v25 = vmul.f32 %v1065_v23, %v9950_v10  ;;  %v1083_v27 = vmul.f32 %v1066_v24, %v9953_v13  ;;  %1121 = vrot.lane.b32.xlu0 %v8574_v22, %s9613_s13 }
  0xc9   : > { %v706_v28 = vpop.permute.xlu1 %705  ;;  %v704_v29 = vpop.permute.xlu0 %703  ;;  %v8575_v30 = vpack.c.bf16 %v1083_v27, %v1082_v25 }
  0xca   : > { %v720_v31 = vsel %vm719_vm3, %v704_v29, %v706_v28  ;;  %v736_v32 = vmul.f32 0.0, %v704_v29 }
  0xcb   : > { %v737_v33 = vmul.f32 %v720_v31, %v9928_v0  ;;  %1123 = vrot.lane.b32.xlu1 %v8575_v30, %s9613_s13  ;;  %v13270_v30 = vmov 0  }
  0xcc   : > { %1818 = vmatprep.mubr.bf16.mxu0 %v13270_v30  ;;  %8852 = vset.pattern.permute.xlu1 %v13270_v30 }
  0xcd   : > { %v710_v34 = vpop.permute.xlu1 %709  ;;  %v708_v35 = vpop.permute.xlu0 %707  ;;  %v8559_v36 = vpack.c.bf16 %v737_v33, %v736_v32  ;;  %1861 = vmatprep.mubr.bf16.mxu1 %v13270_v30  ;;  %8851 = vset.pattern.permute.xlu0 %v13270_v30 }
  0xce   : > { %v721_v37 = vsel %vm719_vm3, %v706_v28, %v708_v35  ;;  %v722_v38 = vsel %vm719_vm3, %v708_v35, %v710_v34 }
  0xcf   : > { %v738_v39 = vmul.f32 %v721_v37, %v9931_v1  ;;  %v739_v40 = vmul.f32 %v722_v38, %v9937_v7  ;;  %777 = vrot.lane.b32.xlu0 %v8559_v36, %s9610_s23 }
  0xd1   : > { %v10023_v41 = vpop.permute.xlu1 %713  ;;  %v712_v42 = vpop.permute.xlu0 %711  ;;  %v8560_v43 = vpack.c.bf16 %v739_v40, %v738_v39 }
  0xd2   : > { %v723_v44 = vsel %vm719_vm3, %v710_v34, %v712_v42  ;;  %v724_v45 = vsel %vm719_vm3, %v712_v42, %v10023_v41 }
  0xd3   : > { %v740_v46 = vmul.f32 %v723_v44, %v9934_v6  ;;  %v741_v48 = vmul.f32 %v724_v45, %v9950_v10  ;;  %779 = vrot.lane.b32.xlu1 %v8560_v43, %s9610_s23 }
  0xd5   : > { %v855_v49 = vpop.permute.xlu1 %854  ;;  %v853_v52 = vpop.permute.xlu0 %852  ;;  %v8561_v53 = vpack.c.bf16 %v741_v48, %v740_v46  ;;  %v13272_v46 = vmov 0.0  }
  0xd6   : > { %v869_v54 = vsel %vm868_vm4, %v853_v52, %v855_v49  ;;  %v885_v55 = vmul.f32 0.0, %v853_v52  ;;  %v8554_v48 = vpack.c.bf16 %v9928_v0, %v13272_v46 }
  0xd7   : > { %v886_v56 = vmul.f32 %v869_v54, %v9928_v0  ;;  %781 = vrot.lane.b32.xlu0 %v8561_v53, %s9610_s23  ;;  %v10070_v54 = vld [vmem:[%s9921_s24 + $0x30] sm:$0xff] }
  0xd9   : > { %v859_v57 = vpop.permute.xlu1 %858  ;;  %v857_v58 = vpop.permute.xlu0 %856  ;;  %v8564_v59 = vpack.c.bf16 %v886_v56, %v885_v55  ;;  %v10073_v55 = vld [vmem:[%s9921_s24 + $0x38] sm:$0xff]  ;;  %s9625_s24 = smov 16  }
  0xda   : > { %v870_v60 = vsel %vm868_vm4, %v855_v49, %v857_v58  ;;  %v871_v61 = vsel %vm868_vm4, %v857_v58, %v859_v57 }
  0xdb   : > { %v887_v62 = vmul.f32 %v870_v60, %v9931_v1  ;;  %v888_v63 = vmul.f32 %v871_v61, %v9937_v7  ;;  %926 = vrot.lane.b32.xlu1 %v8564_v59, %s9611_s26  ;;  %v8555_v59 = vpack.c.bf16 %v9937_v7, %v9931_v1 }
  0xdd   : > { %v10039_v15 = vpop.permute.xlu1 %862  ;;  %v861_v16 = vpop.permute.xlu0 %860  ;;  %v8565_v17 = vpack.c.bf16 %v888_v63, %v887_v62 }
  0xde   : > { %v872_v18 = vsel %vm868_vm4, %v859_v57, %v861_v16  ;;  %v873_v19 = vsel %vm868_vm4, %v861_v16, %v10039_v15 }
  0xdf   : > { %v889_v21 = vmul.f32 %v872_v18, %v9934_v6  ;;  %v890_v22 = vmul.f32 %v873_v19, %v9950_v10  ;;  %928 = vrot.lane.b32.xlu0 %v8565_v17, %s9611_s26 }
  0xe1   : > { %v482_v23 = vpop.permute.xlu1 %481  ;;  %v480_v24 = vpop.permute.xlu0 %479  ;;  %v8566_v25 = vpack.c.bf16 %v890_v22, %v889_v21 }
  0xe2   : > { %v496_v27 = vsel %vm495_vm5, %v480_v24, %v482_v23  ;;  %v512_v28 = vmul.f32 0.0, %v480_v24 }
  0xe3   : > { %v513_v29 = vmul.f32 %v496_v27, %v9928_v0  ;;  %930 = vrot.lane.b32.xlu1 %v8566_v25, %s9611_s26  ;;  %v8556_v0 = vpack.c.bf16 %v9950_v10, %v9934_v6 }
  0xe5   : > { %v486_v31 = vpop.permute.xlu1 %485  ;;  %v484_v32 = vpop.permute.xlu0 %483  ;;  %v8549_v33 = vpack.c.bf16 %v513_v29, %v512_v28 }
  0xe6   : > { %v497_v34 = vsel %vm495_vm5, %v482_v23, %v484_v32  ;;  %v498_v35 = vsel %vm495_vm5, %v484_v32, %v486_v31 }
  0xe7   : > { %v514_v36 = vmul.f32 %v497_v34, %v9931_v1  ;;  %v515_v37 = vmul.f32 %v498_v35, %v9937_v7  ;;  %553 = vrot.lane.b32.xlu0 %v8549_v33, %s9609_s19 }
  0xe9   : > { %v10059_v38 = vpop.permute.xlu1 %489  ;;  %v488_v39 = vpop.permute.xlu0 %487  ;;  %v8550_v40 = vpack.c.bf16 %v515_v37, %v514_v36  ;;  %v13274_v37 = vmov 0.0|0.0  }
  0xea   : > { %v499_v42 = vsel %vm495_vm5, %v486_v31, %v488_v39  ;;  %v500_v43 = vsel %vm495_vm5, %v488_v39, %v10059_v38 }
  0xeb   : > { %v516_v44 = vmul.f32 %v499_v42, %v9934_v6  ;;  %v517_v45 = vmul.f32 %v500_v43, %v9950_v10  ;;  %555 = vrot.lane.b32.xlu1 %v8550_v40, %s9609_s19 }
  0xed   : > { %v1431_v49 = vpop.permute.xlu1 %1430  ;;  %v1429_v52 = vpop.permute.xlu0 %1428  ;;  %v8551_v53 = vpack.c.bf16 %v517_v45, %v516_v44 }
  0xee   : > { %v1438_v56 = vsel %vm570_vm0, %v9972_v26, %v1429_v52  ;;  %v1439_v57 = vsel %vm570_vm0, %v1429_v52, %v1431_v49  ;;  %v1457_v58 = vmul.f32 0.0, %v1431_v49 }
  0xef   : > { %627 = vrot.lane.b32.xlu1 %v8554_v48, %s9618_s27  ;;  %557 = vrot.lane.b32.xlu0 %v8551_v53, %s9609_s19  ;;  %v1455_v60 = vmul.f32 %v1438_v56, %v10070_v54  ;;  %v1456_v61 = vmul.f32 %v1439_v57, %v10073_v55 }
  0xf0   : > { %v8592_v17 = vpack.c.bf16 %v1457_v58, %v1457_v58 }
  0xf1   : > { %v1209_v62 = vpop.permute.xlu1 %1208  ;;  %v1207_v26 = vpop.permute.xlu0 %1206  ;;  %v8591_v18 = vpack.c.bf16 %v1456_v61, %v1455_v60 }
  0xf2   : > { %v1216_v63 = vsel %vm793_vm1, %v9990_v47, %v1207_v26  ;;  %v1217_v16 = vsel %vm793_vm1, %v1207_v26, %v1209_v62  ;;  %v1235_v19 = vmul.f32 0.0, %v1209_v62  ;;  %v10097_v47 = vpack.c.bf16 %v10073_v55, %v10070_v54 }
  0xf3   : > { %631 = vrot.lane.b32.xlu1 %v8556_v0, %s9618_s27  ;;  %629 = vrot.lane.b32.xlu0 %v8555_v59, %s9618_s27  ;;  %v1233_v6 = vmul.f32 %v1216_v63, %v10070_v54  ;;  %v1234_v1 = vmul.f32 %v1217_v16, %v10073_v55  ;;  %v8558_v26 = vpack.c.bf16 %v10073_v55, %v10073_v55  ;;  %v1561_v16 = vld [vmem:[%s13260_s2 + $0x8] sm:$0xff] }
  0xf4   : > { %v8582_v28 = vpack.c.bf16 %v1235_v19, %v1235_v19  ;;  %v10170_v19 = vld [vmem:[%s13265_s7 + $0x1] ss:$2 sm:$0xff] }
  0xf5   : > { %v1060_v7 = vpop.permute.xlu1 %1059  ;;  %v1058_v10 = vpop.permute.xlu0 %1057  ;;  %v8581_v25 = vpack.c.bf16 %v1234_v1, %v1233_v6 }
  0xf6   : > { %v1067_v21 = vsel %vm942_vm2, %v10007_v20, %v1058_v10  ;;  %v1068_v22 = vsel %vm942_vm2, %v1058_v10, %v1060_v7  ;;  %v1086_v27 = vmul.f32 0.0, %v1060_v7 }
  0xf7   : > { %1498 = vrot.lane.b32.xlu1 %v8592_v17, %s9614_s16  ;;  %1496 = vrot.lane.b32.xlu0 %v8591_v18, %s9614_s16  ;;  %v1084_v29 = vmul.f32 %v1067_v21, %v10070_v54  ;;  %v1085_v31 = vmul.f32 %v1068_v22, %v10073_v55  ;;  %v2845_v21 = vrot.slane %v10170_v19, %v9740_v2 }
  0xf8   : > { %v8577_v39 = vpack.c.bf16 %v1086_v27, %v1086_v27  ;;  %v2849_v22 = vrot.slane %v10170_v19, %v9746_v4 }
  0xf9   : > { %v718_v23 = vpop.permute.xlu1 %717  ;;  %v716_v24 = vpop.permute.xlu0 %715  ;;  %v8576_v40 = vpack.c.bf16 %v1085_v31, %v1084_v29  ;;  %v2857_v29 = vrot.slane %v10170_v19, %v9749_v5 }
  0xfa   : > { %v725_v20 = vsel %vm719_vm3, %v10023_v41, %v716_v24  ;;  %v726_v34 = vsel %vm719_vm3, %v716_v24, %v718_v23 }
  0xfb   : > { %1347 = vrot.lane.b32.xlu1 %v10097_v47, %s9615_s25  ;;  %1274 = vrot.lane.b32.xlu0 %v8581_v25, %s9612_s29  ;;  %v742_v42 = vmul.f32 %v725_v20, %v9953_v13  ;;  %v743_v43 = vmul.f32 %v726_v34, %v10070_v54 }
  0xfd   : > { %v867_v32 = vpop.permute.xlu1 %866  ;;  %v865_v33 = vpop.permute.xlu0 %864  ;;  %v8562_v53 = vpack.c.bf16 %v743_v43, %v742_v42 }
  0xfe   : > { %v874_v35 = vsel %vm868_vm4, %v10039_v15, %v865_v33  ;;  %v875_v36 = vsel %vm868_vm4, %v865_v33, %v867_v32  ;;  %v744_v15 = vmul.f32 %v718_v23, %v10073_v55  ;;  %v893_v45 = vmul.f32 %v867_v32, %v10073_v55  ;;  %v10188_v32 = vld [vmem:[%s13265_s7] ss:$2 sm:$0xff] }
  0xff   : > { %1349 = vrot.lane.b32.xlu1 %v13274_v37, %s9615_s25  ;;  %1276 = vrot.lane.b32.xlu0 %v8582_v28, %s9612_s29  ;;  %v891_v41 = vmul.f32 %v874_v35, %v9953_v13  ;;  %v892_v44 = vmul.f32 %v875_v36, %v10070_v54  ;;  %v2853_v28 = vrot.slane %v10170_v19, %v9743_v3 }
 0x100   : > { %v8568_v58 = vpack.c.bf16 %v893_v45, %v893_v45  ;;  %v8563_v0 = vpack.c.bf16 %v744_v15, %v744_v15 }
 0x101   : > { %v494_v48 = vpop.permute.xlu1 %493  ;;  %v492_v49 = vpop.permute.xlu0 %491  ;;  %v8567_v52 = vpack.c.bf16 %v892_v44, %v891_v41 }
 0x102   : > { %v501_v56 = vsel %vm495_vm5, %v10059_v38, %v492_v49  ;;  %v502_v57 = vsel %vm495_vm5, %v492_v49, %v494_v48  ;;  %v520_v61 = vmul.f32 %v494_v48, %v10073_v55  ;;  %v8557_v38 = vpack.c.bf16 %v10070_v54, %v9953_v13 }
 0x103   : > { %1127 = vrot.lane.b32.xlu1 %v8577_v39, %s9613_s13  ;;  %1125 = vrot.lane.b32.xlu0 %v8576_v40, %s9613_s13  ;;  %v518_v59 = vmul.f32 %v501_v56, %v9953_v13  ;;  %v519_v60 = vmul.f32 %v502_v57, %v10070_v54  ;;  %v10148_v13 = vld [vmem:[%s13265_s7] ss:$2 sm:$0xff]  ;;  %v2563_v39 = vrot.slane %v10188_v32, %v9740_v2 }
 0x104   : > { %v8553_v63 = vpack.c.bf16 %v520_v61, %v520_v61  ;;  %v1560_v54 = vld [vmem:[%s13260_s2] sm:$0xff]  ;;  %v3055_v55 = vrot.slane %v10148_v13, %v9740_v2  ;;  %v3059_v6 = vrot.slane %v10148_v13, %v9746_v4  ;;  %v3063_v10 = vrot.slane %v10148_v13, %v9743_v3 }
 0x105   : > { %v8552_v62 = vpack.c.bf16 %v519_v60, %v518_v59  ;;  %v1342_v17 = vpop.permute.xlu0 %1341  ;;  %v10157_v1 = vpop.permute.xlu1 %1343  ;;  %v3067_v18 = vrot.slane %v10148_v13, %v9749_v5  ;;  %v2567_v40 = vrot.slane %v10188_v32, %v9746_v4 }
 0x106   : > { %v1351_v42 = vrot.slane %v1342_v17, 4  ;;  %v1352_v43 = vrot.slane %v10157_v1, 4 }
 0x107   : > { %932 = vrot.lane.b32.xlu1 %v8567_v52, %s9611_s26  ;;  %783 = vrot.lane.b32.xlu0 %v8562_v53, %s9610_s23  ;;  %v2571_v52 = vrot.slane %v10188_v32, %v9743_v3  ;;  %v2575_v53 = vrot.slane %v10188_v32, %v9749_v5 }
 0x109   : > { %v10159_v7 = vpop.permute.xlu0 %1345 }
 0x10a   : > { %v1353_v56 = vrot.slane %v10159_v7, 4 }
 0x10b   : > { %934 = vrot.lane.b32.xlu1 %v8568_v58, %s9611_s26  ;;  %785 = vrot.lane.b32.xlu0 %v8563_v0, %s9610_s23  ;;  %v1356_v58 = vsel %vm568_vm6, %v1351_v42, %v1352_v43  ;;  %v10220_v0 = vld [vmem:[%s13265_s7 + $0x1] ss:$2 sm:$0xff] }
 0x10f   : > { %633 = vrot.lane.b32.xlu1 %v8557_v38, %s9618_s27  ;;  %559 = vrot.lane.b32.xlu0 %v8552_v62, %s9609_s19  ;;  %v1358_v38 = vsel %vm1357_vm7, %v1342_v17, %v1356_v58  ;;  %v2353_v62 = vrot.slane %v10220_v0, %v9740_v2 }
 0x113   : > { %635 = vrot.lane.b32.xlu1 %v8558_v26, %s9618_s27  ;;  %561 = vrot.lane.b32.xlu0 %v8553_v63, %s9609_s19  ;;  %v2357_v26 = vrot.slane %v10220_v0, %v9746_v4 }
 0x117   : > { %1569 = vperm.xlu1 %8852, %v1561_v16   ;;  %1564 = vperm.xlu0 %8851, %v1560_v54   ;;  %v1359_v16 = vsel %vm568_vm6, %v1352_v43, %v1353_v56  ;;  %v10270_v43 = vld [vmem:[%s13265_s7 + $0x1] ss:$2 sm:$0xff] }
 0x11b   : > { %3084 = vrot.lane.b32.xlu1 %v3055_v55, %s9610_s23  ;;  %3086 = vrot.lane.b32.xlu0 %v3059_v6, %s9610_s23 }
 0x11f   : > { %3088 = vrot.lane.b32.xlu1 %v3063_v10, %s9610_s23  ;;  %3090 = vrot.lane.b32.xlu0 %v3067_v18, %s9610_s23  ;;  %v1360_v18 = vsel %vm1357_vm7, %v10157_v1, %v1359_v16 }
 0x121   : > { %v1493_v23 = vpop.permute.xlu1 %1492  ;;  %v1491_v24 = vpop.permute.xlu0 %1490 }
 0x122   : > { %v1501_v25 = vrot.slane %v1493_v23, 4  ;;  %v1500_v27 = vrot.slane %v1491_v24, 4 }
 0x123   : > { %2874 = vrot.lane.b32.xlu1 %v2845_v21, %s9611_s26  ;;  %2876 = vrot.lane.b32.xlu0 %v2849_v22, %s9611_s26  ;;  %v2361_v21 = vrot.slane %v10220_v0, %v9743_v3  ;;  %v2365_v22 = vrot.slane %v10220_v0, %v9749_v5 }
 0x124   : > { %v1505_v31 = vsel %vm568_vm6, %v1500_v27, %v1501_v25 }
 0x125   : > { %v10190_v33 = vpop.permute.xlu0 %1494  ;;  %v1507_v20 = vsel %vm495_vm5, %v1491_v24, %v1505_v31  ;;  %v10251_v24 = vld [vmem:[%s13265_s7] ss:$2 sm:$0xff] }
 0x126   : > { %v1502_v34 = vrot.slane %v10190_v33, 4  ;;  %v8088_v35 = vcombine.high %v1507_v20, %v1507_v20  ;;  %v8087_v36 = vcombine.low %v1507_v20, %v1507_v20  ;;  %v2021_v31 = vrot.slane %v10251_v24, %v9746_v4 }
 0x127   : > { %2878 = vrot.lane.b32.xlu1 %v2853_v28, %s9611_s26  ;;  %2880 = vrot.lane.b32.xlu0 %v2857_v29, %s9611_s26  ;;  %v2017_v29 = vrot.slane %v10251_v24, %v9740_v2 }
 0x128   : > { %8095 = vmatprep.subr.msk.bf16.mxu0 %vm568_vm6, %v8088_v35  ;;  %v1763_v41 = vsel %vm568_vm6, %v8087_v36, 0  ;;  %v1508_v44 = vsel %vm568_vm6, %v1501_v25, %v1502_v34 }
 0x129   : > { %1793 = vmatpush1.bf16.msra.mxu0 %v1763_v41  ;;  %v1509_v15 = vsel %vm495_vm5, %v1493_v23, %v1508_v44  ;;  %v1269_v49 = vpop.permute.xlu1 %1268 }
 0x12a   : > { %v8090_v45 = vcombine.high %v1509_v15, %v1509_v15  ;;  %v8089_v48 = vcombine.low %v1509_v15, %v1509_v15  ;;  %v1278_v60 = vrot.slane %v1269_v49, 4 }
 0x12b   : > { %2592 = vrot.lane.b32.xlu1 %v2563_v39, %s9613_s13  ;;  %2594 = vrot.lane.b32.xlu0 %v2567_v40, %s9613_s13  ;;  %v2025_v39 = vrot.slane %v10251_v24, %v9743_v3  ;;  %v2029_v40 = vrot.slane %v10251_v24, %v9749_v5 }
 0x12c   : > { %8097 = vmatprep.subr.msk.bf16.mxu1 %vm568_vm6, %v8090_v45  ;;  %v1769_v57 = vsel %vm568_vm6, %v8089_v48, 0 }
 0x12d   : > { %1836 = vmatpush1.bf16.msra.mxu1 %v1769_v57  ;;  %v1271_v59 = vpop.permute.xlu0 %1270 }
 0x12e   : > { %v1279_v61 = vrot.slane %v1271_v59, 4 }
 0x12f   : > { %2596 = vrot.lane.b32.xlu1 %v2571_v52, %s9613_s13  ;;  %2598 = vrot.lane.b32.xlu0 %v2575_v53, %s9613_s13  ;;  %v3395_v52 = vrot.slane %v10270_v43, %v9746_v4 }
 0x130   : > { %v1283_v63 = vsel %vm568_vm6, %v1278_v60, %v1279_v61  ;;  %v3403_v60 = vrot.slane %v10270_v43, %v9749_v5  ;;  %v3083_v5 = vrot.slane %v10148_v13, %v9878_v50 }
 0x131   : > { %v10233_v54 = vpop.permute.xlu1 %1272  ;;  %v1285_v17 = vsel %vm719_vm3, %v1269_v49, %v1283_v63  ;;  %v3391_v49 = vrot.slane %v10270_v43, %v9740_v2 }
 0x132   : > { %v1280_v55 = vrot.slane %v10233_v54, 4  ;;  %v8080_v6 = vcombine.high %v1285_v17, %v1358_v38  ;;  %v8079_v10 = vcombine.low %v1285_v17, %v1358_v38  ;;  %v2861_v17 = vrot.slane %v10170_v19, %v9770_v12 }
 0x133   : > { %2382 = vrot.lane.b32.xlu1 %v2353_v62, %s9612_s29  ;;  %2384 = vrot.lane.b32.xlu0 %v2357_v26, %s9612_s29 }
 0x134   : > { %1794 = vmatprep.subr.bf16.mxu0 %v8080_v6  ;;  %v1286_v23 = vsel %vm568_vm6, %v1279_v61, %v1280_v55  ;;  %v3071_v61 = vrot.slane %v10148_v13, %v9770_v12  ;;  %v2865_v6 = vrot.slane %v10170_v19, %v9767_v11 }
 0x135   : > { %1795 = vmatpush1.bf16.msra.mxu0 %v8079_v10  ;;  %v1287_v1 = vsel %vm719_vm3, %v1271_v59, %v1286_v23  ;;  %v1120_v28 = vpop.permute.xlu1 %1119  ;;  %v3399_v59 = vrot.slane %v10270_v43, %v9743_v3  ;;  %v3079_v3 = vrot.slane %v10148_v13, %v9881_v51 }
 0x136   : > { %v8082_v25 = vcombine.high %v1287_v1, %v1360_v18  ;;  %v8081_v27 = vcombine.low %v1287_v1, %v1360_v18  ;;  %v1129_v35 = vrot.slane %v1120_v28, 4  ;;  %v2869_v1 = vrot.slane %v10170_v19, %v9881_v51 }
 0x137   : > { %2386 = vrot.lane.b32.xlu1 %v2361_v21, %s9612_s29  ;;  %2388 = vrot.lane.b32.xlu0 %v2365_v22, %s9612_s29 }
 0x138   : > { %1837 = vmatprep.subr.bf16.mxu1 %v8082_v25  ;;  %v2873_v25 = vrot.slane %v10170_v19, %v9878_v50  ;;  %v2579_v19 = vrot.slane %v10188_v32, %v9770_v12 }
 0x139   : > { %1838 = vmatpush1.bf16.msra.mxu1 %v8081_v27  ;;  %v1122_v20 = vpop.permute.xlu0 %1121 }
 0x13a   : > { %v1130_v36 = vrot.slane %v1122_v20, 4 }
 0x13b   : > { %2046 = vrot.lane.b32.xlu1 %v2017_v29, %s9614_s16  ;;  %2048 = vrot.lane.b32.xlu0 %v2021_v31, %s9614_s16 }
 0x13c   : > { %v1134_v42 = vsel %vm568_vm6, %v1129_v35, %v1130_v36 }
 0x13d   : > { %v10272_v41 = vpop.permute.xlu1 %1123  ;;  %v1136_v44 = vsel %vm868_vm4, %v1120_v28, %v1134_v42 }
 0x13e   : > { %v1131_v15 = vrot.slane %v10272_v41, 4  ;;  %v8072_v45 = vcombine.high %v9943_v8, %v1136_v44  ;;  %v8071_v48 = vcombine.low %v9943_v8, %v1136_v44 }
 0x13f   : > { %2050 = vrot.lane.b32.xlu1 %v2025_v39, %s9614_s16  ;;  %2052 = vrot.lane.b32.xlu0 %v2029_v40, %s9614_s16  ;;  %v2583_v40 = vrot.slane %v10188_v32, %v9767_v11 }
 0x140   : > { %1796 = vmatprep.subr.bf16.mxu0 %v8072_v45  ;;  %v1137_v53 = vsel %vm568_vm6, %v1130_v36, %v1131_v15 }
 0x141   : > { %1797 = vmatpush1.bf16.msra.mxu0 %v8071_v48  ;;  %v1138_v57 = vsel %vm868_vm4, %v1122_v20, %v1137_v53  ;;  %v778_v38 = vpop.permute.xlu0 %777  ;;  %v2591_v53 = vrot.slane %v10188_v32, %v9878_v50 }
 0x142   : > { %v8074_v8 = vcombine.high %v9947_v9, %v1138_v57  ;;  %v8073_v58 = vcombine.low %v9947_v9, %v1138_v57  ;;  %v3075_v9 = vrot.slane %v10148_v13, %v9767_v11  ;;  %v787_v10 = vrot.slane %v778_v38, 4 }
 0x143   : > { %3420 = vrot.lane.b32.xlu1 %v3391_v49, %s9609_s19  ;;  %3422 = vrot.lane.b32.xlu0 %v3395_v52, %s9609_s19  ;;  %v2587_v52 = vrot.slane %v10188_v32, %v9881_v51 }
 0x144   : > { %1839 = vmatprep.subr.bf16.mxu1 %v8074_v8 }
 0x145   : > { %1840 = vmatpush1.bf16.msra.mxu1 %v8073_v58  ;;  %v780_v62 = vpop.permute.xlu1 %779  ;;  %v2369_v58 = vrot.slane %v10220_v0, %v9770_v12 }
 0x146   : > { %v788_v63 = vrot.slane %v780_v62, 4 }
 0x147   : > { %3424 = vrot.lane.b32.xlu1 %v3399_v59, %s9609_s19  ;;  %3426 = vrot.lane.b32.xlu0 %v3403_v60, %s9609_s19  ;;  %v2373_v59 = vrot.slane %v10220_v0, %v9767_v11 }
 0x148   : > { %v792_v23 = vsel %vm568_vm6, %v787_v10, %v788_v63 }
 0x149   : > { %v10308_v26 = vpop.permute.xlu0 %781  ;;  %v794_v29 = vsel %vm793_vm1, %v778_v38, %v792_v23 }
 0x14a   : > { %v789_v21 = vrot.slane %v10308_v26, 4 }
 0x14b   : > { %3092 = vrot.lane.b32.xlu1 %v3071_v61, %s9610_s23  ;;  %3094 = vrot.lane.b32.xlu0 %v3075_v9, %s9610_s23 }
 0x14c   : > { %v795_v39 = vsel %vm568_vm6, %v788_v63, %v789_v21 }
 0x14d   : > { %v927_v16 = vpop.permute.xlu1 %926  ;;  %v796_v44 = vsel %vm793_vm1, %v780_v62, %v795_v39  ;;  %v2377_v62 = vrot.slane %v10220_v0, %v9881_v51 }
 0x14e   : > { %v936_v22 = vrot.slane %v927_v16, 4 }
 0x14f   : > { %3096 = vrot.lane.b32.xlu1 %v3079_v3, %s9610_s23  ;;  %3098 = vrot.lane.b32.xlu0 %v3083_v5, %s9610_s23  ;;  %v2381_v3 = vrot.slane %v10220_v0, %v9878_v50  ;;  %v2037_v0 = vrot.slane %v10251_v24, %v9767_v11 }
 0x151   : > { %v929_v18 = vpop.permute.xlu0 %928 }
 0x152   : > { %v937_v13 = vrot.slane %v929_v18, 4 }
 0x153   : > { %2882 = vrot.lane.b32.xlu1 %v2861_v17, %s9611_s26  ;;  %2884 = vrot.lane.b32.xlu0 %v2865_v6, %s9611_s26 }
 0x154   : > { %v941_v27 = vsel %vm568_vm6, %v936_v22, %v937_v13  ;;  %v2033_v22 = vrot.slane %v10251_v24, %v9770_v12 }
 0x155   : > { %v10325_v28 = vpop.permute.xlu1 %930  ;;  %v943_v31 = vsel %vm942_vm2, %v927_v16, %v941_v27 }
 0x156   : > { %v938_v20 = vrot.slane %v10325_v28, 4  ;;  %v8064_v35 = vcombine.high %v794_v29, %v943_v31  ;;  %v8063_v36 = vcombine.low %v794_v29, %v943_v31 }
 0x157   : > { %2886 = vrot.lane.b32.xlu1 %v2869_v1, %s9611_s26  ;;  %2888 = vrot.lane.b32.xlu0 %v2873_v25, %s9611_s26  ;;  %v2041_v1 = vrot.slane %v10251_v24, %v9881_v51 }
 0x158   : > { %1798 = vmatprep.subr.bf16.mxu0 %v8064_v35  ;;  %v944_v42 = vsel %vm568_vm6, %v937_v13, %v938_v20 }
 0x159   : > { %1799 = vmatpush1.bf16.msra.mxu0 %v8063_v36  ;;  %v945_v45 = vsel %vm942_vm2, %v929_v18, %v944_v42  ;;  %v554_v57 = vpop.permute.xlu0 %553 }
 0x15a   : > { %v8066_v48 = vcombine.high %v796_v44, %v945_v45  ;;  %v8065_v49 = vcombine.low %v796_v44, %v945_v45  ;;  %v563_v38 = vrot.slane %v554_v57, 4 }
 0x15b   : > { %2600 = vrot.lane.b32.xlu1 %v2579_v19, %s9613_s13  ;;  %2602 = vrot.lane.b32.xlu0 %v2583_v40, %s9613_s13 }
 0x15c   : > { %1841 = vmatprep.subr.bf16.mxu1 %v8066_v48  ;;  %v2045_v48 = vrot.slane %v10251_v24, %v9878_v50 }
 0x15d   : > { %v556_v8 = vpop.permute.xlu1 %555  ;;  %1842 = vmatpush1.bf16.msra.mxu1 %v8065_v49 }
 0x15e   : > { %v564_v60 = vrot.slane %v556_v8, 4 }
 0x15f   : > { %2604 = vrot.lane.b32.xlu1 %v2587_v52, %s9613_s13  ;;  %2606 = vrot.lane.b32.xlu0 %v2591_v53, %s9613_s13  ;;  %v10399_v53 = vld [vmem:[%s13259_s1] sm:$0xff]  }
 0x160   : > { %v569_v16 = vsel %vm568_vm6, %v563_v38, %v564_v60 }
 0x161   : > { %v628_v61 = vpop.permute.xlu1 %627  ;;  %v10356_v9 = vpop.permute.xlu0 %557  ;;  %v571_v31 = vsel %vm570_vm0, %v554_v57, %v569_v16  ;;  %v3407_v16 = vrot.slane %v10270_v43, %v9770_v12 }
 0x162   : > { %v565_v32 = vrot.slane %v10356_v9, 4  ;;  %v637_v17 = vrot.slane %v628_v61, 4 }
 0x163   : > { %2390 = vrot.lane.b32.xlu1 %v2369_v58, %s9612_s29  ;;  %2392 = vrot.lane.b32.xlu0 %v2373_v59, %s9612_s29 }
 0x164   : > { %v572_v18 = vsel %vm568_vm6, %v564_v60, %v565_v32 }
 0x165   : > { %v10365_v5 = vpop.permute.xlu1 %631  ;;  %v630_v63 = vpop.permute.xlu0 %629  ;;  %v573_v36 = vsel %vm570_vm0, %v556_v8, %v572_v18 }
 0x166   : > { %v639_v6 = vrot.slane %v10365_v5, 4  ;;  %v638_v10 = vrot.slane %v630_v63, 4 }
 0x167   : > { %2394 = vrot.lane.b32.xlu1 %v2377_v62, %s9612_s29  ;;  %2396 = vrot.lane.b32.xlu0 %v2381_v3, %s9612_s29 }
 0x168   : > { %v645_v13 = vsel %vm568_vm6, %v638_v10, %v639_v6  ;;  %v642_v23 = vsel %vm568_vm6, %v637_v17, %v638_v10 }
 0x169   : > { %v646_v25 = vsel %vm643_vm8, %v630_v63, %v645_v13  ;;  %v1499_v27 = vpop.permute.xlu1 %1498  ;;  %v1497_v29 = vpop.permute.xlu0 %1496  ;;  %v644_v35 = vsel %vm643_vm8, %v628_v61, %v642_v23 }
 0x16a   : > { %v1504_v39 = vrot.slane %v1499_v27, 4  ;;  %v1503_v19 = vrot.slane %v1497_v29, 4  ;;  %v8056_v40 = vcombine.high %v571_v31, %v644_v35  ;;  %v8058_v42 = vcombine.high %v573_v36, %v646_v25 }
 0x16b   : > { %v8055_v44 = vcombine.low %v571_v31, %v644_v35  ;;  %v8057_v45 = vcombine.low %v573_v36, %v646_v25  ;;  %2054 = vrot.lane.b32.xlu1 %v2033_v22, %s9614_s16  ;;  %2056 = vrot.lane.b32.xlu0 %v2037_v0, %s9614_s16  ;;  %v3419_v31 = vrot.slane %v10270_v43, %v9878_v50 }
 0x16c   : > { %v1510_v49 = vsel %vm568_vm6, %v1502_v34, %v1503_v19  ;;  %v1512_v52 = vsel %vm568_vm6, %v1503_v19, %v1504_v39  ;;  %1800 = vmatprep.subr.bf16.mxu0 %v8056_v40  ;;  %1843 = vmatprep.subr.bf16.mxu1 %v8058_v42 }
 0x16d   : > { %v1513_v57 = vsel %vm495_vm5, %v1497_v29, %v1512_v52  ;;  %v1348_v8 = vpop.permute.xlu1 %1347  ;;  %1801 = vmatpush1.bf16.msra.mxu0 %v8055_v44  ;;  %1844 = vmatpush1.bf16.msra.mxu1 %v8057_v45  ;;  %v1275_v58 = vpop.permute.xlu0 %1274  ;;  %v1511_v24 = vsel %vm495_vm5, %v10190_v33, %v1510_v49 }
 0x16e   : > { %v8093_v34 = vcombine.low %v1513_v57, %v1513_v57  ;;  %v8094_v59 = vcombine.high %v1513_v57, %v1513_v57  ;;  %v1354_v60 = vrot.slane %v1348_v8, 4  ;;  %v1281_v61 = vrot.slane %v1275_v58, 4 }
 0x16f   : > { %v8092_v38 = vcombine.high %v1511_v24, %v1511_v24  ;;  %v8091_v62 = vcombine.low %v1511_v24, %v1511_v24  ;;  %2058 = vrot.lane.b32.xlu1 %v2041_v1, %s9614_s16  ;;  %2060 = vrot.lane.b32.xlu0 %v2045_v48, %s9614_s16 }
 0x170   : > { %8096 = vmatmul.mubr.msk.bf16.vlgmr.msra.gmra.mxu0 %vm1757_vm9, %v10399_v53  ;;  %8098 = vmatmul.mubr.msk.bf16.vlgmr.msra.gmra.mxu1 %vm1757_vm9, %v10399_v53  ;;  %v1781_v3 = vsel %vm568_vm6, %v8093_v34, 0  ;;  %v1288_v33 = vsel %vm568_vm6, %v1280_v55, %v1281_v61  ;;  %v1361_v63 = vsel %vm568_vm6, %v1353_v56, %v1354_v60  ;;  %v3411_v56 = vrot.slane %v10270_v43, %v9767_v11 }
 0x171   : > { %8099 = vmatprep.subr.msk.bf16.mxu0 %vm568_vm6, %v8092_v38  ;;  %8101 = vmatprep.subr.msk.bf16.mxu1 %vm568_vm6, %v8094_v59  ;;  %v1350_v17 = vpop.permute.xlu1 %1349  ;;  %v1775_v10 = vsel %vm568_vm6, %v8091_v62, 0  ;;  %v1277_v18 = vpop.permute.xlu0 %1276  ;;  %v1289_v22 = vsel %vm719_vm3, %v10233_v54, %v1288_v33  ;;  %v1362_v55 = vsel %vm1357_vm7, %v10159_v7, %v1361_v63  ;;  %v3415_v11 = vrot.slane %v10270_v43, %v9881_v51 }
 0x172   : > { %v1355_v0 = vrot.slane %v1350_v17, 4  ;;  %1879 = vmatpush1.bf16.msra.mxu0 %v1775_v10  ;;  %1922 = vmatpush1.bf16.msra.mxu1 %v1781_v3  ;;  %v1282_v12 = vrot.slane %v1277_v18, 4  ;;  %v8083_v13 = vcombine.low %v1289_v22, %v1362_v55  ;;  %v8084_v23 = vcombine.high %v1289_v22, %v1362_v55 }
 0x173   : > { %1904 = vmatprep.mubr.bf16.mxu0 %v13270_v30  ;;  %1947 = vmatprep.mubr.bf16.mxu1 %v13270_v30 }
 0x174   : > { %v1363_v1 = vsel %vm568_vm6, %v1354_v60, %v1355_v0  ;;  %v1290_v54 = vsel %vm568_vm6, %v1281_v61, %v1282_v12  ;;  %1880 = vmatprep.subr.bf16.mxu0 %v8084_v23  ;;  %3428 = vrot.lane.b32.xlu1 %v3407_v16, %s9609_s19 }
 0x175   : > { %v1128_v7 = vpop.permute.xlu1 %1127  ;;  %v1126_v25 = vpop.permute.xlu0 %1125  ;;  %v1291_v27 = vsel %vm719_vm3, %v1275_v58, %v1290_v54  ;;  %v1364_v29 = vsel %vm1357_vm7, %v1348_v8, %v1363_v1  ;;  %3430 = vrot.lane.b32.xlu0 %v3411_v56, %s9609_s19 }
 0x176   : > { %v1133_v35 = vrot.slane %v1128_v7, 4  ;;  %1881 = vmatpush1.bf16.msra.mxu0 %v8083_v13  ;;  %v1132_v36 = vrot.slane %v1126_v25, 4  ;;  %v8085_v39 = vcombine.low %v1291_v27, %v1364_v29  ;;  %v8086_v19 = vcombine.high %v1291_v27, %v1364_v29 }
 0x178   : > { %v1141_v40 = vsel %vm568_vm6, %v1132_v36, %v1133_v35  ;;  %1923 = vmatprep.subr.bf16.mxu1 %v8086_v19  ;;  %v1139_v51 = vsel %vm568_vm6, %v1131_v15, %v1132_v36  ;;  %3432 = vrot.lane.b32.xlu1 %v3415_v11, %s9609_s19 }
 0x179   : > { %v1142_v42 = vsel %vm868_vm4, %v1126_v25, %v1141_v40  ;;  %v933_v44 = vpop.permute.xlu1 %932  ;;  %1924 = vmatpush1.bf16.msra.mxu1 %v8085_v39  ;;  %v784_v45 = vpop.permute.xlu0 %783  ;;  %v1140_v50 = vsel %vm868_vm4, %v10272_v41, %v1139_v51  ;;  %3434 = vrot.lane.b32.xlu0 %v3419_v31, %s9609_s19 }
 0x17a   : > { %v8077_v43 = vcombine.low %v10097_v47, %v1142_v42  ;;  %v939_v48 = vrot.slane %v933_v44, 4  ;;  %v790_v49 = vrot.slane %v784_v45, 4  ;;  %v8075_v52 = vcombine.low %v9961_v14, %v1140_v50 }
 0x17b   : > { %v8076_v15 = vcombine.high %v9961_v14, %v1140_v50  ;;  %v8078_v57 = vcombine.high %v10097_v47, %v1142_v42 }
 0x17c   : > { %v797_v8 = vsel %vm568_vm6, %v789_v21, %v790_v49  ;;  %v946_v41 = vsel %vm568_vm6, %v938_v20, %v939_v48 }
 0x17d   : > { %1882 = vmatprep.subr.bf16.mxu0 %v8076_v15  ;;  %1925 = vmatprep.subr.bf16.mxu1 %v8078_v57  ;;  %v935_v58 = vpop.permute.xlu1 %934  ;;  %v786_v24 = vpop.permute.xlu0 %785  ;;  %v798_v34 = vsel %vm793_vm1, %v10308_v26, %v797_v8  ;;  %v947_v14 = vsel %vm942_vm2, %v10325_v28, %v946_v41 }
 0x17e   : > { %v940_v59 = vrot.slane %v935_v58, 4  ;;  %1883 = vmatpush1.bf16.msra.mxu0 %v8075_v52  ;;  %1926 = vmatpush1.bf16.msra.mxu1 %v8077_v43  ;;  %v791_v47 = vrot.slane %v786_v24, 4  ;;  %v8067_v60 = vcombine.low %v798_v34, %v947_v14  ;;  %v8068_v21 = vcombine.high %v798_v34, %v947_v14 }
 0x180   : > { %v948_v61 = vsel %vm568_vm6, %v939_v48, %v940_v59  ;;  %v799_v20 = vsel %vm568_vm6, %v790_v49, %v791_v47  ;;  %1884 = vmatprep.subr.bf16.mxu0 %v8068_v21 }
 0x181   : > { %v634_v38 = vpop.permute.xlu1 %633  ;;  %v560_v62 = vpop.permute.xlu0 %559  ;;  %v800_v3 = vsel %vm793_vm1, %v784_v45, %v799_v20  ;;  %v949_v26 = vsel %vm942_vm2, %v933_v44, %v948_v61 }
 0x182   : > { %v640_v33 = vrot.slane %v634_v38, 4  ;;  %1885 = vmatpush1.bf16.msra.mxu0 %v8067_v60  ;;  %v566_v28 = vrot.slane %v560_v62, 4  ;;  %v8069_v63 = vcombine.low %v800_v3, %v949_v26  ;;  %v8070_v16 = vcombine.high %v800_v3, %v949_v26 }
 0x184   : > { %1927 = vmatprep.subr.bf16.mxu1 %v8070_v16  ;;  %v574_v17 = vsel %vm568_vm6, %v565_v32, %v566_v28  ;;  %v647_v10 = vsel %vm568_vm6, %v639_v6, %v640_v33 }
 0x185   : > { %v636_v18 = vpop.permute.xlu1 %635  ;;  %1928 = vmatpush1.bf16.msra.mxu1 %v8069_v63  ;;  %v562_v22 = vpop.permute.xlu0 %561  ;;  %v575_v55 = vsel %vm570_vm0, %v10356_v9, %v574_v17  ;;  %v648_v56 = vsel %vm643_vm8, %v10365_v5, %v647_v10 }
 0x186   : > { %v641_v0 = vrot.slane %v636_v18, 4  ;;  %v567_v12 = vrot.slane %v562_v22, 4  ;;  %v8059_v13 = vcombine.low %v575_v55, %v648_v56  ;;  %v8060_v23 = vcombine.high %v575_v55, %v648_v56 }
 0x188   : > { %v649_v1 = vsel %vm568_vm6, %v640_v33, %v641_v0  ;;  %v576_v32 = vsel %vm568_vm6, %v566_v28, %v567_v12  ;;  %1886 = vmatprep.subr.bf16.mxu0 %v8060_v23 }
 0x189   : > { %1887 = vmatpush1.bf16.msra.mxu0 %v8059_v13  ;;  %v577_v6 = vsel %vm570_vm0, %v560_v62, %v576_v32  ;;  %v650_v54 = vsel %vm643_vm8, %v634_v38, %v649_v1 }
 0x18a   : > { %v8061_v11 = vcombine.low %v577_v6, %v650_v54  ;;  %v8062_v7 = vcombine.high %v577_v6, %v650_v54 }
 0x18c   : > { %8100 = vmatmul.mubr.msk.bf16.vlgmr.msra.gmra.mxu0 %vm1757_vm9, %v10399_v53  ;;  %1929 = vmatprep.subr.bf16.mxu1 %v8062_v7 }
 0x18d   : > { %1930 = vmatpush1.bf16.msra.mxu1 %v8061_v11 }
 0x190   : > { %8102 = vmatmul.mubr.msk.bf16.vlgmr.msra.gmra.mxu1 %vm1757_vm9, %v10399_v53 }
 0x192   : > { %v10485_v9 = vpop.permute.xlu1 %1569  ;;  %v10487_v5 = vpop.permute.xlu0 %1564 }
 0x196   : > { %v10489_v25 = vpop.permute.xlu1 %3084  ;;  %v10491_v27 = vpop.permute.xlu0 %3086 }
 0x19a   : > { %v3089_v29 = vpop.permute.xlu1 %3088  ;;  %v10493_v31 = vpop.permute.xlu0 %3090 }
 0x19b   : > { %v10538_v26 = vsel %vm793_vm1, %v3089_v29, %v10493_v31  ;;  %v10551_v17 = vsel %vm793_vm1, %v10491_v27, %v3089_v29 }
 0x19e   : > { %v10495_v35 = vpop.permute.xlu1 %2874  ;;  %v10497_v36 = vpop.permute.xlu0 %2876 }
 0x1a2   : > { %v2879_v39 = vpop.permute.xlu1 %2878  ;;  %v10499_v19 = vpop.permute.xlu0 %2880 }
 0x1a3   : > { %v10563_v0 = vsel %vm942_vm2, %v2879_v39, %v10499_v19  ;;  %v10575_v54 = vsel %vm942_vm2, %v10497_v36, %v2879_v39 }
 0x1a6   : > { %v2593_v40 = vpop.permute.xlu1 %2592  ;;  %v2595_v53 = vpop.permute.xlu0 %2594 }
 0x1a7   : > { %v10524_v60 = vsel %vm868_vm4, %v2593_v40, %v2595_v53  ;;  %v10529_v20 = vmul.f32 0.0, %v2593_v40 }
 0x1aa   : > { %v2597_v51 = vpop.permute.xlu1 %2596  ;;  %v10501_v42 = vpop.permute.xlu0 %2598 }
 0x1ab   : > { %v10578_v11 = vsel %vm868_vm4, %v2595_v53, %v2597_v51  ;;  %v10590_v39 = vsel %vm868_vm4, %v2597_v51, %v10501_v42 }
 0x1ae   : > { %v2383_v44 = vpop.permute.xlu1 %2382  ;;  %v10503_v45 = vpop.permute.xlu0 %2384 }
 0x1af   : > { %v10542_v33 = vsel %vm719_vm3, %v2383_v44, %v10503_v45  ;;  %v10553_v18 = vmul.f32 0.0, %v2383_v44 }
 0x1b2   : > { %v10507_v57 = vpop.permute.xlu1 %2386  ;;  %v10513_v24 = vpop.permute.xlu0 %2388 }
 0x1b3   : > { %v10607_v51 = vsel %vm719_vm3, %v10503_v45, %v10507_v57 }
 0x1b6   : > { %v2047_v61 = vpop.permute.xlu1 %2046  ;;  %v2049_v38 = vpop.permute.xlu0 %2048 }
 0x1b7   : > { %v10566_v13 = vsel %vm495_vm5, %v2047_v61, %v2049_v38  ;;  %v10580_v29 = vmul.f32 0.0, %v2047_v61 }
 0x1ba   : > { %v2051_v12 = vpop.permute.xlu1 %2050  ;;  %v10568_v23 = vpop.permute.xlu0 %2052 }
 0x230   : > { %v1820_v50 = vpop.f32.mrf.mxu0  ;;  %v1863_v43 = vpop.f32.mrf.mxu1 }
 0x231   : > { %v1821_v48 = vadd.f32 %v1820_v50, %v10487_v5  ;;  %v1864_v49 = vadd.f32 %v1863_v43, %v10487_v5 }
 0x232   : > { %v1822_v52 = vpop.f32.mrf.mxu0  ;;  %v1865_v15 = vpop.f32.mrf.mxu1 }
 0x233   : > { %v10509_v8 = vmax.f32 %v1821_v48, 0.0  ;;  %v1823_v41 = vadd.f32 %v1822_v52, %v10487_v5  ;;  %v1866_v58 = vadd.f32 %v1865_v15, %v10487_v5  ;;  %v10517_v14 = vmax.f32 %v1864_v49, 0.0 }
 0x234   : > { %v1824_v28 = vpop.f32.mrf.mxu0  ;;  %v1867_v10 = vpop.f32.mrf.mxu1 }
 0x235   : > { %v10515_v34 = vmax.f32 %v1866_v58, 0.0  ;;  %v10519_v59 = vmax.f32 %v1823_v41, 0.0  ;;  %v8603_v47 = vpack.c.bf16 %v10509_v8, %v13272_v46  ;;  %v2625_v3 = vmul.f32 %v10524_v60, %v10509_v8  ;;  %v10609_v58 = vpop.permute.xlu1 %3420 }
 0x236   : > { %v3118_v55 = vmul.f32 %v10551_v17, %v10517_v14  ;;  %v2415_v56 = vmul.f32 %v10542_v33, %v10509_v8  ;;  %v1826_v1 = vpop.f32.mrf.mxu0  ;;  %v1869_v7 = vpop.f32.mrf.mxu1  ;;  %v2908_v44 = vmul.f32 %v10575_v54, %v10517_v14  ;;  %v2079_v50 = vmul.f32 %v10566_v13, %v10509_v8 }
 0x237   : > { %2268 = vrot.lane.b32.xlu1 %v8603_v47, %s9618_s27  ;;  %v8634_v21 = vpack.c.bf16 %v10515_v34, %v10517_v14  ;;  %v8633_v62 = vpack.c.bf16 %v10519_v59, %v10509_v8  ;;  %v8604_v63 = vpack.c.bf16 %v10517_v14, %v10519_v59  ;;  %v3119_v16 = vmul.f32 %v10538_v26, %v10515_v34  ;;  %v3423_v47 = vpop.permute.xlu0 %3422 }
 0x238   : > { %v8623_v22 = vpack.c.bf16 %v2625_v3, %v10529_v20  ;;  %v2909_v6 = vmul.f32 %v10563_v0, %v10515_v34  ;;  %v8613_v40 = vpack.c.bf16 %v2415_v56, %v10553_v18  ;;  %v1825_v53 = vadd.f32 %v1824_v28, %v10485_v9 }
 0x239   : > { %3308 = vrot.lane.b32.xlu0 %v8634_v21, %s9615_s25  ;;  %v8652_v32 = vpack.c.bf16 %v3119_v16, %v3118_v55  ;;  %v1868_v43 = vadd.f32 %v1867_v10, %v10485_v9  ;;  %v1827_v48 = vadd.f32 %v1826_v1, %v10485_v9  ;;  %v1870_v49 = vadd.f32 %v1869_v7, %v10485_v9 }
 0x23a   : > { %v8642_v52 = vpack.c.bf16 %v2909_v6, %v2908_v44  ;;  %v2626_v15 = vmul.f32 %v10578_v11, %v10519_v59  ;;  %v10602_v41 = vsel %vm793_vm1, %v10489_v25, %v10491_v27  ;;  %v8593_v21 = vpack.c.bf16 %v2079_v50, %v10580_v29 }
 0x23b   : > { %3306 = vrot.lane.b32.xlu1 %v8633_v62, %s9615_s25  ;;  %v2627_v61 = vmul.f32 %v10590_v39, %v10517_v14  ;;  %v3117_v62 = vmul.f32 %v10602_v41, %v10519_v59  ;;  %v10620_v27 = vsel %vm719_vm3, %v10507_v57, %v10513_v24  ;;  %v10622_v45 = vmax.f32 %v1825_v53, 0.0  ;;  %v10658_v44 = vpop.permute.xlu0 %3426 }
 0x23c   : > { %v10624_v3 = vmax.f32 %v1868_v43, 0.0  ;;  %v10626_v28 = vmax.f32 %v1827_v48, 0.0  ;;  %v3116_v10 = vmul.f32 %v10489_v25, %v10509_v8  ;;  %v10638_v57 = vsel %vm942_vm2, %v10495_v35, %v10497_v36 }
 0x23d   : > { %2270 = vrot.lane.b32.xlu0 %v8604_v63, %s9618_s27  ;;  %v10628_v63 = vmax.f32 %v1870_v49, 0.0  ;;  %v8624_v16 = vpack.c.bf16 %v2627_v61, %v2626_v15  ;;  %v10641_v55 = vsel %vm495_vm5, %v2049_v38, %v2051_v12  ;;  %v2417_v1 = vmul.f32 %v10620_v27, %v10517_v14 }
 0x23e   : > { %v8651_v56 = vpack.c.bf16 %v3117_v62, %v3116_v10  ;;  %v10650_v6 = vsel %vm495_vm5, %v2051_v12, %v10568_v23  ;;  %v2906_v36 = vmul.f32 %v10495_v35, %v10509_v8  ;;  %v8750_v38 = vpack.c.bf16 %v10626_v28, %v10519_v59 }
 0x23f   : > { %2688 = vrot.lane.b32.xlu1 %v8623_v22, %s9611_s26  ;;  %v2416_v22 = vmul.f32 %v10607_v51, %v10519_v59  ;;  %v8749_v7 = vpack.c.bf16 %v10622_v45, %v10509_v8  ;;  %v2080_v53 = vmul.f32 %v10641_v55, %v10519_v59  ;;  %v10676_v15 = vsel %vm570_vm0, %v10609_v58, %v3423_v47 }
 0x240   : > { %v8608_v10 = vpack.c.bf16 %v10622_v45, %v13272_v46 }
 0x241   : > { %3182 = vrot.lane.b32.xlu0 %v8652_v32, %s9612_s29  ;;  %v2907_v32 = vmul.f32 %v10638_v57, %v10519_v59  ;;  %v8614_v50 = vpack.c.bf16 %v2417_v1, %v2416_v22 }
 0x243   : > { %2478 = vrot.lane.b32.xlu1 %v8613_v40, %s9610_s23  ;;  %v3425_v40 = vpop.permute.xlu1 %3424  ;;  %v8641_v49 = vpack.c.bf16 %v2907_v32, %v2906_v36  ;;  %v3452_v32 = vmul.f32 %v10609_v58, %v10509_v8 }
 0x244   : > { %v10669_v48 = vsel %vm570_vm0, %v3425_v40, %v10658_v44 }
 0x245   : > { %2972 = vrot.lane.b32.xlu0 %v8642_v52, %s9613_s13  ;;  %v2081_v52 = vmul.f32 %v10650_v6, %v10517_v14  ;;  %v3455_v62 = vmul.f32 %v10669_v48, %v10515_v34 }
 0x247   : > { %2142 = vrot.lane.b32.xlu1 %v8593_v21, %s9609_s19  ;;  %v10679_v21 = vsel %vm570_vm0, %v3423_v47, %v3425_v40  ;;  %v8594_v61 = vpack.c.bf16 %v2081_v52, %v2080_v53  ;;  %v8638_v53 = vpack.c.bf16 %v10628_v63, %v10624_v3  ;;  %v10700_v52 = vpop.permute.xlu0 %3094 }
 0x248   : > { %v3454_v22 = vmul.f32 %v10679_v21, %v10517_v14 }
 0x249   : > { %2690 = vrot.lane.b32.xlu0 %v8624_v16, %s9611_s26 }
 0x24a   : > { %v8672_v1 = vpack.c.bf16 %v3455_v62, %v3454_v22  ;;  %v8637_v62 = vpack.c.bf16 %v10626_v28, %v10622_v45 }
 0x24b   : > { %3180 = vrot.lane.b32.xlu1 %v8651_v56, %s9612_s29  ;;  %v3453_v56 = vmul.f32 %v10676_v15, %v10519_v59 }
 0x24c   : > { %v1906_v16 = vpop.f32.mrf.mxu0 }
 0x24d   : > { %2480 = vrot.lane.b32.xlu0 %v8614_v50, %s9610_s23  ;;  %v8671_v40 = vpack.c.bf16 %v3453_v56, %v3452_v32  ;;  %v8609_v56 = vpack.c.bf16 %v10624_v3, %v10626_v28 }
 0x24e   : > { %v1908_v36 = vpop.f32.mrf.mxu0 }
 0x24f   : > { %2970 = vrot.lane.b32.xlu1 %v8641_v49, %s9613_s13  ;;  %v10698_v49 = vpop.permute.xlu1 %3092 }
 0x250   : > { %v1949_v47 = vpop.f32.mrf.mxu1 }
 0x251   : > { %2144 = vrot.lane.b32.xlu0 %v8594_v61, %s9609_s19  ;;  %v1910_v61 = vpop.f32.mrf.mxu0 }
 0x252   : > { %v1951_v50 = vpop.f32.mrf.mxu1 }
 0x253   : > { %2278 = vrot.lane.b32.xlu1 %v8608_v10, %s9618_s27  ;;  %v2634_v10 = vmul.f32 %v10524_v60, %v10622_v45  ;;  %v1912_v32 = vpop.f32.mrf.mxu0  ;;  %v2424_v60 = vmul.f32 %v10542_v33, %v10622_v45  ;;  %v10718_v46 = vpop.permute.xlu1 %3096  ;;  %v1911_v33 = vadd.f32 %v1910_v61, %v10485_v9 }
 0x254   : > { %v1953_v22 = vpop.f32.mrf.mxu1 }
 0x255   : > { %3518 = vrot.lane.b32.xlu0 %v8672_v1, %s9614_s16  ;;  %v3128_v1 = vmul.f32 %v10538_v26, %v10628_v63  ;;  %v2918_v26 = vmul.f32 %v10563_v0, %v10628_v63  ;;  %v1909_v0 = vadd.f32 %v1908_v36, %v10487_v5 }
 0x256   : > { %v1955_v30 = vpop.f32.mrf.mxu1 }
 0x257   : > { %3516 = vrot.lane.b32.xlu1 %v8671_v40, %s9614_s16  ;;  %v8628_v40 = vpack.c.bf16 %v2634_v10, %v10529_v20  ;;  %v2917_v20 = vmul.f32 %v10575_v54, %v10624_v3  ;;  %v1954_v10 = vadd.f32 %v1953_v22, %v10485_v9  ;;  %v1956_v12 = vadd.f32 %v1955_v30, %v10485_v9 }
 0x258   : > { %v1907_v54 = vadd.f32 %v1906_v16, %v10487_v5  ;;  %v2636_v30 = vmul.f32 %v10590_v39, %v10624_v3  ;;  %v10760_v36 = vmax.f32 %v1909_v0, 0.0 }
 0x259   : > { %3318 = vrot.lane.b32.xlu0 %v8638_v53, %s9615_s25  ;;  %v3127_v53 = vmul.f32 %v10551_v17, %v10624_v3  ;;  %v2088_v17 = vmul.f32 %v10566_v13, %v10622_v45  ;;  %v1952_v13 = vadd.f32 %v1951_v50, %v10487_v5  ;;  %v8647_v61 = vpack.c.bf16 %v2918_v26, %v2917_v20 }
 0x25a   : > { %v10754_v16 = vmax.f32 %v1954_v10, 0.0  ;;  %v10764_v50 = vmax.f32 %v1907_v54, 0.0  ;;  %v3462_v54 = vmul.f32 %v10676_v15, %v10626_v28 }
 0x25b   : > { %3316 = vrot.lane.b32.xlu1 %v8637_v62, %s9615_s25  ;;  %v10720_v62 = vpop.permute.xlu0 %3098  ;;  %v8657_v43 = vpack.c.bf16 %v3128_v1, %v3127_v53  ;;  %v8618_v1 = vpack.c.bf16 %v2424_v60, %v10553_v18  ;;  %v10748_v18 = vpop.permute.xlu1 %2882  ;;  %v10768_v60 = vmax.f32 %v1952_v13, 0.0  ;;  %v3461_v13 = vmul.f32 %v10609_v58, %v10622_v45 }
 0x25c   : > { %v8605_v58 = vpack.c.bf16 %v10764_v50, %v10515_v34 }
 0x25d   : > { %2280 = vrot.lane.b32.xlu0 %v8609_v56, %s9618_s27  ;;  %v1913_v56 = vadd.f32 %v1912_v32, %v10485_v9  ;;  %v2635_v32 = vmul.f32 %v10578_v11, %v10626_v28  ;;  %v3126_v9 = vmul.f32 %v10602_v41, %v10626_v28  ;;  %v3125_v41 = vmul.f32 %v10489_v25, %v10622_v45 }
 0x25e   : > { %v2916_v25 = vmul.f32 %v10638_v57, %v10626_v28  ;;  %v2089_v57 = vmul.f32 %v10641_v55, %v10626_v28 }
 0x25f   : > { %2698 = vrot.lane.b32.xlu1 %v8628_v40, %s9611_s26  ;;  %v1950_v40 = vadd.f32 %v1949_v47, %v10487_v5  ;;  %v10742_v22 = vmax.f32 %v1913_v56, 0.0  ;;  %v10750_v11 = vpop.permute.xlu0 %2884  ;;  %v10756_v5 = vmax.f32 %v1956_v12, 0.0  ;;  %v8598_v47 = vpack.c.bf16 %v2088_v17, %v10580_v29 }
 0x260   : > { %v8629_v39 = vpack.c.bf16 %v2636_v30, %v2635_v32  ;;  %v2425_v12 = vmul.f32 %v10607_v51, %v10626_v28  ;;  %v8656_v26 = vpack.c.bf16 %v3126_v9, %v3125_v41  ;;  %v2426_v29 = vmul.f32 %v10620_v27, %v10624_v3 }
 0x261   : > { %3192 = vrot.lane.b32.xlu0 %v8657_v43, %s9612_s29  ;;  %v10752_v43 = vmax.f32 %v1911_v33, 0.0  ;;  %v10766_v53 = vmax.f32 %v1950_v40, 0.0  ;;  %v10786_v33 = vpop.permute.xlu1 %2886  ;;  %v2090_v32 = vmul.f32 %v10650_v6, %v10624_v3  ;;  %v8676_v30 = vpack.c.bf16 %v3462_v54, %v3461_v13 }
 0x262   : > { %v8619_v10 = vpack.c.bf16 %v2426_v29, %v2425_v12  ;;  %v3463_v6 = vmul.f32 %v10679_v21, %v10624_v3  ;;  %v8635_v21 = vpack.c.bf16 %v10760_v36, %v10764_v50 }
 0x263   : > { %2488 = vrot.lane.b32.xlu1 %v8618_v1, %s9610_s23  ;;  %v10788_v27 = vpop.permute.xlu0 %2888  ;;  %v2915_v1 = vmul.f32 %v10495_v35, %v10622_v45  ;;  %v8599_v40 = vpack.c.bf16 %v2090_v32, %v2089_v57  ;;  %v3464_v35 = vmul.f32 %v10669_v48, %v10628_v63  ;;  %v8639_v41 = vpack.c.bf16 %v10742_v22, %v10752_v43 }
 0x264   : > { %v8640_v57 = vpack.c.bf16 %v10756_v5, %v10754_v16 }
 0x265   : > { %2982 = vrot.lane.b32.xlu0 %v8647_v61, %s9613_s13  ;;  %v8646_v0 = vpack.c.bf16 %v2916_v25, %v2915_v1  ;;  %v2601_v61 = vpop.permute.xlu1 %2600  ;;  %v8677_v15 = vpack.c.bf16 %v3464_v35, %v3463_v6  ;;  %v8636_v25 = vpack.c.bf16 %v10768_v60, %v10766_v53  ;;  %v10852_v35 = vld [vmem:[%s13261_s3 + $0x4] ss:$8 sps:$4 sm:$0xff]  }
 0x266   : > { %v2611_v12 = vsel %vm868_vm4, %v10501_v42, %v2601_v61  ;;  %8270 = vmatprep.mubr.msk.bf16.mxu0 %vm4056_vm10, %v10852_v35  ;;  %8272 = vmatprep.mubr.msk.bf16.mxu1 %vm4056_vm10, %v10852_v35 }
 0x267   : > { %2152 = vrot.lane.b32.xlu1 %v8598_v47, %s9609_s19  ;;  %v10805_v55 = vpop.permute.xlu0 %2602  ;;  %v8610_v47 = vpack.c.bf16 %v10752_v43, %v10628_v63  ;;  %v2628_v42 = vmul.f32 %v2611_v12, %v10515_v34 }
 0x269   : > { %2700 = vrot.lane.b32.xlu0 %v8629_v39, %s9611_s26  ;;  %v10814_v9 = vpop.permute.xlu1 %2604  ;;  %v2612_v39 = vsel %vm868_vm4, %v2601_v61, %v10805_v55 }
 0x26b   : > { %3190 = vrot.lane.b32.xlu1 %v8656_v26, %s9612_s29  ;;  %v10816_v48 = vpop.permute.xlu0 %2606 }
 0x26d   : > { %2490 = vrot.lane.b32.xlu0 %v8619_v10, %s9610_s23  ;;  %v2391_v26 = vpop.permute.xlu1 %2390  ;;  %v2629_v10 = vmul.f32 %v2612_v39, %v10764_v50 }
 0x26e   : > { %v2401_v32 = vsel %vm719_vm3, %v10513_v24, %v2391_v26 }
 0x26f   : > { %2980 = vrot.lane.b32.xlu1 %v8646_v0, %s9613_s13  ;;  %v10831_v29 = vpop.permute.xlu0 %2392  ;;  %v2638_v0 = vmul.f32 %v2612_v39, %v10752_v43  ;;  %v8625_v54 = vpack.c.bf16 %v2629_v10, %v2628_v42  ;;  %v2894_v42 = vsel %vm942_vm2, %v10748_v18, %v10750_v11 }
 0x270   : > { %v2402_v1 = vsel %vm719_vm3, %v2391_v26, %v10831_v29  ;;  %v8611_v26 = vpack.c.bf16 %v10754_v16, %v10742_v22 }
 0x271   : > { %2154 = vrot.lane.b32.xlu0 %v8599_v40, %s9609_s19  ;;  %v2637_v40 = vmul.f32 %v2611_v12, %v10628_v63  ;;  %v2419_v13 = vmul.f32 %v2402_v1, %v10764_v50  ;;  %v2428_v24 = vmul.f32 %v2402_v1, %v10752_v43  ;;  %v3106_v12 = vsel %vm793_vm1, %v10718_v46, %v10720_v62 }
 0x272   : > { %v3105_v1 = vsel %vm793_vm1, %v10700_v52, %v10718_v46  ;;  %v3132_v46 = vmul.f32 %v3106_v12, %v10756_v5 }
 0x273   : > { %3526 = vrot.lane.b32.xlu1 %v8676_v30, %s9614_s16  ;;  %v8630_v61 = vpack.c.bf16 %v2638_v0, %v2637_v40  ;;  %v2418_v30 = vmul.f32 %v2401_v32, %v10515_v34  ;;  %v2395_v0 = vpop.permute.xlu1 %2394  ;;  %v3122_v40 = vmul.f32 %v3105_v1, %v10766_v53 }
 0x275   : > { %3528 = vrot.lane.b32.xlu0 %v8677_v15, %s9614_s16  ;;  %v8615_v6 = vpack.c.bf16 %v2419_v13, %v2418_v30  ;;  %v2427_v15 = vmul.f32 %v2401_v32, %v10628_v63  ;;  %v10891_v32 = vpop.permute.xlu0 %2396  ;;  %v3131_v13 = vmul.f32 %v3105_v1, %v10754_v16  ;;  %v2893_v30 = vsel %vm942_vm2, %v10499_v19, %v10748_v18 }
 0x276   : > { %v2919_v18 = vmul.f32 %v2893_v30, %v10752_v43 }
 0x277   : > { %2272 = vrot.lane.b32.xlu1 %v8605_v58, %s9618_s27  ;;  %v3104_v58 = vsel %vm793_vm1, %v10698_v49, %v10700_v52 }
 0x278   : > { %v3121_v39 = vmul.f32 %v3104_v58, %v10760_v36  ;;  %v3130_v10 = vmul.f32 %v3104_v58, %v10742_v22  ;;  %v2920_v58 = vmul.f32 %v2894_v42, %v10742_v22 }
 0x279   : > { %2282 = vrot.lane.b32.xlu0 %v8610_v47, %s9618_s27  ;;  %v8620_v47 = vpack.c.bf16 %v2428_v24, %v2427_v15  ;;  %v2896_v24 = vsel %vm942_vm2, %v10786_v33, %v10788_v27  ;;  %v2910_v15 = vmul.f32 %v2893_v30, %v10764_v50  ;;  %v2404_v30 = vsel %vm719_vm3, %v2395_v0, %v10891_v32 }
 0x27b   : > { %3310 = vrot.lane.b32.xlu1 %v8635_v21, %s9615_s25  ;;  %v8606_v21 = vpack.c.bf16 %v10766_v53, %v10760_v36 }
 0x27d   : > { %3320 = vrot.lane.b32.xlu0 %v8639_v41, %s9615_s25  ;;  %v3103_v41 = vsel %vm793_vm1, %v10493_v31, %v10698_v49 }
 0x27e   : > { %v3129_v49 = vmul.f32 %v3103_v41, %v10752_v43 }
 0x27f   : > { %3312 = vrot.lane.b32.xlu1 %v8636_v25, %s9615_s25  ;;  %v3120_v25 = vmul.f32 %v3103_v41, %v10764_v50  ;;  %v2913_v41 = vmul.f32 %v2896_v24, %v10768_v60 }
 0x281   : > { %3322 = vrot.lane.b32.xlu0 %v8640_v57, %s9615_s25  ;;  %v8653_v31 = vpack.c.bf16 %v3121_v39, %v3120_v25  ;;  %v3123_v57 = vmul.f32 %v3106_v12, %v10768_v60  ;;  %v2057_v39 = vpop.permute.xlu0 %2056 }
 0x283   : > { %2692 = vrot.lane.b32.xlu1 %v8625_v54, %s9611_s26  ;;  %v8658_v54 = vpack.c.bf16 %v3130_v10, %v3129_v49  ;;  %v8654_v52 = vpack.c.bf16 %v3123_v57, %v3122_v40  ;;  %v2922_v10 = vmul.f32 %v2896_v24, %v10756_v5  ;;  %v2614_v57 = vsel %vm868_vm4, %v10814_v9, %v10816_v48 }
 0x285   : > { %2702 = vrot.lane.b32.xlu0 %v8630_v61, %s9611_s26  ;;  %v2911_v61 = vmul.f32 %v2894_v42, %v10760_v36 }
 0x287   : > { %2482 = vrot.lane.b32.xlu1 %v8615_v6, %s9610_s23  ;;  %v8659_v6 = vpack.c.bf16 %v3132_v46, %v3131_v13  ;;  %v8643_v19 = vpack.c.bf16 %v2911_v61, %v2910_v15  ;;  %v2613_v46 = vsel %vm868_vm4, %v10805_v55, %v10814_v9  ;;  %v2631_v61 = vmul.f32 %v2614_v57, %v10766_v53 }
 0x288   : > { %v2630_v15 = vmul.f32 %v2613_v46, %v10760_v36  ;;  %v2403_v55 = vsel %vm719_vm3, %v10831_v29, %v2395_v0 }
 0x289   : > { %2492 = vrot.lane.b32.xlu0 %v8620_v47, %s9610_s23  ;;  %v2895_v47 = vsel %vm942_vm2, %v10750_v11, %v10786_v33 }
 0x28a   : > { %v2912_v25 = vmul.f32 %v2895_v47, %v10766_v53 }
 0x28b   : > { %2274 = vrot.lane.b32.xlu1 %v8606_v21, %s9618_s27  ;;  %v2055_v21 = vpop.permute.xlu1 %2054 }
 0x28c   : > { %v2066_v12 = vsel %vm495_vm5, %v2055_v21, %v2057_v39  ;;  %v2065_v11 = vsel %vm495_vm5, %v10568_v23, %v2055_v21  ;;  %v8644_v1 = vpack.c.bf16 %v2913_v41, %v2912_v25  ;;  %v2639_v21 = vmul.f32 %v2613_v46, %v10742_v22 }
 0x28d   : > { %2284 = vrot.lane.b32.xlu0 %v8611_v26, %s9618_s27  ;;  %v8648_v26 = vpack.c.bf16 %v2920_v58, %v2919_v18  ;;  %v2083_v49 = vmul.f32 %v2066_v12, %v10764_v50  ;;  %v2082_v42 = vmul.f32 %v2065_v11, %v10515_v34  ;;  %v2092_v23 = vmul.f32 %v2066_v12, %v10752_v43 }
 0x28e   : > { %v2091_v13 = vmul.f32 %v2065_v11, %v10628_v63  ;;  %v2640_v58 = vmul.f32 %v2614_v57, %v10754_v16  ;;  %v2420_v12 = vmul.f32 %v2403_v55, %v10760_v36 }
 0x28f   : > { %3184 = vrot.lane.b32.xlu1 %v8653_v31, %s9612_s29  ;;  %v2059_v33 = vpop.permute.xlu1 %2058  ;;  %v2921_v31 = vmul.f32 %v2895_v47, %v10754_v16  ;;  %v8626_v47 = vpack.c.bf16 %v2631_v61, %v2630_v15 }
 0x290   : > { %v8631_v41 = vpack.c.bf16 %v2640_v58, %v2639_v21  ;;  %v2067_v29 = vsel %vm495_vm5, %v2057_v39, %v2059_v33 }
 0x291   : > { %3194 = vrot.lane.b32.xlu0 %v8658_v54, %s9612_s29  ;;  %v10927_v54 = vpop.permute.xlu0 %2060  ;;  %v8649_v40 = vpack.c.bf16 %v2922_v10, %v2921_v31  ;;  %v2429_v10 = vmul.f32 %v2403_v55, %v10742_v22  ;;  %v2084_v57 = vmul.f32 %v2067_v29, %v10760_v36  ;;  %v2093_v46 = vmul.f32 %v2067_v29, %v10742_v22 }
 0x292   : > { %v2068_v18 = vsel %vm495_vm5, %v2059_v33, %v10927_v54 }
 0x293   : > { %3186 = vrot.lane.b32.xlu1 %v8654_v52, %s9612_s29  ;;  %v8595_v52 = vpack.c.bf16 %v2083_v49, %v2082_v42  ;;  %v3429_v24 = vpop.permute.xlu1 %3428  ;;  %v2085_v11 = vmul.f32 %v2068_v18, %v10766_v53  ;;  %v2094_v42 = vmul.f32 %v2068_v18, %v10754_v16 }
 0x294   : > { %v3439_v39 = vsel %vm570_vm0, %v10658_v44, %v3429_v24 }
 0x295   : > { %3196 = vrot.lane.b32.xlu0 %v8659_v6, %s9612_s29  ;;  %v8600_v6 = vpack.c.bf16 %v2092_v23, %v2091_v13  ;;  %v3431_v9 = vpop.permute.xlu0 %3430  ;;  %v8596_v23 = vpack.c.bf16 %v2085_v11, %v2084_v57  ;;  %v3456_v13 = vmul.f32 %v3439_v39, %v10764_v50  ;;  %v3465_v55 = vmul.f32 %v3439_v39, %v10752_v43 }
 0x296   : > { %v2632_v39 = vmul.f32 %v10816_v48, %v10768_v60 }
 0x297   : > { %2974 = vrot.lane.b32.xlu1 %v8643_v19, %s9613_s13  ;;  %v2421_v19 = vmul.f32 %v2404_v30, %v10766_v53  ;;  %v3433_v0 = vpop.permute.xlu1 %3432 }
 0x299   : > { %2984 = vrot.lane.b32.xlu0 %v8648_v26, %s9613_s13  ;;  %v2430_v26 = vmul.f32 %v2404_v30, %v10754_v16  ;;  %v8616_v25 = vpack.c.bf16 %v2421_v19, %v2420_v12  ;;  %v10957_v31 = vpop.permute.xlu0 %3434  ;;  %v8601_v30 = vpack.c.bf16 %v2094_v42, %v2093_v46  ;;  %v8627_v46 = vpack.c.bf16 %v2632_v39, %v2632_v39 }
 0x29b   : > { %2976 = vrot.lane.b32.xlu1 %v8644_v1, %s9613_s13  ;;  %v3440_v1 = vsel %vm570_vm0, %v3429_v24, %v3431_v9  ;;  %v8621_v49 = vpack.c.bf16 %v2430_v26, %v2429_v10  ;;  %v3441_v24 = vsel %vm570_vm0, %v3431_v9, %v3433_v0 }
 0x29c   : > { %v3457_v33 = vmul.f32 %v3440_v1, %v10760_v36  ;;  %v3466_v44 = vmul.f32 %v3440_v1, %v10742_v22  ;;  %v3467_v12 = vmul.f32 %v3441_v24, %v10754_v16  ;;  %v2914_v1 = vmul.f32 0.0, %v10788_v27 }
 0x29d   : > { %2986 = vrot.lane.b32.xlu0 %v8649_v40, %s9613_s13 }
 0x29e   : > { %v8678_v19 = vpack.c.bf16 %v3466_v44, %v3465_v55  ;;  %v8645_v57 = vpack.c.bf16 %v2914_v1, %v2914_v1  ;;  %v2431_v44 = vmul.f32 %v10891_v32, %v10756_v5 }
 0x29f   : > { %2146 = vrot.lane.b32.xlu1 %v8595_v52, %s9609_s19  ;;  %v3442_v52 = vsel %vm570_vm0, %v3433_v0, %v10957_v31  ;;  %v3124_v0 = vmul.f32 0.0, %v10720_v62 }
 0x2a0   : > { %v3459_v15 = vmul.f32 %v3442_v52, %v10768_v60  ;;  %v3468_v18 = vmul.f32 %v3442_v52, %v10756_v5  ;;  %v2422_v52 = vmul.f32 %v10891_v32, %v10768_v60  ;;  %v2086_v32 = vmul.f32 %v10927_v54, %v10768_v60 }
 0x2a1   : > { %2156 = vrot.lane.b32.xlu0 %v8600_v6, %s9609_s19  ;;  %v8673_v6 = vpack.c.bf16 %v3457_v33, %v3456_v13  ;;  %v8655_v11 = vpack.c.bf16 %v3124_v0, %v3124_v0  ;;  %v2641_v33 = vmul.f32 %v10816_v48, %v10756_v5  ;;  %v3460_v0 = vmul.f32 0.0, %v10957_v31 }
 0x2a2   : > { %v8679_v29 = vpack.c.bf16 %v3468_v18, %v3467_v12  ;;  %v8617_v48 = vpack.c.bf16 %v2422_v52, %v2422_v52  ;;  %v2095_v12 = vmul.f32 %v10927_v54, %v10756_v5  ;;  %v8597_v1 = vpack.c.bf16 %v2086_v32, %v2086_v32 }
 0x2a3   : > { %2694 = vrot.lane.b32.xlu1 %v8626_v47, %s9611_s26  ;;  %v3458_v47 = vmul.f32 %v3441_v24, %v10766_v53  ;;  %v8675_v52 = vpack.c.bf16 %v3460_v0, %v3460_v0  ;;  %v3656_v0 = vld [vmem:[%s13262_s4 + $0x10] sm:$0xff] }
 0x2a4   : > { %v8602_v54 = vpack.c.bf16 %v2095_v12, %v2095_v12 }
 0x2a5   : > { %2704 = vrot.lane.b32.xlu0 %v8631_v41, %s9611_s26  ;;  %v8674_v41 = vpack.c.bf16 %v3459_v15, %v3458_v47  ;;  %v8622_v15 = vpack.c.bf16 %v2431_v44, %v2431_v44  ;;  %v8607_v47 = vpack.c.bf16 %v10768_v60, %v10768_v60 }
 0x2a7   : > { %2484 = vrot.lane.b32.xlu1 %v8616_v25, %s9610_s23 }
 0x2a9   : > { %v10965_v40 = vpop.permute.xlu1 %2268  ;;  %2494 = vrot.lane.b32.xlu0 %v8621_v49, %s9610_s23 }
 0x2ab   : > { %2148 = vrot.lane.b32.xlu1 %v8596_v23, %s9609_s19  ;;  %v10973_v61 = vpop.permute.xlu0 %3308 }
 0x2ad   : > { %v10978_v58 = vpop.permute.xlu1 %3306  ;;  %2158 = vrot.lane.b32.xlu0 %v8601_v30, %s9609_s19  ;;  %v8632_v30 = vpack.c.bf16 %v2641_v33, %v2641_v33 }
 0x2af   : > { %3520 = vrot.lane.b32.xlu1 %v8673_v6, %s9614_s16  ;;  %v10984_v21 = vpop.permute.xlu0 %2270 }
 0x2b1   : > { %v10987_v9 = vpop.permute.xlu1 %2688  ;;  %3530 = vrot.lane.b32.xlu0 %v8678_v19, %s9614_s16  ;;  %v3326_v19 = vrot.slane %v10978_v58, 4 }
 0x2b3   : > { %3522 = vrot.lane.b32.xlu1 %v8674_v41, %s9614_s16  ;;  %v10992_v26 = vpop.permute.xlu0 %3182  ;;  %v8612_v41 = vpack.c.bf16 %v10756_v5, %v10756_v5 }
 0x2b5   : > { %v10995_v25 = vpop.permute.xlu1 %2478  ;;  %3532 = vrot.lane.b32.xlu0 %v8679_v29, %s9614_s16  ;;  %v13280_v29 = vrot.slane %v10973_v61, 4 }
 0x2b7   : > { %3314 = vrot.lane.b32.xlu1 %v13274_v37, %s9615_s25  ;;  %v11000_v10 = vpop.permute.xlu0 %2972 }
 0x2b9   : > { %v11003_v49 = vpop.permute.xlu1 %2142  ;;  %3324 = vrot.lane.b32.xlu0 %v13274_v37, %s9615_s25 }
 0x2ba   : > { %v2162_v8 = vrot.slane %v11003_v49, 4 }
 0x2bb   : > { %3188 = vrot.lane.b32.xlu1 %v8655_v11, %s9612_s29  ;;  %v11008_v62 = vpop.permute.xlu0 %2690 }
 0x2bd   : > { %v11010_v42 = vpop.permute.xlu1 %3180  ;;  %3198 = vrot.lane.b32.xlu0 %v8655_v11, %s9612_s29 }
 0x2bf   : > { %2978 = vrot.lane.b32.xlu1 %v8645_v57, %s9613_s13  ;;  %v11016_v27 = vpop.permute.xlu0 %2480 }
 0x2c1   : > { %v11020_v23 = vpop.permute.xlu1 %2970  ;;  %2988 = vrot.lane.b32.xlu0 %v8645_v57, %s9613_s13  ;;  %v3336_v57 = vsel %vm568_vm6, %v3326_v19, %v13280_v29  ;;  %v3654_v19 = vld [vmem:[%s13262_s4] sm:$0xff] }
 0x2c3   : > { %2696 = vrot.lane.b32.xlu1 %v8627_v46, %s9611_s26  ;;  %v11026_v13 = vpop.permute.xlu0 %2144 }
 0x2c5   : > { %v11030_v24 = vpop.permute.xlu1 %2278  ;;  %2706 = vrot.lane.b32.xlu0 %v8632_v30, %s9611_s26  ;;  %v3337_v30 = vsel %vm1357_vm7, %v10978_v58, %v3336_v57  ;;  %v3655_v58 = vld [vmem:[%s13262_s4 + $0x8] sm:$0xff]  ;;  %v3657_v57 = vld [vmem:[%s13262_s4 + $0x18] sm:$0xff] }
 0x2c7   : > { %2486 = vrot.lane.b32.xlu1 %v8617_v48, %s9610_s23  ;;  %v11034_v6 = vpop.permute.xlu0 %3518 }
 0x2c9   : > { %v11036_v55 = vpop.permute.xlu1 %3516  ;;  %2496 = vrot.lane.b32.xlu0 %v8622_v15, %s9610_s23 }
 0x2cb   : > { %2276 = vrot.lane.b32.xlu1 %v8607_v47, %s9618_s27  ;;  %v11045_v18 = vpop.permute.xlu0 %3318 }
 0x2cc   : > { %v13277_v39 = vrot.slane %v11045_v18, 4 }
 0x2cd   : > { %v3317_v11 = vpop.permute.xlu1 %3316  ;;  %2286 = vrot.lane.b32.xlu0 %v8612_v41, %s9618_s27  ;;  %s9622_s27 = smov 15  }
 0x2ce   : > { %v3331_v33 = vrot.slane %v3317_v11, 4 }
 0x2cf   : > { %2150 = vrot.lane.b32.xlu1 %v8597_v1, %s9609_s19  ;;  %v11059_v46 = vpop.permute.xlu0 %2280  ;;  %v3200_v1 = vrot.slane %v11010_v42, 4 }
 0x2d0   : > { %v3344_v31 = vsel %vm568_vm6, %v3331_v33, %v13277_v39 }
 0x2d1   : > { %v3345_v44 = vsel %vm1357_vm7, %v3317_v11, %v3344_v31  ;;  %v11067_v48 = vpop.permute.xlu1 %2698  ;;  %2160 = vrot.lane.b32.xlu0 %v8602_v54, %s9609_s19  ;;  %v13276_v54 = vrot.slane %v10992_v26, 4  ;;  %v2990_v31 = vrot.slane %v11020_v23, 4 }
 0x2d2   : > { %v8254_v15 = vcombine.low %v3337_v30, %v3345_v44  ;;  %v8255_v47 = vcombine.high %v3337_v30, %v3345_v44 }
 0x2d3   : > { %3524 = vrot.lane.b32.xlu1 %v8675_v52, %s9614_s16  ;;  %v11071_v32 = vpop.permute.xlu0 %3192  ;;  %v3210_v30 = vsel %vm568_vm6, %v3200_v1, %v13276_v54 }
 0x2d4   : > { %4063 = vmatprep.subr.bf16.mxu0 %v8255_v47  ;;  %v13279_v44 = vrot.slane %v11071_v32, 4  ;;  %v13278_v47 = vrot.slane %v11000_v10, 4 }
 0x2d5   : > { %v11076_v41 = vpop.permute.xlu1 %2488  ;;  %3534 = vrot.lane.b32.xlu0 %v8675_v52, %s9614_s16  ;;  %4064 = vmatpush1.bf16.msra.mxu0 %v8254_v15 }
 0x2d7   : > { %3660 = vperm.xlu1 %8852, %v3654_v19   ;;  %v11082_v12 = vpop.permute.xlu0 %2982 }
 0x2d8   : > { %v13281_v1 = vrot.slane %v11082_v12, 4 }
 0x2d9   : > { %v11087_v11 = vpop.permute.xlu1 %2152  ;;  %3665 = vperm.xlu0 %8851, %v3655_v58  }
 0x2db   : > { %3670 = vperm.xlu1 %8852, %v3656_v0   ;;  %v11093_v33 = vpop.permute.xlu0 %2700  ;;  %v3211_v0 = vsel %vm719_vm3, %v11010_v42, %v3210_v30  ;;  %v2713_v42 = vrot.slane %v11067_v48, 4  ;;  %v2708_v30 = vrot.slane %v10987_v9, 4 }
 0x2dc   : > { %v2714_v17 = vrot.slane %v11093_v33, 4 }
 0x2dd   : > { %v3191_v52 = vpop.permute.xlu1 %3190  ;;  %3675 = vperm.xlu0 %8851, %v3657_v57   ;;  %v3000_v57 = vsel %vm568_vm6, %v2990_v31, %v13278_v47 }
 0x2de   : > { %v3205_v15 = vrot.slane %v3191_v52, 4  ;;  %v2726_v29 = vsel %vm568_vm6, %v2713_v42, %v2714_v17  ;;  %v2498_v42 = vrot.slane %v10995_v25, 4 }
 0x2df   : > { %v11102_v19 = vpop.permute.xlu0 %2490 }
 0x2e0   : > { %v3218_v58 = vsel %vm568_vm6, %v3205_v15, %v13279_v44  ;;  %v13286_v15 = vrot.slane %v11008_v62, 4 }
 0x2e1   : > { %v3219_v37 = vsel %vm719_vm3, %v3191_v52, %v3218_v58  ;;  %v2981_v51 = vpop.permute.xlu1 %2980  ;;  %v3001_v52 = vsel %vm868_vm4, %v11020_v23, %v3000_v57  ;;  %v2727_v57 = vsel %vm942_vm2, %v11067_v48, %v2726_v29  ;;  %v2293_v29 = vrot.slane %v11030_v24, 4 }
 0x2e2   : > { %v8246_v20 = vcombine.low %v3211_v0, %v3219_v37  ;;  %v2995_v56 = vrot.slane %v2981_v51, 4  ;;  %v8247_v54 = vcombine.high %v3211_v0, %v3219_v37  ;;  %v13284_v37 = vrot.slane %v11102_v19, 4 }
 0x2e3   : > { %v11115_v39 = vpop.permute.xlu0 %2154 }
 0x2e4   : > { %v3008_v31 = vsel %vm568_vm6, %v2995_v56, %v13281_v1  ;;  %4065 = vmatprep.subr.bf16.mxu0 %v8247_v54  ;;  %v13283_v54 = vrot.slane %v11016_v27, 4  ;;  %v2503_v1 = vrot.slane %v11076_v41, 4 }
 0x2e5   : > { %v3009_v58 = vsel %vm868_vm4, %v2981_v51, %v3008_v31  ;;  %v11126_v47 = vpop.permute.xlu1 %3526  ;;  %4066 = vmatpush1.bf16.msra.mxu0 %v8246_v20  ;;  %v2718_v51 = vsel %vm568_vm6, %v2708_v30, %v13286_v15  ;;  %v13282_v20 = vrot.slane %v10984_v21, 4  ;;  %v13285_v31 = vrot.slane %v11059_v46, 4 }
 0x2e6   : > { %v8238_v0 = vcombine.low %v3001_v52, %v3009_v58  ;;  %v8239_v44 = vcombine.high %v3001_v52, %v3009_v58  ;;  %v2288_v30 = vrot.slane %v10965_v40, 4  ;;  %v2719_v58 = vsel %vm942_vm2, %v10987_v9, %v2718_v51 }
 0x2e7   : > { %v11132_v56 = vpop.permute.xlu0 %3528  ;;  %v8223_v48 = vcombine.high %v2719_v58, %v2727_v57  ;;  %v13287_v9 = vrot.slane %v11026_v13, 4  ;;  %v8222_v45 = vcombine.low %v2719_v58, %v2727_v57 }
 0x2e8   : > { %4067 = vmatprep.subr.bf16.mxu0 %v8239_v44  ;;  %v2516_v44 = vsel %vm568_vm6, %v2503_v1, %v13284_v37  ;;  %v13296_v1 = vrot.slane %v11115_v39, 4  ;;  %v13291_v58 = vrot.slane %v11132_v56, 4 }
 0x2e9   : > { %v11140_v23 = vpop.permute.xlu1 %2272  ;;  %4068 = vmatpush1.bf16.msra.mxu0 %v8238_v0  ;;  %v2508_v0 = vsel %vm568_vm6, %v2498_v42, %v13283_v54  ;;  %v2517_v28 = vsel %vm793_vm1, %v11076_v41, %v2516_v44  ;;  %v2306_v42 = vsel %vm568_vm6, %v2293_v29, %v13285_v31  ;;  %v2167_v44 = vrot.slane %v11087_v11, 4 }
 0x2ea   : > { %4069 = vmatprep.subr.bf16.mxu0 %v8750_v38  ;;  %v2298_v38 = vsel %vm568_vm6, %v2288_v30, %v13282_v20  ;;  %v2509_v41 = vsel %vm793_vm1, %v10995_v25, %v2508_v0  ;;  %v13349_v54 = vrot.slane %v10973_v61, 4  ;;  %v2307_v57 = vsel %vm643_vm8, %v11030_v24, %v2306_v42 }
 0x2eb   : > { %v11153_v52 = vpop.permute.xlu0 %2282  ;;  %v8215_v20 = vcombine.high %v2509_v41, %v2517_v28  ;;  %v2299_v29 = vsel %vm643_vm8, %v10965_v40, %v2298_v38  ;;  %v13350_v25 = vrot.slane %v11045_v18, 4  ;;  %v3536_v40 = vrot.slane %v11036_v55, 4 }
 0x2ec   : > { %v8214_v38 = vcombine.low %v2509_v41, %v2517_v28  ;;  %v3541_v42 = vrot.slane %v11126_v47, 4  ;;  %v13294_v28 = vrot.slane %v11034_v6, 4 }
 0x2ed   : > { %v11161_v59 = vpop.permute.xlu1 %3310  ;;  %4070 = vmatpush1.bf16.msra.mxu0 %v8749_v7 }
 0x2ee   : > { %v3328_v51 = vrot.slane %v11161_v59, 4  ;;  %4071 = vmatprep.subr.bf16.mxu0 %v8223_v48 }
 0x2ef   : > { %v3321_v7 = vpop.permute.xlu0 %3320 }
 0x2f0   : > { %v3333_v30 = vrot.slane %v3321_v7, 4  ;;  %v3338_v37 = vsel %vm568_vm6, %v13349_v54, %v3328_v51  ;;  %v2172_v54 = vsel %vm568_vm6, %v2162_v8, %v13287_v9 }
 0x2f1   : > { %v11184_v48 = vpop.permute.xlu1 %3312  ;;  %4072 = vmatpush1.bf16.msra.mxu0 %v8222_v45  ;;  %v2180_v45 = vsel %vm568_vm6, %v2167_v44, %v13296_v1  ;;  %v3339_v24 = vsel %vm1357_vm7, %v10973_v61, %v3338_v37  ;;  %v3554_v61 = vsel %vm568_vm6, %v3541_v42, %v13291_v58 }
 0x2f2   : > { %4073 = vmatprep.subr.bf16.mxu0 %v8215_v20  ;;  %v3346_v0 = vsel %vm568_vm6, %v13350_v25, %v3333_v30  ;;  %v8207_v25 = vcombine.high %v2299_v29, %v2307_v57  ;;  %v2181_v44 = vsel %vm570_vm0, %v11087_v11, %v2180_v45  ;;  %v3546_v11 = vsel %vm568_vm6, %v3536_v40, %v13294_v28 }
 0x2f3   : > { %v11201_v31 = vpop.permute.xlu0 %3322  ;;  %v3347_v20 = vsel %vm1357_vm7, %v11045_v18, %v3346_v0  ;;  %v8206_v18 = vcombine.low %v2299_v29, %v2307_v57  ;;  %v2173_v0 = vsel %vm570_vm0, %v11003_v49, %v2172_v54  ;;  %v13289_v45 = vrot.slane %v11184_v48, 4 }
 0x2f4   : > { %v8256_v15 = vcombine.low %v3339_v24, %v3347_v20  ;;  %v8257_v8 = vcombine.high %v3339_v24, %v3347_v20  ;;  %v13288_v41 = vrot.slane %v11201_v31, 4  ;;  %v3555_v20 = vsel %vm495_vm5, %v11126_v47, %v3554_v61 }
 0x2f5   : > { %v11208_v9 = vpop.permute.xlu1 %2692  ;;  %4074 = vmatpush1.bf16.msra.mxu0 %v8214_v38  ;;  %v8199_v38 = vcombine.high %v2173_v0, %v2181_v44  ;;  %v3547_v49 = vsel %vm495_vm5, %v11036_v55, %v3546_v11  ;;  %v8198_v29 = vcombine.low %v2173_v0, %v2181_v44  ;;  %v3340_v40 = vsel %vm568_vm6, %v3328_v51, %v13289_v45  ;;  %v11249_v44 = vld [vmem:[%s13261_s3] ss:$8 sps:$4 sm:$0xff]   ;;  %v11254_v51 = vld [vmem:[%s13261_s3 + $0x14] ss:$8 sps:$4 sm:$0xff]  }
 0x2f6   : > { %4075 = vmatprep.subr.bf16.mxu0 %v8207_v25  ;;  %4116 = vmatprep.subr.bf16.mxu1 %v8257_v8  ;;  %v8263_v54 = vcombine.high %v3547_v49, %v3555_v20  ;;  %v8262_v25 = vcombine.low %v3547_v49, %v3555_v20  ;;  %v3341_v55 = vsel %vm1357_vm7, %v11161_v59, %v3340_v40  ;;  %v13351_v59 = vrot.slane %v10992_v26, 4 }
 0x2f7   : > { %4117 = vmatpush1.bf16.msra.mxu1 %v8256_v15  ;;  %v11217_v37 = vpop.permute.xlu0 %2702  ;;  %v3348_v15 = vsel %vm568_vm6, %v3333_v30, %v13288_v41  ;;  %v13352_v49 = vrot.slane %v11071_v32, 4 }
 0x2f8   : > { %v3349_v47 = vsel %vm1357_vm7, %v3321_v7, %v3348_v15 }
 0x2f9   : > { %v11225_v24 = vpop.permute.xlu1 %2482  ;;  %4076 = vmatpush1.bf16.msra.mxu0 %v8206_v18  ;;  %v8259_v30 = vcombine.high %v3341_v55, %v3349_v47  ;;  %v8258_v18 = vcombine.low %v3341_v55, %v3349_v47 }
 0x2fa   : > { %4077 = vmatprep.subr.bf16.mxu0 %v8199_v38 }
 0x2fb   : > { %v11234_v57 = vpop.permute.xlu0 %2492 }
 0x2fd   : > { %v11239_v42 = vpop.permute.xlu1 %2274  ;;  %4078 = vmatpush1.bf16.msra.mxu0 %v8198_v29 }
 0x2fe   : > { %4093 = vmatprep.subr.bf16.mxu0 %v8263_v54 }
 0x2ff   : > { %v11242_v8 = vpop.permute.xlu0 %2284 }
 0x301   : > { %v3185_v61 = vpop.permute.xlu1 %3184  ;;  %4094 = vmatpush2.bf16.msra.mxu0 %v8262_v25 }
 0x302   : > { %v3202_v7 = vrot.slane %v3185_v61, 4  ;;  %4169 = vmatprep.subr.bf16.mxu0 %v8259_v30 }
 0x303   : > { %v3195_v0 = vpop.permute.xlu0 %3194 }
 0x304   : > { %v3207_v11 = vrot.slane %v3195_v0, 4  ;;  %4096 = vmatmul.mubr.bf16.vlgmr.msra.gmra.mxu0 %v11249_v44  ;;  %v3212_v38 = vsel %vm568_vm6, %v13351_v59, %v3202_v7 }
 0x305   : > { %v11260_v20 = vpop.permute.xlu1 %3186  ;;  %4170 = vmatpush1.bf16.msra.mxu0 %v8258_v18  ;;  %8271 = vmatprep.mubr.msk.bf16.mxu0 %vm4056_vm10, %v11254_v51  ;;  %v3213_v40 = vsel %vm719_vm3, %v10992_v26, %v3212_v38  ;;  %v11278_v18 = vld [vmem:[%s13261_s3 + $0x10] ss:$8 sps:$4 sm:$0xff]  }
 0x306   : > { %v13290_v15 = vrot.slane %v11260_v20, 4  ;;  %v3220_v29 = vsel %vm568_vm6, %v13352_v49, %v3207_v11 }
 0x307   : > { %v11268_v54 = vpop.permute.xlu0 %3196  ;;  %v3221_v47 = vsel %vm719_vm3, %v11071_v32, %v3220_v29  ;;  %v2715_v32 = vrot.slane %v11217_v37, 4 }
 0x308   : > { %v13292_v25 = vrot.slane %v11268_v54, 4  ;;  %v8248_v55 = vcombine.low %v3213_v40, %v3221_v47  ;;  %v8249_v30 = vcombine.high %v3213_v40, %v3221_v47  ;;  %v3214_v59 = vsel %vm568_vm6, %v3202_v7, %v13290_v15 }
 0x309   : > { %v2975_v49 = vpop.permute.xlu1 %2974  ;;  %v3215_v29 = vsel %vm719_vm3, %v3185_v61, %v3214_v59  ;;  %v13353_v15 = vrot.slane %v11000_v10, 4  ;;  %v2505_v59 = vrot.slane %v11234_v57, 4 }
 0x30a   : > { %v2992_v41 = vrot.slane %v2975_v49, 4  ;;  %4118 = vmatprep.subr.bf16.mxu1 %v8249_v30  ;;  %v3222_v26 = vsel %vm568_vm6, %v3207_v11, %v13292_v25  ;;  %v2710_v11 = vrot.slane %v11208_v9, 4  ;;  %v2290_v25 = vrot.slane %v11140_v23, 4 }
 0x30b   : > { %4119 = vmatpush1.bf16.msra.mxu1 %v8248_v55  ;;  %v2985_v38 = vpop.permute.xlu0 %2984  ;;  %v3223_v40 = vsel %vm719_vm3, %v3195_v0, %v3222_v26  ;;  %v13354_v0 = vrot.slane %v11082_v12, 4 }
 0x30c   : > { %v2997_v47 = vrot.slane %v2985_v38, 4  ;;  %4106 = vmatmul.mubr.bf16.gmra.mxu0 %v11278_v18  ;;  %v8250_v45 = vcombine.low %v3215_v29, %v3223_v40  ;;  %v8251_v7 = vcombine.high %v3215_v29, %v3223_v40  ;;  %v3002_v30 = vsel %vm568_vm6, %v13353_v15, %v2992_v41 }
 0x30d   : > { %v11293_v58 = vpop.permute.xlu1 %2976  ;;  %8274 = vmatprep.mubr.msk.bf16.mxu0 %vm4056_vm10, %v10852_v35  ;;  %v3003_v15 = vsel %vm868_vm4, %v11000_v10, %v3002_v30  ;;  %v2728_v29 = vsel %vm568_vm6, %v2714_v17, %v2715_v32  ;;  %v2295_v10 = vrot.slane %v11153_v52, 4 }
 0x30e   : > { %v13293_v61 = vrot.slane %v11293_v58, 4  ;;  %4171 = vmatprep.subr.bf16.mxu0 %v8251_v7  ;;  %v3010_v55 = vsel %vm568_vm6, %v13354_v0, %v2997_v47  ;;  %v2729_v28 = vsel %vm942_vm2, %v11093_v33, %v2728_v29  ;;  %v13359_v29 = vrot.slane %v10984_v21, 4 }
 0x30f   : > { %4172 = vmatpush1.bf16.msra.mxu0 %v8250_v45  ;;  %v11303_v26 = vpop.permute.xlu0 %2986  ;;  %v3011_v35 = vsel %vm868_vm4, %v11082_v12, %v3010_v55  ;;  %v2500_v12 = vrot.slane %v11225_v24, 4  ;;  %v13355_v55 = vrot.slane %v11008_v62, 4 }
 0x310   : > { %v13295_v40 = vrot.slane %v11303_v26, 4  ;;  %v8240_v7 = vcombine.low %v3003_v15, %v3011_v35  ;;  %v8241_v0 = vcombine.high %v3003_v15, %v3011_v35  ;;  %v3004_v45 = vsel %vm568_vm6, %v2992_v41, %v13293_v61 }
 0x311   : > { %v11321_v30 = vpop.permute.xlu1 %2146  ;;  %v2720_v15 = vsel %vm568_vm6, %v13355_v55, %v2710_v11  ;;  %v3005_v41 = vsel %vm868_vm4, %v2975_v49, %v3004_v45  ;;  %v2300_v45 = vsel %vm568_vm6, %v13359_v29, %v2290_v25  ;;  %v13362_v29 = vpack.c.bf16 %v10742_v22, %v10760_v36 }
 0x312   : > { %4120 = vmatprep.subr.bf16.mxu1 %v8241_v0  ;;  %v3012_v17 = vsel %vm568_vm6, %v2997_v47, %v13295_v40  ;;  %v13356_v0 = vrot.slane %v11102_v19, 4  ;;  %v13357_v40 = vpack.c.bf16 %v10628_v63, %v10515_v34  ;;  %v2721_v49 = vsel %vm942_vm2, %v11008_v62, %v2720_v15 }
 0x313   : > { %4121 = vmatpush1.bf16.msra.mxu1 %v8240_v7  ;;  %v11329_v35 = vpop.permute.xlu0 %2156  ;;  %v3013_v61 = vsel %vm868_vm4, %v2985_v38, %v3012_v17  ;;  %v13358_v38 = vrot.slane %v11016_v27, 4  ;;  %v13360_v17 = vrot.slane %v11059_v46, 4  ;;  %v2296_v63 = vrot.slane %v11242_v8, 4 }
 0x314   : > { %v2518_v47 = vsel %vm568_vm6, %v13356_v0, %v2505_v59  ;;  %4122 = vmatprep.subr.bf16.mxu1 %v13357_v40  ;;  %v8242_v7 = vcombine.low %v3005_v41, %v3013_v61  ;;  %v8243_v55 = vcombine.high %v3005_v41, %v3013_v61  ;;  %v8225_v40 = vcombine.high %v2721_v49, %v2729_v28 }
 0x315   : > { %v11343_v1 = vpop.permute.xlu1 %2694  ;;  %v2510_v33 = vsel %vm568_vm6, %v13358_v38, %v2500_v12  ;;  %v2308_v34 = vsel %vm568_vm6, %v13360_v17, %v2295_v10  ;;  %v2519_v62 = vsel %vm793_vm1, %v11102_v19, %v2518_v47  ;;  %v2169_v15 = vrot.slane %v11329_v35, 4 }
 0x316   : > { %v2711_v61 = vrot.slane %v11343_v1, 4  ;;  %4173 = vmatprep.subr.bf16.mxu0 %v8243_v55  ;;  %v13361_v41 = vpack.c.bf16 %v10624_v3, %v10517_v14  ;;  %v2511_v55 = vsel %vm793_vm1, %v11016_v27, %v2510_v33  ;;  %v2301_v14 = vsel %vm643_vm8, %v10984_v21, %v2300_v45 }
 0x317   : > { %4174 = vmatpush1.bf16.msra.mxu0 %v8242_v7  ;;  %v11364_v0 = vpop.permute.xlu0 %2704  ;;  %v2291_v3 = vrot.slane %v11239_v42, 4  ;;  %v8224_v47 = vcombine.low %v2721_v49, %v2729_v28  ;;  %v8217_v17 = vcombine.high %v2511_v55, %v2519_v62  ;;  %v2309_v22 = vsel %vm643_vm8, %v11059_v46, %v2308_v34 }
 0x318   : > { %4123 = vmatpush1.bf16.msra.mxu1 %v13361_v41  ;;  %v2716_v38 = vrot.slane %v11364_v0, 4  ;;  %4175 = vmatprep.subr.bf16.mxu0 %v13362_v29  ;;  %v2722_v19 = vsel %vm568_vm6, %v2710_v11, %v2711_v61  ;;  %v2164_v36 = vrot.slane %v11321_v30, 4  ;;  %v2310_v21 = vsel %vm568_vm6, %v2295_v10, %v2296_v63 }
 0x319   : > { %4124 = vmatprep.subr.bf16.mxu1 %v8225_v40  ;;  %v11378_v7 = vpop.permute.xlu1 %2484  ;;  %v13363_v28 = vpack.c.bf16 %v10752_v43, %v10764_v50  ;;  %v2723_v49 = vsel %vm942_vm2, %v11208_v9, %v2722_v19  ;;  %v13364_v45 = vrot.slane %v11115_v39, 4  ;;  %v8216_v50 = vcombine.low %v2511_v55, %v2519_v62 }
 0x31a   : > { %v2501_v27 = vrot.slane %v11378_v7, 4  ;;  %v2730_v11 = vsel %vm568_vm6, %v2715_v32, %v2716_v38  ;;  %v8209_v9 = vcombine.high %v2301_v14, %v2309_v22  ;;  %v2311_v62 = vsel %vm643_vm8, %v11153_v52, %v2310_v21 }
 0x31b   : > { %4176 = vmatpush1.bf16.msra.mxu0 %v13363_v28  ;;  %v11395_v46 = vpop.permute.xlu0 %2494  ;;  %v2731_v33 = vsel %vm942_vm2, %v11217_v37, %v2730_v11  ;;  %v2182_v32 = vsel %vm568_vm6, %v13364_v45, %v2169_v15  ;;  %v2302_v37 = vsel %vm568_vm6, %v2290_v25, %v2291_v3  ;;  %v8208_v21 = vcombine.low %v2301_v14, %v2309_v22 }
 0x31c   : > { %4125 = vmatpush1.bf16.msra.mxu1 %v8224_v47  ;;  %v2506_v34 = vrot.slane %v11395_v46, 4  ;;  %v8226_v10 = vcombine.low %v2723_v49, %v2731_v33  ;;  %v8227_v40 = vcombine.high %v2723_v49, %v2731_v33  ;;  %v2512_v43 = vsel %vm568_vm6, %v2500_v12, %v2501_v27 }
 0x31d   : > { %4126 = vmatprep.subr.bf16.mxu1 %v8217_v17  ;;  %v11408_v41 = vpop.permute.xlu1 %2148  ;;  %v13365_v47 = vrot.slane %v11026_v13, 4  ;;  %v2513_v25 = vsel %vm793_vm1, %v11225_v24, %v2512_v43  ;;  %v2303_v52 = vsel %vm643_vm8, %v11140_v23, %v2302_v37 }
 0x31e   : > { %v2165_v29 = vrot.slane %v11408_v41, 4  ;;  %4177 = vmatprep.subr.bf16.mxu0 %v8227_v40  ;;  %v2520_v19 = vsel %vm568_vm6, %v2505_v59, %v2506_v34  ;;  %v2183_v59 = vsel %vm570_vm0, %v11115_v39, %v2182_v32  ;;  %v8211_v24 = vcombine.high %v2303_v52, %v2311_v62 }
 0x31f   : > { %v2174_v12 = vsel %vm568_vm6, %v13365_v47, %v2164_v36  ;;  %4178 = vmatpush1.bf16.msra.mxu0 %v8226_v10  ;;  %v11424_v55 = vpop.permute.xlu0 %2158  ;;  %v2521_v17 = vsel %vm793_vm1, %v11234_v57, %v2520_v19  ;;  %v13367_v19 = vrot.slane %v11132_v56, 4 }
 0x320   : > { %4127 = vmatpush1.bf16.msra.mxu1 %v8216_v50  ;;  %v2170_v11 = vrot.slane %v11424_v55, 4  ;;  %v8218_v28 = vcombine.low %v2513_v25, %v2521_v17  ;;  %v8219_v49 = vcombine.high %v2513_v25, %v2521_v17  ;;  %v2175_v45 = vsel %vm570_vm0, %v11026_v13, %v2174_v12 }
 0x321   : > { %4128 = vmatprep.subr.bf16.mxu1 %v8209_v9  ;;  %v3521_v33 = vpop.permute.xlu1 %3520  ;;  %v8201_v57 = vcombine.high %v2175_v45, %v2183_v59  ;;  %v2176_v39 = vsel %vm568_vm6, %v2164_v36, %v2165_v29  ;;  %v13366_v13 = vrot.slane %v11034_v6, 4  ;;  %v8200_v43 = vcombine.low %v2175_v45, %v2183_v59 }
 0x322   : > { %v3538_v10 = vrot.slane %v3521_v33, 4  ;;  %4179 = vmatprep.subr.bf16.mxu0 %v8219_v49  ;;  %v2184_v32 = vsel %vm568_vm6, %v2169_v15, %v2170_v11  ;;  %v8210_v50 = vcombine.low %v2303_v52, %v2311_v62  ;;  %v2177_v15 = vsel %vm570_vm0, %v11321_v30, %v2176_v39 }
 0x323   : > { %4180 = vmatpush1.bf16.msra.mxu0 %v8218_v28  ;;  %v3531_v23 = vpop.permute.xlu0 %3530  ;;  %v2185_v14 = vsel %vm570_vm0, %v11329_v35, %v2184_v32 }
 0x324   : > { %4129 = vmatpush1.bf16.msra.mxu1 %v8208_v21  ;;  %v3543_v22 = vrot.slane %v3531_v23, 4  ;;  %4181 = vmatprep.subr.bf16.mxu0 %v8211_v24  ;;  %v3548_v40 = vsel %vm568_vm6, %v13366_v13, %v3538_v10  ;;  %v8203_v37 = vcombine.high %v2177_v15, %v2185_v14  ;;  %v8202_v28 = vcombine.low %v2177_v15, %v2185_v14 }
 0x325   : > { %4130 = vmatprep.subr.bf16.mxu1 %v8201_v57  ;;  %v11448_v36 = vpop.permute.xlu1 %3522  ;;  %v3549_v12 = vsel %vm495_vm5, %v11034_v6, %v3548_v40  ;;  %v13368_v24 = vrot.slane %v11184_v48, 4  ;;  %v13369_v13 = vrot.slane %v11201_v31, 4 }
 0x326   : > { %v3539_v9 = vrot.slane %v11448_v36, 4  ;;  %v3556_v35 = vsel %vm568_vm6, %v13367_v19, %v3543_v22 }
 0x327   : > { %4182 = vmatpush1.bf16.msra.mxu0 %v8210_v50  ;;  %v11456_v47 = vpop.permute.xlu0 %3532  ;;  %v3557_v62 = vsel %vm495_vm5, %v11132_v56, %v3556_v35  ;;  %v13370_v50 = vrot.slane %v11260_v20, 4 }
 0x328   : > { %4131 = vmatpush1.bf16.msra.mxu1 %v8200_v43  ;;  %v3544_v25 = vrot.slane %v11456_v47, 4  ;;  %4183 = vmatprep.subr.bf16.mxu0 %v8203_v37  ;;  %v8264_v30 = vcombine.low %v3549_v12, %v3557_v62  ;;  %v8265_v17 = vcombine.high %v3549_v12, %v3557_v62  ;;  %v3550_v59 = vsel %vm568_vm6, %v3538_v10, %v3539_v9 }
 0x329   : > { %v3315_v49 = vpop.permute.xlu1 %3314  ;;  %v3551_v21 = vsel %vm495_vm5, %v3521_v33, %v3550_v59  ;;  %v13371_v62 = vrot.slane %v11268_v54, 4 }
 0x32a   : > { %v3330_v52 = vrot.slane %v3315_v49, 4  ;;  %4146 = vmatprep.subr.bf16.mxu1 %v8265_v17  ;;  %v3558_v6 = vsel %vm568_vm6, %v3543_v22, %v3544_v25 }
 0x32b   : > { %4184 = vmatpush1.bf16.msra.mxu0 %v8202_v28  ;;  %v3325_v56 = vpop.permute.xlu0 %3324  ;;  %v3559_v45 = vsel %vm495_vm5, %v3531_v23, %v3558_v6  ;;  %v13372_v28 = vrot.slane %v11293_v58, 4 }
 0x32c   : > { %4147 = vmatpush2.bf16.msra.mxu1 %v8264_v30  ;;  %v3342_v57 = vsel %vm568_vm6, %v13368_v24, %v3330_v52  ;;  %v3335_v10 = vrot.slane %v3325_v56, 4  ;;  %v8266_v39 = vcombine.low %v3551_v21, %v3559_v45  ;;  %v8267_v32 = vcombine.high %v3551_v21, %v3559_v45 }
 0x32d   : > { %v3189_v14 = vpop.permute.xlu1 %3188  ;;  %v3343_v23 = vsel %vm1357_vm7, %v11184_v48, %v3342_v57  ;;  %v13373_v45 = vrot.slane %v11303_v26, 4 }
 0x32e   : > { %v3350_v40 = vsel %vm568_vm6, %v13369_v13, %v3335_v10  ;;  %v3204_v22 = vrot.slane %v3189_v14, 4  ;;  %4199 = vmatprep.subr.bf16.mxu0 %v8267_v32 }
 0x32f   : > { %4149 = vmatmul.mubr.bf16.vlgmr.msra.gmra.mxu1 %v11249_v44  ;;  %4200 = vmatpush2.bf16.msra.mxu0 %v8266_v39  ;;  %v3199_v33 = vpop.permute.xlu0 %3198  ;;  %v3351_v43 = vsel %vm1357_vm7, %v11201_v31, %v3350_v40  ;;  %v9534_v39 = vld [vmem:[%s13261_s3 + $0x4] ss:$8 sps:$4 sm:$0xff]  }
 0x330   : > { %8273 = vmatprep.mubr.msk.bf16.mxu1 %vm4056_vm10, %v11254_v51  ;;  %v3216_v15 = vsel %vm568_vm6, %v13370_v50, %v3204_v22  ;;  %v3209_v37 = vrot.slane %v3199_v33, 4  ;;  %v8260_v19 = vcombine.low %v3343_v23, %v3351_v43  ;;  %v8261_v35 = vcombine.high %v3343_v23, %v3351_v43 }
 0x331   : > { %v2979_v12 = vpop.permute.xlu1 %2978  ;;  %v3217_v48 = vsel %vm719_vm3, %v11260_v20, %v3216_v15  ;;  %v13374_v50 = vpack.c.bf16 %v10756_v5, %v10768_v60 }
 0x332   : > { %v3224_v30 = vsel %vm568_vm6, %v13371_v62, %v3209_v37  ;;  %v2994_v17 = vrot.slane %v2979_v12, 4  ;;  %4202 = vmatmul.mubr.bf16.vlgmr.msra.gmra.mxu0 %v11249_v44  ;;  %4222 = vmatprep.subr.bf16.mxu1 %v8261_v35 }
 0x333   : > { %4223 = vmatpush1.bf16.msra.mxu1 %v8260_v19  ;;  %v2989_v31 = vpop.permute.xlu0 %2988  ;;  %v3225_v59 = vsel %vm719_vm3, %v11268_v54, %v3224_v30  ;;  %8275 = vmatprep.mubr.msk.bf16.mxu0 %vm4056_vm10, %v11254_v51 }
 0x334   : > { %v3006_v49 = vsel %vm568_vm6, %v13372_v28, %v2994_v17  ;;  %v2999_v52 = vrot.slane %v2989_v31, 4  ;;  %v8252_v6 = vcombine.low %v3217_v48, %v3225_v59  ;;  %v8253_v56 = vcombine.high %v3217_v48, %v3225_v59 }
 0x335   : > { %v2697_v21 = vpop.permute.xlu1 %2696  ;;  %v3007_v54 = vsel %vm868_vm4, %v11293_v58, %v3006_v49 }
 0x336   : > { %v3014_v24 = vsel %vm568_vm6, %v13373_v45, %v2999_v52  ;;  %v2712_v57 = vrot.slane %v2697_v21, 4  ;;  %4224 = vmatprep.subr.bf16.mxu1 %v8253_v56 }
 0x337   : > { %4159 = vmatmul.mubr.bf16.gmra.mxu1 %v11278_v18  ;;  %v2707_v20 = vpop.permute.xlu0 %2706  ;;  %v3015_v10 = vsel %vm868_vm4, %v11303_v26, %v3014_v24 }
 0x338   : > { %4225 = vmatpush1.bf16.msra.mxu1 %v8252_v6  ;;  %8276 = vmatprep.mubr.msk.bf16.mxu1 %vm4056_vm10, %v9534_v39  ;;  %v2717_v32 = vrot.slane %v2707_v20, 4  ;;  %v8244_v14 = vcombine.low %v3007_v54, %v3015_v10  ;;  %v8245_v13 = vcombine.high %v3007_v54, %v3015_v10  ;;  %v2724_v22 = vsel %vm568_vm6, %v2711_v61, %v2712_v57  ;;  %v9315_v20 = vld [vmem:[#allocation6 + $0x64] ss:$8 sps:$4 sm:$0xff]   ;;  %v9318_v54 = vld [vmem:[#allocation6 + $0x54] ss:$8 sps:$4 sm:$0xff]  }
 0x339   : > { %v2487_v40 = vpop.permute.xlu1 %2486  ;;  %v2725_v61 = vsel %vm942_vm2, %v11343_v1, %v2724_v22  ;;  %v9319_v10 = vld [vmem:[#allocation6 + $0x40] ss:$8 sps:$4 sm:$0xff]   ;;  %v9321_v39 = vld [vmem:[#allocation6 + $0x44] ss:$8 sps:$4 sm:$0xff]   ;;  %v9327_v22 = vld [vmem:[#allocation6 + $0x174] ss:$8 sps:$4 sm:$0xff]  }
 0x33a   : > { %v2732_v58 = vsel %vm568_vm6, %v2716_v38, %v2717_v32  ;;  %v2502_v33 = vrot.slane %v2487_v40, 4  ;;  %4212 = vmatmul.mubr.bf16.gmra.mxu0 %v11278_v18  ;;  %4226 = vmatprep.subr.bf16.mxu1 %v8245_v13  ;;  %v9322_v32 = vld [vmem:[#allocation6 + $0x30] ss:$8 sps:$4 sm:$0xff]  }
 0x33b   : > { %v2497_v26 = vpop.permute.xlu0 %2496  ;;  %v2733_v23 = vsel %vm942_vm2, %v11364_v0, %v2732_v58  ;;  %v13375_v0 = vpack.c.bf16 %v10754_v16, %v10766_v53  ;;  %v9325_v13 = vld [vmem:[#allocation6 + $0x170] ss:$8 sps:$4 sm:$0xff]  }
 0x33c   : > { %4227 = vmatpush1.bf16.msra.mxu1 %v8244_v14  ;;  %v2507_v43 = vrot.slane %v2497_v26, 4  ;;  %v2514_v38 = vsel %vm568_vm6, %v2501_v27, %v2502_v33  ;;  %v8229_v35 = vcombine.high %v2725_v61, %v2733_v23  ;;  %v8228_v1 = vcombine.low %v2725_v61, %v2733_v23  ;;  %v9324_v14 = vld [vmem:[#allocation6 + $0x34] ss:$8 sps:$4 sm:$0xff]   ;;  %v9328_v23 = vld [vmem:[#allocation6 + $0x20] ss:$8 sps:$4 sm:$0xff]  }
 0x33d   : > { %4228 = vmatprep.subr.bf16.mxu1 %v13374_v50  ;;  %v2277_v15 = vpop.permute.xlu1 %2276  ;;  %v2515_v27 = vsel %vm793_vm1, %v11378_v7, %v2514_v38  ;;  %v9331_v50 = vld [vmem:[#allocation6 + $0x160] ss:$8 sps:$4 sm:$0xff]   ;;  %v9333_v38 = vld [vmem:[#allocation6 + $0x164] ss:$8 sps:$4 sm:$0xff]  }
 0x33e   : > { %v2522_v37 = vsel %vm568_vm6, %v2506_v34, %v2507_v43  ;;  %v2292_v19 = vrot.slane %v2277_v15, 4  ;;  %v9330_v43 = vld [vmem:[#allocation6 + $0x24] ss:$8 sps:$4 sm:$0xff]  }
 0x33f   : > { %v2287_v5 = vpop.permute.xlu0 %2286  ;;  %v2523_v60 = vsel %vm793_vm1, %v11395_v46, %v2522_v37 }
 0x340   : > { %4229 = vmatpush1.bf16.msra.mxu1 %v13375_v0  ;;  %v2297_v12 = vrot.slane %v2287_v5, 4  ;;  %v2304_v34 = vsel %vm568_vm6, %v2291_v3, %v2292_v19  ;;  %v8221_v30 = vcombine.high %v2515_v27, %v2523_v60  ;;  %v8220_v48 = vcombine.low %v2515_v27, %v2523_v60  ;;  %v9334_v19 = vld [vmem:[#allocation6 + $0x10] ss:$8 sps:$4 sm:$0xff]   ;;  %v9339_v5 = vld [vmem:[#allocation6 + $0x154] ss:$8 sps:$4 sm:$0xff]  }
 0x341   : > { %4230 = vmatprep.subr.bf16.mxu1 %v8229_v35  ;;  %v2151_v62 = vpop.permute.xlu1 %2150  ;;  %v2305_v7 = vsel %vm643_vm8, %v11239_v42, %v2304_v34  ;;  %v9336_v35 = vld [vmem:[#allocation6 + $0x14] ss:$8 sps:$4 sm:$0xff]   ;;  %v9337_v0 = vld [vmem:[#allocation6 + $0x150] ss:$8 sps:$4 sm:$0xff]   ;;  %v9340_v60 = vld [vmem:[#allocation6] ss:$8 sps:$4 sm:$0xff]  }
 0x342   : > { %v2312_v16 = vsel %vm568_vm6, %v2296_v63, %v2297_v12  ;;  %v2166_v53 = vrot.slane %v2151_v62, 4  ;;  %v9342_v12 = vld [vmem:[#allocation6 + $0x4] ss:$8 sps:$4 sm:$0xff]   ;;  %v9346_v27 = vld [vmem:[#allocation6 + $0xf0] ss:$8 sps:$4 sm:$0xff]  }
 0x343   : > { %v2161_v17 = vpop.permute.xlu0 %2160  ;;  %v2313_v46 = vsel %vm643_vm8, %v11242_v8, %v2312_v16  ;;  %v9345_v62 = vld [vmem:[#allocation6 + $0x144] ss:$8 sps:$4 sm:$0xff]   ;;  %v9348_v34 = vld [vmem:[#allocation6 + $0xf4] ss:$8 sps:$4 sm:$0xff]   ;;  %v9349_v16 = vld [vmem:[#allocation6 + $0x130] ss:$8 sps:$4 sm:$0xff]  }
 0x344   : > { %4231 = vmatpush1.bf16.msra.mxu1 %v8228_v1  ;;  %v2171_v31 = vrot.slane %v2161_v17, 4  ;;  %v2178_v3 = vsel %vm568_vm6, %v2165_v29, %v2166_v53  ;;  %v8213_v49 = vcombine.high %v2305_v7, %v2313_v46  ;;  %v8212_v56 = vcombine.low %v2305_v7, %v2313_v46  ;;  %v9343_v1 = vld [vmem:[#allocation6 + $0x140] ss:$8 sps:$4 sm:$0xff]   ;;  %v9351_v53 = vld [vmem:[#allocation6 + $0x134] ss:$8 sps:$4 sm:$0xff]  }
 0x345   : > { %4232 = vmatprep.subr.bf16.mxu1 %v8221_v30  ;;  %v3525_v59 = vpop.permute.xlu1 %3524  ;;  %v2179_v42 = vsel %vm570_vm0, %v11408_v41, %v2178_v3  ;;  %v9352_v30 = vld [vmem:[#allocation6 + $0xe0] ss:$8 sps:$4 sm:$0xff]   ;;  %v9354_v17 = vld [vmem:[#allocation6 + $0xe4] ss:$8 sps:$4 sm:$0xff]   ;;  %v9358_v7 = vld [vmem:[#allocation6 + $0xd0] ss:$8 sps:$4 sm:$0xff]  }
 0x346   : > { %v2186_v63 = vsel %vm568_vm6, %v2170_v11, %v2171_v31  ;;  %v3540_v28 = vrot.slane %v3525_v59, 4  ;;  %v9355_v46 = vld [vmem:[#allocation6 + $0x120] ss:$8 sps:$4 sm:$0xff]   ;;  %v9357_v31 = vld [vmem:[#allocation6 + $0x124] ss:$8 sps:$4 sm:$0xff]  }
 0x347   : > { %v3535_v52 = vpop.permute.xlu0 %3534  ;;  %v2187_v8 = vsel %vm570_vm0, %v11424_v55, %v2186_v63  ;;  %v9363_v59 = vld [vmem:[#allocation6 + $0x114] ss:$8 sps:$4 sm:$0xff]   ;;  %v9361_v3 = vld [vmem:[#allocation6 + $0x110] ss:$8 sps:$4 sm:$0xff]   ;;  %v9366_v63 = vld [vmem:[#allocation6 + $0xc4] ss:$8 sps:$4 sm:$0xff]  }
 0x348   : > { %4233 = vmatpush1.bf16.msra.mxu1 %v8220_v48  ;;  %v3545_v6 = vrot.slane %v3535_v52, 4  ;;  %v3552_v29 = vsel %vm568_vm6, %v3539_v9, %v3540_v28  ;;  %v8205_v21 = vcombine.high %v2179_v42, %v2187_v8  ;;  %v8204_v55 = vcombine.low %v2179_v42, %v2187_v8  ;;  %v9310_v9 = vld [vmem:[#allocation6 + $0x70] ss:$8 sps:$4 sm:$0xff]   ;;  %v9360_v48 = vld [vmem:[#allocation6 + $0xd4] ss:$8 sps:$4 sm:$0xff]  }
 0x349   : > { %4234 = vmatprep.subr.bf16.mxu1 %v8213_v49  ;;  %v3553_v24 = vsel %vm495_vm5, %v11448_v36, %v3552_v29  ;;  %v9316_v36 = vld [vmem:[#allocation6 + $0x50] ss:$8 sps:$4 sm:$0xff]   ;;  %v9369_v28 = vld [vmem:[#allocation6 + $0x104] ss:$8 sps:$4 sm:$0xff]   ;;  %v9364_v49 = vld [vmem:[#allocation6 + $0xc0] ss:$8 sps:$4 sm:$0xff]  }
 0x34a   : > { %v3560_v11 = vsel %vm568_vm6, %v3544_v25, %v3545_v6  ;;  %v9312_v25 = vld [vmem:[#allocation6 + $0x74] ss:$8 sps:$4 sm:$0xff]   ;;  %v9367_v52 = vld [vmem:[#allocation6 + $0x100] ss:$8 sps:$4 sm:$0xff]   ;;  %vm7908_vm0 = vcmask 523264  }
 0x34b   : > { %v3561_v45 = vsel %vm495_vm5, %v11456_v47, %v3560_v11  ;;  %5704 = vmatprep.subr.bf16.mxu0 %v9312_v25  ;;  %v9313_v47 = vld [vmem:[#allocation6 + $0x60] ss:$8 sps:$4 sm:$0xff]   ;;  %v9370_v11 = vld [vmem:[#allocation6 + $0xb0] ss:$8 sps:$4 sm:$0xff]  }
 0x34c   : > { %4235 = vmatpush1.bf16.msra.mxu1 %v8212_v56  ;;  %v8269_v57 = vcombine.high %v3553_v24, %v3561_v45  ;;  %v8268_v41 = vcombine.low %v3553_v24, %v3561_v45  ;;  %5705 = vmatpush1.bf16.msra.mxu0 %v9310_v9  ;;  %v9373_v45 = vld [vmem:[#allocation6 + $0x1f0] ss:$8 sps:$4 sm:$0xff]   ;;  %v9378_v9 = vld [vmem:[#allocation6 + $0xa4] ss:$8 sps:$4 sm:$0xff]  }
 0x34d   : > { %4236 = vmatprep.subr.bf16.mxu1 %v8205_v21  ;;  %5706 = vmatprep.subr.bf16.mxu0 %v9315_v20  ;;  %v9372_v21 = vld [vmem:[#allocation6 + $0xb4] ss:$8 sps:$4 sm:$0xff]   ;;  %v9376_v20 = vld [vmem:[#allocation6 + $0xa0] ss:$8 sps:$4 sm:$0xff]  }
 0x350   : > { %4237 = vmatpush1.bf16.msra.mxu1 %v8204_v55  ;;  %5707 = vmatpush1.bf16.msra.mxu0 %v9313_v47 }
 0x351   : > { %4252 = vmatprep.subr.bf16.mxu1 %v8269_v57  ;;  %5708 = vmatprep.subr.bf16.mxu0 %v9318_v54  ;;  %v9375_v57 = vld [vmem:[#allocation6 + $0x1f4] ss:$8 sps:$4 sm:$0xff]  }
 0x354   : > { %4253 = vmatpush2.bf16.msra.mxu1 %v8268_v41  ;;  %5709 = vmatpush1.bf16.msra.mxu0 %v9316_v36  ;;  %v11580_v58 = vpop.permute.xlu0 %3665  ;;  %v9381_v36 = vld [vmem:[#allocation6 + $0x1e4] ss:$8 sps:$4 sm:$0xff]  }
 0x355   : > { %5710 = vmatprep.subr.bf16.mxu0 %v9321_v39  ;;  %5757 = vmatprep.subr.bf16.mxu1 %v9327_v22  ;;  %v9379_v39 = vld [vmem:[#allocation6 + $0x1e0] ss:$8 sps:$4 sm:$0xff]  }
 0x357   : > { %4255 = vmatmul.mubr.bf16.vlgmr.msra.gmra.mxu1 %v11249_v44 }
 0x358   : > { %8277 = vmatprep.mubr.msk.bf16.mxu1 %vm4056_vm10, %v11254_v51  ;;  %5711 = vmatpush1.bf16.msra.mxu0 %v9319_v10  ;;  %v11573_v51 = vpop.permute.xlu1 %3660 }
 0x359   : > { %5712 = vmatprep.subr.bf16.mxu0 %v9324_v14  ;;  %5758 = vmatpush1.bf16.msra.mxu1 %v9325_v13 }
 0x35a   : > { %5759 = vmatprep.subr.bf16.mxu1 %v9333_v38 }
 0x35c   : > { %5713 = vmatpush1.bf16.msra.mxu0 %v9322_v32 }
 0x35d   : > { %5714 = vmatprep.subr.bf16.mxu0 %v9330_v43  ;;  %5760 = vmatpush1.bf16.msra.mxu1 %v9331_v50  ;;  %v11621_v43 = vpop.permute.xlu1 %3670  ;;  %v11623_v50 = vpop.permute.xlu0 %3675 }
 0x35e   : > { %5761 = vmatprep.subr.bf16.mxu1 %v9339_v5 }
 0x35f   : > { %4265 = vmatmul.mubr.bf16.gmra.mxu1 %v11278_v18 }
 0x360   : > { %5715 = vmatpush1.bf16.msra.mxu0 %v9328_v23 }
 0x361   : > { %5716 = vmatprep.subr.bf16.mxu0 %v9336_v35  ;;  %5762 = vmatpush1.bf16.msra.mxu1 %v9337_v0  ;;  %v9382_v35 = vld [vmem:[#allocation6 + $0x90] ss:$8 sps:$4 sm:$0xff]   ;;  %v9384_v0 = vld [vmem:[#allocation6 + $0x94] ss:$8 sps:$4 sm:$0xff]  }
 0x362   : > { %5763 = vmatprep.subr.bf16.mxu1 %v9345_v62 }
 0x364   : > { %5717 = vmatpush1.bf16.msra.mxu0 %v9334_v19 }
 0x365   : > { %5718 = vmatprep.subr.bf16.mxu0 %v9342_v12  ;;  %5764 = vmatpush1.bf16.msra.mxu1 %v9343_v1  ;;  %v9385_v12 = vld [vmem:[#allocation6 + $0x1d0] ss:$8 sps:$4 sm:$0xff]   ;;  %v9387_v1 = vld [vmem:[#allocation6 + $0x1d4] ss:$8 sps:$4 sm:$0xff]  }
 0x366   : > { %5765 = vmatprep.subr.bf16.mxu1 %v9351_v53  ;;  %v9393_v53 = vld [vmem:[#allocation6 + $0x1c4] ss:$8 sps:$4 sm:$0xff]  }
 0x368   : > { %5719 = vmatpush1.bf16.msra.mxu0 %v9340_v60 }
 0x369   : > { %5720 = vmatprep.subr.bf16.mxu0 %v9348_v34  ;;  %5766 = vmatpush1.bf16.msra.mxu1 %v9349_v16  ;;  %v9390_v34 = vld [vmem:[#allocation6 + $0x84] ss:$8 sps:$4 sm:$0xff]  }
 0x36a   : > { %5767 = vmatprep.subr.bf16.mxu1 %v9357_v31 }
 0x36c   : > { %5721 = vmatpush2.bf16.msra.mxu0 %v9346_v27 }
 0x36d   : > { %5722 = vmatprep.subr.bf16.mxu0 %v9354_v17  ;;  %5768 = vmatpush1.bf16.msra.mxu1 %v9355_v46  ;;  %v9388_v46 = vld [vmem:[#allocation6 + $0x80] ss:$8 sps:$4 sm:$0xff]  }
 0x36e   : > { %5769 = vmatprep.subr.bf16.mxu1 %v9363_v59 }
 0x370   : > { %5723 = vmatpush2.bf16.msra.mxu0 %v9352_v30 }
 0x371   : > { %5724 = vmatprep.subr.bf16.mxu0 %v9360_v48  ;;  %5770 = vmatpush1.bf16.msra.mxu1 %v9361_v3  ;;  %v9399_v3 = vld [vmem:[#allocation6 + $0x274] ss:$8 sps:$4 sm:$0xff]  }
 0x372   : > { %5771 = vmatprep.subr.bf16.mxu1 %v9369_v28 }
 0x374   : > { %5725 = vmatpush2.bf16.msra.mxu0 %v9358_v7  ;;  %v9391_v7 = vld [vmem:[#allocation6 + $0x1c0] ss:$8 sps:$4 sm:$0xff]  }
 0x375   : > { %5726 = vmatprep.subr.bf16.mxu0 %v9366_v63  ;;  %5772 = vmatpush1.bf16.msra.mxu1 %v9367_v52  ;;  %v9396_v52 = vld [vmem:[#allocation6 + $0x1b4] ss:$8 sps:$4 sm:$0xff]  }
 0x376   : > { %5773 = vmatprep.subr.bf16.mxu1 %v9375_v57  ;;  %v9402_v57 = vld [vmem:[#allocation6 + $0x1a4] ss:$8 sps:$4 sm:$0xff]  }
 0x378   : > { %5727 = vmatpush2.bf16.msra.mxu0 %v9364_v49 }
 0x379   : > { %5728 = vmatprep.subr.bf16.mxu0 %v9372_v21  ;;  %5774 = vmatpush2.bf16.msra.mxu1 %v9373_v45 }
 0x37a   : > { %5775 = vmatprep.subr.bf16.mxu1 %v9381_v36 }
 0x37c   : > { %5729 = vmatpush2.bf16.msra.mxu0 %v9370_v11  ;;  %v9394_v11 = vld [vmem:[#allocation6 + $0x1b0] ss:$8 sps:$4 sm:$0xff]  }
 0x37d   : > { %5730 = vmatprep.subr.bf16.mxu0 %v9378_v9  ;;  %5776 = vmatpush2.bf16.msra.mxu1 %v9379_v39 }
 0x37e   : > { %5777 = vmatprep.subr.bf16.mxu1 %v9387_v1 }
 0x380   : > { %5731 = vmatpush2.bf16.msra.mxu0 %v9376_v20  ;;  %v9400_v20 = vld [vmem:[#allocation6 + $0x1a0] ss:$8 sps:$4 sm:$0xff]  }
 0x381   : > { %5732 = vmatprep.subr.bf16.mxu0 %v9384_v0  ;;  %5778 = vmatpush2.bf16.msra.mxu1 %v9385_v12 }
 0x382   : > { %5779 = vmatprep.subr.bf16.mxu1 %v9393_v53 }
 0x384   : > { %5733 = vmatpush2.bf16.msra.mxu0 %v9382_v35 }
 0x385   : > { %5734 = vmatprep.subr.bf16.mxu0 %v9390_v34  ;;  %5780 = vmatpush2.bf16.msra.mxu1 %v9391_v7 }
 0x386   : > { %5781 = vmatprep.subr.bf16.mxu1 %v9396_v52 }
 0x388   : > { %5735 = vmatpush2.bf16.msra.mxu0 %v9388_v46 }
 0x389   : > { %5810 = vmatprep.subr.bf16.mxu0 %v9399_v3  ;;  %5782 = vmatpush2.bf16.msra.mxu1 %v9394_v11 }
 0x38a   : > { %5783 = vmatprep.subr.bf16.mxu1 %v9402_v57 }
 0x38d   : > { %5784 = vmatpush2.bf16.msra.mxu1 %v9400_v20 }
 0x3c4   : > { %v4097_v44 = vpop.f32.mrf.mxu0 }
 0x3c5   : > { %v11578_v40 = vadd.f32 %v4097_v44, %v11573_v51 }
 0x3c6   : > { %v11575_v18 = vpop.f32.mrf.mxu0 }
 0x3c7   : > { %v4275_v15 = vmax.f32 %v11578_v40, 0.0  ;;  %v11598_v42 = vadd.f32 %v11575_v18, %v11573_v51 }
 0x3c8   : > { %v4101_v33 = vpop.f32.mrf.mxu0 }
 0x3c9   : > { %v11583_v26 = vadd.f32 %v4101_v33, %v11580_v58  ;;  %v4276_v25 = vmax.f32 %v11598_v42, 0.0 }
 0x3ca   : > { %v4103_v8 = vpop.f32.mrf.mxu0 }
 0x3cb   : > { %v4283_v61 = vmax.f32 %v11583_v26, 0.0  ;;  %v11608_v54 = vadd.f32 %v4103_v8, %v11580_v58 }
 0x3cc   : > { %v11594_v6 = vpop.f32.mrf.mxu0 }
 0x3cd   : > { %v8858_v37 = vpack.i.bf16 %v4283_v61, %v4275_v15  ;;  %v4284_v33 = vmax.f32 %v11608_v54, 0.0 }
 0x3ce   : > { %v4109_v56 = vpop.f32.mrf.mxu0 }
 0x3cf   : > { %8859 = vrot.lane.b32.xlu0 %v8858_v37, %s9615_s25  ;;  %8854 = vrot.lane.b32.xlu1 %v8858_v37, %s9613_s13  ;;  %v11640_v62 = vadd.f32 %v4109_v56, %v11621_v43 }
 0x3d0   : > { %v11600_v55 = vpop.f32.mrf.mxu0 }
 0x3d1   : > { %v13319_v63 = vmax.f32 %v11640_v62, 0.0  ;;  %v11687_v39 = vadd.f32 %v11600_v55, %v11623_v50 }
 0x3d2   : > { %v4113_v44 = vpop.f32.mrf.mxu0 }
 0x3d3   : > { %8864 = vrot.lane.b32.xlu1 %v8858_v37, %s9614_s16  ;;  %v11635_v5 = vadd.f32 %v4113_v44, %v11623_v50  ;;  %v13317_v55 = vmax.f32 %v11687_v39, 0.0 }
 0x3d5   : > { %v13320_v31 = vmax.f32 %v11635_v5, 0.0 }
 0x3ef   : > { %v4150_v29 = vpop.f32.mrf.mxu1 }
 0x3f0   : > { %v11603_v24 = vadd.f32 %v4150_v29, %v11573_v51 }
 0x3f1   : > { %v4152_v41 = vpop.f32.mrf.mxu1 }
 0x3f2   : > { %v4277_v47 = vmax.f32 %v11603_v24, 0.0  ;;  %v4203_v22 = vpop.f32.mrf.mxu0  ;;  %v11655_v28 = vadd.f32 %v4152_v41, %v11573_v51 }
 0x3f3   : > { %v4154_v10 = vpop.f32.mrf.mxu1  ;;  %v11648_v30 = vadd.f32 %v4203_v22, %v11573_v51  ;;  %v9414_v22 = vld [vmem:[#allocation6 + $0x184] ss:$8 sps:$4 sm:$0xff]  }
 0x3f4   : > { %v11611_v18 = vadd.f32 %v4154_v10, %v11580_v58  ;;  %v8873_v32 = vpack.i.bf16 %v4277_v47, %v4276_v25  ;;  %v11637_v60 = vpop.f32.mrf.mxu0  ;;  %v13323_v21 = vmax.f32 %v11655_v28, 0.0  ;;  %v9408_v10 = vld [vmem:[#allocation6 + $0x194] ss:$8 sps:$4 sm:$0xff]  }
 0x3f5   : > { %v4156_v14 = vpop.f32.mrf.mxu1  ;;  %v13303_v8 = vmax.f32 %v11648_v30, 0.0  ;;  %5785 = vmatprep.subr.bf16.mxu1 %v9408_v10  ;;  %v11740_v20 = vadd.f32 %v11637_v60, %v11573_v51 }
 0x3f6   : > { %v13322_v13 = vmax.f32 %v11611_v18, 0.0  ;;  %8874 = vrot.lane.b32.xlu0 %v8873_v32, %s9615_s25  ;;  %8869 = vrot.lane.b32.xlu1 %v8873_v32, %s9613_s13  ;;  %v4207_v48 = vpop.f32.mrf.mxu0  ;;  %v11673_v45 = vadd.f32 %v4156_v14, %v11580_v58  ;;  %v11695_v14 = vadd.f32 %v11594_v6, %v11621_v43  ;;  %v9423_v6 = vld [vmem:[#allocation6 + $0x374] ss:$8 sps:$4 sm:$0xff]  }
 0x3f7   : > { %v4160_v23 = vpop.f32.mrf.mxu1  ;;  %v11665_v56 = vadd.f32 %v4207_v48, %v11580_v58  ;;  %v8908_v9 = vpack.i.bf16 %v13303_v8, %v13323_v21 }
 0x3f8   : > { %v11626_v38 = vadd.f32 %v4160_v23, %v11621_v43  ;;  %v8883_v19 = vpack.i.bf16 %v13322_v13, %v4284_v33  ;;  %v13321_v36 = vmax.f32 %v11673_v45, 0.0  ;;  %v4209_v23 = vpop.f32.mrf.mxu0  ;;  %v13318_v35 = vmax.f32 %v11695_v14, 0.0 }
 0x3f9   : > { %v11628_v37 = vpop.f32.mrf.mxu1  ;;  %v13310_v41 = vmax.f32 %v11665_v56, 0.0  ;;  %v11755_v60 = vadd.f32 %v4209_v23, %v11580_v58 }
 0x3fa   : > { %8884 = vrot.lane.b32.xlu0 %v8883_v19, %s9613_s13  ;;  %8879 = vrot.lane.b32.xlu1 %v8873_v32, %s9614_s16  ;;  %v13316_v17 = vmax.f32 %v11626_v38, 0.0  ;;  %v9406_v32 = vld [vmem:[#allocation6 + $0x190] ss:$8 sps:$4 sm:$0xff]   ;;  %v8933_v0 = vpack.i.bf16 %v13317_v55, %v13318_v35  ;;  %v4213_v12 = vpop.f32.mrf.mxu0  ;;  %v11714_v34 = vadd.f32 %v11628_v37, %v11621_v43 }
 0x3fb   : > { %v4164_v27 = vpop.f32.mrf.mxu1  ;;  %v8923_v44 = vpack.i.bf16 %v13310_v41, %v13321_v36  ;;  %5786 = vmatpush2.bf16.msra.mxu1 %v9406_v32  ;;  %v11710_v1 = vadd.f32 %v4213_v12, %v11621_v43  ;;  %v13311_v12 = vmax.f32 %v11755_v60, 0.0 }
 0x3fc   : > { %v11645_v16 = vadd.f32 %v4164_v27, %v11623_v50  ;;  %v8898_v29 = vpack.i.bf16 %v13316_v17, %v13319_v63  ;;  %5787 = vmatprep.subr.bf16.mxu1 %v9414_v22  ;;  %v4215_v27 = vpop.f32.mrf.mxu0  ;;  %v13315_v3 = vmax.f32 %v11714_v34, 0.0 }
 0x3fd   : > { %v4166_v53 = vpop.f32.mrf.mxu1  ;;  %v13298_v46 = vmax.f32 %v11710_v1, 0.0 }
 0x3fe   : > { %v13314_v59 = vmax.f32 %v11645_v16, 0.0  ;;  %8894 = vrot.lane.b32.xlu0 %v8883_v19, %s9614_s16  ;;  %8889 = vrot.lane.b32.xlu1 %v8883_v19, %s9615_s25  ;;  %v9412_v19 = vld [vmem:[#allocation6 + $0x180] ss:$8 sps:$4 sm:$0xff]   ;;  %v4217_v48 = vpop.f32.mrf.mxu0  ;;  %v11730_v57 = vadd.f32 %v4166_v53, %v11623_v50 }
 0x3ff   : > { %5788 = vmatpush2.bf16.msra.mxu1 %v9412_v19  ;;  %v11723_v52 = vadd.f32 %v4217_v48, %v11623_v50  ;;  %v8973_v37 = vpack.i.bf16 %v13298_v46, %v13315_v3  ;;  %v13312_v19 = vmax.f32 %v11740_v20, 0.0 }
 0x400   : > { %v8903_v49 = vpack.i.bf16 %v13314_v59, %v13320_v31  ;;  %5863 = vmatprep.subr.bf16.mxu1 %v9423_v6  ;;  %v13313_v10 = vmax.f32 %v11730_v57, 0.0 }
 0x402   : > { %8899 = vrot.lane.b32.xlu0 %v8898_v29, %s9613_s13  ;;  %8904 = vrot.lane.b32.xlu1 %v8903_v49, %s9613_s13 }
 0x406   : > { %8909 = vrot.lane.b32.xlu0 %v8908_v9, %s9613_s13  ;;  %8914 = vrot.lane.b32.xlu1 %v8908_v9, %s9615_s25 }
 0x40a   : > { %8919 = vrot.lane.b32.xlu0 %v8908_v9, %s9614_s16  ;;  %8924 = vrot.lane.b32.xlu1 %v8923_v44, %s9613_s13 }
 0x40e   : > { %8929 = vrot.lane.b32.xlu0 %v8923_v44, %s9615_s25  ;;  %8939 = vrot.lane.b32.xlu1 %v8923_v44, %s9614_s16 }
 0x412   : > { %8944 = vrot.lane.b32.xlu1 %v8898_v29, %s9615_s25  ;;  %8934 = vrot.lane.b32.xlu0 %v8933_v0, %s9613_s13 }
 0x416   : > { %8954 = vrot.lane.b32.xlu1 %v8933_v0, %s9615_s25  ;;  %8949 = vrot.lane.b32.xlu0 %v8903_v49, %s9615_s25 }
 0x417   : > { %v4256_v7 = vpop.f32.mrf.mxu1 }
 0x419   : > { %v4258_v11 = vpop.f32.mrf.mxu1 }
 0x41a   : > { %8964 = vrot.lane.b32.xlu1 %v8903_v49, %s9614_s16  ;;  %8959 = vrot.lane.b32.xlu0 %v8898_v29, %s9614_s16  ;;  %v13297_v49 = vmax.f32 %v11723_v52, 0.0  ;;  %v11736_v29 = vadd.f32 %v4256_v7, %v11573_v51  ;;  %v11768_v23 = vadd.f32 %v4258_v11, %v11573_v51  ;;  %v13376_v11 = vmov 0.0  }
 0x41b   : > { %v4260_v9 = vpop.f32.mrf.mxu1 }
 0x41c   : > { %v13300_v44 = vmax.f32 %v11736_v29, 0.0  ;;  %v11747_v32 = vadd.f32 %v4260_v9, %v11580_v58  ;;  %v8993_v22 = vpack.i.bf16 %v13297_v49, %v13313_v10  ;;  %v13301_v7 = vmax.f32 %v11768_v23, 0.0 }
 0x41d   : > { %v4262_v48 = vpop.f32.mrf.mxu1 }
 0x41e   : > { %8974 = vrot.lane.b32.xlu1 %v8973_v37, %s9613_s13  ;;  %8969 = vrot.lane.b32.xlu0 %v8933_v0, %s9614_s16  ;;  %v13299_v6 = vmax.f32 %v11747_v32, 0.0  ;;  %v9003_v0 = vpack.i.bf16 %v13300_v44, %v13312_v19 }
 0x41f   : > { %v4266_v9 = vpop.f32.mrf.mxu1 }
 0x420   : > { %v9033_v53 = vpack.i.bf16 %v13299_v6, %v13311_v12  ;;  %v11789_v46 = vadd.f32 %v4266_v9, %v11621_v43  ;;  %v4219_v6 = vpop.f32.mrf.mxu0 }
 0x421   : > { %v4268_v49 = vpop.f32.mrf.mxu1 }
 0x422   : > { %8984 = vrot.lane.b32.xlu1 %v8973_v37, %s9614_s16  ;;  %8979 = vrot.lane.b32.xlu0 %v8973_v37, %s9615_s25  ;;  %v11778_v37 = vadd.f32 %v4262_v48, %v11580_v58  ;;  %v11795_v48 = vadd.f32 %v4215_v27, %v11621_v43  ;;  %v13304_v44 = vmax.f32 %v11789_v46, 0.0 }
 0x424   : > { %v13302_v51 = vmax.f32 %v11778_v37, 0.0  ;;  %v13305_v9 = vmax.f32 %v11795_v48, 0.0 }
 0x426   : > { %8994 = vrot.lane.b32.xlu1 %v8993_v22, %s9615_s25  ;;  %8989 = vrot.lane.b32.xlu0 %v8993_v22, %s9613_s13  ;;  %v9048_v58 = vpack.i.bf16 %v13376_v11, %v13302_v51  ;;  %v9063_v51 = vpack.i.bf16 %v13304_v44, %v13305_v9 }
 0x42a   : > { %9004 = vrot.lane.b32.xlu1 %v9003_v0, %s9613_s13  ;;  %8999 = vrot.lane.b32.xlu0 %v8993_v22, %s9614_s16  ;;  %v9018_v22 = vpack.i.bf16 %v13376_v11, %v13301_v7  ;;  %v11805_v7 = vadd.f32 %v4219_v6, %v11623_v50  ;;  %v11818_v6 = vadd.f32 %v4268_v49, %v11621_v43 }
 0x42c   : > { %v13309_v8 = vmax.f32 %v11805_v7, 0.0  ;;  %v13308_v44 = vmax.f32 %v11818_v6, 0.0 }
 0x42e   : > { %9009 = vrot.lane.b32.xlu1 %v9003_v0, %s9615_s25  ;;  %9034 = vrot.lane.b32.xlu0 %v9033_v53, %s9613_s13  ;;  %v9078_v49 = vpack.i.bf16 %v13376_v11, %v13308_v44 }
 0x432   : > { %9014 = vrot.lane.b32.xlu1 %v9003_v0, %s9614_s16  ;;  %9039 = vrot.lane.b32.xlu0 %v9033_v53, %s9615_s25  ;;  %v4270_v0 = vpop.f32.mrf.mxu1 }
 0x436   : > { %9019 = vrot.lane.b32.xlu1 %v9018_v22, %s9613_s13  ;;  %9044 = vrot.lane.b32.xlu0 %v9033_v53, %s9614_s16  ;;  %v11801_v53 = vadd.f32 %v4270_v0, %v11623_v50  ;;  %v4272_v0 = vpop.f32.mrf.mxu1 }
 0x437   : > { %v11828_v9 = vadd.f32 %v4272_v0, %v11623_v50  ;;  %v6262_v50 = vld [vmem:[%s13266_s8] ss:$2 sm:$0x3] }
 0x438   : > { %v13307_v27 = vmax.f32 %v11801_v53, 0.0  ;;  %v6271_v0 = vrot.slane %v6262_v50, %v9746_v4 }
 0x439   : > { %v13306_v43 = vmax.f32 %v11828_v9, 0.0 }
 0x43a   : > { %9024 = vrot.lane.b32.xlu1 %v9018_v22, %s9615_s25  ;;  %9049 = vrot.lane.b32.xlu0 %v9048_v58, %s9613_s13 }
 0x43e   : > { %9029 = vrot.lane.b32.xlu1 %v9018_v22, %s9614_s16  ;;  %9054 = vrot.lane.b32.xlu0 %v9048_v58, %s9615_s25  ;;  %v9093_v22 = vpack.i.bf16 %v13307_v27, %v13309_v8 }
 0x441   : > { %v8855_v27 = vpop.permute.xlu1 %8854  ;;  %v8860_v8 = vpop.permute.xlu0 %8859 }
 0x442   : > { %9064 = vrot.lane.b32.xlu1 %v9063_v51, %s9613_s13  ;;  %9059 = vrot.lane.b32.xlu0 %v9048_v58, %s9614_s16  ;;  %v9108_v58 = vpack.i.bf16 %v13376_v11, %v13306_v43  ;;  %v8856_v19 = vunpack.i.l.bf16 %v8855_v27  ;;  %v8861_v31 = vunpack.i.l.bf16 %v8860_v8 }
 0x446   : > { %9069 = vrot.lane.b32.xlu1 %v9063_v51, %s9615_s25  ;;  %9094 = vrot.lane.b32.xlu0 %v9093_v22, %s9613_s13 }
 0x44a   : > { %9074 = vrot.lane.b32.xlu1 %v9063_v51, %s9614_s16  ;;  %9099 = vrot.lane.b32.xlu0 %v9093_v22, %s9615_s25  ;;  %v6267_v51 = vrot.slane %v6262_v50, %v9740_v2  ;;  %v6526_v50 = vld [vmem:[%s13266_s8] ss:$2 sm:$0x3] }
 0x44e   : > { %9079 = vrot.lane.b32.xlu1 %v9078_v49, %s9613_s13  ;;  %9104 = vrot.lane.b32.xlu0 %v9093_v22, %s9614_s16  ;;  %v8422_v22 = vld [vmem:[%s13266_s8 + $0x1] ss:$2 sm:$0x3] }
 0x44f   : > { %v6151_v43 = vrot.slane %v8422_v22, %v9740_v2  ;;  %v6155_v44 = vrot.slane %v8422_v22, %v9746_v4  ;;  %v8865_v22 = vpop.permute.xlu1 %8864 }
 0x450   : > { %v8866_v42 = vunpack.i.l.bf16 %v8865_v22 }
 0x452   : > { %9084 = vrot.lane.b32.xlu1 %v9078_v49, %s9615_s25  ;;  %9109 = vrot.lane.b32.xlu0 %v9108_v58, %s9613_s13 }
 0x456   : > { %9089 = vrot.lane.b32.xlu1 %v9078_v49, %s9614_s16  ;;  %9114 = vrot.lane.b32.xlu0 %v9108_v58, %s9615_s25  ;;  %v5944_v49 = vld [vmem:[%s13266_s8] ss:$2 sm:$0x3]  ;;  %s9620_s25 = smov 113  }
 0x45a   : > { %9119 = vrot.lane.b32.xlu0 %v9108_v58, %s9614_s16  ;;  %6272 = vrot.lane.b32.xlu1 %v6267_v51, %s9613_s13  ;;  %v5949_v58 = vrot.slane %v5944_v49, %v9740_v2  ;;  %v5953_v51 = vrot.slane %v5944_v49, %v9746_v4  ;;  %v8468_v49 = vld [vmem:[%s13266_s8 + $0x1] ss:$2 sm:$0x3] }
 0x45b   : > { %v6736_v36 = vrot.slane %v8468_v49, %v9746_v4 }
 0x45e   : > { %6274 = vrot.lane.b32.xlu0 %v6271_v0, %s9613_s13  ;;  %6156 = vrot.lane.b32.xlu1 %v6151_v43, %s9620_s25  ;;  %v6531_v0 = vrot.slane %v6526_v50, %v9740_v2  ;;  %v8443_v43 = vld [vmem:[%s13266_s8 + $0x1] ss:$2 sm:$0x3] }
 0x45f   : > { %v6417_v41 = vrot.slane %v8443_v43, %v9740_v2 }
 0x462   : > { %6158 = vrot.lane.b32.xlu0 %v6155_v44, %s9620_s25  ;;  %5954 = vrot.lane.b32.xlu1 %v5949_v58, %s9621_s14  ;;  %v6535_v44 = vrot.slane %v6526_v50, %v9746_v4  ;;  %v6421_v50 = vrot.slane %v8443_v43, %v9746_v4 }
 0x466   : > { %5956 = vrot.lane.b32.xlu0 %v5953_v51, %s9621_s14  ;;  %6536 = vrot.lane.b32.xlu1 %v6531_v0, %s9622_s27  ;;  %v6732_v0 = vrot.slane %v8468_v49, %v9740_v2 }
 0x468   : > { %v11877_v58 = vpop.permute.xlu0 %8874  ;;  %v11882_v12 = vpop.permute.xlu1 %8869 }
 0x469   : > { %v8872_v10 = vunpack.i.h.bf16 %v11882_v12  ;;  %v8871_v51 = vunpack.i.l.bf16 %v11882_v12  ;;  %v13324_v17 = vunpack.i.h.bf16 %v11877_v58  ;;  %v8876_v55 = vunpack.i.l.bf16 %v11877_v58 }
 0x46a   : > { %6538 = vrot.lane.b32.xlu0 %v6535_v44, %s9622_s27  ;;  %6422 = vrot.lane.b32.xlu1 %v6417_v41, %s9611_s26  ;;  %v8857_v44 = vunpack.i.h.bf16 %v8855_v27  ;;  %v8862_v41 = vunpack.i.h.bf16 %v8860_v8 }
 0x46b   : > { %v4487_v59 = vsel %vm868_vm4, %v8856_v19, %v8871_v51  ;;  %v4488_v3 = vsel %vm868_vm4, %v8871_v51, %v8872_v10 }
 0x46c   : > { %v11896_v35 = vpop.permute.xlu1 %8879  ;;  %v11898_v63 = vpop.permute.xlu0 %8884  ;;  %v4551_v19 = vmax.f32 %v4275_v15, %v4487_v59  ;;  %v4552_v51 = vmax.f32 %v4276_v25, %v4488_v3  ;;  %v8867_v15 = vunpack.i.h.bf16 %v8865_v22  ;;  %v4656_v25 = vsel %vm1357_vm7, %v8861_v31, %v8876_v55 }
 0x46d   : > { %v13325_v43 = vunpack.i.h.bf16 %v11898_v63  ;;  %v8886_v2 = vunpack.i.l.bf16 %v11898_v63  ;;  %v8882_v27 = vunpack.i.h.bf16 %v11896_v35  ;;  %v8881_v13 = vunpack.i.l.bf16 %v11896_v35 }
 0x46e   : > { %6424 = vrot.lane.b32.xlu0 %v6421_v50, %s9611_s26  ;;  %6737 = vrot.lane.b32.xlu1 %v6732_v0, %s9623_s21  ;;  %v4657_v59 = vsel %vm1357_vm7, %v8876_v55, %v13324_v17 }
 0x46f   : > { %v4495_v21 = vsel %vm868_vm4, %v8857_v44, %v8886_v2  ;;  %v4496_v40 = vsel %vm868_vm4, %v8886_v2, %v13325_v43  ;;  %v4720_v44 = vmax.f32 %v4551_v19, %v4656_v25  ;;  %v4721_v55 = vmax.f32 %v4552_v51, %v4657_v59 }
 0x470   : > { %v11919_v8 = vpop.permute.xlu1 %8889  ;;  %v11921_v4 = vpop.permute.xlu0 %8894  ;;  %v4559_v31 = vmax.f32 %v4283_v61, %v4495_v21  ;;  %v4560_v22 = vmax.f32 %v4284_v33, %v4496_v40  ;;  %v4824_v2 = vsel %vm495_vm5, %v8866_v42, %v8881_v13  ;;  %v4825_v19 = vsel %vm495_vm5, %v8881_v13, %v8882_v27 }
 0x471   : > { %v8892_v3 = vunpack.i.h.bf16 %v11919_v8  ;;  %v8891_v49 = vunpack.i.l.bf16 %v11919_v8  ;;  %v8897_v50 = vunpack.i.h.bf16 %v11921_v4  ;;  %v8896_v0 = vunpack.i.l.bf16 %v11921_v4  ;;  %v9415_v8 = vld [vmem:[#allocation6 + $0x240] ss:$8 sps:$4 sm:$0xff]  }
 0x472   : > { %6739 = vrot.lane.b32.xlu0 %v6736_v36, %s9623_s21  ;;  %v4889_v40 = vmax.f32 %v4721_v55, %v4825_v19 }
 0x473   : > { %v4664_v17 = vsel %vm1357_vm7, %v8862_v41, %v8891_v49  ;;  %v4665_v43 = vsel %vm1357_vm7, %v8891_v49, %v8892_v3  ;;  %v4832_v21 = vsel %vm495_vm5, %v8867_v15, %v8896_v0  ;;  %v4833_v36 = vsel %vm495_vm5, %v8896_v0, %v8897_v50  ;;  %v9397_v49 = vld [vmem:[#allocation6 + $0x270] ss:$8 sps:$4 sm:$0xff]   ;;  %v9405_v15 = vld [vmem:[#allocation6 + $0x264] ss:$8 sps:$4 sm:$0xff]  }
 0x474   : > { %v4728_v26 = vmax.f32 %v4559_v31, %v4664_v17  ;;  %v11940_v61 = vpop.permute.xlu1 %8904  ;;  %v11942_v54 = vpop.permute.xlu0 %8899  ;;  %v4729_v33 = vmax.f32 %v4560_v22, %v4665_v43  ;;  %v4888_v41 = vmax.f32 %v4720_v44, %v4824_v2 }
 0x476   : > { %v4896_v51 = vmax.f32 %v4728_v26, %v4832_v21  ;;  %v4897_v42 = vmax.f32 %v4729_v33, %v4833_v36  ;;  %v9403_v26 = vld [vmem:[#allocation6 + $0x260] ss:$8 sps:$4 sm:$0xff]   ;;  %v13377_v36 = vmax.f32 %v11655_v28, 0.0 }
 0x478   : > { %v4920_v25 = vpack.c.bf16 %v4896_v51, %v4888_v41  ;;  %v11948_v59 = vpop.permute.xlu1 %8914  ;;  %v11950_v13 = vpop.permute.xlu0 %8909  ;;  %v4921_v17 = vpack.c.bf16 %v4897_v42, %v4889_v40  ;;  %v13378_v51 = vunpack.i.h.bf16 %v11898_v63 }
 0x479   : > { %v13327_v31 = vunpack.i.h.bf16 %v11950_v13  ;;  %v8911_v43 = vunpack.i.l.bf16 %v11950_v13  ;;  %v13326_v22 = vunpack.i.h.bf16 %v11948_v59  ;;  %v8916_v55 = vunpack.i.l.bf16 %v11948_v59 }
 0x47a   : > { %5736 = vmatprep.mubr.bf16.mxu0 %v4921_v17 }
 0x47b   : > { %v4489_v0 = vsel %vm868_vm4, %v8872_v10, %v8911_v43  ;;  %v4490_v44 = vsel %vm868_vm4, %v8911_v43, %v13327_v31  ;;  %5737 = vmatmul.mubr.bf16.vlgmr.msra.gmra.mxu0 %v4920_v25  ;;  %v9411_v10 = vld [vmem:[#allocation6 + $0x254] ss:$8 sps:$4 sm:$0xff]   ;;  %v9409_v43 = vld [vmem:[#allocation6 + $0x250] ss:$8 sps:$4 sm:$0xff]  }
 0x47c   : > { %5811 = vmatpush1.bf16.msra.mxu0 %v9397_v49  ;;  %v11962_v2 = vpop.permute.xlu1 %8924  ;;  %v11964_v19 = vpop.permute.xlu0 %8919  ;;  %v4553_v21 = vmax.f32 %v4277_v47, %v4489_v0  ;;  %v4554_v41 = vmax.f32 %v13377_v36, %v4490_v44  ;;  %v13379_v49 = vunpack.i.h.bf16 %v11877_v58  ;;  %v4659_v47 = vsel %vm1357_vm7, %v8916_v55, %v13326_v22 }
 0x47d   : > { %v13328_v33 = vunpack.i.h.bf16 %v11962_v2  ;;  %v8926_v12 = vunpack.i.l.bf16 %v11962_v2  ;;  %5812 = vmatprep.subr.bf16.mxu0 %v9405_v15  ;;  %v13329_v25 = vunpack.i.h.bf16 %v11964_v19  ;;  %v8921_v17 = vunpack.i.l.bf16 %v11964_v19 }
 0x47e   : > { %v4658_v24 = vsel %vm1357_vm7, %v13379_v49, %v8916_v55  ;;  %v13380_v36 = vmax.f32 %v11611_v18, 0.0  ;;  %v13381_v55 = vmax.f32 %v11673_v45, 0.0  ;;  %v4723_v22 = vmax.f32 %v4554_v41, %v4659_v47 }
 0x47f   : > { %v4497_v40 = vsel %vm868_vm4, %v13378_v51, %v8926_v12  ;;  %v4498_v42 = vsel %vm868_vm4, %v8926_v12, %v13328_v33  ;;  %v9417_v12 = vld [vmem:[#allocation6 + $0x244] ss:$8 sps:$4 sm:$0xff]   ;;  %v4722_v49 = vmax.f32 %v4553_v21, %v4658_v24  ;;  %v4826_v31 = vsel %vm495_vm5, %v8882_v27, %v8921_v17 }
 0x480   : > { %5813 = vmatpush1.bf16.msra.mxu0 %v9403_v26  ;;  %v11986_v63 = vpop.permute.xlu1 %8939  ;;  %v11988_v28 = vpop.permute.xlu0 %8929  ;;  %v4561_v51 = vmax.f32 %v13380_v36, %v4497_v40  ;;  %v4562_v26 = vmax.f32 %v13381_v55, %v4498_v42  ;;  %v4827_v18 = vsel %vm495_vm5, %v8921_v17, %v13329_v25  ;;  %v13332_v45 = vunpack.i.h.bf16 %v11940_v61  ;;  %v9421_v25 = vld [vmem:[#allocation6 + $0x370] ss:$8 sps:$4 sm:$0xff]  }
 0x481   : > { %v13331_v15 = vunpack.i.h.bf16 %v11986_v63  ;;  %v8941_v0 = vunpack.i.l.bf16 %v11986_v63  ;;  %v13330_v44 = vunpack.i.h.bf16 %v11988_v28  ;;  %v8931_v58 = vunpack.i.l.bf16 %v11988_v28  ;;  %5814 = vmatprep.subr.bf16.mxu0 %v9411_v10 }
 0x482   : > { %v8906_v21 = vunpack.i.l.bf16 %v11940_v61  ;;  %v8901_v42 = vunpack.i.l.bf16 %v11942_v54  ;;  %v4890_v47 = vmax.f32 %v4722_v49, %v4826_v31 }
 0x483   : > { %v4666_v33 = vsel %vm1357_vm7, %v8892_v3, %v8931_v58  ;;  %v4667_v10 = vsel %vm1357_vm7, %v8931_v58, %v13330_v44  ;;  %v13337_v3 = vunpack.i.h.bf16 %v11942_v54  ;;  %v4834_v24 = vsel %vm495_vm5, %v8897_v50, %v8941_v0 }
 0x484   : > { %v4730_v41 = vmax.f32 %v4561_v51, %v4666_v33  ;;  %5815 = vmatpush1.bf16.msra.mxu0 %v9409_v43  ;;  %v12012_v35 = vpop.permute.xlu1 %8944  ;;  %v8935_v27 = vpop.permute.xlu0 %8934  ;;  %v4731_v40 = vmax.f32 %v4562_v26, %v4667_v10  ;;  %v4835_v17 = vsel %vm495_vm5, %v8941_v0, %v13331_v15  ;;  %v9420_v33 = vld [vmem:[#allocation6 + $0x234] ss:$8 sps:$4 sm:$0xff]   ;;  %v4891_v58 = vmax.f32 %v4723_v22, %v4827_v18  ;;  %v9426_v18 = vld [vmem:[#allocation6 + $0x224] ss:$8 sps:$4 sm:$0xff]  }
 0x485   : > { %5816 = vmatprep.subr.bf16.mxu0 %v9417_v12  ;;  %v13333_v51 = vunpack.i.h.bf16 %v12012_v35  ;;  %v8946_v55 = vunpack.i.l.bf16 %v12012_v35  ;;  %v8936_v26 = vunpack.i.l.bf16 %v8935_v27  ;;  %v9418_v12 = vld [vmem:[#allocation6 + $0x230] ss:$8 sps:$4 sm:$0xff]   ;;  %v4512_v31 = vsel %vm868_vm4, %v8906_v21, %v13332_v45  ;;  %v9424_v45 = vld [vmem:[#allocation6 + $0x220] ss:$8 sps:$4 sm:$0xff]  }
 0x486   : > { %v4898_v43 = vmax.f32 %v4730_v41, %v4834_v24  ;;  %v4899_v36 = vmax.f32 %v4731_v40, %v4835_v17  ;;  %v4504_v22 = vsel %vm868_vm4, %v8901_v42, %v13337_v3  ;;  %v9429_v41 = vld [vmem:[#allocation6 + $0x364] ss:$8 sps:$4 sm:$0xff]   ;;  %v8937_v40 = vunpack.i.h.bf16 %v8935_v27 }
 0x488   : > { %5817 = vmatpush1.bf16.msra.mxu0 %v9415_v8  ;;  %v8955_v10 = vpop.permute.xlu1 %8954  ;;  %v12024_v4 = vpop.permute.xlu0 %8949  ;;  %v4923_v50 = vpack.c.bf16 %v4899_v36, %v4891_v58  ;;  %v4922_v44 = vpack.c.bf16 %v4898_v43, %v4890_v47  ;;  %v4673_v8 = vsel %vm1357_vm7, %v8946_v55, %v13333_v51  ;;  %v13382_v47 = vmax.f32 %v11635_v5, 0.0  ;;  %v9427_v51 = vld [vmem:[#allocation6 + $0x360] ss:$8 sps:$4 sm:$0xff]  }
 0x489   : > { %v13334_v0 = vunpack.i.h.bf16 %v12024_v4  ;;  %v8951_v49 = vunpack.i.l.bf16 %v12024_v4  ;;  %5818 = vmatprep.subr.bf16.mxu0 %v9420_v33  ;;  %v8956_v24 = vunpack.i.l.bf16 %v8955_v10  ;;  %v13383_v58 = vmax.f32 %v11640_v62, 0.0 }
 0x48a   : > { %5789 = vmatprep.mubr.bf16.mxu1 %v4923_v50  ;;  %v4576_v43 = vmax.f32 %v13382_v47, %v4512_v31  ;;  %v4503_v36 = vsel %vm868_vm4, %v8936_v26, %v8901_v42  ;;  %v8957_v50 = vunpack.i.h.bf16 %v8955_v10  ;;  %v9432_v42 = vld [vmem:[#allocation6 + $0x214] ss:$8 sps:$4 sm:$0xff]  }
 0x48b   : > { %v4681_v17 = vsel %vm1357_vm7, %v8951_v49, %v13334_v0  ;;  %5790 = vmatmul.mubr.bf16.vlgmr.msra.gmra.mxu1 %v4922_v44  ;;  %v4568_v33 = vmax.f32 %v13383_v58, %v4504_v22  ;;  %v9435_v26 = vld [vmem:[#allocation6 + $0x354] ss:$8 sps:$4 sm:$0xff]   ;;  %v4672_v31 = vsel %vm1357_vm7, %v8956_v24, %v8946_v55  ;;  %v13384_v58 = vmax.f32 %v11695_v14, 0.0 }
 0x48c   : > { %5819 = vmatpush1.bf16.msra.mxu0 %v9418_v12  ;;  %5864 = vmatpush1.bf16.msra.mxu1 %v9421_v25  ;;  %v12045_v15 = vpop.permute.xlu1 %8964  ;;  %v12047_v27 = vpop.permute.xlu0 %8959  ;;  %v4745_v25 = vmax.f32 %v4576_v43, %v4681_v17  ;;  %v4511_v12 = vsel %vm868_vm4, %v8937_v40, %v8906_v21  ;;  %v9430_v17 = vld [vmem:[#allocation6 + $0x210] ss:$8 sps:$4 sm:$0xff]   ;;  %v4680_v24 = vsel %vm1357_vm7, %v8957_v50, %v8951_v49 }
 0x48d   : > { %v13336_v0 = vunpack.i.h.bf16 %v12045_v15  ;;  %v8966_v44 = vunpack.i.l.bf16 %v12045_v15  ;;  %v13335_v5 = vunpack.i.h.bf16 %v12047_v27  ;;  %v8961_v62 = vunpack.i.l.bf16 %v12047_v27  ;;  %5820 = vmatprep.subr.bf16.mxu0 %v9426_v18  ;;  %5865 = vmatprep.subr.bf16.mxu1 %v9429_v41  ;;  %v9433_v21 = vld [vmem:[#allocation6 + $0x350] ss:$8 sps:$4 sm:$0xff]  }
 0x48e   : > { %v4737_v10 = vmax.f32 %v4568_v33, %v4673_v8  ;;  %v4567_v18 = vmax.f32 %v13384_v58, %v4503_v36 }
 0x48f   : > { %v4841_v22 = vsel %vm495_vm5, %v8961_v62, %v13335_v5  ;;  %v4849_v47 = vsel %vm495_vm5, %v8966_v44, %v13336_v0  ;;  %v9438_v5 = vld [vmem:[#allocation6 + $0x204] ss:$8 sps:$4 sm:$0xff]   ;;  %v13385_v0 = vmax.f32 %v11687_v39, 0.0  ;;  %v9439_v39 = vld [vmem:[#allocation6 + $0x340] ss:$8 sps:$4 sm:$0xff]  }
 0x490   : > { %5821 = vmatpush1.bf16.msra.mxu0 %v9424_v45  ;;  %5866 = vmatpush1.bf16.msra.mxu1 %v9427_v51  ;;  %v12063_v41 = vpop.permute.xlu1 %8974  ;;  %v8970_v8 = vpop.permute.xlu0 %8969  ;;  %v4905_v40 = vmax.f32 %v4737_v10, %v4841_v22  ;;  %v4913_v55 = vmax.f32 %v4745_v25, %v4849_v47  ;;  %v9441_v45 = vld [vmem:[#allocation6 + $0x344] ss:$8 sps:$4 sm:$0xff]   ;;  %v4736_v51 = vmax.f32 %v4567_v18, %v4672_v31  ;;  %v9444_v22 = vld [vmem:[#allocation6 + $0x2f4] ss:$8 sps:$4 sm:$0xff]   ;;  %v13386_v47 = vunpack.i.h.bf16 %v11942_v54 }
 0x491   : > { %v8972_v43 = vunpack.i.h.bf16 %v8970_v8  ;;  %v8971_v33 = vunpack.i.l.bf16 %v8970_v8  ;;  %5822 = vmatprep.subr.bf16.mxu0 %v9432_v42  ;;  %5867 = vmatprep.subr.bf16.mxu1 %v9435_v26  ;;  %v4575_v14 = vmax.f32 %v13385_v0, %v4511_v12  ;;  %v13346_v58 = vunpack.i.h.bf16 %v12063_v41  ;;  %v9436_v42 = vld [vmem:[#allocation6 + $0x200] ss:$8 sps:$4 sm:$0xff]  }
 0x492   : > { %v4929_v36 = vpack.c.bf16 %v4913_v55, %v4905_v40  ;;  %v8976_v3 = vunpack.i.l.bf16 %v12063_v41  ;;  %v9442_v55 = vld [vmem:[#allocation6 + $0x2f0] ss:$8 sps:$4 sm:$0xff]  }
 0x493   : > { %v4840_v10 = vsel %vm495_vm5, %v8971_v33, %v8961_v62  ;;  %v4848_v25 = vsel %vm495_vm5, %v8972_v43, %v8966_v44  ;;  %v4744_v0 = vmax.f32 %v4575_v14, %v4680_v24  ;;  %v9447_v62 = vld [vmem:[#allocation6 + $0x334] ss:$8 sps:$4 sm:$0xff]   ;;  %v9445_v24 = vld [vmem:[#allocation6 + $0x330] ss:$8 sps:$4 sm:$0xff]   ;;  %v9450_v14 = vld [vmem:[#allocation6 + $0x2e4] ss:$8 sps:$4 sm:$0xff]  }
 0x494   : > { %5823 = vmatpush1.bf16.msra.mxu0 %v9430_v17  ;;  %5868 = vmatpush1.bf16.msra.mxu1 %v9433_v21  ;;  %v12072_v49 = vpop.permute.xlu1 %8984  ;;  %v12074_v50 = vpop.permute.xlu0 %8979  ;;  %v4904_v26 = vmax.f32 %v4736_v51, %v4840_v10  ;;  %v4505_v18 = vsel %vm868_vm4, %v13386_v47, %v8976_v3  ;;  %v4506_v8 = vsel %vm868_vm4, %v8976_v3, %v13346_v58  ;;  %v13388_v10 = vmax.f32 %v11714_v34, 0.0  ;;  %v9483_v58 = vld [vmem:[#allocation6 + $0x3d4] ss:$8 sps:$4 sm:$0xff]  }
 0x495   : > { %v13341_v12 = vunpack.i.h.bf16 %v12074_v50  ;;  %v8981_v31 = vunpack.i.l.bf16 %v12074_v50  ;;  %5746 = vmatprep.mubr.bf16.mxu0 %v4929_v36  ;;  %5824 = vmatprep.subr.bf16.mxu0 %v9438_v5  ;;  %v4912_v44 = vmax.f32 %v4744_v0, %v4848_v25  ;;  %v9453_v36 = vld [vmem:[#allocation6 + $0x324] ss:$8 sps:$4 sm:$0xff]   ;;  %v13389_v0 = vunpack.i.h.bf16 %v12012_v35 }
 0x496   : > { %5869 = vmatprep.subr.bf16.mxu1 %v9441_v45  ;;  %v13387_v45 = vmax.f32 %v11626_v38, 0.0  ;;  %v4570_v25 = vmax.f32 %v13388_v10, %v4506_v8  ;;  %v13391_v34 = vmax.f32 %v11645_v16, 0.0  ;;  %v13392_v47 = vmax.f32 %v11730_v57, 0.0 }
 0x497   : > { %v4675_v17 = vsel %vm1357_vm7, %v8981_v31, %v13341_v12  ;;  %v4928_v40 = vpack.c.bf16 %v4912_v44, %v4904_v26  ;;  %v4674_v26 = vsel %vm1357_vm7, %v13389_v0, %v8981_v31  ;;  %v9448_v31 = vld [vmem:[#allocation6 + $0x2e0] ss:$8 sps:$4 sm:$0xff]  }
 0x498   : > { %5825 = vmatpush1.bf16.msra.mxu0 %v9436_v42  ;;  %5870 = vmatpush1.bf16.msra.mxu1 %v9439_v39  ;;  %v12087_v21 = vpop.permute.xlu1 %8994  ;;  %v12089_v5 = vpop.permute.xlu0 %8989  ;;  %v4569_v51 = vmax.f32 %v13387_v45, %v4505_v18  ;;  %v13339_v42 = vunpack.i.h.bf16 %v12072_v49  ;;  %v8986_v39 = vunpack.i.l.bf16 %v12072_v49  ;;  %v13393_v45 = vunpack.i.h.bf16 %v12024_v4 }
 0x499   : > { %v13340_v54 = vunpack.i.h.bf16 %v12087_v21  ;;  %v8996_v43 = vunpack.i.l.bf16 %v12087_v21  ;;  %v13343_v33 = vunpack.i.h.bf16 %v12089_v5  ;;  %v8991_v3 = vunpack.i.l.bf16 %v12089_v5  ;;  %5826 = vmatprep.subr.bf16.mxu0 %v9444_v22  ;;  %5871 = vmatprep.subr.bf16.mxu1 %v9447_v62 }
 0x49a   : > { %5747 = vmatmul.mubr.bf16.gmra.mxu0 %v4928_v40  ;;  %v13390_v22 = vunpack.i.h.bf16 %v11940_v61  ;;  %v9451_v61 = vld [vmem:[#allocation6 + $0x320] ss:$8 sps:$4 sm:$0xff]   ;;  %v4739_v40 = vmax.f32 %v4570_v25, %v4675_v17  ;;  %v4843_v4 = vsel %vm495_vm5, %v8986_v39, %v13339_v42  ;;  %v4738_v25 = vmax.f32 %v4569_v51, %v4674_v26  ;;  %v9462_v26 = vld [vmem:[#allocation6 + $0x2c4] ss:$8 sps:$4 sm:$0xff]  }
 0x49b   : > { %v4514_v38 = vsel %vm868_vm4, %v8991_v3, %v13343_v33  ;;  %v4682_v10 = vsel %vm1357_vm7, %v13393_v45, %v8996_v43  ;;  %v4683_v16 = vsel %vm1357_vm7, %v8996_v43, %v13340_v54  ;;  %v13394_v43 = vunpack.i.h.bf16 %v12045_v15  ;;  %v9474_v33 = vld [vmem:[#allocation6 + $0x2a4] ss:$8 sps:$4 sm:$0xff]  }
 0x49c   : > { %v4513_v62 = vsel %vm868_vm4, %v13390_v22, %v8991_v3  ;;  %v4578_v18 = vmax.f32 %v13392_v47, %v4514_v38  ;;  %5827 = vmatpush2.bf16.msra.mxu0 %v9442_v55  ;;  %5872 = vmatpush1.bf16.msra.mxu1 %v9445_v24  ;;  %v12114_v8 = vpop.permute.xlu1 %9004  ;;  %v12116_v35 = vpop.permute.xlu0 %8999  ;;  %v9456_v24 = vld [vmem:[#allocation6 + $0x2d4] ss:$8 sps:$4 sm:$0xff]   ;;  %v9457_v47 = vld [vmem:[#allocation6 + $0x310] ss:$8 sps:$4 sm:$0xff]   ;;  %v13397_v54 = vmax.f32 %v11755_v60, 0.0 }
 0x49d   : > { %v4577_v44 = vmax.f32 %v13391_v34, %v4513_v62  ;;  %v13338_v57 = vunpack.i.h.bf16 %v12116_v35  ;;  %v9001_v55 = vunpack.i.l.bf16 %v12116_v35  ;;  %5828 = vmatprep.subr.bf16.mxu0 %v9450_v14  ;;  %5873 = vmatprep.subr.bf16.mxu1 %v9453_v36  ;;  %v9459_v3 = vld [vmem:[#allocation6 + $0x314] ss:$8 sps:$4 sm:$0xff]   ;;  %v9007_v14 = vunpack.i.h.bf16 %v12114_v8  ;;  %v9477_v60 = vld [vmem:[#allocation6 + $0x3e4] ss:$8 sps:$4 sm:$0xff]  }
 0x49e   : > { %v4747_v0 = vmax.f32 %v4578_v18, %v4683_v16  ;;  %v9006_v36 = vunpack.i.l.bf16 %v12114_v8  ;;  %v4907_v18 = vmax.f32 %v4739_v40, %v4843_v4 }
 0x49f   : > { %v4746_v22 = vmax.f32 %v4577_v44, %v4682_v10  ;;  %v4851_v17 = vsel %vm495_vm5, %v9001_v55, %v13338_v57  ;;  %v4850_v62 = vsel %vm495_vm5, %v13394_v43, %v9001_v55  ;;  %v9454_v44 = vld [vmem:[#allocation6 + $0x2d0] ss:$8 sps:$4 sm:$0xff]   ;;  %v9465_v55 = vld [vmem:[#allocation6 + $0x304] ss:$8 sps:$4 sm:$0xff]   ;;  %v13395_v43 = vunpack.i.h.bf16 %v12047_v27  ;;  %v9460_v27 = vld [vmem:[#allocation6 + $0x2c0] ss:$8 sps:$4 sm:$0xff]  }
 0x4a0   : > { %5829 = vmatpush2.bf16.msra.mxu0 %v9448_v31  ;;  %5874 = vmatpush1.bf16.msra.mxu1 %v9451_v61  ;;  %v12137_v38 = vpop.permute.xlu1 %9009  ;;  %v12139_v34 = vpop.permute.xlu0 %9034  ;;  %v4915_v45 = vmax.f32 %v4747_v0, %v4851_v17  ;;  %v4492_v40 = vsel %vm868_vm4, %v9006_v36, %v9007_v14 }
 0x4a1   : > { %v9037_v51 = vunpack.i.h.bf16 %v12139_v34  ;;  %v9036_v15 = vunpack.i.l.bf16 %v12139_v34  ;;  %5830 = vmatprep.subr.bf16.mxu0 %v9456_v24  ;;  %5875 = vmatprep.subr.bf16.mxu1 %v9459_v3  ;;  %v4914_v16 = vmax.f32 %v4746_v22, %v4850_v62  ;;  %v9012_v31 = vunpack.i.h.bf16 %v12137_v38 }
 0x4a2   : > { %v4931_v10 = vpack.c.bf16 %v4915_v45, %v4907_v18  ;;  %v9011_v61 = vunpack.i.l.bf16 %v12137_v38  ;;  %v4842_v57 = vsel %vm495_vm5, %v13395_v43, %v8986_v39  ;;  %v9463_v18 = vld [vmem:[#allocation6 + $0x300] ss:$8 sps:$4 sm:$0xff]   ;;  %v9468_v45 = vld [vmem:[#allocation6 + $0x2b4] ss:$8 sps:$4 sm:$0xff]   ;;  %v13396_v43 = vmax.f32 %v11740_v20, 0.0 }
 0x4a3   : > { %v4500_v24 = vsel %vm868_vm4, %v9036_v15, %v9037_v51  ;;  %v4906_v22 = vmax.f32 %v4738_v25, %v4842_v57 }
 0x4a4   : > { %5831 = vmatpush2.bf16.msra.mxu0 %v9454_v44  ;;  %5876 = vmatpush1.bf16.msra.mxu1 %v9457_v47  ;;  %v12156_v3 = vpop.permute.xlu1 %9014  ;;  %v12158_v0 = vpop.permute.xlu0 %9039  ;;  %v9471_v47 = vld [vmem:[#allocation6 + $0x3f4] ss:$8 sps:$4 sm:$0xff]   ;;  %v4661_v57 = vsel %vm1357_vm7, %v9011_v61, %v9012_v31  ;;  %v4556_v42 = vmax.f32 %v13396_v43, %v4492_v40 }
 0x4a5   : > { %v13344_v39 = vunpack.i.h.bf16 %v12156_v3  ;;  %v9016_v4 = vunpack.i.l.bf16 %v12156_v3  ;;  %v13342_v17 = vunpack.i.h.bf16 %v12158_v0  ;;  %v9041_v62 = vunpack.i.l.bf16 %v12158_v0  ;;  %5799 = vmatprep.mubr.bf16.mxu1 %v4931_v10  ;;  %5832 = vmatprep.subr.bf16.mxu0 %v9462_v26 }
 0x4a6   : > { %v4930_v44 = vpack.c.bf16 %v4914_v16, %v4906_v22  ;;  %5877 = vmatprep.subr.bf16.mxu1 %v9465_v55  ;;  %v4564_v10 = vmax.f32 %v13397_v54, %v4500_v24  ;;  %v9466_v55 = vld [vmem:[#allocation6 + $0x2b0] ss:$8 sps:$4 sm:$0xff]   ;;  %v4725_v54 = vmax.f32 %v4556_v42, %v4661_v57  ;;  %v13398_v24 = vunpack.i.h.bf16 %v11962_v2 }
 0x4a7   : > { %v4669_v25 = vsel %vm1357_vm7, %v9041_v62, %v13342_v17  ;;  %v9469_v17 = vld [vmem:[#allocation6 + $0x3f0] ss:$8 sps:$4 sm:$0xff]   ;;  %v4829_v20 = vsel %vm495_vm5, %v9016_v4, %v13344_v39 }
 0x4a8   : > { %5800 = vmatmul.mubr.bf16.gmra.mxu1 %v4930_v44  ;;  %5833 = vmatpush2.bf16.msra.mxu0 %v9460_v27  ;;  %v12174_v26 = vpop.permute.xlu1 %9019  ;;  %v12176_v16 = vpop.permute.xlu0 %9044  ;;  %v4733_v40 = vmax.f32 %v4564_v10, %v4669_v25  ;;  %v4499_v27 = vsel %vm868_vm4, %v13398_v24, %v9036_v15  ;;  %v4893_v42 = vmax.f32 %v4725_v54, %v4829_v20  ;;  %v9475_v25 = vld [vmem:[#allocation6 + $0x3e0] ss:$8 sps:$4 sm:$0xff]   ;;  %v9480_v10 = vld [vmem:[#allocation6 + $0x294] ss:$8 sps:$4 sm:$0xff]   ;;  %v13399_v24 = vunpack.i.h.bf16 %v11950_v13 }
 0x4a9   : > { %5878 = vmatpush1.bf16.msra.mxu1 %v9463_v18  ;;  %v13345_v22 = vunpack.i.h.bf16 %v12176_v16  ;;  %v9046_v12 = vunpack.i.l.bf16 %v12176_v16  ;;  %5834 = vmatprep.subr.bf16.mxu0 %v9468_v45  ;;  %v9022_v45 = vunpack.i.h.bf16 %v12174_v26  ;;  %v9021_v44 = vunpack.i.l.bf16 %v12174_v26 }
 0x4aa   : > { %5879 = vmatprep.subr.bf16.mxu1 %v9471_v47  ;;  %v9472_v47 = vld [vmem:[#allocation6 + $0x2a0] ss:$8 sps:$4 sm:$0xff]   ;;  %v13400_v20 = vunpack.i.h.bf16 %v11948_v59  ;;  %v13401_v54 = vmax.f32 %v11665_v56, 0.0  ;;  %v9478_v56 = vld [vmem:[#allocation6 + $0x290] ss:$8 sps:$4 sm:$0xff]  }
 0x4ab   : > { %v4837_v18 = vsel %vm495_vm5, %v9046_v12, %v13345_v22 }
 0x4ac   : > { %5835 = vmatpush2.bf16.msra.mxu0 %v9466_v55  ;;  %v12193_v43 = vpop.permute.xlu1 %9024  ;;  %v12195_v39 = vpop.permute.xlu0 %9049  ;;  %v4901_v57 = vmax.f32 %v4733_v40, %v4837_v18  ;;  %v4491_v55 = vsel %vm868_vm4, %v13399_v24, %v9006_v36  ;;  %v4563_v40 = vmax.f32 %v13401_v54, %v4499_v27  ;;  %v13402_v18 = vunpack.i.h.bf16 %v11988_v28 }
 0x4ad   : > { %5880 = vmatpush2.bf16.msra.mxu1 %v9469_v17  ;;  %v9052_v2 = vunpack.i.h.bf16 %v12195_v39  ;;  %v9051_v15 = vunpack.i.l.bf16 %v12195_v39  ;;  %5836 = vmatprep.subr.bf16.mxu0 %v9474_v33  ;;  %v4660_v17 = vsel %vm1357_vm7, %v13400_v20, %v9011_v61  ;;  %v9027_v33 = vunpack.i.h.bf16 %v12193_v43 }
 0x4ae   : > { %5881 = vmatprep.subr.bf16.mxu1 %v9477_v60  ;;  %v4925_v22 = vpack.c.bf16 %v4901_v57, %v4893_v42  ;;  %v9026_v39 = vunpack.i.l.bf16 %v12193_v43  ;;  %v4668_v13 = vsel %vm1357_vm7, %v13402_v18, %v9041_v62  ;;  %v4494_v36 = vsel %vm868_vm4, %v9021_v44, %v9022_v45  ;;  %v9481_v45 = vld [vmem:[#allocation6 + $0x3d0] ss:$8 sps:$4 sm:$0xff]   ;;  %v9486_v57 = vld [vmem:[#allocation6 + $0x284] ss:$8 sps:$4 sm:$0xff]  }
 0x4af   : > { %v4502_v60 = vsel %vm868_vm4, %v9051_v15, %v9052_v2  ;;  %v13404_v24 = vunpack.i.h.bf16 %v11986_v63  ;;  %v4732_v20 = vmax.f32 %v4563_v40, %v4668_v13 }
 0x4b0   : > { %5837 = vmatpush2.bf16.msra.mxu0 %v9472_v47  ;;  %v12218_v59 = vpop.permute.xlu1 %9029  ;;  %v12220_v61 = vpop.permute.xlu0 %9054  ;;  %5842 = vmatprep.mubr.bf16.mxu0 %v4925_v22  ;;  %v13403_v47 = vmax.f32 %v11648_v30, 0.0  ;;  %v4663_v54 = vsel %vm1357_vm7, %v9026_v39, %v9027_v33  ;;  %v13405_v30 = vunpack.i.h.bf16 %v11964_v19 }
 0x4b1   : > { %5882 = vmatpush2.bf16.msra.mxu1 %v9475_v25  ;;  %v9032_v27 = vunpack.i.h.bf16 %v12218_v59  ;;  %v9031_v28 = vunpack.i.l.bf16 %v12218_v59  ;;  %v9057_v62 = vunpack.i.h.bf16 %v12220_v61  ;;  %v9056_v42 = vunpack.i.l.bf16 %v12220_v61  ;;  %5838 = vmatprep.subr.bf16.mxu0 %v9480_v10  ;;  %v9489_v25 = vld [vmem:[#allocation6 + $0x3c4] ss:$8 sps:$4 sm:$0xff]   ;;  %v9498_v59 = vld [vmem:[#allocation6 + $0x394] ss:$8 sps:$4 sm:$0xff]  }
 0x4b2   : > { %v4555_v2 = vmax.f32 %v13403_v47, %v4491_v55  ;;  %v4836_v22 = vsel %vm495_vm5, %v13404_v24, %v9046_v12  ;;  %5883 = vmatprep.subr.bf16.mxu1 %v9483_v58  ;;  %v4828_v63 = vsel %vm495_vm5, %v13405_v30, %v9016_v4  ;;  %v13406_v12 = vmax.f32 %v11768_v23, 0.0  ;;  %v9484_v47 = vld [vmem:[#allocation6 + $0x280] ss:$8 sps:$4 sm:$0xff]  }
 0x4b3   : > { %v4671_v10 = vsel %vm1357_vm7, %v9056_v42, %v9057_v62  ;;  %v13407_v55 = vmax.f32 %v11778_v37, 0.0  ;;  %v4900_v62 = vmax.f32 %v4732_v20, %v4836_v22  ;;  %v9487_v4 = vld [vmem:[#allocation6 + $0x3c0] ss:$8 sps:$4 sm:$0xff]   ;;  %v4831_v23 = vsel %vm495_vm5, %v9031_v28, %v9032_v27  ;;  %v9492_v37 = vld [vmem:[#allocation6 + $0x3b4] ss:$8 sps:$4 sm:$0xff]  }
 0x4b4   : > { %v4724_v18 = vmax.f32 %v4555_v2, %v4660_v17  ;;  %v4558_v58 = vmax.f32 %v13406_v12, %v4494_v36  ;;  %5839 = vmatpush2.bf16.msra.mxu0 %v9478_v56  ;;  %v12246_v13 = vpop.permute.xlu1 %9064  ;;  %v12248_v33 = vpop.permute.xlu0 %9059  ;;  %v13409_v12 = vmax.f32 %v11747_v32, 0.0 }
 0x4b5   : > { %v4566_v40 = vmax.f32 %v13407_v55, %v4502_v60  ;;  %5884 = vmatpush2.bf16.msra.mxu1 %v9481_v45  ;;  %v9062_v17 = vunpack.i.h.bf16 %v12248_v33  ;;  %v9061_v19 = vunpack.i.l.bf16 %v12248_v33  ;;  %5840 = vmatprep.subr.bf16.mxu0 %v9486_v57  ;;  %v4493_v45 = vsel %vm868_vm4, %v9007_v14, %v9021_v44  ;;  %v9490_v44 = vld [vmem:[#allocation6 + $0x3b0] ss:$8 sps:$4 sm:$0xff]  }
 0x4b6   : > { %5885 = vmatprep.subr.bf16.mxu1 %v9489_v25  ;;  %v4727_v36 = vmax.f32 %v4558_v58, %v4663_v54  ;;  %v4892_v56 = vmax.f32 %v4724_v18, %v4828_v63  ;;  %v4501_v57 = vsel %vm868_vm4, %v9037_v51, %v9051_v15  ;;  %v9067_v27 = vunpack.i.h.bf16 %v12246_v13 }
 0x4b7   : > { %v4735_v60 = vmax.f32 %v4566_v40, %v4671_v10  ;;  %v4839_v2 = vsel %vm495_vm5, %v9061_v19, %v9062_v17  ;;  %v9066_v24 = vunpack.i.l.bf16 %v12246_v13  ;;  %v9495_v10 = vld [vmem:[#allocation6 + $0x3a4] ss:$8 sps:$4 sm:$0xff]   ;;  %v13408_v18 = vmax.f32 %v11736_v29, 0.0  ;;  %v9493_v17 = vld [vmem:[#allocation6 + $0x3a0] ss:$8 sps:$4 sm:$0xff]  }
 0x4b8   : > { %5841 = vmatpush2.bf16.msra.mxu0 %v9484_v47  ;;  %v12268_v22 = vpop.permute.xlu1 %9069  ;;  %v12270_v26 = vpop.permute.xlu0 %9094  ;;  %v4895_v8 = vmax.f32 %v4727_v36, %v4831_v23  ;;  %v4924_v14 = vpack.c.bf16 %v4900_v62, %v4892_v56  ;;  %v12285_v63 = vsel %vm1357_vm7, %v9012_v31, %v9026_v39  ;;  %v4565_v58 = vmax.f32 %v13409_v12, %v4501_v57 }
 0x4b9   : > { %v4903_v25 = vmax.f32 %v4735_v60, %v4839_v2  ;;  %5886 = vmatpush2.bf16.msra.mxu1 %v9487_v4  ;;  %v9097_v34 = vunpack.i.h.bf16 %v12270_v26  ;;  %v9096_v51 = vunpack.i.l.bf16 %v12270_v26  ;;  %v9072_v15 = vunpack.i.h.bf16 %v12268_v22 }
 0x4ba   : > { %v9071_v20 = vunpack.i.l.bf16 %v12268_v22  ;;  %5887 = vmatprep.subr.bf16.mxu1 %v9492_v37  ;;  %v12278_v30 = vmax.f32 %v13408_v18, %v4493_v45  ;;  %v13410_v55 = vunpack.i.h.bf16 %v12063_v41  ;;  %v4508_v29 = vsel %vm868_vm4, %v9066_v24, %v9067_v27 }
 0x4bb   : > { %v4927_v54 = vpack.c.bf16 %v4903_v25, %v4895_v8  ;;  %5843 = vmatmul.mubr.bf16.vlgmr.msra.gmra.mxu0 %v4924_v14  ;;  %v13411_v47 = vunpack.i.h.bf16 %v12089_v5  ;;  %v4516_v38 = vsel %vm868_vm4, %v9096_v51, %v9097_v34  ;;  %v13412_v4 = vunpack.i.h.bf16 %v12156_v3 }
 0x4bc   : > { %v4507_v40 = vsel %vm868_vm4, %v13410_v55, %v9066_v24  ;;  %v12301_v31 = vpop.permute.xlu1 %9074  ;;  %v12303_v32 = vpop.permute.xlu0 %9099  ;;  %v13413_v37 = vunpack.i.h.bf16 %v12158_v0  ;;  %v13414_v60 = vunpack.i.h.bf16 %v12074_v50  ;;  %v4677_v45 = vsel %vm1357_vm7, %v9071_v20, %v9072_v15  ;;  %v9501_v55 = vld [vmem:[#allocation6 + $0x384] ss:$8 sps:$4 sm:$0xff]  }
 0x4bd   : > { %v4515_v43 = vsel %vm868_vm4, %v13411_v47, %v9096_v51  ;;  %5895 = vmatprep.mubr.bf16.mxu1 %v4927_v54  ;;  %5888 = vmatpush2.bf16.msra.mxu1 %v9490_v44  ;;  %v9077_v41 = vunpack.i.h.bf16 %v12301_v31  ;;  %v9076_v39 = vunpack.i.l.bf16 %v12301_v31  ;;  %v9102_v62 = vunpack.i.h.bf16 %v12303_v32 }
 0x4be   : > { %v9101_v5 = vunpack.i.l.bf16 %v12303_v32  ;;  %v4830_v23 = vsel %vm495_vm5, %v13412_v4, %v9031_v28  ;;  %v4670_v36 = vsel %vm1357_vm7, %v13413_v37, %v9056_v42  ;;  %v4676_v56 = vsel %vm1357_vm7, %v13414_v60, %v9071_v20  ;;  %5889 = vmatprep.subr.bf16.mxu1 %v9495_v10  ;;  %v9496_v20 = vld [vmem:[#allocation6 + $0x390] ss:$8 sps:$4 sm:$0xff]   ;;  %v9499_v60 = vld [vmem:[#allocation6 + $0x380] ss:$8 sps:$4 sm:$0xff]  }
 0x4bf   : > { %v13415_v3 = vmax.f32 %v11710_v1, 0.0  ;;  %v13416_v28 = vmax.f32 %v11795_v48, 0.0  ;;  %v13417_v0 = vunpack.i.h.bf16 %v12087_v21  ;;  %v13418_v2 = vmax.f32 %v11723_v52, 0.0 }
 0x4c0   : > { %v4685_v50 = vsel %vm1357_vm7, %v9101_v5, %v9102_v62  ;;  %v13419_v8 = vmax.f32 %v11805_v7, 0.0  ;;  %v9080_v14 = vpop.permute.xlu1 %9079  ;;  %v12339_v1 = vpop.permute.xlu0 %9104  ;;  %v4845_v48 = vsel %vm495_vm5, %v9076_v39, %v9077_v41  ;;  %v13420_v21 = vunpack.i.h.bf16 %v12072_v49 }
 0x4c1   : > { %v4571_v57 = vmax.f32 %v13415_v3, %v4507_v40  ;;  %v4572_v61 = vmax.f32 %v13416_v28, %v4508_v29  ;;  %v4684_v42 = vsel %vm1357_vm7, %v13417_v0, %v9101_v5  ;;  %v4579_v24 = vmax.f32 %v13418_v2, %v4515_v43  ;;  %5890 = vmatpush2.bf16.msra.mxu1 %v9493_v17 }
 0x4c2   : > { %v4580_v25 = vmax.f32 %v13419_v8, %v4516_v38  ;;  %v4844_v51 = vsel %vm495_vm5, %v13420_v21, %v9076_v39  ;;  %v9107_v44 = vunpack.i.h.bf16 %v12339_v1  ;;  %v9106_v52 = vunpack.i.l.bf16 %v12339_v1  ;;  %5891 = vmatprep.subr.bf16.mxu1 %v9498_v59 }
 0x4c3   : > { %v4741_v54 = vmax.f32 %v4572_v61, %v4677_v45  ;;  %v4740_v7 = vmax.f32 %v4571_v57, %v4676_v56  ;;  %v4734_v10 = vmax.f32 %v4565_v58, %v4670_v36  ;;  %v13421_v18 = vunpack.i.h.bf16 %v12176_v16 }
 0x4c4   : > { %v4749_v49 = vmax.f32 %v4580_v25, %v4685_v50  ;;  %v4748_v40 = vmax.f32 %v4579_v24, %v4684_v42  ;;  %v4853_v29 = vsel %vm495_vm5, %v9106_v52, %v9107_v44  ;;  %v13422_v43 = vunpack.i.h.bf16 %v12116_v35  ;;  %v9085_v5 = vpop.permute.xlu1 %9084  ;;  %v9110_v16 = vpop.permute.xlu0 %9109 }
 0x4c5   : > { %v4838_v12 = vsel %vm495_vm5, %v13421_v18, %v9061_v19  ;;  %v4909_v47 = vmax.f32 %v4741_v54, %v4845_v48  ;;  %v4908_v58 = vmax.f32 %v4740_v7, %v4844_v51  ;;  %v9082_v39 = vunpack.i.h.bf16 %v9080_v14  ;;  %5892 = vmatpush2.bf16.msra.mxu1 %v9496_v20 }
 0x4c6   : > { %v4852_v38 = vsel %vm495_vm5, %v13422_v43, %v9106_v52  ;;  %v9081_v33 = vunpack.i.l.bf16 %v9080_v14  ;;  %v4917_v17 = vmax.f32 %v4749_v49, %v4853_v29  ;;  %v4726_v4 = vmax.f32 %v12278_v30, %v12285_v63  ;;  %5893 = vmatprep.subr.bf16.mxu1 %v9501_v55 }
 0x4c7   : > { %v4916_v19 = vmax.f32 %v4748_v40, %v4852_v38  ;;  %v9112_v37 = vunpack.i.h.bf16 %v9110_v16  ;;  %v9111_v36 = vunpack.i.l.bf16 %v9110_v16  ;;  %v4902_v56 = vmax.f32 %v4734_v10, %v4838_v12 }
 0x4c8   : > { %v4933_v45 = vpack.c.bf16 %v4917_v17, %v4909_v47  ;;  %v4894_v59 = vmax.f32 %v4726_v4, %v4830_v23  ;;  %v9087_v3 = vunpack.i.h.bf16 %v9085_v5  ;;  %v9086_v57 = vunpack.i.l.bf16 %v9085_v5  ;;  %v9090_v0 = vpop.permute.xlu1 %9089  ;;  %v9115_v42 = vpop.permute.xlu0 %9114 }
 0x4c9   : > { %v4932_v35 = vpack.c.bf16 %v4916_v19, %v4908_v58  ;;  %v4509_v28 = vsel %vm868_vm4, %v9067_v27, %v9081_v33  ;;  %v4510_v61 = vsel %vm868_vm4, %v9081_v33, %v9082_v39  ;;  %v4517_v30 = vsel %vm868_vm4, %v9097_v34, %v9111_v36  ;;  %5894 = vmatpush2.bf16.msra.mxu1 %v9499_v60 }
 0x4ca   : > { %v4518_v63 = vsel %vm868_vm4, %v9111_v36, %v9112_v37  ;;  %5852 = vmatprep.mubr.bf16.mxu0 %v4933_v45  ;;  %v9092_v50 = vunpack.i.h.bf16 %v9090_v0  ;;  %v9091_v23 = vunpack.i.l.bf16 %v9090_v0  ;;  %v9117_v2 = vunpack.i.h.bf16 %v9115_v42 }
 0x4cb   : > { %v9116_v24 = vunpack.i.l.bf16 %v9115_v42  ;;  %5853 = vmatmul.mubr.bf16.gmra.mxu0 %v4932_v35  ;;  %v4926_v13 = vpack.c.bf16 %v4902_v56, %v4894_v59  ;;  %v4678_v27 = vsel %vm1357_vm7, %v9072_v15, %v9086_v57  ;;  %v4679_v26 = vsel %vm1357_vm7, %v9086_v57, %v9087_v3 }
 0x4cc   : > { %v13423_v25 = vmax.f32 %v11789_v46, 0.0  ;;  %v13424_v48 = vmax.f32 %v11818_v6, 0.0  ;;  %v13425_v51 = vmax.f32 %v11801_v53, 0.0  ;;  %v13426_v22 = vmax.f32 %v11828_v9, 0.0  ;;  %v9120_v20 = vpop.permute.xlu0 %9119  ;;  %v6273_v17 = vpop.permute.xlu1 %6272 }
 0x4cd   : > { %v4686_v34 = vsel %vm1357_vm7, %v9102_v62, %v9116_v24  ;;  %v4687_v8 = vsel %vm1357_vm7, %v9116_v24, %v9117_v2  ;;  %5896 = vmatmul.mubr.bf16.vlgmr.msra.gmra.mxu1 %v4926_v13  ;;  %v9122_v54 = vunpack.i.h.bf16 %v9120_v20  ;;  %v9121_v32 = vunpack.i.l.bf16 %v9120_v20 }
 0x4ce   : > { %v4573_v14 = vmax.f32 %v13423_v25, %v4509_v28  ;;  %v4574_v21 = vmax.f32 %v13424_v48, %v4510_v61  ;;  %v4581_v52 = vmax.f32 %v13425_v51, %v4517_v30  ;;  %v4582_v15 = vmax.f32 %v13426_v22, %v4518_v63 }
 0x4cf   : > { %v4847_v62 = vsel %vm495_vm5, %v9091_v23, %v9092_v50  ;;  %v4846_v46 = vsel %vm495_vm5, %v9077_v41, %v9091_v23  ;;  %v4855_v53 = vsel %vm495_vm5, %v9121_v32, %v9122_v54  ;;  %v4854_v9 = vsel %vm495_vm5, %v9107_v44, %v9121_v32 }
 0x4d0   : > { %v4743_v7 = vmax.f32 %v4574_v21, %v4679_v26  ;;  %v4751_v10 = vmax.f32 %v4582_v15, %v4687_v8  ;;  %v4742_v6 = vmax.f32 %v4573_v14, %v4678_v27  ;;  %v4750_v18 = vmax.f32 %v4581_v52, %v4686_v34  ;;  %v12405_v19 = vpop.permute.xlu0 %6274  ;;  %v6157_v60 = vpop.permute.xlu1 %6156 }
 0x4d1   : > { %v13427_v31 = vmov 0   ;;  %v13428_v41 = vmov 0.0|0.0   ;;  %v12425_v23 = vsel %vm868_vm4, %v6273_v17, %v12405_v19  ;;  %v12433_v25 = vmul.f32 0.0, %v6273_v17 }
 0x4d2   : > { %v4911_v12 = vmax.f32 %v4743_v7, %v4847_v62  ;;  %v4919_v55 = vmax.f32 %v4751_v10, %v4855_v53  ;;  %v4910_v49 = vmax.f32 %v4742_v6, %v4846_v46  ;;  %v4918_v40 = vmax.f32 %v4750_v18, %v4854_v9  ;;  %6684 = vrot.lane.b32.xlu0 %v13428_v41, %s9624_s22 }
 0x4d3   : > { %v12452_v32 = vmul.f32 0.0, %v6157_v60 }
 0x4d4   : > { %v4935_v29 = vpack.c.bf16 %v4919_v55, %v4911_v12  ;;  %v4934_v47 = vpack.c.bf16 %v4918_v40, %v4910_v49  ;;  %v12413_v45 = vpop.permute.xlu0 %6158  ;;  %v5955_v3 = vpop.permute.xlu1 %5954 }
 0x4d5   : > { %v12443_v51 = vsel %vm6160_vm11, %v6157_v60, %v12413_v45  ;;  %v12467_v55 = vmul.f32 0.0, %v5955_v3 }
 0x4d6   : > { %5905 = vmatprep.mubr.bf16.mxu1 %v4935_v29  ;;  %6688 = vrot.lane.b32.xlu0 %v13428_v41, %s9624_s22 }
 0x4d7   : > { %5906 = vmatmul.mubr.bf16.gmra.mxu1 %v4934_v47 }
 0x4d8   : > { %7289 = vmatprep.mubr.bf16.mxu1 %v13427_v31  ;;  %v12419_v61 = vpop.permute.xlu0 %5956  ;;  %v12427_v2 = vpop.permute.xlu1 %6536 }
 0x4d9   : > { %v12462_v6 = vsel %vm5958_vm12, %v5955_v3, %v12419_v61 }
 0x4dc   : > { %v12429_v27 = vpop.permute.xlu0 %6538  ;;  %v12448_v20 = vpop.permute.xlu1 %6422 }
 0x4e0   : > { %v12454_v62 = vpop.permute.xlu0 %6424  ;;  %v12473_v47 = vpop.permute.xlu1 %6737 }
 0x53b   : > { %v5738_v1 = vpop.f32.mrf.mxu0 }
 0x53d   : > { %v5740_v43 = vpop.f32.mrf.mxu0 }
 0x53f   : > { %v12399_v44 = vpop.f32.mrf.mxu0 }
 0x541   : > { %v5744_v58 = vpop.f32.mrf.mxu0 }
 0x54b   : > { %v5791_v38 = vpop.f32.mrf.mxu1 }
 0x54c   : > { %v5792_v30 = vadd.f32 %v5791_v38, %v5738_v1  ;;  %v12476_v38 = vpop.permute.xlu0 %6739 }
 0x54d   : > { %v5793_v39 = vpop.f32.mrf.mxu1 }
 0x54e   : > { %v5794_v42 = vadd.f32 %v5793_v39, %v5740_v43 }
 0x54f   : > { %v5795_v5 = vpop.f32.mrf.mxu1 }
 0x550   : > { %v5796_v43 = vadd.f32 %v5795_v5, %v12399_v44 }
 0x551   : > { %v5797_v4 = vpop.f32.mrf.mxu1 }
 0x552   : > { %v5798_v29 = vadd.f32 %v5797_v4, %v5744_v58  ;;  %v12490_v4 = vsel %vm6032_vm13, %v12473_v47, %v12476_v38 }
 0x55a   : > { %v12401_v33 = vpop.f32.mrf.mxu0 }
 0x55c   : > { %v12403_v16 = vpop.f32.mrf.mxu0 }
 0x55e   : > { %v12407_v37 = vpop.f32.mrf.mxu0 }
 0x560   : > { %v12411_v56 = vpop.f32.mrf.mxu0 }
 0x568   : > { %v12409_v36 = vpop.f32.mrf.mxu1 }
 0x569   : > { %v5802_v44 = vadd.f32 %v12409_v36, %v12401_v33  ;;  %v12504_v36 = vsel %vm6234_vm14, %v12427_v2, %v12429_v27 }
 0x56a   : > { %v12415_v35 = vpop.f32.mrf.mxu1 }
 0x56b   : > { %v5804_v5 = vadd.f32 %v12415_v35, %v12403_v16  ;;  %v12509_v35 = vsel %vm942_vm2, %v12448_v20, %v12454_v62 }
 0x56c   : > { %v12417_v57 = vpop.f32.mrf.mxu1 }
 0x56e   : > { %v12421_v63 = vpop.f32.mrf.mxu1 }
 0x57b   : > { %v5844_v59 = vpop.f32.mrf.mxu0 }
 0x57c   : > { %v5845_v50 = vadd.f32 %v5844_v59, %v5792_v30 }
 0x57d   : > { %v5846_v28 = vpop.f32.mrf.mxu0 }
 0x57e   : > { %v5847_v13 = vadd.f32 %v5846_v28, %v5794_v42  ;;  %v5808_v42 = vadd.f32 %v12421_v63, %v12411_v56 }
 0x57f   : > { %v5848_v0 = vpop.f32.mrf.mxu0 }
 0x580   : > { %v5849_v3 = vadd.f32 %v5848_v0, %v5796_v43  ;;  %v5806_v0 = vadd.f32 %v12417_v57, %v12407_v37 }
 0x581   : > { %v5850_v34 = vpop.f32.mrf.mxu0 }
 0x582   : > { %v5851_v59 = vadd.f32 %v5850_v34, %v5798_v29 }
 0x58b   : > { %v5854_v52 = vpop.f32.mrf.mxu0 }
 0x58c   : > { %v5855_v37 = vadd.f32 %v5854_v52, %v5802_v44 }
 0x58d   : > { %v5897_v24 = vpop.f32.mrf.mxu1  ;;  %v5856_v18 = vpop.f32.mrf.mxu0 }
 0x58e   : > { %v12431_v26 = vadd.f32 %v5897_v24, %v5845_v50  ;;  %v5857_v57 = vadd.f32 %v5856_v18, %v5804_v5 }
 0x58f   : > { %v5899_v8 = vpop.f32.mrf.mxu1  ;;  %v5858_v1 = vpop.f32.mrf.mxu0 }
 0x590   : > { %v12435_v14 = vadd.f32 %v5899_v8, %v5847_v13  ;;  %v8689_v48 = vpack.c.bf16 %v12431_v26, %v13376_v11  ;;  %v6281_v21 = vmul.f32 %v12425_v23, %v12431_v26  ;;  %v6166_v10 = vmul.f32 %v12443_v51, %v12431_v26 }
 0x591   : > { %v5901_v22 = vpop.f32.mrf.mxu1  ;;  %v5964_v40 = vmul.f32 %v12462_v6, %v12431_v26  ;;  %v5860_v28 = vpop.f32.mrf.mxu0  ;;  %v5859_v24 = vadd.f32 %v5858_v1, %v5806_v0  ;;  %v12522_v8 = vmul.f32 %v12427_v2, %v12431_v26  ;;  %v12591_v44 = vmul.f32 %v12473_v47, %v12431_v26 }
 0x592   : > { %6092 = vrot.lane.b32.xlu1 %v8689_v48, %s9625_s24  ;;  %v8690_v15 = vpack.c.bf16 %v12435_v14, %v12435_v14  ;;  %v6282_v54 = vmul.f32 %v12405_v19, %v12435_v14  ;;  %v8705_v7 = vpack.c.bf16 %v6281_v21, %v12433_v25  ;;  %v6167_v12 = vmul.f32 %v12413_v45, %v12435_v14 }
 0x593   : > { %v5903_v46 = vpop.f32.mrf.mxu1  ;;  %v8697_v49 = vpack.c.bf16 %v6166_v10, %v12452_v32  ;;  %v5965_v60 = vmul.f32 %v12419_v61, %v12435_v14  ;;  %v8681_v58 = vpack.c.bf16 %v5964_v40, %v12467_v55  ;;  %v12498_v50 = vadd.f32 %v5901_v22, %v5849_v3 }
 0x594   : > { %6094 = vrot.lane.b32.xlu0 %v8690_v15, %s9625_s24  ;;  %v8706_v9 = vpack.c.bf16 %v6282_v54, %v6282_v54  ;;  %v8698_v17 = vpack.c.bf16 %v6167_v12, %v6167_v12  ;;  %v12492_v30 = vadd.f32 %v5903_v46, %v5851_v59  ;;  %v5861_v56 = vadd.f32 %v5860_v28, %v5808_v42 }
 0x595   : > { %v8682_v16 = vpack.c.bf16 %v5965_v60, %v5965_v60  ;;  %v8713_v63 = vpack.c.bf16 %v12435_v14, %v12431_v26  ;;  %v12516_v13 = vmul.f32 %v12490_v4, %v12435_v14  ;;  %v12526_v48 = vmul.f32 %v12448_v20, %v12431_v26 }
 0x596   : > { %6324 = vrot.lane.b32.xlu1 %v8705_v7, %s9611_s26  ;;  %v8692_v34 = vpack.c.bf16 %v12492_v30, %v12492_v30  ;;  %v6285_v52 = vmul.f32 %v12405_v19, %v12492_v30  ;;  %v12533_v22 = vmul.f32 %v12504_v36, %v12435_v14  ;;  %v12537_v15 = vmul.f32 %v12427_v2, %v12498_v50 }
 0x597   : > { %v5907_v53 = vpop.f32.mrf.mxu1  ;;  %v12541_v54 = vmul.f32 %v12504_v36, %v12492_v30  ;;  %v8691_v10 = vpack.c.bf16 %v12498_v50, %v13376_v11  ;;  %v12551_v18 = vmul.f32 %v12509_v35, %v12435_v14  ;;  %v6284_v12 = vmul.f32 %v12425_v23, %v12498_v50 }
 0x598   : > { %6326 = vrot.lane.b32.xlu0 %v8706_v9, %s9611_s26  ;;  %v12543_v46 = vadd.f32 %v5907_v53, %v5855_v37  ;;  %v8725_v53 = vpack.c.bf16 %v12533_v22, %v12522_v8  ;;  %v12568_v1 = vmul.f32 %v12448_v20, %v12498_v50  ;;  %v12572_v43 = vmul.f32 %v12509_v35, %v12492_v30 }
 0x599   : > { %v5909_v39 = vpop.f32.mrf.mxu1  ;;  %v8717_v29 = vpack.c.bf16 %v12551_v18, %v12526_v48  ;;  %v6169_v60 = vmul.f32 %v12443_v51, %v12498_v50  ;;  %v8707_v5 = vpack.c.bf16 %v6284_v12, %v12433_v25  ;;  %v5968_v28 = vmul.f32 %v12419_v61, %v12492_v30  ;;  %v12739_v48 = vpop.permute.xlu0 %6684 }
 0x59a   : > { %6209 = vrot.lane.b32.xlu1 %v8697_v49, %s9622_s27  ;;  %v12545_v7 = vadd.f32 %v5909_v39, %v5857_v57  ;;  %v8727_v49 = vpack.c.bf16 %v12541_v54, %v12537_v15  ;;  %v8708_v39 = vpack.c.bf16 %v6285_v52, %v6285_v52  ;;  %v8719_v59 = vpack.c.bf16 %v12572_v43, %v12568_v1 }
 0x59b   : > { %v5911_v33 = vpop.f32.mrf.mxu1  ;;  %v12583_v3 = vmul.f32 %v12473_v47, %v12543_v46  ;;  %v12599_v0 = vmul.f32 %v12473_v47, %v12498_v50  ;;  %v12603_v42 = vmul.f32 %v12490_v4, %v12492_v30  ;;  %v5967_v52 = vmul.f32 %v12462_v6, %v12498_v50 }
 0x59c   : > { %6211 = vrot.lane.b32.xlu0 %v8698_v17, %s9622_s27  ;;  %v12553_v9 = vadd.f32 %v5911_v33, %v5859_v24  ;;  %v6170_v17 = vmul.f32 %v12413_v45, %v12492_v30  ;;  %v6748_v15 = vmul.f32 0.0, %v12476_v38 }
 0x59d   : > { %v5913_v21 = vpop.f32.mrf.mxu1  ;;  %v8683_v12 = vpack.c.bf16 %v5967_v52, %v12467_v55  ;;  %v6172_v52 = vmul.f32 %v12443_v51, %v12543_v46  ;;  %v12746_v18 = vpop.permute.xlu0 %6688 }
 0x59e   : > { %6007 = vrot.lane.b32.xlu1 %v8681_v58, %s9623_s21  ;;  %v12562_v40 = vadd.f32 %v5913_v21, %v5861_v56  ;;  %v12587_v58 = vmul.f32 %v12490_v4, %v12545_v7  ;;  %v8759_v57 = vpack.c.bf16 %v12553_v9, %v12543_v46  ;;  %v8700_v24 = vpack.c.bf16 %v6170_v17, %v6170_v17 }
 0x59f   : > { %v8743_v56 = vpack.c.bf16 %v12603_v42, %v12599_v0  ;;  %v8699_v21 = vpack.c.bf16 %v6169_v60, %v12452_v32  ;;  %v6288_v17 = vmul.f32 %v12405_v19, %v12545_v7  ;;  %v8693_v60 = vpack.c.bf16 %v12543_v46, %v13376_v11  ;;  %v6890_v42 = vld [vmem:[%s13264_s6 + $0x38] sm:$0xff] }
 0x5a0   : > { %6009 = vrot.lane.b32.xlu0 %v8682_v16, %s9623_s21  ;;  %v8745_v33 = vpack.c.bf16 %v12587_v58, %v12583_v3  ;;  %v8741_v16 = vpack.c.bf16 %v12516_v13, %v12591_v44  ;;  %v8760_v37 = vpack.c.bf16 %v12562_v40, %v12545_v7  ;;  %v6555_v8 = vmul.f32 %v12504_v36, %v12562_v40  ;;  %v6883_v44 = vld [vmem:[%s13264_s6] sm:$0xff] }
 0x5a1   : > { %v6554_v22 = vmul.f32 %v12427_v2, %v12553_v9  ;;  %v6755_v1 = vmul.f32 %v12473_v47, %v12553_v9  ;;  %v6886_v47 = vld [vmem:[%s13264_s6 + $0x18] sm:$0xff] }
 0x5a2   : > { %6674 = vrot.lane.b32.xlu1 %v8713_v63, %s9624_s22  ;;  %v8758_v63 = vpack.c.bf16 %v12492_v30, %v12435_v14  ;;  %v9505_v14 = vld [vmem:[#allocation4 + $0x8] ss:$12 sps:$4 sm:$0xff]  }
 0x5a3   : > { %v8731_v54 = vpack.c.bf16 %v6555_v8, %v6554_v22 }
 0x5a4   : > { %6098 = vrot.lane.b32.xlu0 %v8692_v34, %s9625_s24  ;;  %v8757_v34 = vpack.c.bf16 %v12498_v50, %v12431_v26  ;;  %v9512_v26 = vld [vmem:[#allocation4 + $0x30] ss:$12 sps:$4 sm:$0xff]  }
 0x5a6   : > { %6096 = vrot.lane.b32.xlu1 %v8691_v10, %s9625_s24  ;;  %v8684_v10 = vpack.c.bf16 %v5968_v28, %v5968_v28  ;;  %v8710_v28 = vpack.c.bf16 %v6288_v17, %v6288_v17  ;;  %v5970_v17 = vmul.f32 %v12462_v6, %v12543_v46 }
 0x5a8   : > { %6330 = vrot.lane.b32.xlu0 %v8708_v39, %s9611_s26  ;;  %v8694_v39 = vpack.c.bf16 %v12545_v7, %v12545_v7 }
 0x5aa   : > { %6328 = vrot.lane.b32.xlu1 %v8707_v5, %s9611_s26  ;;  %v6287_v5 = vmul.f32 %v12425_v23, %v12543_v46 }
 0x5ac   : > { %6215 = vrot.lane.b32.xlu0 %v8700_v24, %s9622_s27  ;;  %v6173_v24 = vmul.f32 %v12413_v45, %v12545_v7 }
 0x5ae   : > { %6213 = vrot.lane.b32.xlu1 %v8699_v21, %s9622_s27  ;;  %v8709_v21 = vpack.c.bf16 %v6287_v5, %v12433_v25  ;;  %v8685_v5 = vpack.c.bf16 %v5970_v17, %v12467_v55  ;;  %v6175_v17 = vmul.f32 %v12443_v51, %v12553_v9  ;;  %v5974_v51 = vmul.f32 %v12419_v61, %v12562_v40 }
 0x5b0   : > { %6013 = vrot.lane.b32.xlu0 %v8684_v10, %s9623_s21  ;;  %v8702_v10 = vpack.c.bf16 %v6173_v24, %v6173_v24  ;;  %v6291_v24 = vmul.f32 %v12405_v19, %v12562_v40  ;;  %v6176_v19 = vmul.f32 %v12413_v45, %v12562_v40  ;;  %v5973_v45 = vmul.f32 %v12462_v6, %v12553_v9 }
 0x5b1   : > { %v8688_v6 = vpack.c.bf16 %v5974_v51, %v5974_v51 }
 0x5b2   : > { %6011 = vrot.lane.b32.xlu1 %v8683_v12, %s9623_s21  ;;  %v5971_v12 = vmul.f32 %v12419_v61, %v12545_v7  ;;  %v6432_v61 = vmul.f32 0.0, %v12454_v62  ;;  %v6436_v62 = vmul.f32 %v12448_v20, %v12543_v46 }
 0x5b4   : > { %6102 = vrot.lane.b32.xlu0 %v8694_v39, %s9625_s24  ;;  %v8701_v39 = vpack.c.bf16 %v6172_v52, %v12452_v32  ;;  %v8712_v52 = vpack.c.bf16 %v6291_v24, %v6291_v24 }
 0x5b6   : > { %6100 = vrot.lane.b32.xlu1 %v8693_v60, %s9625_s24  ;;  %v8686_v60 = vpack.c.bf16 %v5971_v12, %v5971_v12  ;;  %v6290_v12 = vmul.f32 %v12425_v23, %v12553_v9  ;;  %v8703_v23 = vpack.c.bf16 %v6175_v17, %v12452_v32  ;;  %v8714_v32 = vpack.c.bf16 %v12492_v30, %v12498_v50  ;;  %v9508_v30 = vld [vmem:[#allocation4 + $0x18] ss:$12 sps:$4 sm:$0xff]  }
 0x5b7   : > { %v9514_v50 = vld [vmem:[#allocation4 + $0x4c] ss:$12 sps:$4 sm:$0xff]  }
 0x5b8   : > { %6334 = vrot.lane.b32.xlu0 %v8710_v28, %s9611_s26  ;;  %v8696_v28 = vpack.c.bf16 %v12562_v40, %v12562_v40 }
 0x5ba   : > { %6332 = vrot.lane.b32.xlu1 %v8709_v21, %s9611_s26  ;;  %v8715_v21 = vpack.c.bf16 %v12545_v7, %v12543_v46 }
 0x5bc   : > { %6219 = vrot.lane.b32.xlu0 %v8702_v10, %s9622_s27  ;;  %v8695_v10 = vpack.c.bf16 %v12553_v9, %v13376_v11 }
 0x5be   : > { %6217 = vrot.lane.b32.xlu1 %v8701_v39, %s9622_s27  ;;  %v8711_v39 = vpack.c.bf16 %v6290_v12, %v12433_v25  ;;  %v8687_v25 = vpack.c.bf16 %v5973_v45, %v12467_v55  ;;  %v6551_v55 = vmul.f32 %v12427_v2, %v12543_v46  ;;  %v6439_v2 = vmul.f32 %v12448_v20, %v12553_v9  ;;  %v9506_v46 = vld [vmem:[#allocation4 + $0x1c] ss:$12 sps:$4 sm:$0xff]  }
 0x5bf   : > { %v6756_v20 = vmul.f32 %v12490_v4, %v12562_v40  ;;  %v6884_v4 = vld [vmem:[%s13264_s6 + $0x8] sm:$0xff] }
 0x5c0   : > { %6017 = vrot.lane.b32.xlu0 %v8686_v60, %s9623_s21  ;;  %v8704_v60 = vpack.c.bf16 %v6176_v19, %v6176_v19  ;;  %v6885_v19 = vld [vmem:[%s13264_s6 + $0x10] sm:$0xff] }
 0x5c2   : > { %6015 = vrot.lane.b32.xlu1 %v8685_v5, %s9623_s21  ;;  %v6547_v5 = vmul.f32 0.0, %v12429_v27  ;;  %v8716_v27 = vpack.c.bf16 %v12562_v40, %v12553_v9 }
 0x5c4   : > { %6106 = vrot.lane.b32.xlu0 %v8696_v28, %s9625_s24  ;;  %v8726_v28 = vpack.c.bf16 %v6547_v5, %v6547_v5  ;;  %v6889_v5 = vld [vmem:[%s13264_s6 + $0x30] sm:$0xff] }
 0x5c6   : > { %6682 = vrot.lane.b32.xlu1 %v8715_v21, %s9624_s22  ;;  %v8718_v21 = vpack.c.bf16 %v6432_v61, %v6432_v61 }
 0x5c8   : > { %6338 = vrot.lane.b32.xlu0 %v8712_v52, %s9611_s26  ;;  %v6437_v52 = vmul.f32 %v12509_v35, %v12545_v7 }
 0x5ca   : > { %6104 = vrot.lane.b32.xlu1 %v8695_v10, %s9625_s24  ;;  %v8721_v10 = vpack.c.bf16 %v6437_v52, %v6436_v62 }
 0x5cc   : > { %6676 = vrot.lane.b32.xlu0 %v13428_v41, %s9624_s22 }
 0x5ce   : > { %6336 = vrot.lane.b32.xlu1 %v8711_v39, %s9611_s26  ;;  %v6887_v39 = vld [vmem:[%s13264_s6 + $0x20] sm:$0xff] }
 0x5d0   : > { %6223 = vrot.lane.b32.xlu0 %v8704_v60, %s9622_s27 }
 0x5d2   : > { %6221 = vrot.lane.b32.xlu1 %v8703_v23, %s9622_s27 }
 0x5d4   : > { %6680 = vrot.lane.b32.xlu0 %v13428_v41, %s9624_s22  ;;  %v6552_v41 = vmul.f32 %v12504_v36, %v12545_v7  ;;  %v6440_v36 = vmul.f32 %v12509_v35, %v12562_v40 }
 0x5d6   : > { %6019 = vrot.lane.b32.xlu1 %v8687_v25, %s9623_s21  ;;  %v8729_v24 = vpack.c.bf16 %v6552_v41, %v6551_v55  ;;  %v8723_v38 = vpack.c.bf16 %v6440_v36, %v6439_v2 }
 0x5d8   : > { %6599 = vrot.lane.b32.xlu0 %v8726_v28, %s9620_s25 }
 0x5da   : > { %6686 = vrot.lane.b32.xlu1 %v8716_v27, %s9624_s22 }
 0x5dc   : > { %6603 = vrot.lane.b32.xlu0 %v8726_v28, %s9620_s25 }
 0x5de   : > { %6678 = vrot.lane.b32.xlu1 %v8714_v32, %s9624_s22 }
 0x5e0   : > { %6021 = vrot.lane.b32.xlu0 %v8688_v6, %s9623_s21 }
 0x5e2   : > { %6597 = vrot.lane.b32.xlu1 %v8729_v24, %s9620_s25 }
 0x5e4   : > { %6591 = vrot.lane.b32.xlu0 %v8726_v28, %s9620_s25 }
 0x5e6   : > { %6589 = vrot.lane.b32.xlu1 %v8725_v53, %s9620_s25  ;;  %v8742_v53 = vpack.c.bf16 %v6748_v15, %v6748_v15 }
 0x5e8   : > { %6595 = vrot.lane.b32.xlu0 %v8726_v28, %s9620_s25 }
 0x5ea   : > { %6593 = vrot.lane.b32.xlu1 %v8727_v49, %s9620_s25  ;;  %v9504_v49 = vld [vmem:[#allocation4 + $0x4] ss:$12 sps:$4 sm:$0xff]  }
 0x5eb   : > { %7216 = vmatprep.mubr.bf16.mxu0 %v9504_v49 }
 0x5ec   : > { %6484 = vrot.lane.b32.xlu0 %v8718_v21, %s9613_s13 }
 0x5ee   : > { %6482 = vrot.lane.b32.xlu1 %v8721_v10, %s9613_s13 }
 0x5f0   : > { %6488 = vrot.lane.b32.xlu0 %v8718_v21, %s9613_s13 }
 0x5f2   : > { %6474 = vrot.lane.b32.xlu1 %v8717_v29, %s9613_s13 }
 0x5f4   : > { %6476 = vrot.lane.b32.xlu0 %v8718_v21, %s9613_s13 }
 0x5f6   : > { %6601 = vrot.lane.b32.xlu1 %v8731_v54, %s9620_s25 }
 0x5f8   : > { %6480 = vrot.lane.b32.xlu0 %v8718_v21, %s9613_s13 }
 0x5fa   : > { %6478 = vrot.lane.b32.xlu1 %v8719_v59, %s9613_s13  ;;  %v8747_v59 = vpack.c.bf16 %v6756_v20, %v6755_v1 }
 0x5fc   : > { %6800 = vrot.lane.b32.xlu0 %v8742_v53, %s9621_s14 }
 0x5fe   : > { %6486 = vrot.lane.b32.xlu1 %v8723_v38, %s9613_s13 }
 0x600   : > { %6804 = vrot.lane.b32.xlu0 %v8742_v53, %s9621_s14 }
 0x602   : > { %6798 = vrot.lane.b32.xlu1 %v8745_v33, %s9621_s14 }
 0x604   : > { %v12752_v35 = vpop.permute.xlu1 %6092  ;;  %6792 = vrot.lane.b32.xlu0 %v8742_v53, %s9621_s14 }
 0x606   : > { %v12757_v29 = vpop.permute.xlu0 %6094  ;;  %6790 = vrot.lane.b32.xlu1 %v8741_v16, %s9621_s14  ;;  %v6888_v16 = vld [vmem:[%s13264_s6 + $0x28] sm:$0xff] }
 0x608   : > { %v12765_v43 = vpop.permute.xlu1 %6324  ;;  %6796 = vrot.lane.b32.xlu0 %v8742_v53, %s9621_s14 }
 0x609   : > { %v6340_v49 = vrot.slane %v12765_v43, 4 }
 0x60a   : > { %v6327_v3 = vpop.permute.xlu0 %6326  ;;  %6802 = vrot.lane.b32.xlu1 %v8747_v59, %s9621_s14 }
 0x60b   : > { %v6341_v36 = vrot.slane %v6327_v3, 4 }
 0x60c   : > { %v12772_v58 = vpop.permute.xlu1 %6209  ;;  %6898 = vperm.xlu0 %8851, %v6884_v4  }
 0x60e   : > { %v12777_v13 = vpop.permute.xlu0 %6211  ;;  %6794 = vrot.lane.b32.xlu1 %v8743_v56, %s9621_s14 }
 0x610   : > { %v12786_v33 = vpop.permute.xlu1 %6007  ;;  %6908 = vperm.xlu0 %8851, %v6886_v47  }
 0x612   : > { %v12791_v12 = vpop.permute.xlu0 %6009  ;;  %6893 = vperm.xlu1 %8852, %v6883_v44   ;;  %v6348_v44 = vsel %vm568_vm6, %v6340_v49, %v6341_v36 }
 0x614   : > { %v12796_v0 = vpop.permute.xlu1 %6674  ;;  %6918 = vperm.xlu0 %8851, %v6888_v16  }
 0x616   : > { %v12801_v56 = vpop.permute.xlu0 %6098  ;;  %6903 = vperm.xlu1 %8852, %v6885_v19  }
 0x618   : > { %v12806_v17 = vpop.permute.xlu1 %6096  ;;  %6928 = vperm.xlu0 %8851, %v6890_v42  }
 0x61a   : > { %v6331_v60 = vpop.permute.xlu0 %6330  ;;  %6913 = vperm.xlu1 %8852, %v6887_v39  }
 0x61b   : > { %v6343_v54 = vrot.slane %v6331_v60, 4 }
 0x61c   : > { %v6329_v23 = vpop.permute.xlu1 %6328 }
 0x61d   : > { %v6342_v8 = vrot.slane %v6329_v23, 4 }
 0x61e   : > { %v6216_v45 = vpop.permute.xlu0 %6215  ;;  %6923 = vperm.xlu1 %8852, %v6889_v5  }
 0x61f   : > { %v6350_v38 = vsel %vm568_vm6, %v6342_v8, %v6343_v54  ;;  %v6228_v49 = vrot.slane %v6216_v45, 4 }
 0x620   : > { %v12811_v28 = vpop.permute.xlu1 %6213  ;;  %v6351_v16 = vsel %vm942_vm2, %v6329_v23, %v6350_v38  ;;  %v6349_v23 = vsel %vm942_vm2, %v12765_v43, %v6348_v44 }
 0x621   : > { %v6227_v3 = vrot.slane %v12811_v28, 4  ;;  %v8502_v38 = vcombine.high %v6349_v23, %v6351_v16  ;;  %v8501_v43 = vcombine.low %v6349_v23, %v6351_v16 }
 0x622   : > { %v12813_v25 = vpop.permute.xlu0 %6013 }
 0x624   : > { %v12815_v27 = vpop.permute.xlu1 %6011 }
 0x626   : > { %v12817_v51 = vpop.permute.xlu0 %6102 }
 0x627   : > { %v6113_v16 = vrot.slane %v12817_v51, 4 }
 0x628   : > { %v12819_v32 = vpop.permute.xlu1 %6100 }
 0x62a   : > { %v6335_v41 = vpop.permute.xlu0 %6334 }
 0x62b   : > { %v6345_v2 = vrot.slane %v6335_v41, 4 }
 0x62c   : > { %v6333_v6 = vpop.permute.xlu1 %6332 }
 0x62d   : > { %v6344_v15 = vrot.slane %v6333_v6, 4 }
 0x62e   : > { %v6220_v55 = vpop.permute.xlu0 %6219 }
 0x62f   : > { %v6352_v1 = vsel %vm568_vm6, %v6344_v15, %v6345_v2  ;;  %v6230_v60 = vrot.slane %v6220_v55, 4  ;;  %v6226_v2 = vrot.slane %v12777_v13, 4  ;;  %v6236_v13 = vsel %vm568_vm6, %v6227_v3, %v6228_v49 }
 0x630   : > { %v6218_v24 = vpop.permute.xlu1 %6217  ;;  %v6353_v39 = vsel %vm942_vm2, %v6333_v6, %v6352_v1  ;;  %v6225_v1 = vrot.slane %v12772_v58, 4  ;;  %v6110_v3 = vrot.slane %v12806_v17, 4 }
 0x631   : > { %v6229_v19 = vrot.slane %v6218_v24, 4 }
 0x632   : > { %v12821_v61 = vpop.permute.xlu0 %6017  ;;  %v6233_v44 = vsel %vm568_vm6, %v6225_v1, %v6226_v2  ;;  %v6108_v2 = vrot.slane %v12752_v35, 4 }
 0x634   : > { %v12823_v21 = vpop.permute.xlu1 %6015 }
 0x636   : > { %v6107_v52 = vpop.permute.xlu0 %6106 }
 0x638   : > { %v12825_v62 = vpop.permute.xlu1 %6682 }
 0x63a   : > { %v6339_v10 = vpop.permute.xlu0 %6338 }
 0x63b   : > { %v6347_v59 = vrot.slane %v6339_v10, 4 }
 0x63c   : > { %v12827_v22 = vpop.permute.xlu1 %6104 }
 0x63e   : > { %v12829_v53 = vpop.permute.xlu0 %6676 }
 0x640   : > { %v6337_v20 = vpop.permute.xlu1 %6336 }
 0x641   : > { %v6346_v4 = vrot.slane %v6337_v20, 4 }
 0x642   : > { %v6224_v47 = vpop.permute.xlu0 %6223 }
 0x643   : > { %v6354_v42 = vsel %vm568_vm6, %v6346_v4, %v6347_v59  ;;  %v6232_v10 = vrot.slane %v6224_v47, 4  ;;  %v6238_v59 = vsel %vm568_vm6, %v6229_v19, %v6230_v60  ;;  %v6114_v4 = vrot.slane %v12827_v22, 4 }
 0x644   : > { %v6355_v5 = vsel %vm942_vm2, %v6337_v20, %v6354_v42  ;;  %v6222_v41 = vpop.permute.xlu1 %6221  ;;  %v6239_v47 = vsel %vm6234_vm14, %v6218_v24, %v6238_v59  ;;  %v6112_v19 = vrot.slane %v12819_v32, 4  ;;  %v6115_v42 = vrot.slane %v6107_v52, 4 }
 0x645   : > { %v8503_v8 = vcombine.low %v6353_v39, %v6355_v5  ;;  %v8504_v15 = vcombine.high %v6353_v39, %v6355_v5  ;;  %v6231_v54 = vrot.slane %v6222_v41, 4  ;;  %v6237_v60 = vsel %vm6234_vm14, %v12811_v28, %v6236_v13 }
 0x646   : > { %v12843_v36 = vpop.permute.xlu0 %6680  ;;  %v6123_v24 = vsel %vm568_vm6, %v6114_v4, %v6115_v42  ;;  %v6111_v28 = vrot.slane %v12801_v56, 4  ;;  %v6027_v59 = vrot.slane %v12823_v21, 4  ;;  %v6025_v4 = vrot.slane %v12815_v27, 4 }
 0x647   : > { %v6240_v6 = vsel %vm568_vm6, %v6231_v54, %v6232_v10  ;;  %7184 = vmatprep.subr.bf16.mxu0 %v8504_v15  ;;  %v6121_v54 = vsel %vm568_vm6, %v6112_v19, %v6113_v16  ;;  %v6124_v51 = vsel %vm4056_vm10, %v12827_v22, %v6123_v24  ;;  %v6024_v42 = vrot.slane %v12791_v12, 4 }
 0x648   : > { %v6241_v55 = vsel %vm6234_vm14, %v6222_v41, %v6240_v6  ;;  %v6020_v20 = vpop.permute.xlu1 %6019  ;;  %7185 = vmatpush1.bf16.msra.mxu0 %v8503_v8  ;;  %v6109_v41 = vrot.slane %v12757_v29, 4  ;;  %v6235_v8 = vsel %vm6234_vm14, %v12772_v58, %v6233_v44  ;;  %v6119_v29 = vsel %vm568_vm6, %v6110_v3, %v6111_v28 }
 0x649   : > { %7186 = vmatprep.subr.bf16.mxu0 %v8502_v38  ;;  %v8500_v39 = vcombine.high %v6239_v47, %v6241_v55  ;;  %v8499_v52 = vcombine.low %v6239_v47, %v6241_v55  ;;  %v8498_v10 = vcombine.high %v6235_v8, %v6237_v60  ;;  %v8497_v38 = vcombine.low %v6235_v8, %v6237_v60 }
 0x64a   : > { %v12852_v45 = vpop.permute.xlu0 %6599  ;;  %v6116_v58 = vsel %vm568_vm6, %v6108_v2, %v6109_v41  ;;  %v6122_v56 = vsel %vm4056_vm10, %v12819_v32, %v6121_v54  ;;  %v6029_v55 = vrot.slane %v6020_v20, 4  ;;  %v6120_v22 = vsel %vm4056_vm10, %v12806_v17, %v6119_v29 }
 0x64b   : > { %v8496_v6 = vcombine.high %v6122_v56, %v6124_v51  ;;  %v6118_v32 = vsel %vm4056_vm10, %v12752_v35, %v6116_v58  ;;  %v8495_v44 = vcombine.low %v6122_v56, %v6124_v51  ;;  %v6026_v17 = vrot.slane %v12813_v25, 4 }
 0x64c   : > { %v12858_v5 = vpop.permute.xlu1 %6686  ;;  %7187 = vmatpush1.bf16.msra.mxu0 %v8501_v43  ;;  %v6028_v43 = vrot.slane %v12821_v61, 4  ;;  %v6023_v16 = vrot.slane %v12786_v33, 4  ;;  %v8493_v41 = vcombine.low %v6118_v32, %v6120_v22  ;;  %v6697_v25 = vrot.slane %v12746_v18, 4 }
 0x64d   : > { %7188 = vmatprep.subr.bf16.mxu0 %v8500_v39  ;;  %v8494_v39 = vcombine.high %v6118_v32, %v6120_v22  ;;  %v6034_v24 = vsel %vm568_vm6, %v6025_v4, %v6026_v17  ;;  %v6696_v35 = vrot.slane %v12858_v5, 4  ;;  %v6694_v28 = vrot.slane %v12825_v62, 4 }
 0x64e   : > { %v12866_v15 = vpop.permute.xlu0 %6603  ;;  %v6036_v60 = vsel %vm568_vm6, %v6027_v59, %v6028_v43  ;;  %v6695_v2 = vrot.slane %v12739_v48, 4  ;;  %v6610_v32 = vrot.slane %v12852_v45, 4 }
 0x64f   : > { %v6037_v12 = vsel %vm6032_vm13, %v12823_v21, %v6036_v60  ;;  %v6705_v51 = vsel %vm568_vm6, %v6696_v35, %v6697_v25 }
 0x650   : > { %v12873_v23 = vpop.permute.xlu1 %6678  ;;  %7189 = vmatpush1.bf16.msra.mxu0 %v8499_v52  ;;  %v6031_v52 = vsel %vm568_vm6, %v6023_v16, %v6024_v42  ;;  %v6703_v56 = vsel %vm568_vm6, %v6694_v28, %v6695_v2  ;;  %v6706_v48 = vsel %vm6699_vm15, %v12858_v5, %v6705_v51  ;;  %v6612_v16 = vrot.slane %v12866_v15, 4 }
 0x651   : > { %7190 = vmatprep.subr.bf16.mxu0 %v8498_v10  ;;  %v6692_v29 = vrot.slane %v12873_v23, 4  ;;  %v6033_v18 = vsel %vm6032_vm13, %v12786_v33, %v6031_v52 }
 0x652   : > { %v6022_v49 = vpop.permute.xlu0 %6021 }
 0x653   : > { %v6030_v1 = vrot.slane %v6022_v49, 4  ;;  %v6693_v49 = vrot.slane %v12843_v36, 4 }
 0x654   : > { %v12882_v13 = vpop.permute.xlu1 %6597  ;;  %7191 = vmatpush1.bf16.msra.mxu0 %v8497_v38 }
 0x655   : > { %v6038_v47 = vsel %vm568_vm6, %v6029_v55, %v6030_v1  ;;  %7192 = vmatprep.subr.bf16.mxu0 %v8496_v6  ;;  %v6690_v6 = vrot.slane %v12796_v0, 4  ;;  %v6701_v33 = vsel %vm568_vm6, %v6692_v29, %v6693_v49  ;;  %v6704_v1 = vsel %vm6699_vm15, %v12825_v62, %v6703_v56 }
 0x656   : > { %v12889_v19 = vpop.permute.xlu0 %6591  ;;  %v6039_v61 = vsel %vm6032_vm13, %v6020_v20, %v6038_v47  ;;  %v6035_v20 = vsel %vm6032_vm13, %v12815_v27, %v6034_v24  ;;  %v6691_v27 = vrot.slane %v12829_v53, 4  ;;  %v8520_v4 = vcombine.high %v6704_v1, %v6706_v48 }
 0x657   : > { %v8492_v10 = vcombine.high %v6037_v12, %v6039_v61  ;;  %v8491_v21 = vcombine.low %v6037_v12, %v6039_v61  ;;  %v8490_v38 = vcombine.high %v6033_v18, %v6035_v20  ;;  %v8489_v55 = vcombine.low %v6033_v18, %v6035_v20 }
 0x658   : > { %v12894_v3 = vpop.permute.xlu1 %6589  ;;  %7193 = vmatpush1.bf16.msra.mxu0 %v8495_v44  ;;  %v6698_v53 = vsel %vm568_vm6, %v6690_v6, %v6691_v27  ;;  %v6702_v36 = vsel %vm6699_vm15, %v12873_v23, %v6701_v33  ;;  %v6609_v5 = vrot.slane %v12882_v13, 4  ;;  %v8519_v44 = vcombine.low %v6704_v1, %v6706_v48 }
 0x659   : > { %7194 = vmatprep.subr.bf16.mxu0 %v8494_v39  ;;  %v6700_v42 = vsel %vm6699_vm15, %v12796_v0, %v6698_v53  ;;  %v6605_v17 = vrot.slane %v12894_v3, 4  ;;  %v6606_v24 = vrot.slane %v12889_v19, 4 }
 0x65a   : > { %v6596_v8 = vpop.permute.xlu0 %6595  ;;  %v8518_v39 = vcombine.high %v6700_v42, %v6702_v36  ;;  %v6618_v61 = vsel %vm568_vm6, %v6609_v5, %v6610_v32 }
 0x65b   : > { %v6608_v60 = vrot.slane %v6596_v8, 4  ;;  %v6619_v0 = vsel %vm6160_vm11, %v12882_v13, %v6618_v61  ;;  %v6613_v25 = vsel %vm568_vm6, %v6605_v17, %v6606_v24 }
 0x65c   : > { %v6594_v54 = vpop.permute.xlu1 %6593  ;;  %7195 = vmatpush1.bf16.msra.mxu0 %v8493_v41  ;;  %v8517_v41 = vcombine.low %v6700_v42, %v6702_v36  ;;  %v6615_v29 = vsel %vm6160_vm11, %v12894_v3, %v6613_v25 }
 0x65d   : > { %7196 = vmatprep.subr.bf16.mxu0 %v8492_v10  ;;  %v6607_v47 = vrot.slane %v6594_v54, 4 }
 0x65e   : > { %v6485_v58 = vpop.permute.xlu0 %6484 }
 0x65f   : > { %v6616_v35 = vsel %vm568_vm6, %v6607_v47, %v6608_v60  ;;  %v6495_v28 = vrot.slane %v6485_v58, 4 }
 0x660   : > { %v12917_v59 = vpop.permute.xlu1 %6482  ;;  %7197 = vmatpush1.bf16.msra.mxu0 %v8491_v21  ;;  %v6617_v52 = vsel %vm6160_vm11, %v6594_v54, %v6616_v35 }
 0x661   : > { %7198 = vmatprep.subr.bf16.mxu0 %v8490_v38  ;;  %v6494_v15 = vrot.slane %v12917_v59, 4  ;;  %v8514_v18 = vcombine.high %v6615_v29, %v6617_v52  ;;  %v8513_v6 = vcombine.low %v6615_v29, %v6617_v52  ;;  %v9520_v29 = vld [vmem:[%s13268_s10 + $0x70] sm:$0xff]  }
 0x662   : > { %v6489_v22 = vpop.permute.xlu0 %6488 }
 0x663   : > { %v6502_v54 = vsel %vm568_vm6, %v6494_v15, %v6495_v28  ;;  %v6497_v56 = vrot.slane %v6489_v22, 4 }
 0x664   : > { %v6475_v43 = vpop.permute.xlu1 %6474  ;;  %7199 = vmatpush1.bf16.msra.mxu0 %v8489_v55  ;;  %v6503_v1 = vsel %vm868_vm4, %v12917_v59, %v6502_v54 }
 0x665   : > { %7200 = vmatprep.subr.bf16.mxu0 %v8520_v4  ;;  %v6490_v27 = vrot.slane %v6475_v43, 4 }
 0x666   : > { %v6477_v62 = vpop.permute.xlu0 %6476 }
 0x667   : > { %v6491_v21 = vrot.slane %v6477_v62, 4 }
 0x668   : > { %v6602_v23 = vpop.permute.xlu1 %6601  ;;  %7201 = vmatpush2.bf16.msra.mxu0 %v8519_v44 }
 0x669   : > { %v6611_v45 = vrot.slane %v6602_v23, 4  ;;  %7202 = vmatprep.subr.bf16.mxu0 %v8518_v39  ;;  %v6498_v55 = vsel %vm568_vm6, %v6490_v27, %v6491_v21 }
 0x66a   : > { %v6481_v12 = vpop.permute.xlu0 %6480  ;;  %v6499_v47 = vsel %vm868_vm4, %v6475_v43, %v6498_v55 }
 0x66b   : > { %v6620_v8 = vsel %vm568_vm6, %v6611_v45, %v6612_v16  ;;  %v6493_v38 = vrot.slane %v6481_v12, 4 }
 0x66c   : > { %v6621_v19 = vsel %vm6160_vm11, %v6602_v23, %v6620_v8  ;;  %v6479_v10 = vpop.permute.xlu1 %6478  ;;  %7203 = vmatpush2.bf16.msra.mxu0 %v8517_v41 }
 0x66d   : > { %v8515_v20 = vcombine.low %v6619_v0, %v6621_v19  ;;  %v8516_v2 = vcombine.high %v6619_v0, %v6621_v19  ;;  %v6492_v51 = vrot.slane %v6479_v10, 4  ;;  %v9509_v19 = vld [vmem:[#allocation4 + $0x20] ss:$12 sps:$4 sm:$0xff]  }
 0x66e   : > { %v6801_v13 = vpop.permute.xlu0 %6800 }
 0x66f   : > { %7204 = vmatprep.subr.bf16.mxu0 %v8516_v2  ;;  %v6500_v49 = vsel %vm568_vm6, %v6492_v51, %v6493_v38  ;;  %v6811_v62 = vrot.slane %v6801_v13, 4  ;;  %v9518_v2 = vld [vmem:[%s13268_s10 + $0x78] sm:$0xff]  }
 0x670   : > { %v6487_v58 = vpop.permute.xlu1 %6486  ;;  %7205 = vmatpush2.bf16.msra.mxu0 %v8515_v20  ;;  %v6501_v53 = vsel %vm868_vm4, %v6479_v10, %v6500_v49  ;;  %v9516_v10 = vld [vmem:[#allocation4 + $0x48] ss:$12 sps:$4 sm:$0xff]   ;;  %v9517_v20 = vld [vmem:[#allocation4 + $0x50] ss:$12 sps:$4 sm:$0xff]  }
 0x671   : > { %v6496_v48 = vrot.slane %v6487_v58, 4  ;;  %7206 = vmatprep.subr.bf16.mxu0 %v8514_v18  ;;  %v8510_v32 = vcombine.high %v6499_v47, %v6501_v53  ;;  %v8509_v17 = vcombine.low %v6499_v47, %v6501_v53  ;;  %v9519_v51 = vld [vmem:[%s13268_s10 + $0x38] sm:$0xff]   ;;  %v9525_v47 = vld [vmem:[%s13268_s10 + $0x20] sm:$0xff]  }
 0x672   : > { %v6805_v33 = vpop.permute.xlu0 %6804 }
 0x673   : > { %v6504_v3 = vsel %vm568_vm6, %v6496_v48, %v6497_v56  ;;  %v6813_v61 = vrot.slane %v6805_v33, 4  ;;  %v9522_v48 = vld [vmem:[%s13268_s10 + $0x68] sm:$0xff]  }
 0x674   : > { %v6505_v4 = vsel %vm868_vm4, %v6487_v58, %v6504_v3  ;;  %v6799_v36 = vpop.permute.xlu1 %6798  ;;  %7207 = vmatpush2.bf16.msra.mxu0 %v8513_v6  ;;  %v9523_v6 = vld [vmem:[%s13268_s10 + $0x28] sm:$0xff]  }
 0x675   : > { %v8511_v22 = vcombine.low %v6503_v1, %v6505_v4  ;;  %v8512_v5 = vcombine.high %v6503_v1, %v6505_v4  ;;  %v6810_v39 = vrot.slane %v6799_v36, 4  ;;  %v9524_v1 = vld [vmem:[%s13268_s10 + $0x60] sm:$0xff]  }
 0x676   : > { %v6793_v44 = vpop.permute.xlu0 %6792 }
 0x677   : > { %7208 = vmatprep.subr.bf16.mxu0 %v8512_v5  ;;  %v6819_v23 = vsel %vm568_vm6, %v6810_v39, %v6811_v62  ;;  %v6807_v43 = vrot.slane %v6793_v44, 4 }
 0x678   : > { %v6791_v42 = vpop.permute.xlu1 %6790  ;;  %7209 = vmatpush2.bf16.msra.mxu0 %v8511_v22  ;;  %v6820_v45 = vsel %vm5958_vm12, %v6799_v36, %v6819_v23 }
 0x679   : > { %7210 = vmatprep.subr.bf16.mxu0 %v8510_v32  ;;  %v6806_v59 = vrot.slane %v6791_v42, 4 }
 0x67a   : > { %v6797_v24 = vpop.permute.xlu0 %6796 }
 0x67b   : > { %v6814_v41 = vsel %vm568_vm6, %v6806_v59, %v6807_v43  ;;  %v6809_v25 = vrot.slane %v6797_v24, 4  ;;  %v9526_v59 = vld [vmem:[%s13268_s10 + $0x58] sm:$0xff]  }
 0x67c   : > { %v6803_v60 = vpop.permute.xlu1 %6802  ;;  %7211 = vmatpush2.bf16.msra.mxu0 %v8509_v17  ;;  %v6816_v28 = vsel %vm5958_vm12, %v6791_v42, %v6814_v41 }
 0x67d   : > { %v6812_v16 = vrot.slane %v6803_v60, 4  ;;  %7212 = vmatprep.subr.bf16.mxu0 %v8760_v37  ;;  %v9502_v37 = vld [vmem:[#allocation4] ss:$12 sps:$4 sm:$0xff]  }
 0x67f   : > { %v6821_v35 = vsel %vm568_vm6, %v6812_v16, %v6813_v61  ;;  %v9527_v61 = vld [vmem:[%s13268_s10 + $0x18] sm:$0xff]  }
 0x680   : > { %v6822_v12 = vsel %vm5958_vm12, %v6803_v60, %v6821_v35  ;;  %v6795_v0 = vpop.permute.xlu1 %6794  ;;  %7213 = vmatpush2.bf16.msra.mxu0 %v8759_v57 }
 0x681   : > { %v8523_v8 = vcombine.low %v6820_v45, %v6822_v12  ;;  %v8524_v52 = vcombine.high %v6820_v45, %v6822_v12  ;;  %v6808_v7 = vrot.slane %v6795_v0, 4  ;;  %7214 = vmatprep.subr.bf16.mxu0 %v8758_v63  ;;  %v9510_v63 = vld [vmem:[#allocation4 + $0x34] ss:$12 sps:$4 sm:$0xff]  }
 0x682   : > { %v9528_v45 = vld [vmem:[%s13268_s10 + $0x50] sm:$0xff]  }
 0x683   : > { %v6817_v40 = vsel %vm568_vm6, %v6808_v7, %v6809_v25  ;;  %7269 = vmatprep.subr.bf16.mxu1 %v8524_v52  ;;  %v9529_v12 = vld [vmem:[%s13268_s10 + $0x10] sm:$0xff]  }
 0x684   : > { %v6818_v15 = vsel %vm5958_vm12, %v6795_v0, %v6817_v40  ;;  %7215 = vmatpush2.bf16.msra.mxu0 %v8757_v34  ;;  %7270 = vmatpush1.bf16.msra.mxu1 %v8523_v8  ;;  %v9513_v34 = vld [vmem:[#allocation4 + $0x38] ss:$12 sps:$4 sm:$0xff]  }
 0x685   : > { %v8521_v9 = vcombine.low %v6816_v28, %v6818_v15  ;;  %v8522_v57 = vcombine.high %v6816_v28, %v6818_v15  ;;  %v9531_v28 = vld [vmem:[%s13268_s10 + $0x8] sm:$0xff]   ;;  %v9532_v15 = vld [vmem:[%s13268_s10 + $0x40] sm:$0xff]  }
 0x687   : > { %7217 = vmatmul.mubr.bf16.vlgmr.msra.gmra.mxu0 %v9502_v37  ;;  %7271 = vmatprep.subr.bf16.mxu1 %v8522_v57  ;;  %v6899_v58 = vpop.permute.xlu0 %6898  ;;  %v9530_v37 = vld [vmem:[%s13268_s10 + $0x48] sm:$0xff]  }
 0x688   : > { %7272 = vmatpush1.bf16.msra.mxu1 %v8521_v9  ;;  %7226 = vmatprep.mubr.bf16.mxu0 %v9506_v46 }
 0x689   : > { %8761 = vmatprep.subr.bf16.mxu1 %v9518_v2 }
 0x68b   : > { %8525 = vmatmul.mubr.msk.bf16.vlgmr.msra.gmra.mxu1 %vm643_vm8, %v9505_v14  ;;  %v6909_v7 = vpop.permute.xlu0 %6908 }
 0x68c   : > { %7299 = vmatprep.mubr.bf16.mxu1 %v13427_v31  ;;  %8762 = vmatpush3.bf16.msra.mxu1 %v9519_v51 }
 0x68d   : > { %8763 = vmatprep.subr.bf16.mxu1 %v9520_v29  ;;  %v6894_v21 = vpop.permute.xlu1 %6893 }
 0x68f   : > { %7227 = vmatmul.mubr.bf16.gmra.mxu0 %v9508_v30 }
 0x690   : > { %7236 = vmatprep.mubr.bf16.mxu0 %v9510_v63  ;;  %v9533_v63 = vld [vmem:[%s13268_s10] sm:$0xff]  }
 0x691   : > { %v6904_v24 = vpop.permute.xlu1 %6903 }
 0x693   : > { %8526 = vmatmul.mubr.msk.bf16.gmra.mxu1 %vm643_vm8, %v9509_v19 }
 0x694   : > { %7309 = vmatprep.mubr.bf16.mxu1 %v13427_v31 }
 0x697   : > { %7237 = vmatmul.mubr.bf16.gmra.mxu0 %v9512_v26 }
 0x698   : > { %7246 = vmatprep.mubr.bf16.mxu0 %v9514_v50 }
 0x69b   : > { %8527 = vmatmul.mubr.msk.bf16.gmra.mxu1 %vm643_vm8, %v9513_v34 }
 0x69c   : > { %7319 = vmatprep.mubr.bf16.mxu1 %v13427_v31  ;;  %v9521_v31 = vld [vmem:[%s13268_s10 + $0x30] sm:$0xff]  }
 0x69d   : > { %8764 = vmatpush3.bf16.msra.mxu1 %v9521_v31 }
 0x69e   : > { %8765 = vmatprep.subr.bf16.mxu1 %v9522_v48 }
 0x69f   : > { %7247 = vmatmul.mubr.bf16.gmra.mxu0 %v9516_v10 }
 0x6a1   : > { %8766 = vmatpush3.bf16.msra.mxu1 %v9523_v6 }
 0x6a2   : > { %8767 = vmatprep.subr.bf16.mxu1 %v9524_v1 }
 0x6a3   : > { %8528 = vmatmul.mubr.msk.bf16.gmra.mxu1 %vm643_vm8, %v9517_v20 }
 0x6a5   : > { %8768 = vmatpush3.bf16.msra.mxu1 %v9525_v47 }
 0x6a6   : > { %8769 = vmatprep.subr.bf16.mxu1 %v9526_v59 }
 0x6a9   : > { %8770 = vmatpush3.bf16.msra.mxu1 %v9527_v61 }
 0x6aa   : > { %8771 = vmatprep.subr.bf16.mxu1 %v9528_v45 }
 0x6ad   : > { %8772 = vmatpush3.bf16.msra.mxu1 %v9529_v12 }
 0x6ae   : > { %8773 = vmatprep.subr.bf16.mxu1 %v9530_v37 }
 0x6b1   : > { %8774 = vmatpush3.bf16.msra.mxu1 %v9531_v28 }
 0x6b2   : > { %8775 = vmatprep.subr.bf16.mxu1 %v9532_v15 }
 0x6b5   : > { %8776 = vmatpush3.bf16.msra.mxu1 %v9533_v63 }
 0x747   : > { %v7218_v13 = vpop.f32.mrf.mxu0 }
 0x748   : > { %v7219_v33 = vadd.f32 %v7218_v13, %v6894_v21  ;;  %v6914_v13 = vpop.permute.xlu1 %6913 }
 0x749   : > { %v7220_v18 = vpop.f32.mrf.mxu0 }
 0x74a   : > { %v7221_v56 = vadd.f32 %v7220_v18, %v6894_v21 }
 0x74b   : > { %v7222_v38 = vpop.f32.mrf.mxu0  ;;  %v7291_v54 = vpop.f32.mrf.mxu1 }
 0x74c   : > { %v7223_v55 = vadd.f32 %v7222_v38, %v6899_v58  ;;  %v13003_v4 = vadd.f32 %v7291_v54, %v7219_v33 }
 0x74d   : > { %v7224_v27 = vpop.f32.mrf.mxu0  ;;  %v7293_v49 = vpop.f32.mrf.mxu1 }
 0x74e   : > { %v12998_v3 = vadd.f32 %v7293_v49, %v7221_v56  ;;  %v7225_v36 = vadd.f32 %v7224_v27, %v6899_v58  ;;  %v7330_v60 = vmax.f32 %v13003_v4, 0.0  ;;  %v6919_v56 = vpop.permute.xlu0 %6918 }
 0x74f   : > { %v7295_v53 = vpop.f32.mrf.mxu1  ;;  %v7228_v32 = vpop.f32.mrf.mxu0 }
 0x750   : > { %v7331_v22 = vmax.f32 %v12998_v3, 0.0  ;;  %v13006_v5 = vadd.f32 %v7295_v53, %v7223_v55  ;;  %v7229_v57 = vadd.f32 %v7228_v32, %v6904_v24 }
 0x751   : > { %v7297_v44 = vpop.f32.mrf.mxu1  ;;  %v7230_v23 = vpop.f32.mrf.mxu0 }
 0x752   : > { %v7332_v42 = vmax.f32 %v13006_v5, 0.0  ;;  %v13012_v62 = vadd.f32 %v7297_v44, %v7225_v36  ;;  %v9128_v39 = vpack.i.bf16 %v13376_v11, %v7331_v22  ;;  %v7231_v41 = vadd.f32 %v7230_v23, %v6904_v24 }
 0x753   : > { %v7301_v17 = vpop.f32.mrf.mxu1  ;;  %v7232_v8 = vpop.f32.mrf.mxu0 }
 0x754   : > { %9129 = vrot.lane.b32.xlu0 %v9128_v39, %s9624_s22  ;;  %9124 = vrot.lane.b32.xlu1 %v9128_v39, %s9613_s13  ;;  %v7333_v16 = vmax.f32 %v13012_v62, 0.0  ;;  %v9143_v43 = vpack.i.bf16 %v7332_v42, %v7330_v60  ;;  %v7233_v46 = vadd.f32 %v7232_v8, %v6909_v7  ;;  %v13066_v26 = vadd.f32 %v7301_v17, %v7229_v57 }
 0x755   : > { %v7303_v35 = vpop.f32.mrf.mxu1  ;;  %v7234_v9 = vpop.f32.mrf.mxu0 }
 0x756   : > { %v13039_v0 = vadd.f32 %v7303_v35, %v7231_v41  ;;  %v9153_v25 = vpack.i.bf16 %v13376_v11, %v7333_v16  ;;  %v7235_v50 = vadd.f32 %v7234_v9, %v6909_v7  ;;  %v7334_v51 = vmax.f32 %v13066_v26, 0.0  ;;  %v6924_v35 = vpop.permute.xlu1 %6923 }
 0x757   : > { %v7305_v40 = vpop.f32.mrf.mxu1  ;;  %v7238_v34 = vpop.f32.mrf.mxu0 }
 0x758   : > { %9144 = vrot.lane.b32.xlu0 %v9143_v43, %s9624_s22  ;;  %9134 = vrot.lane.b32.xlu1 %v9128_v39, %s9621_s14  ;;  %v7335_v52 = vmax.f32 %v13039_v0, 0.0  ;;  %v13058_v14 = vadd.f32 %v7305_v40, %v7233_v46  ;;  %v7239_v33 = vadd.f32 %v7238_v34, %v6914_v13  ;;  %v6929_v40 = vpop.permute.xlu0 %6928 }
 0x759   : > { %v7307_v19 = vpop.f32.mrf.mxu1  ;;  %v7240_v29 = vpop.f32.mrf.mxu0 }
 0x75a   : > { %v9168_v30 = vpack.i.bf16 %v13376_v11, %v7335_v52  ;;  %v7336_v10 = vmax.f32 %v13058_v14, 0.0  ;;  %v13071_v20 = vadd.f32 %v7307_v19, %v7235_v50  ;;  %v7241_v38 = vadd.f32 %v7240_v29, %v6914_v13 }
 0x75b   : > { %v7311_v2 = vpop.f32.mrf.mxu1  ;;  %v7242_v54 = vpop.f32.mrf.mxu0 }
 0x75c   : > { %9154 = vrot.lane.b32.xlu0 %v9153_v25, %s9613_s13  ;;  %9139 = vrot.lane.b32.xlu1 %v9143_v43, %s9613_s13  ;;  %v9183_v31 = vpack.i.bf16 %v7336_v10, %v7334_v51  ;;  %v7337_v18 = vmax.f32 %v13071_v20, 0.0  ;;  %v7243_v48 = vadd.f32 %v7242_v54, %v6919_v56  ;;  %v13093_v36 = vadd.f32 %v7311_v2, %v7239_v33 }
 0x75d   : > { %v7313_v21 = vpop.f32.mrf.mxu1  ;;  %v7244_v6 = vpop.f32.mrf.mxu0 }
 0x75e   : > { %v13083_v58 = vadd.f32 %v7313_v21, %v7241_v38  ;;  %v9198_v49 = vpack.i.bf16 %v13376_v11, %v7337_v18  ;;  %v7245_v47 = vadd.f32 %v7244_v6, %v6919_v56  ;;  %v7338_v61 = vmax.f32 %v13093_v36, 0.0 }
 0x75f   : > { %v7315_v27 = vpop.f32.mrf.mxu1  ;;  %v7248_v32 = vpop.f32.mrf.mxu0 }
 0x760   : > { %9164 = vrot.lane.b32.xlu0 %v9153_v25, %s9621_s14  ;;  %9149 = vrot.lane.b32.xlu1 %v9143_v43, %s9621_s14  ;;  %v7339_v55 = vmax.f32 %v13083_v58, 0.0  ;;  %v13091_v1 = vadd.f32 %v7315_v27, %v7243_v48  ;;  %v7249_v46 = vadd.f32 %v7248_v32, %v6924_v35 }
 0x761   : > { %v7317_v53 = vpop.f32.mrf.mxu1  ;;  %v7250_v23 = vpop.f32.mrf.mxu0 }
 0x762   : > { %v7340_v44 = vmax.f32 %v13091_v1, 0.0  ;;  %v13098_v39 = vadd.f32 %v7317_v53, %v7245_v47  ;;  %v9218_v17 = vpack.i.bf16 %v13376_v11, %v7339_v55  ;;  %v7251_v41 = vadd.f32 %v7250_v23, %v6924_v35 }
 0x763   : > { %v7321_v59 = vpop.f32.mrf.mxu1  ;;  %v7252_v8 = vpop.f32.mrf.mxu0 }
 0x764   : > { %9169 = vrot.lane.b32.xlu0 %v9168_v30, %s9613_s13  ;;  %9159 = vrot.lane.b32.xlu1 %v9153_v25, %s9624_s22  ;;  %v7341_v43 = vmax.f32 %v13098_v39, 0.0  ;;  %v9233_v24 = vpack.i.bf16 %v7340_v44, %v7338_v61  ;;  %v7253_v28 = vadd.f32 %v7252_v8, %v6929_v40  ;;  %v13128_v63 = vadd.f32 %v7321_v59, %v7249_v46 }
 0x765   : > { %v7323_v45 = vpop.f32.mrf.mxu1  ;;  %v7254_v15 = vpop.f32.mrf.mxu0 }
 0x766   : > { %v13113_v12 = vadd.f32 %v7323_v45, %v7251_v41  ;;  %v9243_v25 = vpack.i.bf16 %v13376_v11, %v7341_v43  ;;  %v7255_v19 = vadd.f32 %v7254_v15, %v6929_v40  ;;  %v7342_v2 = vmax.f32 %v13128_v63, 0.0 }
 0x767   : > { %v7325_v37 = vpop.f32.mrf.mxu1 }
 0x768   : > { %9179 = vrot.lane.b32.xlu0 %v9168_v30, %s9621_s14  ;;  %9174 = vrot.lane.b32.xlu1 %v9168_v30, %s9624_s22  ;;  %v7343_v7 = vmax.f32 %v13113_v12, 0.0  ;;  %v13123_v9 = vadd.f32 %v7325_v37, %v7253_v28 }
 0x769   : > { %v7327_v30 = vpop.f32.mrf.mxu1 }
 0x76a   : > { %v9258_v57 = vpack.i.bf16 %v13376_v11, %v7343_v7  ;;  %v7344_v50 = vmax.f32 %v13123_v9, 0.0  ;;  %v13133_v34 = vadd.f32 %v7327_v30, %v7255_v19 }
 0x76c   : > { %9184 = vrot.lane.b32.xlu0 %v9183_v31, %s9613_s13  ;;  %9189 = vrot.lane.b32.xlu1 %v9183_v31, %s9624_s22  ;;  %v7345_v29 = vmax.f32 %v13133_v34, 0.0 }
 0x76e   : > { %v9288_v13 = vpack.i.bf16 %v13376_v11, %v7345_v29 }
 0x770   : > { %9194 = vrot.lane.b32.xlu0 %v9183_v31, %s9621_s14  ;;  %9199 = vrot.lane.b32.xlu1 %v9198_v49, %s9613_s13  ;;  %v9273_v31 = vpack.i.bf16 %v7344_v50, %v7342_v2 }
 0x774   : > { %9204 = vrot.lane.b32.xlu0 %v9198_v49, %s9624_s22  ;;  %9209 = vrot.lane.b32.xlu1 %v9198_v49, %s9621_s14 }
 0x778   : > { %9219 = vrot.lane.b32.xlu0 %v9218_v17, %s9624_s22  ;;  %9214 = vrot.lane.b32.xlu1 %v9218_v17, %s9613_s13 }
 0x77c   : > { %9234 = vrot.lane.b32.xlu0 %v9233_v24, %s9624_s22  ;;  %9224 = vrot.lane.b32.xlu1 %v9218_v17, %s9621_s14 }
 0x780   : > { %9244 = vrot.lane.b32.xlu0 %v9243_v25, %s9613_s13  ;;  %9229 = vrot.lane.b32.xlu1 %v9233_v24, %s9613_s13 }
 0x784   : > { %9254 = vrot.lane.b32.xlu0 %v9243_v25, %s9621_s14  ;;  %9239 = vrot.lane.b32.xlu1 %v9233_v24, %s9621_s14 }
 0x788   : > { %9259 = vrot.lane.b32.xlu0 %v9258_v57, %s9613_s13  ;;  %9249 = vrot.lane.b32.xlu1 %v9243_v25, %s9624_s22 }
 0x78c   : > { %9269 = vrot.lane.b32.xlu0 %v9258_v57, %s9621_s14  ;;  %9264 = vrot.lane.b32.xlu1 %v9258_v57, %s9624_s22 }
 0x790   : > { %9274 = vrot.lane.b32.xlu0 %v9273_v31, %s9613_s13  ;;  %9279 = vrot.lane.b32.xlu1 %v9273_v31, %s9624_s22 }
 0x794   : > { %9289 = vrot.lane.b32.xlu0 %v9288_v13, %s9624_s22  ;;  %9284 = vrot.lane.b32.xlu1 %v9288_v13, %s9613_s13  ;;  %s13237_s22 = scalar_lea.vmem %s13269_s11, %s8547_s18 }
 0x798   : > { %9299 = vrot.lane.b32.xlu0 %v9273_v31, %s9621_s14  ;;  %9294 = vrot.lane.b32.xlu1 %v9288_v13, %s9621_s14 }
 0x7c6   : > { %v9130_v21 = vpop.permute.xlu0 %9129  ;;  %v9125_v38 = vpop.permute.xlu1 %9124 }
 0x7c7   : > { %v9127_v27 = vunpack.i.h.bf16 %v9125_v38  ;;  %v9126_v49 = vunpack.i.l.bf16 %v9125_v38  ;;  %v9132_v41 = vunpack.i.h.bf16 %v9130_v21  ;;  %v9131_v25 = vunpack.i.l.bf16 %v9130_v21 }
 0x7c9   : > { %v7467_v53 = vsel %vm868_vm4, %v9126_v49, %v9127_v27  ;;  %v7564_v21 = vsel %vm6699_vm15, %v9131_v25, %v9132_v41 }
 0x7ca   : > { %v9145_v54 = vpop.permute.xlu0 %9144  ;;  %v9135_v56 = vpop.permute.xlu1 %9134  ;;  %v7499_v45 = vmax.f32 %v7331_v22, %v7467_v53 }
 0x7cb   : > { %v9146_v23 = vunpack.i.l.bf16 %v9145_v54  ;;  %v9137_v40 = vunpack.i.h.bf16 %v9135_v56  ;;  %v9147_v37 = vunpack.i.h.bf16 %v9145_v54  ;;  %v9136_v57 = vunpack.i.l.bf16 %v9135_v56 }
 0x7cc   : > { %v7596_v56 = vmax.f32 %v7499_v45, %v7564_v21 }
 0x7cd   : > { %v7563_v30 = vsel %vm6699_vm15, %v9146_v23, %v9131_v25 }
 0x7ce   : > { %v9155_v48 = vpop.permute.xlu0 %9154  ;;  %v9140_v6 = vpop.permute.xlu1 %9139 }
 0x7cf   : > { %v9141_v33 = vunpack.i.l.bf16 %v9140_v6  ;;  %v9142_v11 = vunpack.i.h.bf16 %v9140_v6  ;;  %v9157_v32 = vunpack.i.h.bf16 %v9155_v48  ;;  %v9156_v17 = vunpack.i.l.bf16 %v9155_v48 }
 0x7d1   : > { %v7466_v47 = vsel %vm868_vm4, %v9141_v33, %v9126_v49  ;;  %v7468_v28 = vsel %vm868_vm4, %v9142_v11, %v9156_v17  ;;  %v7469_v15 = vsel %vm868_vm4, %v9156_v17, %v9157_v32  ;;  %v7660_v33 = vsel %vm5958_vm12, %v9136_v57, %v9137_v40 }
 0x7d2   : > { %v9165_v59 = vpop.permute.xlu0 %9164  ;;  %v9150_v24 = vpop.permute.xlu1 %9149  ;;  %v7498_v35 = vmax.f32 %v7330_v60, %v7466_v47  ;;  %v7500_v38 = vmax.f32 %v7332_v42, %v7468_v28  ;;  %v7501_v54 = vmax.f32 %v7333_v16, %v7469_v15 }
 0x7d3   : > { %v9151_v8 = vunpack.i.l.bf16 %v9150_v24  ;;  %v9167_v19 = vunpack.i.h.bf16 %v9165_v59  ;;  %v9166_v31 = vunpack.i.l.bf16 %v9165_v59  ;;  %v9152_v60 = vunpack.i.h.bf16 %v9150_v24 }
 0x7d4   : > { %v7595_v13 = vmax.f32 %v7498_v35, %v7563_v30  ;;  %v7692_v24 = vmax.f32 %v7596_v56, %v7660_v33 }
 0x7d5   : > { %v7659_v27 = vsel %vm5958_vm12, %v9151_v8, %v9136_v57  ;;  %v7661_v5 = vsel %vm5958_vm12, %v9152_v60, %v9166_v31  ;;  %v7662_v42 = vsel %vm5958_vm12, %v9166_v31, %v9167_v19 }
 0x7d6   : > { %v9170_v46 = vpop.permute.xlu0 %9169  ;;  %v9160_v4 = vpop.permute.xlu1 %9159  ;;  %v7691_v32 = vmax.f32 %v7595_v13, %v7659_v27 }
 0x7d7   : > { %v9162_v3 = vunpack.i.h.bf16 %v9160_v4  ;;  %v9161_v22 = vunpack.i.l.bf16 %v9160_v4  ;;  %v9172_v16 = vunpack.i.h.bf16 %v9170_v46  ;;  %v9171_v17 = vunpack.i.l.bf16 %v9170_v46 }
 0x7d9   : > { %v7565_v49 = vsel %vm6699_vm15, %v9147_v37, %v9161_v22  ;;  %v7566_v48 = vsel %vm6699_vm15, %v9161_v22, %v9162_v3  ;;  %v7471_v37 = vsel %vm868_vm4, %v9171_v17, %v9172_v16 }
 0x7da   : > { %v9180_v6 = vpop.permute.xlu0 %9179  ;;  %v7597_v53 = vmax.f32 %v7500_v38, %v7565_v49  ;;  %v7598_v11 = vmax.f32 %v7501_v54, %v7566_v48  ;;  %v9175_v47 = vpop.permute.xlu1 %9174  ;;  %v7503_v31 = vmax.f32 %v7335_v52, %v7471_v37 }
 0x7db   : > { %v9177_v45 = vunpack.i.h.bf16 %v9175_v47  ;;  %v9176_v41 = vunpack.i.l.bf16 %v9175_v47  ;;  %v9182_v3 = vunpack.i.h.bf16 %v9180_v6  ;;  %v9181_v22 = vunpack.i.l.bf16 %v9180_v6 }
 0x7dc   : > { %v7693_v62 = vmax.f32 %v7597_v53, %v7661_v5  ;;  %v7694_v59 = vmax.f32 %v7598_v11, %v7662_v42 }
 0x7dd   : > { %v7568_v30 = vsel %vm6699_vm15, %v9176_v41, %v9177_v45 }
 0x7de   : > { %v9185_v23 = vpop.permute.xlu0 %9184  ;;  %v7707_v35 = vpack.c.bf16 %v7693_v62, %v7691_v32  ;;  %v9190_v25 = vpop.permute.xlu1 %9189  ;;  %v7708_v40 = vpack.c.bf16 %v7694_v59, %v7692_v24  ;;  %v7600_v38 = vmax.f32 %v7503_v31, %v7568_v30  ;;  %v7664_v59 = vsel %vm5958_vm12, %v9181_v22, %v9182_v3 }
 0x7df   : > { %v9186_v8 = vunpack.i.l.bf16 %v9185_v23  ;;  %v9191_v15 = vunpack.i.l.bf16 %v9190_v25  ;;  %v9187_v4 = vunpack.i.h.bf16 %v9185_v23 }
 0x7e0   : > { %7875 = vmatprep.mubr.bf16.mxu1 %v7708_v40 }
 0x7e1   : > { %v7470_v28 = vsel %vm868_vm4, %v9186_v8, %v9171_v17  ;;  %7876 = vmatmul.mubr.bf16.vlgmr.msra.gmra.mxu1 %v7707_v35  ;;  %v7567_v54 = vsel %vm6699_vm15, %v9191_v15, %v9176_v41 }
 0x7e2   : > { %v9195_v57 = vpop.permute.xlu0 %9194  ;;  %v7502_v46 = vmax.f32 %v7334_v51, %v7470_v28  ;;  %v9200_v19 = vpop.permute.xlu1 %9199  ;;  %v9192_v51 = vunpack.i.h.bf16 %v9190_v25 }
 0x7e3   : > { %v9202_v60 = vunpack.i.h.bf16 %v9200_v19  ;;  %v9201_v13 = vunpack.i.l.bf16 %v9200_v19  ;;  %v9196_v21 = vunpack.i.l.bf16 %v9195_v57  ;;  %v9197_v47 = vunpack.i.h.bf16 %v9195_v57 }
 0x7e4   : > { %v7599_v0 = vmax.f32 %v7502_v46, %v7567_v54 }
 0x7e5   : > { %v7472_v27 = vsel %vm868_vm4, %v9187_v4, %v9201_v13  ;;  %v7473_v56 = vsel %vm868_vm4, %v9201_v13, %v9202_v60  ;;  %v7663_v32 = vsel %vm5958_vm12, %v9196_v21, %v9181_v22 }
 0x7e6   : > { %v9205_v26 = vpop.permute.xlu0 %9204  ;;  %v9210_v49 = vpop.permute.xlu1 %9209  ;;  %v7504_v52 = vmax.f32 %v7336_v10, %v7472_v27  ;;  %v7505_v6 = vmax.f32 %v7337_v18, %v7473_v56  ;;  %v7696_v18 = vmax.f32 %v7600_v38, %v7664_v59  ;;  %v7695_v24 = vmax.f32 %v7599_v0, %v7663_v32 }
 0x7e7   : > { %v9207_v48 = vunpack.i.h.bf16 %v9205_v26  ;;  %v9206_v33 = vunpack.i.l.bf16 %v9205_v26  ;;  %v9212_v53 = vunpack.i.h.bf16 %v9210_v49  ;;  %v9211_v11 = vunpack.i.l.bf16 %v9210_v49 }
 0x7e9   : > { %v7569_v5 = vsel %vm6699_vm15, %v9192_v51, %v9206_v33  ;;  %v7570_v42 = vsel %vm6699_vm15, %v9206_v33, %v9207_v48  ;;  %v7665_v14 = vsel %vm5958_vm12, %v9197_v47, %v9211_v11  ;;  %v7666_v10 = vsel %vm5958_vm12, %v9211_v11, %v9212_v53 }
 0x7ea   : > { %v7601_v62 = vmax.f32 %v7504_v52, %v7569_v5  ;;  %v7602_v16 = vmax.f32 %v7505_v6, %v7570_v42  ;;  %v9220_v17 = vpop.permute.xlu0 %9219  ;;  %v9215_v20 = vpop.permute.xlu1 %9214 }
 0x7eb   : > { %v9217_v40 = vunpack.i.h.bf16 %v9215_v20  ;;  %v9216_v37 = vunpack.i.l.bf16 %v9215_v20  ;;  %v9222_v60 = vunpack.i.h.bf16 %v9220_v17  ;;  %v9221_v13 = vunpack.i.l.bf16 %v9220_v17 }
 0x7ec   : > { %v7698_v23 = vmax.f32 %v7602_v16, %v7666_v10  ;;  %v7697_v35 = vmax.f32 %v7601_v62, %v7665_v14 }
 0x7ed   : > { %v7475_v30 = vsel %vm868_vm4, %v9216_v37, %v9217_v40  ;;  %v7572_v48 = vsel %vm6699_vm15, %v9221_v13, %v9222_v60 }
 0x7ee   : > { %v9235_v45 = vpop.permute.xlu0 %9234  ;;  %v7710_v41 = vpack.c.bf16 %v7698_v23, %v7696_v18  ;;  %v7709_v25 = vpack.c.bf16 %v7697_v35, %v7695_v24  ;;  %v9225_v8 = vpop.permute.xlu1 %9224  ;;  %v7507_v21 = vmax.f32 %v7339_v55, %v7475_v30 }
 0x7ef   : > { %v9227_v38 = vunpack.i.h.bf16 %v9225_v8  ;;  %v9236_v54 = vunpack.i.l.bf16 %v9235_v45  ;;  %v9226_v27 = vunpack.i.l.bf16 %v9225_v8  ;;  %v9237_v33 = vunpack.i.h.bf16 %v9235_v45 }
 0x7f0   : > { %7883 = vmatprep.mubr.bf16.mxu1 %v7710_v41  ;;  %v7604_v47 = vmax.f32 %v7507_v21, %v7572_v48 }
 0x7f1   : > { %7884 = vmatmul.mubr.bf16.gmra.mxu1 %v7709_v25  ;;  %v7571_v32 = vsel %vm6699_vm15, %v9236_v54, %v9221_v13  ;;  %v7668_v5 = vsel %vm5958_vm12, %v9226_v27, %v9227_v38 }
 0x7f2   : > { %v9245_v28 = vpop.permute.xlu0 %9244  ;;  %v9230_v15 = vpop.permute.xlu1 %9229 }
 0x7f3   : > { %v9231_v57 = vunpack.i.l.bf16 %v9230_v15  ;;  %v9232_v46 = vunpack.i.h.bf16 %v9230_v15  ;;  %v9247_v19 = vunpack.i.h.bf16 %v9245_v28  ;;  %v9246_v31 = vunpack.i.l.bf16 %v9245_v28 }
 0x7f5   : > { %v7474_v3 = vsel %vm868_vm4, %v9231_v57, %v9216_v37  ;;  %v7476_v26 = vsel %vm868_vm4, %v9232_v46, %v9246_v31  ;;  %v7477_v51 = vsel %vm868_vm4, %v9246_v31, %v9247_v19 }
 0x7f6   : > { %v9255_v4 = vpop.permute.xlu0 %9254  ;;  %v9240_v22 = vpop.permute.xlu1 %9239  ;;  %v7506_v56 = vmax.f32 %v7338_v61, %v7474_v3  ;;  %v7508_v36 = vmax.f32 %v7340_v44, %v7476_v26  ;;  %v7509_v61 = vmax.f32 %v7341_v43, %v7477_v51  ;;  %v7700_v43 = vmax.f32 %v7604_v47, %v7668_v5 }
 0x7f7   : > { %v9241_v0 = vunpack.i.l.bf16 %v9240_v22  ;;  %v9257_v52 = vunpack.i.h.bf16 %v9255_v4  ;;  %v9242_v53 = vunpack.i.h.bf16 %v9240_v22  ;;  %v9256_v58 = vunpack.i.l.bf16 %v9255_v4 }
 0x7f8   : > { %v7603_v17 = vmax.f32 %v7506_v56, %v7571_v32 }
 0x7f9   : > { %v7667_v59 = vsel %vm5958_vm12, %v9241_v0, %v9226_v27  ;;  %v7669_v18 = vsel %vm5958_vm12, %v9242_v53, %v9256_v58  ;;  %v7670_v1 = vsel %vm5958_vm12, %v9256_v58, %v9257_v52 }
 0x7fa   : > { %v9260_v49 = vpop.permute.xlu0 %9259  ;;  %v9250_v6 = vpop.permute.xlu1 %9249  ;;  %v7699_v25 = vmax.f32 %v7603_v17, %v7667_v59 }
 0x7fb   : > { %v9252_v55 = vunpack.i.h.bf16 %v9250_v6  ;;  %v9251_v11 = vunpack.i.l.bf16 %v9250_v6  ;;  %v9262_v44 = vunpack.i.h.bf16 %v9260_v49  ;;  %v9261_v39 = vunpack.i.l.bf16 %v9260_v49 }
 0x7fd   : > { %v7573_v42 = vsel %vm6699_vm15, %v9237_v33, %v9251_v11  ;;  %v7574_v62 = vsel %vm6699_vm15, %v9251_v11, %v9252_v55  ;;  %v7479_v28 = vsel %vm868_vm4, %v9261_v39, %v9262_v44 }
 0x7fe   : > { %v9270_v16 = vpop.permute.xlu0 %9269  ;;  %v7605_v14 = vmax.f32 %v7508_v36, %v7573_v42  ;;  %v7606_v10 = vmax.f32 %v7509_v61, %v7574_v62  ;;  %v9265_v20 = vpop.permute.xlu1 %9264  ;;  %v7511_v4 = vmax.f32 %v7343_v7, %v7479_v28 }
 0x7ff   : > { %v9267_v35 = vunpack.i.h.bf16 %v9265_v20  ;;  %v9266_v45 = vunpack.i.l.bf16 %v9265_v20  ;;  %v9272_v27 = vunpack.i.h.bf16 %v9270_v16  ;;  %v9271_v56 = vunpack.i.l.bf16 %v9270_v16 }
 0x800   : > { %v7702_v23 = vmax.f32 %v7606_v10, %v7670_v1  ;;  %v7701_v24 = vmax.f32 %v7605_v14, %v7669_v18 }
 0x801   : > { %v7576_v46 = vsel %vm6699_vm15, %v9266_v45, %v9267_v35  ;;  %v7672_v9 = vsel %vm5958_vm12, %v9271_v56, %v9272_v27 }
 0x802   : > { %v9275_v41 = vpop.permute.xlu0 %9274  ;;  %v9280_v8 = vpop.permute.xlu1 %9279  ;;  %v7712_v37 = vpack.c.bf16 %v7702_v23, %v7700_v43  ;;  %v7711_v15 = vpack.c.bf16 %v7701_v24, %v7699_v25  ;;  %v7608_v54 = vmax.f32 %v7511_v4, %v7576_v46 }
 0x803   : > { %v9276_v40 = vunpack.i.l.bf16 %v9275_v41  ;;  %v9281_v57 = vunpack.i.l.bf16 %v9280_v8  ;;  %v9277_v60 = vunpack.i.h.bf16 %v9275_v41  ;;  %v9282_v51 = vunpack.i.h.bf16 %v9280_v8 }
 0x804   : > { %7891 = vmatprep.mubr.bf16.mxu1 %v7712_v37  ;;  %v7704_v36 = vmax.f32 %v7608_v54, %v7672_v9 }
 0x805   : > { %v7478_v30 = vsel %vm868_vm4, %v9276_v40, %v9261_v39  ;;  %7892 = vmatmul.mubr.bf16.gmra.mxu1 %v7711_v15  ;;  %v7575_v26 = vsel %vm6699_vm15, %v9281_v57, %v9266_v45 }
 0x806   : > { %v7510_v19 = vmax.f32 %v7342_v2, %v7478_v30  ;;  %v9290_v31 = vpop.permute.xlu0 %9289  ;;  %v9285_v13 = vpop.permute.xlu1 %9284 }
 0x807   : > { %v9287_v3 = vunpack.i.h.bf16 %v9285_v13  ;;  %v9286_v22 = vunpack.i.l.bf16 %v9285_v13  ;;  %v9292_v21 = vunpack.i.h.bf16 %v9290_v31  ;;  %v9291_v38 = vunpack.i.l.bf16 %v9290_v31 }
 0x808   : > { %v7607_v48 = vmax.f32 %v7510_v19, %v7575_v26 }
 0x809   : > { %v7480_v63 = vsel %vm868_vm4, %v9277_v60, %v9286_v22  ;;  %v7481_v2 = vsel %vm868_vm4, %v9286_v22, %v9287_v3  ;;  %v7577_v6 = vsel %vm6699_vm15, %v9282_v51, %v9291_v38  ;;  %v7578_v53 = vsel %vm6699_vm15, %v9291_v38, %v9292_v21 }
 0x80a   : > { %v9300_v49 = vpop.permute.xlu0 %9299  ;;  %v7512_v12 = vmax.f32 %v7344_v50, %v7480_v63  ;;  %v7513_v7 = vmax.f32 %v7345_v29, %v7481_v2  ;;  %v9295_v33 = vpop.permute.xlu1 %9294 }
 0x80b   : > { %v9302_v0 = vunpack.i.h.bf16 %v9300_v49  ;;  %v9301_v52 = vunpack.i.l.bf16 %v9300_v49  ;;  %v9297_v58 = vunpack.i.h.bf16 %v9295_v33  ;;  %v9296_v55 = vunpack.i.l.bf16 %v9295_v33 }
 0x80c   : > { %v7609_v11 = vmax.f32 %v7512_v12, %v7577_v6  ;;  %v7610_v47 = vmax.f32 %v7513_v7, %v7578_v53 }
 0x80d   : > { %v7671_v32 = vsel %vm5958_vm12, %v9301_v52, %v9271_v56  ;;  %v7674_v50 = vsel %vm5958_vm12, %v9296_v55, %v9297_v58  ;;  %v7673_v34 = vsel %vm5958_vm12, %v9302_v0, %v9296_v55 }
 0x80e   : > { %v7703_v29 = vmax.f32 %v7607_v48, %v7671_v32  ;;  %v7706_v61 = vmax.f32 %v7610_v47, %v7674_v50  ;;  %v7705_v5 = vmax.f32 %v7609_v11, %v7673_v34 }
 0x810   : > { %v7714_v42 = vpack.c.bf16 %v7706_v61, %v7704_v36  ;;  %v7713_v62 = vpack.c.bf16 %v7705_v5, %v7703_v29 }
 0x812   : > { %7899 = vmatprep.mubr.bf16.mxu1 %v7714_v42 }
 0x813   : > { %7900 = vmatmul.mubr.bf16.gmra.mxu1 %v7713_v62 }
 0x8a1   : > { %v8777_v16 = vpop.f32.mrf.mxu1 }
 0x8a3   : > { %v8778_v17 = vpop.f32.mrf.mxu1 }
 0x8a4   : > { %v8779_v59 = vadd.f32 %v8778_v17, %v8777_v16 }
 0x8a5   : > { %v8780_v14 = vpop.f32.mrf.mxu1 }
 0x8a6   : > { %7909 = vst.msk [vmem:[%s13237_s22] sm:$0xff] %vm7908_vm0, %v8779_v59 }
 0x8a7   : > { %v8781_v10 = vpop.f32.mrf.mxu1 }
 0x8a8   : > { %v8782_v20 = vadd.f32 %v8781_v10, %v8780_v14 }
 0x8aa   : > { %7910 = vst.msk [vmem:[%s13237_s22 + $0x8] sm:$0xff] %vm7908_vm0, %v8782_v20 }
 0x8b1   : > { %v8783_v18 = vpop.f32.mrf.mxu1 }
 0x8b3   : > { %v8784_v1 = vpop.f32.mrf.mxu1 }
 0x8b4   : > { %v8785_v44 = vadd.f32 %v8784_v1, %v8783_v18 }
 0x8b5   : > { %v8786_v39 = vpop.f32.mrf.mxu1 }
 0x8b6   : > { %7911 = vst.msk [vmem:[%s13237_s22 + $0x10] sm:$0xff] %vm7908_vm0, %v8785_v44 }
 0x8b7   : > { %v8787_v43 = vpop.f32.mrf.mxu1 }
 0x8b8   : > { %v8788_v23 = vadd.f32 %v8787_v43, %v8786_v39 }
 0x8ba   : > { %7912 = vst.msk [vmem:[%s13237_s22 + $0x18] sm:$0xff] %vm7908_vm0, %v8788_v23 }
 0x8c5   : > { %v8789_v24 = vpop.f32.mrf.mxu1 }
 0x8c7   : > { %v8790_v35 = vpop.f32.mrf.mxu1 }
 0x8c8   : > { %v8791_v45 = vadd.f32 %v8790_v35, %v8789_v24 }
 0x8c9   : > { %v8792_v41 = vpop.f32.mrf.mxu1 }
 0x8ca   : > { %7913 = vst.msk [vmem:[%s13237_s22 + $0x20] sm:$0xff] %vm7908_vm0, %v8791_v45 }
 0x8cb   : > { %v8793_v25 = vpop.f32.mrf.mxu1 }
 0x8cc   : > { %v8794_v8 = vadd.f32 %v8793_v25, %v8792_v41 }
 0x8ce   : > { %7914 = vst.msk [vmem:[%s13237_s22 + $0x28] sm:$0xff] %vm7908_vm0, %v8794_v8 }
 0x8d3   : > { %v8795_v40 = vpop.f32.mrf.mxu1 }
 0x8d5   : > { %v8796_v37 = vpop.f32.mrf.mxu1 }
 0x8d6   : > { %v8797_v28 = vadd.f32 %v8796_v37, %v8795_v40 }
 0x8d7   : > { %v8798_v15 = vpop.f32.mrf.mxu1 }
 0x8d8   : > { %7915 = vst.msk [vmem:[%s13237_s22 + $0x30] sm:$0xff] %vm7908_vm0, %v8797_v28 }
 0x8d9   : > { %v8799_v57 = vpop.f32.mrf.mxu1 }
 0x8da   : > { %v8800_v30 = vadd.f32 %v8799_v57, %v8798_v15 }
 0x8dc   : > { %7916 = vst.msk [vmem:[%s13237_s22 + $0x38] sm:$0xff] %vm7908_vm0, %v8800_v30 }
 0x8dd PF: > { %s23_s17 = sadd.s32 1, %s9601_s17  }
 0x8de   : > { %p20_p3 = scmp.ge.s32.totalorder %s23_s17, 4  }
 0x8e0   :  { %22 = sbr.rel (!%p20_p3) target bundleno = 2 (0x2), region = 105 }
 0x8e5   :  { %7938 = vsyncpa [#allocation5], 1 }
 0x8e6   :  { %7940 = vsyncpa [#allocation5 + $0x1], 1 }
 0x8e7   :  { %7941 = vsyncpa [#allocation7], 1 }

</bundles_post_ra>
